<compile_context>
chip_gen: v7x
topology: tpu7x:2x2x1
jax: 0.10.0
libtpu: 0.0.40
codegen_flags: <defaults>
</compile_context>

<pallas_src>
import jax
import jax.numpy as jnp
import numpy as np
from jax.experimental import pallas as pl
from jax.experimental.pallas import tpu as pltpu


# ----------------------------------------------------------------------------
# Kernel 1: up_conv as a sub-pixel 3x3 conv with fused pad + BN-shift + ReLU.
# ----------------------------------------------------------------------------
def _make_up_kernel(H, W, cin, cout4):
    HW = H * W

    def kernel(x_ref, w_ref, shift_ref, o_ref, xpad_ref, patch_ref):
        # In-kernel zero padding (pad=1): zero the scratch, overwrite interior.
        xpad_ref[...] = jnp.zeros_like(xpad_ref)
        xpad_ref[1:H + 1, 1:W + 1, :] = x_ref[0]
        xp = xpad_ref[...]                                   # (H+2, W+2, cin)

        # im2col: one lane-aligned copy per 3x3 tap, then ONE MXU matmul over
        # the full 9*cin contraction.
        col = 0
        for kh in range(3):
            for kw in range(3):
                patch_ref[:, col:col + cin] = (
                    xp[kh:kh + H, kw:kw + W, :].reshape(HW, cin))
                col += cin
        acc = jnp.dot(patch_ref[...], w_ref[...],
                      preferred_element_type=jnp.float32)    # (HW, 4*cout) f32
        y = jnp.maximum(acc + shift_ref[...], 0.0)           # BN shift + ReLU
        o_ref[...] = y.reshape(1, H, W, cout4).astype(o_ref.dtype)

    return kernel


def up_conv_pallas(x, w_mat, shift, out_dtype=jnp.bfloat16):
    """x: (N,H,W,cin) unpadded.  w_mat: (9*cin, 4*cout) sub-pixel-packed,
    BN-scale-folded.  shift: (4*cout,) f32.  Returns parity-planar
    (N,H,W,4*cout)."""
    N, H, W, cin = x.shape
    kkc, cout4 = w_mat.shape
    assert kkc == 9 * cin
    return pl.pallas_call(
        _make_up_kernel(H, W, cin, cout4),
        out_shape=jax.ShapeDtypeStruct((N, H, W, cout4), out_dtype),
        grid=(N,),
        in_specs=[pl.BlockSpec((1, H, W, cin), lambda n: (n, 0, 0, 0)),
                  pl.BlockSpec((kkc, cout4), lambda n: (0, 0)),
                  pl.BlockSpec((1, cout4), lambda n: (0, 0))],
        out_specs=pl.BlockSpec((1, H, W, cout4), lambda n: (n, 0, 0, 0)),
        scratch_shapes=[pltpu.VMEM((H + 2, W + 2, cin), jnp.bfloat16),
                        pltpu.VMEM((H * W, kkc), jnp.bfloat16)],
        compiler_params=pltpu.CompilerParams(dimension_semantics=("parallel",)),
    )(x, w_mat, shift.reshape(1, cout4))


# ----------------------------------------------------------------------------
# Kernel 2: conv1 (with fused concat([up, skip])) + conv2, fully fused.
# The conv1 output never leaves VMEM.
# ----------------------------------------------------------------------------
def _make_conv12_kernel(H2, W2, C):
    HW = H2 * W2

    def kernel(y_ref, s_ref, w1_ref, sh1_ref, w2_ref, sh2_ref, o_ref,
               ypad_ref, spad_ref, patch1_ref, zpad_ref, patch2_ref):
        # In-kernel zero padding (pad=1) for both conv1 inputs and the
        # conv1->conv2 intermediate.
        ypad_ref[...] = jnp.zeros_like(ypad_ref)
        spad_ref[...] = jnp.zeros_like(spad_ref)
        zpad_ref[...] = jnp.zeros_like(zpad_ref)
        ypad_ref[1:H2 + 1, 1:W2 + 1, :] = y_ref[0]
        spad_ref[1:H2 + 1, 1:W2 + 1, :] = s_ref[0]

        # --- conv1: fused channel concat -> one im2col over 2*9*C columns.
        # Column order (input, kh, kw, c) matches the packed weight rows.
        col = 0
        for src in (ypad_ref, spad_ref):
            xv = src[...]                                    # (H2+2, W2+2, C)
            for kh in range(3):
                for kw in range(3):
                    patch1_ref[:, col:col + C] = (
                        xv[kh:kh + H2, kw:kw + W2, :].reshape(HW, C))
                    col += C
        acc1 = jnp.dot(patch1_ref[...], w1_ref[...],
                       preferred_element_type=jnp.float32)   # (HW, C) f32
        z = jnp.maximum(acc1 + sh1_ref[...], 0.0).astype(zpad_ref.dtype)
        zpad_ref[1:H2 + 1, 1:W2 + 1, :] = z.reshape(H2, W2, C)

        # --- conv2 on the VMEM-resident intermediate.
        zv = zpad_ref[...]
        col = 0
        for kh in range(3):
            for kw in range(3):
                patch2_ref[:, col:col + C] = (
                    zv[kh:kh + H2, kw:kw + W2, :].reshape(HW, C))
                col += C
        acc2 = jnp.dot(patch2_ref[...], w2_ref[...],
                       preferred_element_type=jnp.float32)
        out = jnp.maximum(acc2 + sh2_ref[...], 0.0)
        o_ref[...] = out.reshape(1, H2, W2, C).astype(o_ref.dtype)

    return kernel


def conv12_pallas(y, skip, w1, sh1, w2, sh2, out_dtype=jnp.bfloat16):
    """y, skip: (N, 2H, 2W, C) unpadded.  w1: (2*9*C, C), w2: (9*C, C)
    (BN-scale folded).  sh1, sh2: (C,) f32."""
    N, H2, W2, C = y.shape
    assert skip.shape == (N, H2, W2, C)
    kkc1, c1out = w1.shape
    kkc2, c2out = w2.shape
    assert kkc1 == 2 * 9 * C and c1out == C
    assert kkc2 == 9 * C and c2out == C
    return pl.pallas_call(
        _make_conv12_kernel(H2, W2, C),
        out_shape=jax.ShapeDtypeStruct((N, H2, W2, C), out_dtype),
        grid=(N,),
        in_specs=[pl.BlockSpec((1, H2, W2, C), lambda n: (n, 0, 0, 0)),
                  pl.BlockSpec((1, H2, W2, C), lambda n: (n, 0, 0, 0)),
                  pl.BlockSpec((kkc1, C), lambda n: (0, 0)),
                  pl.BlockSpec((1, C), lambda n: (0, 0)),
                  pl.BlockSpec((kkc2, C), lambda n: (0, 0)),
                  pl.BlockSpec((1, C), lambda n: (0, 0))],
        out_specs=pl.BlockSpec((1, H2, W2, C), lambda n: (n, 0, 0, 0)),
        scratch_shapes=[pltpu.VMEM((H2 + 2, W2 + 2, C), jnp.bfloat16),   # ypad
                        pltpu.VMEM((H2 + 2, W2 + 2, C), jnp.bfloat16),   # spad
                        pltpu.VMEM((H2 * W2, kkc1), jnp.bfloat16),       # patch1
                        pltpu.VMEM((H2 + 2, W2 + 2, C), jnp.bfloat16),   # zpad
                        pltpu.VMEM((H2 * W2, kkc2), jnp.bfloat16)],      # patch2
        compiler_params=pltpu.CompilerParams(dimension_semantics=("parallel",)),
    )(y, skip, w1, sh1.reshape(1, C), w2, sh2.reshape(1, C))


# ----------------------------------------------------------------------------
# One-time parameter preparation (hoisted out of the per-call path)
# ----------------------------------------------------------------------------
def bn_fold(gamma, beta, mean, var, eps=1e-5):
    scale = gamma / jnp.sqrt(var + eps)
    return scale, beta - mean * scale


def _flip_tconv_weight(w_t):
    # PyTorch ConvTranspose2d weight (Cin, Cout, K, K) -> spatially flipped
    # cross-correlation weight (K, K, Cin, Cout).
    return jnp.transpose(w_t[:, :, ::-1, ::-1], (2, 3, 0, 1))


def _pack_im2col_weight(w_fold, cin_splits):
    # (K,K,Cin_total,Cout) -> (K*K*Cin_total, Cout), rows ordered
    # (input, kh, kw, cin) to match the kernels' im2col column order.
    K = w_fold.shape[0]
    cout = w_fold.shape[3]
    parts, start = [], 0
    for c in cin_splits:
        parts.append(w_fold[:, :, start:start + c, :].reshape(K * K * c, cout))
        start += c
    return jnp.concatenate(parts, axis=0)


def _pack_subpixel_up_weight(w_fold4):
    """Sub-pixel packing of the k=4, stride=2, pad=1 transposed conv.
    Returns a (3*3*Cin, 4*Cout) im2col weight whose output columns are ordered
    (parity_h, parity_w, cout): output pixel (2m+ph, 2n+pw) is a 3x3-window dot
    product at position (m, n) of the once-padded (pad=1) un-dilated input."""
    K4, _, cin, cout = w_fold4.shape
    assert K4 == 4
    w9 = jnp.zeros((3, 3, cin, 4, cout), w_fold4.dtype)
    for ph in range(2):
        for pw in range(2):
            for rh in range(3):
                for rw in range(3):
                    kh, kw = 2 * rh - ph, 2 * rw - pw
                    if 0 <= kh < 4 and 0 <= kw < 4:
                        w9 = w9.at[rh, rw, :, ph * 2 + pw, :].set(w_fold4[kh, kw])
    return w9.reshape(9 * cin, 4 * cout)


def prepare_params(p, dtype=jnp.bfloat16):
    """Flip/transpose ConvTranspose2d weights, fold eval-mode BN scale into the
    weights, cast to bf16 and pack im2col matrices.  Done once, not per call."""
    out = {}

    s, b = bn_fold(*p["up_bn"])
    w4 = (_flip_tconv_weight(p["up_w"]) * s).astype(dtype)      # (4,4,Cin,Cout)
    out["up_wf"] = w4                                           # reference path
    out["up_w"] = _pack_subpixel_up_weight(w4)                  # (9*Cin, 4*Cout)
    out["up_shift1"] = b.astype(jnp.float32)
    out["up_shift"] = jnp.tile(b, 4).astype(jnp.float32)

    s, b = bn_fold(*p["c1_bn"])
    w3 = (_flip_tconv_weight(p["c1_w"]) * s).astype(dtype)      # (3,3,2C,C)
    oc = w3.shape[3]
    out["c1_wf"] = w3
    out["c1_w"] = _pack_im2col_weight(w3, (oc, oc))             # (2*9*C, C)
    out["c1_shift"] = b.astype(jnp.float32)

    s, b = bn_fold(*p["c2_bn"])
    w3 = (_flip_tconv_weight(p["c2_w"]) * s).astype(dtype)      # (3,3,C,C)
    out["c2_wf"] = w3
    out["c2_w"] = _pack_im2col_weight(w3, (w3.shape[2],))       # (9*C, C)
    out["c2_shift"] = b.astype(jnp.float32)
    return out


# ----------------------------------------------------------------------------
# UnetUp forward (Pallas path): 2 kernels + one pure-layout XLA interleave.
# ----------------------------------------------------------------------------
def unet_up_forward(x, skip, pp):
    """x: (N,H,W,Cin), skip: (N,2H,2W,Cout) in NHWC."""
    cdt = jnp.bfloat16
    x = x.astype(cdt)
    skip = skip.astype(cdt)
    out_ch = pp["c1_shift"].shape[0]

    # up_conv: sub-pixel decomposition (no zero-insert), padding in-kernel.
    y4 = up_conv_pallas(x, pp["up_w"], pp["up_shift"])      # (N, H, W, 4*C)
    N, H, W, _ = y4.shape
    # parity depth -> space interleave (pure layout op, done in XLA).
    y = (y4.reshape(N, H, W, 2, 2, out_ch)
           .transpose(0, 1, 3, 2, 4, 5)
           .reshape(N, 2 * H, 2 * W, out_ch))

    # conv1 (concat fused) + conv2, fused in ONE kernel, pads in-kernel.
    return conv12_pallas(y, skip, pp["c1_w"], pp["c1_shift"],
                         pp["c2_w"], pp["c2_shift"])


# ----------------------------------------------------------------------------
# Pure-JAX reference (lax conv with lhs_dilation), using the SAME folded bf16
# weights / f32 shifts, for correctness checking.
# ----------------------------------------------------------------------------
def _ref_forward(x, skip, pp):
    cdt = jnp.bfloat16
    x = x.astype(cdt)
    skip = skip.astype(cdt)

    def layer(z, w_fold, shift, stride):
        K = w_fold.shape[0]
        q = K - 1 - 1  # padding = 1 in the module
        y = jax.lax.conv_general_dilated(
            z, w_fold, window_strides=(1, 1), padding=[(q, q), (q, q)],
            lhs_dilation=(stride, stride),
            dimension_numbers=("NHWC", "HWIO", "NHWC"),
            preferred_element_type=jnp.float32)
        return jnp.maximum(y + shift, 0.0).astype(cdt)

    y = layer(x, pp["up_wf"], pp["up_shift1"], 2)
    y = jnp.concatenate([y, skip], axis=-1)
    y = layer(y, pp["c1_wf"], pp["c1_shift"], 1)
    y = layer(y, pp["c2_wf"], pp["c2_shift"], 1)
    return y


# ----------------------------------------------------------------------------
def make_params(key, in_ch, out_ch):
    ks = jax.random.split(key, 10)

    def bn(k, c):
        k1, k2, k3, k4 = jax.random.split(k, 4)
        gamma = jax.random.uniform(k1, (c,), jnp.float32, 0.5, 1.5)
        beta = 0.1 * jax.random.normal(k2, (c,), jnp.float32)
        mean = 0.1 * jax.random.normal(k3, (c,), jnp.float32)
        var = jax.random.uniform(k4, (c,), jnp.float32, 0.5, 1.5)
        return gamma, beta, mean, var

    return {
        # PyTorch ConvTranspose2d weight layout: (Cin, Cout, K, K), bias=False
        "up_w": 0.1 * jax.random.normal(ks[0], (in_ch, out_ch, 4, 4), jnp.float32),
        "up_bn": bn(ks[1], out_ch),
        "c1_w": 0.1 * jax.random.normal(ks[2], (2 * out_ch, out_ch, 3, 3), jnp.float32),
        "c1_bn": bn(ks[3], out_ch),
        "c2_w": 0.1 * jax.random.normal(ks[4], (out_ch, out_ch, 3, 3), jnp.float32),
        "c2_bn": bn(ks[5], out_ch),
    }


if __name__ == "__main__":
    key = jax.random.PRNGKey(0)
    k_x, k_skip, k_p = jax.random.split(key, 3)

    N, H, W = 2, 8, 8
    in_ch, out_ch = 8, 8

    # layout: NHWC
    x = jax.random.normal(k_x, (N, H, W, in_ch), jnp.float32)
    skip = jax.random.normal(k_skip, (N, 2 * H, 2 * W, out_ch), jnp.float32)
    params = make_params(k_p, in_ch, out_ch)
    pp = prepare_params(params)     # one-time weight flip / BN-fold / packing

    fwd = jax.jit(unet_up_forward)
    out = jax.block_until_ready(fwd(x, skip, pp))
    assert out.shape == (N, 2 * H, 2 * W, out_ch), out.shape

    ref = jax.block_until_ready(_ref_forward(x, skip, pp))
    # bf16 activations/weights (f32 accumulation) -> allow a couple of bf16 ulps.
    np.testing.assert_allclose(np.asarray(out.astype(jnp.float32)),
                               np.asarray(ref.astype(jnp.float32)),
                               rtol=2e-2, atol=1e-2)

    print("KERNEL_OK")
</pallas_src>

<mosaic_0001>
module attributes {stable_mosaic.version = 11 : i64} {
  func.func @kernel(%arg0: i32, %arg1: memref<1x8x8x8xbf16, #tpu.memory_space<vmem>>, %arg2: memref<72x32xbf16, #tpu.memory_space<vmem>>, %arg3: memref<1x32xf32, #tpu.memory_space<vmem>>, %arg4: memref<1x8x8x32xbf16, #tpu.memory_space<vmem>>, %arg5: memref<10x10x8xbf16, #tpu.memory_space<vmem>>, %arg6: memref<64x72xbf16, #tpu.memory_space<vmem>>) attributes {dimension_semantics = [#tpu.dimension_semantics<parallel>], iteration_bounds = array<i64: 2>, scalar_prefetch = 0 : i64, scratch_operands = 2 : i64, tpu.core_type = #tpu.core_type<tc>, window_params = [{transform_indices = @transform_0, window_bounds = array<i64: 1, 8, 8, 8>}, {pipeline_mode = #tpu.pipeline_mode<synchronous>, transform_indices = @transform_1, window_bounds = array<i64: 72, 32>}, {pipeline_mode = #tpu.pipeline_mode<synchronous>, transform_indices = @transform_2, window_bounds = array<i64: 1, 32>}, {transform_indices = @transform_3, window_bounds = array<i64: 1, 8, 8, 32>}]} {
    %cst = arith.constant 0.000000e+00 : bf16
    %0 = vector.broadcast %cst : bf16 to vector<10x10x8xbf16>
    %c0 = arith.constant 0 : index
    %c0_0 = arith.constant 0 : index
    %c0_1 = arith.constant 0 : index
    %1 = vector.load %arg5[%c0, %c0_0, %c0_1] : memref<10x10x8xbf16, #tpu.memory_space<vmem>>, vector<10x10x8xbf16>
    tpu.vector_store %arg5[%c0, %c0_0, %c0_1], %0 {strides = array<i32>} : memref<10x10x8xbf16, #tpu.memory_space<vmem>>, vector<10x10x8xbf16>,
    %c0_2 = arith.constant 0 : index
    %c0_3 = arith.constant 0 : index
    %c0_4 = arith.constant 0 : index
    %c0_5 = arith.constant 0 : index
    %2 = vector.load %arg1[%c0_2, %c0_3, %c0_4, %c0_5] : memref<1x8x8x8xbf16, #tpu.memory_space<vmem>>, vector<1x8x8x8xbf16>
    %3 = vector.shape_cast %2 : vector<1x8x8x8xbf16> to vector<8x8x8xbf16>
    %c1 = arith.constant 1 : index
    %c1_6 = arith.constant 1 : index
    %c0_7 = arith.constant 0 : index
    %4 = vector.load %arg5[%c1, %c1_6, %c0_7] : memref<10x10x8xbf16, #tpu.memory_space<vmem>>, vector<8x8x8xbf16>
    tpu.vector_store %arg5[%c1, %c1_6, %c0_7], %3 {strides = array<i32>} : memref<10x10x8xbf16, #tpu.memory_space<vmem>>, vector<8x8x8xbf16>,
    %c0_8 = arith.constant 0 : index
    %c0_9 = arith.constant 0 : index
    %c0_10 = arith.constant 0 : index
    %5 = vector.load %arg5[%c0_8, %c0_9, %c0_10] : memref<10x10x8xbf16, #tpu.memory_space<vmem>>, vector<10x10x8xbf16>
    %6 = vector.extract_strided_slice %5 {offsets = [0, 0, 0], sizes = [8, 8, 8], strides = [1, 1, 1]} : vector<10x10x8xbf16> to vector<8x8x8xbf16>
    %7 = vector.shape_cast %6 : vector<8x8x8xbf16> to vector<64x8xbf16>
    %c0_11 = arith.constant 0 : index
    %c0_12 = arith.constant 0 : index
    %8 = vector.load %arg6[%c0_11, %c0_12] : memref<64x72xbf16, #tpu.memory_space<vmem>>, vector<64x8xbf16>
    tpu.vector_store %arg6[%c0_11, %c0_12], %7 {strides = array<i32>} : memref<64x72xbf16, #tpu.memory_space<vmem>>, vector<64x8xbf16>,
    %9 = vector.extract_strided_slice %5 {offsets = [0, 1, 0], sizes = [8, 8, 8], strides = [1, 1, 1]} : vector<10x10x8xbf16> to vector<8x8x8xbf16>
    %10 = vector.shape_cast %9 : vector<8x8x8xbf16> to vector<64x8xbf16>
    %c0_13 = arith.constant 0 : index
    %c8 = arith.constant 8 : index
    %11 = vector.load %arg6[%c0_13, %c8] : memref<64x72xbf16, #tpu.memory_space<vmem>>, vector<64x8xbf16>
    tpu.vector_store %arg6[%c0_13, %c8], %10 {strides = array<i32>} : memref<64x72xbf16, #tpu.memory_space<vmem>>, vector<64x8xbf16>,
    %12 = vector.extract_strided_slice %5 {offsets = [0, 2, 0], sizes = [8, 8, 8], strides = [1, 1, 1]} : vector<10x10x8xbf16> to vector<8x8x8xbf16>
    %13 = vector.shape_cast %12 : vector<8x8x8xbf16> to vector<64x8xbf16>
    %c0_14 = arith.constant 0 : index
    %c16 = arith.constant 16 : index
    %14 = vector.load %arg6[%c0_14, %c16] : memref<64x72xbf16, #tpu.memory_space<vmem>>, vector<64x8xbf16>
    tpu.vector_store %arg6[%c0_14, %c16], %13 {strides = array<i32>} : memref<64x72xbf16, #tpu.memory_space<vmem>>, vector<64x8xbf16>,
    %15 = vector.extract_strided_slice %5 {offsets = [1, 0, 0], sizes = [8, 8, 8], strides = [1, 1, 1]} : vector<10x10x8xbf16> to vector<8x8x8xbf16>
    %16 = vector.shape_cast %15 : vector<8x8x8xbf16> to vector<64x8xbf16>
    %c0_15 = arith.constant 0 : index
    %c24 = arith.constant 24 : index
    %17 = vector.load %arg6[%c0_15, %c24] : memref<64x72xbf16, #tpu.memory_space<vmem>>, vector<64x8xbf16>
    tpu.vector_store %arg6[%c0_15, %c24], %16 {strides = array<i32>} : memref<64x72xbf16, #tpu.memory_space<vmem>>, vector<64x8xbf16>,
    %18 = vector.extract_strided_slice %5 {offsets = [1, 1, 0], sizes = [8, 8, 8], strides = [1, 1, 1]} : vector<10x10x8xbf16> to vector<8x8x8xbf16>
    %19 = vector.shape_cast %18 : vector<8x8x8xbf16> to vector<64x8xbf16>
    %c0_16 = arith.constant 0 : index
    %c32 = arith.constant 32 : index
    %20 = vector.load %arg6[%c0_16, %c32] : memref<64x72xbf16, #tpu.memory_space<vmem>>, vector<64x8xbf16>
    tpu.vector_store %arg6[%c0_16, %c32], %19 {strides = array<i32>} : memref<64x72xbf16, #tpu.memory_space<vmem>>, vector<64x8xbf16>,
    %21 = vector.extract_strided_slice %5 {offsets = [1, 2, 0], sizes = [8, 8, 8], strides = [1, 1, 1]} : vector<10x10x8xbf16> to vector<8x8x8xbf16>
    %22 = vector.shape_cast %21 : vector<8x8x8xbf16> to vector<64x8xbf16>
    %c0_17 = arith.constant 0 : index
    %c40 = arith.constant 40 : index
    %23 = vector.load %arg6[%c0_17, %c40] : memref<64x72xbf16, #tpu.memory_space<vmem>>, vector<64x8xbf16>
    tpu.vector_store %arg6[%c0_17, %c40], %22 {strides = array<i32>} : memref<64x72xbf16, #tpu.memory_space<vmem>>, vector<64x8xbf16>,
    %24 = vector.extract_strided_slice %5 {offsets = [2, 0, 0], sizes = [8, 8, 8], strides = [1, 1, 1]} : vector<10x10x8xbf16> to vector<8x8x8xbf16>
    %25 = vector.shape_cast %24 : vector<8x8x8xbf16> to vector<64x8xbf16>
    %c0_18 = arith.constant 0 : index
    %c48 = arith.constant 48 : index
    %26 = vector.load %arg6[%c0_18, %c48] : memref<64x72xbf16, #tpu.memory_space<vmem>>, vector<64x8xbf16>
    tpu.vector_store %arg6[%c0_18, %c48], %25 {strides = array<i32>} : memref<64x72xbf16, #tpu.memory_space<vmem>>, vector<64x8xbf16>,
    %27 = vector.extract_strided_slice %5 {offsets = [2, 1, 0], sizes = [8, 8, 8], strides = [1, 1, 1]} : vector<10x10x8xbf16> to vector<8x8x8xbf16>
    %28 = vector.shape_cast %27 : vector<8x8x8xbf16> to vector<64x8xbf16>
    %c0_19 = arith.constant 0 : index
    %c56 = arith.constant 56 : index
    %29 = vector.load %arg6[%c0_19, %c56] : memref<64x72xbf16, #tpu.memory_space<vmem>>, vector<64x8xbf16>
    tpu.vector_store %arg6[%c0_19, %c56], %28 {strides = array<i32>} : memref<64x72xbf16, #tpu.memory_space<vmem>>, vector<64x8xbf16>,
    %30 = vector.extract_strided_slice %5 {offsets = [2, 2, 0], sizes = [8, 8, 8], strides = [1, 1, 1]} : vector<10x10x8xbf16> to vector<8x8x8xbf16>
    %31 = vector.shape_cast %30 : vector<8x8x8xbf16> to vector<64x8xbf16>
    %c0_20 = arith.constant 0 : index
    %c64 = arith.constant 64 : index
    %32 = vector.load %arg6[%c0_20, %c64] : memref<64x72xbf16, #tpu.memory_space<vmem>>, vector<64x8xbf16>
    tpu.vector_store %arg6[%c0_20, %c64], %31 {strides = array<i32>} : memref<64x72xbf16, #tpu.memory_space<vmem>>, vector<64x8xbf16>,
    %c0_21 = arith.constant 0 : index
    %c0_22 = arith.constant 0 : index
    %33 = vector.load %arg6[%c0_21, %c0_22] : memref<64x72xbf16, #tpu.memory_space<vmem>>, vector<64x72xbf16>
    %c0_23 = arith.constant 0 : index
    %c0_24 = arith.constant 0 : index
    %34 = vector.load %arg2[%c0_23, %c0_24] : memref<72x32xbf16, #tpu.memory_space<vmem>>, vector<72x32xbf16>
    %cst_25 = arith.constant dense<0.000000e+00> : vector<64x32xf32>
    %35 = tpu.matmul %33, %34, %cst_25 {dimension_numbers = #tpu.dot_dimension_numbers<[1], [0], [0], [1], [0, 0, 1, 1], [], []>} : vector<64x72xbf16>, vector<72x32xbf16>, vector<64x32xf32> -> vector<64x32xf32>
    %c0_26 = arith.constant 0 : index
    %c0_27 = arith.constant 0 : index
    %36 = vector.load %arg3[%c0_26, %c0_27] : memref<1x32xf32, #tpu.memory_space<vmem>>, vector<1x32xf32>
    %37 = vector.broadcast %36 : vector<1x32xf32> to vector<64x32xf32>
    %38 = arith.addf %35, %37 : vector<64x32xf32>
    %cst_28 = arith.constant 0.000000e+00 : f32
    %39 = vector.broadcast %cst_28 : f32 to vector<64x32xf32>
    %40 = arith.maximumf %38, %39 : vector<64x32xf32>
    %41 = vector.shape_cast %40 : vector<64x32xf32> to vector<1x8x8x32xf32>
    %42 = arith.truncf %41 : vector<1x8x8x32xf32> to vector<1x8x8x32xbf16>
    %c0_29 = arith.constant 0 : index
    %c0_30 = arith.constant 0 : index
    %c0_31 = arith.constant 0 : index
    %c0_32 = arith.constant 0 : index
    %43 = vector.load %arg4[%c0_29, %c0_30, %c0_31, %c0_32] : memref<1x8x8x32xbf16, #tpu.memory_space<vmem>>, vector<1x8x8x32xbf16>
    tpu.vector_store %arg4[%c0_29, %c0_30, %c0_31, %c0_32], %42 {strides = array<i32>} : memref<1x8x8x32xbf16, #tpu.memory_space<vmem>>, vector<1x8x8x32xbf16>,
    return
  }
  func.func @transform_0(%arg0: i32) -> (i32, i32, i32, i32) {
    %c0_i32 = arith.constant 0 : i32
    %c0_i32_0 = arith.constant 0 : i32
    %c0_i32_1 = arith.constant 0 : i32
    %c0_i32_2 = arith.constant 0 : i32
    return %arg0, %c0_i32, %c0_i32_0, %c0_i32_1 : i32, i32, i32, i32
  }
  func.func @transform_1(%arg0: i32) -> (i32, i32) {
    %c0_i32 = arith.constant 0 : i32
    %c0_i32_0 = arith.constant 0 : i32
    %c0_i32_1 = arith.constant 0 : i32
    return %c0_i32, %c0_i32_0 : i32, i32
  }
  func.func @transform_2(%arg0: i32) -> (i32, i32) {
    %c0_i32 = arith.constant 0 : i32
    %c0_i32_0 = arith.constant 0 : i32
    %c0_i32_1 = arith.constant 0 : i32
    return %c0_i32, %c0_i32_0 : i32, i32
  }
  func.func @transform_3(%arg0: i32) -> (i32, i32, i32, i32) {
    %c0_i32 = arith.constant 0 : i32
    %c0_i32_0 = arith.constant 0 : i32
    %c0_i32_1 = arith.constant 0 : i32
    %c0_i32_2 = arith.constant 0 : i32
    return %arg0, %c0_i32, %c0_i32_0, %c0_i32_1 : i32, i32, i32, i32
  }
}

module attributes {stable_mosaic.version = 11 : i64} {
  func.func @kernel(%arg0: i32, %arg1: memref<1x16x16x8xbf16, #tpu.memory_space<vmem>>, %arg2: memref<1x16x16x8xbf16, #tpu.memory_space<vmem>>, %arg3: memref<144x8xbf16, #tpu.memory_space<vmem>>, %arg4: memref<1x8xf32, #tpu.memory_space<vmem>>, %arg5: memref<72x8xbf16, #tpu.memory_space<vmem>>, %arg6: memref<1x8xf32, #tpu.memory_space<vmem>>, %arg7: memref<1x16x16x8xbf16, #tpu.memory_space<vmem>>, %arg8: memref<18x18x8xbf16, #tpu.memory_space<vmem>>, %arg9: memref<18x18x8xbf16, #tpu.memory_space<vmem>>, %arg10: memref<256x144xbf16, #tpu.memory_space<vmem>>, %arg11: memref<18x18x8xbf16, #tpu.memory_space<vmem>>, %arg12: memref<256x72xbf16, #tpu.memory_space<vmem>>) attributes {dimension_semantics = [#tpu.dimension_semantics<parallel>], iteration_bounds = array<i64: 2>, scalar_prefetch = 0 : i64, scratch_operands = 5 : i64, tpu.core_type = #tpu.core_type<tc>, window_params = [{transform_indices = @transform_0, window_bounds = array<i64: 1, 16, 16, 8>}, {transform_indices = @transform_1, window_bounds = array<i64: 1, 16, 16, 8>}, {pipeline_mode = #tpu.pipeline_mode<synchronous>, transform_indices = @transform_2, window_bounds = array<i64: 144, 8>}, {pipeline_mode = #tpu.pipeline_mode<synchronous>, transform_indices = @transform_3, window_bounds = array<i64: 1, 8>}, {pipeline_mode = #tpu.pipeline_mode<synchronous>, transform_indices = @transform_4, window_bounds = array<i64: 72, 8>}, {pipeline_mode = #tpu.pipeline_mode<synchronous>, transform_indices = @transform_5, window_bounds = array<i64: 1, 8>}, {transform_indices = @transform_6, window_bounds = array<i64: 1, 16, 16, 8>}]} {
    %cst = arith.constant 0.000000e+00 : bf16
    %0 = vector.broadcast %cst : bf16 to vector<18x18x8xbf16>
    %c0 = arith.constant 0 : index
    %c0_0 = arith.constant 0 : index
    %c0_1 = arith.constant 0 : index
    %1 = vector.load %arg8[%c0, %c0_0, %c0_1] : memref<18x18x8xbf16, #tpu.memory_space<vmem>>, vector<18x18x8xbf16>
    tpu.vector_store %arg8[%c0, %c0_0, %c0_1], %0 {strides = array<i32>} : memref<18x18x8xbf16, #tpu.memory_space<vmem>>, vector<18x18x8xbf16>,
    %cst_2 = arith.constant 0.000000e+00 : bf16
    %2 = vector.broadcast %cst_2 : bf16 to vector<18x18x8xbf16>
    %c0_3 = arith.constant 0 : index
    %c0_4 = arith.constant 0 : index
    %c0_5 = arith.constant 0 : index
    %3 = vector.load %arg9[%c0_3, %c0_4, %c0_5] : memref<18x18x8xbf16, #tpu.memory_space<vmem>>, vector<18x18x8xbf16>
    tpu.vector_store %arg9[%c0_3, %c0_4, %c0_5], %2 {strides = array<i32>} : memref<18x18x8xbf16, #tpu.memory_space<vmem>>, vector<18x18x8xbf16>,
    %cst_6 = arith.constant 0.000000e+00 : bf16
    %4 = vector.broadcast %cst_6 : bf16 to vector<18x18x8xbf16>
    %c0_7 = arith.constant 0 : index
    %c0_8 = arith.constant 0 : index
    %c0_9 = arith.constant 0 : index
    %5 = vector.load %arg11[%c0_7, %c0_8, %c0_9] : memref<18x18x8xbf16, #tpu.memory_space<vmem>>, vector<18x18x8xbf16>
    tpu.vector_store %arg11[%c0_7, %c0_8, %c0_9], %4 {strides = array<i32>} : memref<18x18x8xbf16, #tpu.memory_space<vmem>>, vector<18x18x8xbf16>,
    %c0_10 = arith.constant 0 : index
    %c0_11 = arith.constant 0 : index
    %c0_12 = arith.constant 0 : index
    %c0_13 = arith.constant 0 : index
    %6 = vector.load %arg1[%c0_10, %c0_11, %c0_12, %c0_13] : memref<1x16x16x8xbf16, #tpu.memory_space<vmem>>, vector<1x16x16x8xbf16>
    %7 = vector.shape_cast %6 : vector<1x16x16x8xbf16> to vector<16x16x8xbf16>
    %c1 = arith.constant 1 : index
    %c1_14 = arith.constant 1 : index
    %c0_15 = arith.constant 0 : index
    %8 = vector.load %arg8[%c1, %c1_14, %c0_15] : memref<18x18x8xbf16, #tpu.memory_space<vmem>>, vector<16x16x8xbf16>
    tpu.vector_store %arg8[%c1, %c1_14, %c0_15], %7 {strides = array<i32>} : memref<18x18x8xbf16, #tpu.memory_space<vmem>>, vector<16x16x8xbf16>,
    %c0_16 = arith.constant 0 : index
    %c0_17 = arith.constant 0 : index
    %c0_18 = arith.constant 0 : index
    %c0_19 = arith.constant 0 : index
    %9 = vector.load %arg2[%c0_16, %c0_17, %c0_18, %c0_19] : memref<1x16x16x8xbf16, #tpu.memory_space<vmem>>, vector<1x16x16x8xbf16>
    %10 = vector.shape_cast %9 : vector<1x16x16x8xbf16> to vector<16x16x8xbf16>
    %c1_20 = arith.constant 1 : index
    %c1_21 = arith.constant 1 : index
    %c0_22 = arith.constant 0 : index
    %11 = vector.load %arg9[%c1_20, %c1_21, %c0_22] : memref<18x18x8xbf16, #tpu.memory_space<vmem>>, vector<16x16x8xbf16>
    tpu.vector_store %arg9[%c1_20, %c1_21, %c0_22], %10 {strides = array<i32>} : memref<18x18x8xbf16, #tpu.memory_space<vmem>>, vector<16x16x8xbf16>,
    %c0_23 = arith.constant 0 : index
    %c0_24 = arith.constant 0 : index
    %c0_25 = arith.constant 0 : index
    %12 = vector.load %arg8[%c0_23, %c0_24, %c0_25] : memref<18x18x8xbf16, #tpu.memory_space<vmem>>, vector<18x18x8xbf16>
    %13 = vector.extract_strided_slice %12 {offsets = [0, 0, 0], sizes = [16, 16, 8], strides = [1, 1, 1]} : vector<18x18x8xbf16> to vector<16x16x8xbf16>
    %14 = vector.shape_cast %13 : vector<16x16x8xbf16> to vector<256x8xbf16>
    %c0_26 = arith.constant 0 : index
    %c0_27 = arith.constant 0 : index
    %15 = vector.load %arg10[%c0_26, %c0_27] : memref<256x144xbf16, #tpu.memory_space<vmem>>, vector<256x8xbf16>
    tpu.vector_store %arg10[%c0_26, %c0_27], %14 {strides = array<i32>} : memref<256x144xbf16, #tpu.memory_space<vmem>>, vector<256x8xbf16>,
    %16 = vector.extract_strided_slice %12 {offsets = [0, 1, 0], sizes = [16, 16, 8], strides = [1, 1, 1]} : vector<18x18x8xbf16> to vector<16x16x8xbf16>
    %17 = vector.shape_cast %16 : vector<16x16x8xbf16> to vector<256x8xbf16>
    %c0_28 = arith.constant 0 : index
    %c8 = arith.constant 8 : index
    %18 = vector.load %arg10[%c0_28, %c8] : memref<256x144xbf16, #tpu.memory_space<vmem>>, vector<256x8xbf16>
    tpu.vector_store %arg10[%c0_28, %c8], %17 {strides = array<i32>} : memref<256x144xbf16, #tpu.memory_space<vmem>>, vector<256x8xbf16>,
    %19 = vector.extract_strided_slice %12 {offsets = [0, 2, 0], sizes = [16, 16, 8], strides = [1, 1, 1]} : vector<18x18x8xbf16> to vector<16x16x8xbf16>
    %20 = vector.shape_cast %19 : vector<16x16x8xbf16> to vector<256x8xbf16>
    %c0_29 = arith.constant 0 : index
    %c16 = arith.constant 16 : index
    %21 = vector.load %arg10[%c0_29, %c16] : memref<256x144xbf16, #tpu.memory_space<vmem>>, vector<256x8xbf16>
    tpu.vector_store %arg10[%c0_29, %c16], %20 {strides = array<i32>} : memref<256x144xbf16, #tpu.memory_space<vmem>>, vector<256x8xbf16>,
    %22 = vector.extract_strided_slice %12 {offsets = [1, 0, 0], sizes = [16, 16, 8], strides = [1, 1, 1]} : vector<18x18x8xbf16> to vector<16x16x8xbf16>
    %23 = vector.shape_cast %22 : vector<16x16x8xbf16> to vector<256x8xbf16>
    %c0_30 = arith.constant 0 : index
    %c24 = arith.constant 24 : index
    %24 = vector.load %arg10[%c0_30, %c24] : memref<256x144xbf16, #tpu.memory_space<vmem>>, vector<256x8xbf16>
    tpu.vector_store %arg10[%c0_30, %c24], %23 {strides = array<i32>} : memref<256x144xbf16, #tpu.memory_space<vmem>>, vector<256x8xbf16>,
    %25 = vector.extract_strided_slice %12 {offsets = [1, 1, 0], sizes = [16, 16, 8], strides = [1, 1, 1]} : vector<18x18x8xbf16> to vector<16x16x8xbf16>
    %26 = vector.shape_cast %25 : vector<16x16x8xbf16> to vector<256x8xbf16>
    %c0_31 = arith.constant 0 : index
    %c32 = arith.constant 32 : index
    %27 = vector.load %arg10[%c0_31, %c32] : memref<256x144xbf16, #tpu.memory_space<vmem>>, vector<256x8xbf16>
    tpu.vector_store %arg10[%c0_31, %c32], %26 {strides = array<i32>} : memref<256x144xbf16, #tpu.memory_space<vmem>>, vector<256x8xbf16>,
    %28 = vector.extract_strided_slice %12 {offsets = [1, 2, 0], sizes = [16, 16, 8], strides = [1, 1, 1]} : vector<18x18x8xbf16> to vector<16x16x8xbf16>
    %29 = vector.shape_cast %28 : vector<16x16x8xbf16> to vector<256x8xbf16>
    %c0_32 = arith.constant 0 : index
    %c40 = arith.constant 40 : index
    %30 = vector.load %arg10[%c0_32, %c40] : memref<256x144xbf16, #tpu.memory_space<vmem>>, vector<256x8xbf16>
    tpu.vector_store %arg10[%c0_32, %c40], %29 {strides = array<i32>} : memref<256x144xbf16, #tpu.memory_space<vmem>>, vector<256x8xbf16>,
    %31 = vector.extract_strided_slice %12 {offsets = [2, 0, 0], sizes = [16, 16, 8], strides = [1, 1, 1]} : vector<18x18x8xbf16> to vector<16x16x8xbf16>
    %32 = vector.shape_cast %31 : vector<16x16x8xbf16> to vector<256x8xbf16>
    %c0_33 = arith.constant 0 : index
    %c48 = arith.constant 48 : index
    %33 = vector.load %arg10[%c0_33, %c48] : memref<256x144xbf16, #tpu.memory_space<vmem>>, vector<256x8xbf16>
    tpu.vector_store %arg10[%c0_33, %c48], %32 {strides = array<i32>} : memref<256x144xbf16, #tpu.memory_space<vmem>>, vector<256x8xbf16>,
    %34 = vector.extract_strided_slice %12 {offsets = [2, 1, 0], sizes = [16, 16, 8], strides = [1, 1, 1]} : vector<18x18x8xbf16> to vector<16x16x8xbf16>
    %35 = vector.shape_cast %34 : vector<16x16x8xbf16> to vector<256x8xbf16>
    %c0_34 = arith.constant 0 : index
    %c56 = arith.constant 56 : index
    %36 = vector.load %arg10[%c0_34, %c56] : memref<256x144xbf16, #tpu.memory_space<vmem>>, vector<256x8xbf16>
    tpu.vector_store %arg10[%c0_34, %c56], %35 {strides = array<i32>} : memref<256x144xbf16, #tpu.memory_space<vmem>>, vector<256x8xbf16>,
    %37 = vector.extract_strided_slice %12 {offsets = [2, 2, 0], sizes = [16, 16, 8], strides = [1, 1, 1]} : vector<18x18x8xbf16> to vector<16x16x8xbf16>
    %38 = vector.shape_cast %37 : vector<16x16x8xbf16> to vector<256x8xbf16>
    %c0_35 = arith.constant 0 : index
    %c64 = arith.constant 64 : index
    %39 = vector.load %arg10[%c0_35, %c64] : memref<256x144xbf16, #tpu.memory_space<vmem>>, vector<256x8xbf16>
    tpu.vector_store %arg10[%c0_35, %c64], %38 {strides = array<i32>} : memref<256x144xbf16, #tpu.memory_space<vmem>>, vector<256x8xbf16>,
    %c0_36 = arith.constant 0 : index
    %c0_37 = arith.constant 0 : index
    %c0_38 = arith.constant 0 : index
    %40 = vector.load %arg9[%c0_36, %c0_37, %c0_38] : memref<18x18x8xbf16, #tpu.memory_space<vmem>>, vector<18x18x8xbf16>
    %41 = vector.extract_strided_slice %40 {offsets = [0, 0, 0], sizes = [16, 16, 8], strides = [1, 1, 1]} : vector<18x18x8xbf16> to vector<16x16x8xbf16>
    %42 = vector.shape_cast %41 : vector<16x16x8xbf16> to vector<256x8xbf16>
    %c0_39 = arith.constant 0 : index
    %c72 = arith.constant 72 : index
    %43 = vector.load %arg10[%c0_39, %c72] : memref<256x144xbf16, #tpu.memory_space<vmem>>, vector<256x8xbf16>
    tpu.vector_store %arg10[%c0_39, %c72], %42 {strides = array<i32>} : memref<256x144xbf16, #tpu.memory_space<vmem>>, vector<256x8xbf16>,
    %44 = vector.extract_strided_slice %40 {offsets = [0, 1, 0], sizes = [16, 16, 8], strides = [1, 1, 1]} : vector<18x18x8xbf16> to vector<16x16x8xbf16>
    %45 = vector.shape_cast %44 : vector<16x16x8xbf16> to vector<256x8xbf16>
    %c0_40 = arith.constant 0 : index
    %c80 = arith.constant 80 : index
    %46 = vector.load %arg10[%c0_40, %c80] : memref<256x144xbf16, #tpu.memory_space<vmem>>, vector<256x8xbf16>
    tpu.vector_store %arg10[%c0_40, %c80], %45 {strides = array<i32>} : memref<256x144xbf16, #tpu.memory_space<vmem>>, vector<256x8xbf16>,
    %47 = vector.extract_strided_slice %40 {offsets = [0, 2, 0], sizes = [16, 16, 8], strides = [1, 1, 1]} : vector<18x18x8xbf16> to vector<16x16x8xbf16>
    %48 = vector.shape_cast %47 : vector<16x16x8xbf16> to vector<256x8xbf16>
    %c0_41 = arith.constant 0 : index
    %c88 = arith.constant 88 : index
    %49 = vector.load %arg10[%c0_41, %c88] : memref<256x144xbf16, #tpu.memory_space<vmem>>, vector<256x8xbf16>
    tpu.vector_store %arg10[%c0_41, %c88], %48 {strides = array<i32>} : memref<256x144xbf16, #tpu.memory_space<vmem>>, vector<256x8xbf16>,
    %50 = vector.extract_strided_slice %40 {offsets = [1, 0, 0], sizes = [16, 16, 8], strides = [1, 1, 1]} : vector<18x18x8xbf16> to vector<16x16x8xbf16>
    %51 = vector.shape_cast %50 : vector<16x16x8xbf16> to vector<256x8xbf16>
    %c0_42 = arith.constant 0 : index
    %c96 = arith.constant 96 : index
    %52 = vector.load %arg10[%c0_42, %c96] : memref<256x144xbf16, #tpu.memory_space<vmem>>, vector<256x8xbf16>
    tpu.vector_store %arg10[%c0_42, %c96], %51 {strides = array<i32>} : memref<256x144xbf16, #tpu.memory_space<vmem>>, vector<256x8xbf16>,
    %53 = vector.extract_strided_slice %40 {offsets = [1, 1, 0], sizes = [16, 16, 8], strides = [1, 1, 1]} : vector<18x18x8xbf16> to vector<16x16x8xbf16>
    %54 = vector.shape_cast %53 : vector<16x16x8xbf16> to vector<256x8xbf16>
    %c0_43 = arith.constant 0 : index
    %c104 = arith.constant 104 : index
    %55 = vector.load %arg10[%c0_43, %c104] : memref<256x144xbf16, #tpu.memory_space<vmem>>, vector<256x8xbf16>
    tpu.vector_store %arg10[%c0_43, %c104], %54 {strides = array<i32>} : memref<256x144xbf16, #tpu.memory_space<vmem>>, vector<256x8xbf16>,
    %56 = vector.extract_strided_slice %40 {offsets = [1, 2, 0], sizes = [16, 16, 8], strides = [1, 1, 1]} : vector<18x18x8xbf16> to vector<16x16x8xbf16>
    %57 = vector.shape_cast %56 : vector<16x16x8xbf16> to vector<256x8xbf16>
    %c0_44 = arith.constant 0 : index
    %c112 = arith.constant 112 : index
    %58 = vector.load %arg10[%c0_44, %c112] : memref<256x144xbf16, #tpu.memory_space<vmem>>, vector<256x8xbf16>
    tpu.vector_store %arg10[%c0_44, %c112], %57 {strides = array<i32>} : memref<256x144xbf16, #tpu.memory_space<vmem>>, vector<256x8xbf16>,
    %59 = vector.extract_strided_slice %40 {offsets = [2, 0, 0], sizes = [16, 16, 8], strides = [1, 1, 1]} : vector<18x18x8xbf16> to vector<16x16x8xbf16>
    %60 = vector.shape_cast %59 : vector<16x16x8xbf16> to vector<256x8xbf16>
    %c0_45 = arith.constant 0 : index
    %c120 = arith.constant 120 : index
    %61 = vector.load %arg10[%c0_45, %c120] : memref<256x144xbf16, #tpu.memory_space<vmem>>, vector<256x8xbf16>
    tpu.vector_store %arg10[%c0_45, %c120], %60 {strides = array<i32>} : memref<256x144xbf16, #tpu.memory_space<vmem>>, vector<256x8xbf16>,
    %62 = vector.extract_strided_slice %40 {offsets = [2, 1, 0], sizes = [16, 16, 8], strides = [1, 1, 1]} : vector<18x18x8xbf16> to vector<16x16x8xbf16>
    %63 = vector.shape_cast %62 : vector<16x16x8xbf16> to vector<256x8xbf16>
    %c0_46 = arith.constant 0 : index
    %c128 = arith.constant 128 : index
    %64 = vector.load %arg10[%c0_46, %c128] : memref<256x144xbf16, #tpu.memory_space<vmem>>, vector<256x8xbf16>
    tpu.vector_store %arg10[%c0_46, %c128], %63 {strides = array<i32>} : memref<256x144xbf16, #tpu.memory_space<vmem>>, vector<256x8xbf16>,
    %65 = vector.extract_strided_slice %40 {offsets = [2, 2, 0], sizes = [16, 16, 8], strides = [1, 1, 1]} : vector<18x18x8xbf16> to vector<16x16x8xbf16>
    %66 = vector.shape_cast %65 : vector<16x16x8xbf16> to vector<256x8xbf16>
    %c0_47 = arith.constant 0 : index
    %c136 = arith.constant 136 : index
    %67 = vector.load %arg10[%c0_47, %c136] : memref<256x144xbf16, #tpu.memory_space<vmem>>, vector<256x8xbf16>
    tpu.vector_store %arg10[%c0_47, %c136], %66 {strides = array<i32>} : memref<256x144xbf16, #tpu.memory_space<vmem>>, vector<256x8xbf16>,
    %c0_48 = arith.constant 0 : index
    %c0_49 = arith.constant 0 : index
    %68 = vector.load %arg10[%c0_48, %c0_49] : memref<256x144xbf16, #tpu.memory_space<vmem>>, vector<256x144xbf16>
    %c0_50 = arith.constant 0 : index
    %c0_51 = arith.constant 0 : index
    %69 = vector.load %arg3[%c0_50, %c0_51] : memref<144x8xbf16, #tpu.memory_space<vmem>>, vector<144x8xbf16>
    %cst_52 = arith.constant dense<0.000000e+00> : vector<256x8xf32>
    %70 = tpu.matmul %68, %69, %cst_52 {dimension_numbers = #tpu.dot_dimension_numbers<[1], [0], [0], [1], [0, 0, 1, 1], [], []>} : vector<256x144xbf16>, vector<144x8xbf16>, vector<256x8xf32> -> vector<256x8xf32>
    %c0_53 = arith.constant 0 : index
    %c0_54 = arith.constant 0 : index
    %71 = vector.load %arg4[%c0_53, %c0_54] : memref<1x8xf32, #tpu.memory_space<vmem>>, vector<1x8xf32>
    %72 = vector.broadcast %71 : vector<1x8xf32> to vector<256x8xf32>
    %73 = arith.addf %70, %72 : vector<256x8xf32>
    %cst_55 = arith.constant 0.000000e+00 : f32
    %74 = vector.broadcast %cst_55 : f32 to vector<256x8xf32>
    %75 = arith.maximumf %73, %74 : vector<256x8xf32>
    %76 = arith.truncf %75 : vector<256x8xf32> to vector<256x8xbf16>
    %77 = vector.shape_cast %76 : vector<256x8xbf16> to vector<16x16x8xbf16>
    %c1_56 = arith.constant 1 : index
    %c1_57 = arith.constant 1 : index
    %c0_58 = arith.constant 0 : index
    %78 = vector.load %arg11[%c1_56, %c1_57, %c0_58] : memref<18x18x8xbf16, #tpu.memory_space<vmem>>, vector<16x16x8xbf16>
    tpu.vector_store %arg11[%c1_56, %c1_57, %c0_58], %77 {strides = array<i32>} : memref<18x18x8xbf16, #tpu.memory_space<vmem>>, vector<16x16x8xbf16>,
    %c0_59 = arith.constant 0 : index
    %c0_60 = arith.constant 0 : index
    %c0_61 = arith.constant 0 : index
    %79 = vector.load %arg11[%c0_59, %c0_60, %c0_61] : memref<18x18x8xbf16, #tpu.memory_space<vmem>>, vector<18x18x8xbf16>
    %80 = vector.extract_strided_slice %79 {offsets = [0, 0, 0], sizes = [16, 16, 8], strides = [1, 1, 1]} : vector<18x18x8xbf16> to vector<16x16x8xbf16>
    %81 = vector.shape_cast %80 : vector<16x16x8xbf16> to vector<256x8xbf16>
    %c0_62 = arith.constant 0 : index
    %c0_63 = arith.constant 0 : index
    %82 = vector.load %arg12[%c0_62, %c0_63] : memref<256x72xbf16, #tpu.memory_space<vmem>>, vector<256x8xbf16>
    tpu.vector_store %arg12[%c0_62, %c0_63], %81 {strides = array<i32>} : memref<256x72xbf16, #tpu.memory_space<vmem>>, vector<256x8xbf16>,
    %83 = vector.extract_strided_slice %79 {offsets = [0, 1, 0], sizes = [16, 16, 8], strides = [1, 1, 1]} : vector<18x18x8xbf16> to vector<16x16x8xbf16>
    %84 = vector.shape_cast %83 : vector<16x16x8xbf16> to vector<256x8xbf16>
    %c0_64 = arith.constant 0 : index
    %c8_65 = arith.constant 8 : index
    %85 = vector.load %arg12[%c0_64, %c8_65] : memref<256x72xbf16, #tpu.memory_space<vmem>>, vector<256x8xbf16>
    tpu.vector_store %arg12[%c0_64, %c8_65], %84 {strides = array<i32>} : memref<256x72xbf16, #tpu.memory_space<vmem>>, vector<256x8xbf16>,
    %86 = vector.extract_strided_slice %79 {offsets = [0, 2, 0], sizes = [16, 16, 8], strides = [1, 1, 1]} : vector<18x18x8xbf16> to vector<16x16x8xbf16>
    %87 = vector.shape_cast %86 : vector<16x16x8xbf16> to vector<256x8xbf16>
    %c0_66 = arith.constant 0 : index
    %c16_67 = arith.constant 16 : index
    %88 = vector.load %arg12[%c0_66, %c16_67] : memref<256x72xbf16, #tpu.memory_space<vmem>>, vector<256x8xbf16>
    tpu.vector_store %arg12[%c0_66, %c16_67], %87 {strides = array<i32>} : memref<256x72xbf16, #tpu.memory_space<vmem>>, vector<256x8xbf16>,
    %89 = vector.extract_strided_slice %79 {offsets = [1, 0, 0], sizes = [16, 16, 8], strides = [1, 1, 1]} : vector<18x18x8xbf16> to vector<16x16x8xbf16>
    %90 = vector.shape_cast %89 : vector<16x16x8xbf16> to vector<256x8xbf16>
    %c0_68 = arith.constant 0 : index
    %c24_69 = arith.constant 24 : index
    %91 = vector.load %arg12[%c0_68, %c24_69] : memref<256x72xbf16, #tpu.memory_space<vmem>>, vector<256x8xbf16>
    tpu.vector_store %arg12[%c0_68, %c24_69], %90 {strides = array<i32>} : memref<256x72xbf16, #tpu.memory_space<vmem>>, vector<256x8xbf16>,
    %92 = vector.extract_strided_slice %79 {offsets = [1, 1, 0], sizes = [16, 16, 8], strides = [1, 1, 1]} : vector<18x18x8xbf16> to vector<16x16x8xbf16>
    %93 = vector.shape_cast %92 : vector<16x16x8xbf16> to vector<256x8xbf16>
    %c0_70 = arith.constant 0 : index
    %c32_71 = arith.constant 32 : index
    %94 = vector.load %arg12[%c0_70, %c32_71] : memref<256x72xbf16, #tpu.memory_space<vmem>>, vector<256x8xbf16>
    tpu.vector_store %arg12[%c0_70, %c32_71], %93 {strides = array<i32>} : memref<256x72xbf16, #tpu.memory_space<vmem>>, vector<256x8xbf16>,
    %95 = vector.extract_strided_slice %79 {offsets = [1, 2, 0], sizes = [16, 16, 8], strides = [1, 1, 1]} : vector<18x18x8xbf16> to vector<16x16x8xbf16>
    %96 = vector.shape_cast %95 : vector<16x16x8xbf16> to vector<256x8xbf16>
    %c0_72 = arith.constant 0 : index
    %c40_73 = arith.constant 40 : index
    %97 = vector.load %arg12[%c0_72, %c40_73] : memref<256x72xbf16, #tpu.memory_space<vmem>>, vector<256x8xbf16>
    tpu.vector_store %arg12[%c0_72, %c40_73], %96 {strides = array<i32>} : memref<256x72xbf16, #tpu.memory_space<vmem>>, vector<256x8xbf16>,
    %98 = vector.extract_strided_slice %79 {offsets = [2, 0, 0], sizes = [16, 16, 8], strides = [1, 1, 1]} : vector<18x18x8xbf16> to vector<16x16x8xbf16>
    %99 = vector.shape_cast %98 : vector<16x16x8xbf16> to vector<256x8xbf16>
    %c0_74 = arith.constant 0 : index
    %c48_75 = arith.constant 48 : index
    %100 = vector.load %arg12[%c0_74, %c48_75] : memref<256x72xbf16, #tpu.memory_space<vmem>>, vector<256x8xbf16>
    tpu.vector_store %arg12[%c0_74, %c48_75], %99 {strides = array<i32>} : memref<256x72xbf16, #tpu.memory_space<vmem>>, vector<256x8xbf16>,
    %101 = vector.extract_strided_slice %79 {offsets = [2, 1, 0], sizes = [16, 16, 8], strides = [1, 1, 1]} : vector<18x18x8xbf16> to vector<16x16x8xbf16>
    %102 = vector.shape_cast %101 : vector<16x16x8xbf16> to vector<256x8xbf16>
    %c0_76 = arith.constant 0 : index
    %c56_77 = arith.constant 56 : index
    %103 = vector.load %arg12[%c0_76, %c56_77] : memref<256x72xbf16, #tpu.memory_space<vmem>>, vector<256x8xbf16>
    tpu.vector_store %arg12[%c0_76, %c56_77], %102 {strides = array<i32>} : memref<256x72xbf16, #tpu.memory_space<vmem>>, vector<256x8xbf16>,
    %104 = vector.extract_strided_slice %79 {offsets = [2, 2, 0], sizes = [16, 16, 8], strides = [1, 1, 1]} : vector<18x18x8xbf16> to vector<16x16x8xbf16>
    %105 = vector.shape_cast %104 : vector<16x16x8xbf16> to vector<256x8xbf16>
    %c0_78 = arith.constant 0 : index
    %c64_79 = arith.constant 64 : index
    %106 = vector.load %arg12[%c0_78, %c64_79] : memref<256x72xbf16, #tpu.memory_space<vmem>>, vector<256x8xbf16>
    tpu.vector_store %arg12[%c0_78, %c64_79], %105 {strides = array<i32>} : memref<256x72xbf16, #tpu.memory_space<vmem>>, vector<256x8xbf16>,
    %c0_80 = arith.constant 0 : index
    %c0_81 = arith.constant 0 : index
    %107 = vector.load %arg12[%c0_80, %c0_81] : memref<256x72xbf16, #tpu.memory_space<vmem>>, vector<256x72xbf16>
    %c0_82 = arith.constant 0 : index
    %c0_83 = arith.constant 0 : index
    %108 = vector.load %arg5[%c0_82, %c0_83] : memref<72x8xbf16, #tpu.memory_space<vmem>>, vector<72x8xbf16>
    %cst_84 = arith.constant dense<0.000000e+00> : vector<256x8xf32>
    %109 = tpu.matmul %107, %108, %cst_84 {dimension_numbers = #tpu.dot_dimension_numbers<[1], [0], [0], [1], [0, 0, 1, 1], [], []>} : vector<256x72xbf16>, vector<72x8xbf16>, vector<256x8xf32> -> vector<256x8xf32>
    %c0_85 = arith.constant 0 : index
    %c0_86 = arith.constant 0 : index
    %110 = vector.load %arg6[%c0_85, %c0_86] : memref<1x8xf32, #tpu.memory_space<vmem>>, vector<1x8xf32>
    %111 = vector.broadcast %110 : vector<1x8xf32> to vector<256x8xf32>
    %112 = arith.addf %109, %111 : vector<256x8xf32>
    %cst_87 = arith.constant 0.000000e+00 : f32
    %113 = vector.broadcast %cst_87 : f32 to vector<256x8xf32>
    %114 = arith.maximumf %112, %113 : vector<256x8xf32>
    %115 = vector.shape_cast %114 : vector<256x8xf32> to vector<1x16x16x8xf32>
    %116 = arith.truncf %115 : vector<1x16x16x8xf32> to vector<1x16x16x8xbf16>
    %c0_88 = arith.constant 0 : index
    %c0_89 = arith.constant 0 : index
    %c0_90 = arith.constant 0 : index
    %c0_91 = arith.constant 0 : index
    %117 = vector.load %arg7[%c0_88, %c0_89, %c0_90, %c0_91] : memref<1x16x16x8xbf16, #tpu.memory_space<vmem>>, vector<1x16x16x8xbf16>
    tpu.vector_store %arg7[%c0_88, %c0_89, %c0_90, %c0_91], %116 {strides = array<i32>} : memref<1x16x16x8xbf16, #tpu.memory_space<vmem>>, vector<1x16x16x8xbf16>,
    return
  }
  func.func @transform_0(%arg0: i32) -> (i32, i32, i32, i32) {
    %c0_i32 = arith.constant 0 : i32
    %c0_i32_0 = arith.constant 0 : i32
    %c0_i32_1 = arith.constant 0 : i32
    %c0_i32_2 = arith.constant 0 : i32
    return %arg0, %c0_i32, %c0_i32_0, %c0_i32_1 : i32, i32, i32, i32
  }
  func.func @transform_1(%arg0: i32) -> (i32, i32, i32, i32) {
    %c0_i32 = arith.constant 0 : i32
    %c0_i32_0 = arith.constant 0 : i32
    %c0_i32_1 = arith.constant 0 : i32
    %c0_i32_2 = arith.constant 0 : i32
    return %arg0, %c0_i32, %c0_i32_0, %c0_i32_1 : i32, i32, i32, i32
  }
  func.func @transform_2(%arg0: i32) -> (i32, i32) {
    %c0_i32 = arith.constant 0 : i32
    %c0_i32_0 = arith.constant 0 : i32
    %c0_i32_1 = arith.constant 0 : i32
    return %c0_i32, %c0_i32_0 : i32, i32
  }
  func.func @transform_3(%arg0: i32) -> (i32, i32) {
    %c0_i32 = arith.constant 0 : i32
    %c0_i32_0 = arith.constant 0 : i32
    %c0_i32_1 = arith.constant 0 : i32
    return %c0_i32, %c0_i32_0 : i32, i32
  }
  func.func @transform_4(%arg0: i32) -> (i32, i32) {
    %c0_i32 = arith.constant 0 : i32
    %c0_i32_0 = arith.constant 0 : i32
    %c0_i32_1 = arith.constant 0 : i32
    return %c0_i32, %c0_i32_0 : i32, i32
  }
  func.func @transform_5(%arg0: i32) -> (i32, i32) {
    %c0_i32 = arith.constant 0 : i32
    %c0_i32_0 = arith.constant 0 : i32
    %c0_i32_1 = arith.constant 0 : i32
    return %c0_i32, %c0_i32_0 : i32, i32
  }
  func.func @transform_6(%arg0: i32) -> (i32, i32, i32, i32) {
    %c0_i32 = arith.constant 0 : i32
    %c0_i32_0 = arith.constant 0 : i32
    %c0_i32_1 = arith.constant 0 : i32
    %c0_i32_2 = arith.constant 0 : i32
    return %arg0, %c0_i32, %c0_i32_0, %c0_i32_1 : i32, i32, i32, i32
  }
}

</mosaic_0001>

<bundles_post_ra>
// kernel: unet_up_forward.2
= control target key start
LH: loop header
LB: loop body
LE: loop exit
PB: predicated region body
PF: predicated region fallthrough
CT: control target
= control target key end

     0   :  { %s1136_s12 = smov 0   ;;  %s1513_s0 = inlined_call_operand.vmem [shape: bf16[2,8,8,8], index: 0, kind: input, shape index: {}]   ;;  %s1514_s1 = inlined_call_operand.vmem [shape: bf16[72,32], index: 1, kind: input, shape index: {}]   ;;  %s1515_s2 = inlined_call_operand.vmem [shape: f32[1,32], index: 2, kind: input, shape index: {}]   ;;  %s1516_s3 = inlined_call_operand.vmem [shape: bf16[2,8,8,32], index: 3, kind: output, shape index: {}]  }
   0x1 LB: > { %s974_s13 = sadd.s32 4294967295, %s1105_s12   ;;  %p978_p0 = scmp.ge.s32.totalorder %s1105_s12, 1  ;;  %s1105_s12 = sphi %s1136_s12, %s13_s12  }
   0x2   : > { %p137_p1 = scmp.lt.s32.totalorder %s1105_s12, 3 }
   0x4   : > { %p138_p2 = pnand %p978_p0, %p137_p1 }
   0x5   : > { %p1144_p3 = scmp.lt.s32.totalorder (!%p138_p2), %s974_s13, 1  ;;  %vm172_vm0 = vcmask (!%p138_p2), 60416   ;;  %v1107_v0 = vmov (!%p138_p2), 0   ;;  %vm174_vm1 = vcmask (!%p138_p2), 57344   ;;  %vm284_vm2 = vsmask.f32 (!%p138_p2), 7938 }
   0x6   : > { %141 = sbr.rel (%p138_p2) target bundleno = 450 (0x1c2), region = 32  ;;  %184 = vst.msk [vmem:[#allocation2 + $0x28] sm:$0xf] (!%p138_p2), %vm172_vm0, %v1107_v0  ;;  %186 = vst.msk [vmem:[#allocation2 + $0x30] sm:$0xf] (!%p138_p2), %vm172_vm0, %v1107_v0  ;;  %vm538_vm5 = vcmask (!%p138_p2), 1042432  }
   0x7   : > { %173 = vst.msk [vmem:[#allocation2] sm:$0xf] (!%p138_p2), %vm172_vm0, %v1107_v0  ;;  %176 = vst.msk [vmem:[#allocation2 + $0x8] sm:$0xf] (!%p138_p2), %vm172_vm0, %v1107_v0  ;;  %vm290_vm3 = vsmask.f32 (!%p138_p2), 256 }
   0x8   : > { %178 = vst.msk [vmem:[#allocation2 + $0x10] sm:$0xf] (!%p138_p2), %vm172_vm0, %v1107_v0  ;;  %180 = vst.msk [vmem:[#allocation2 + $0x18] sm:$0xf] (!%p138_p2), %vm172_vm0, %v1107_v0  ;;  %vm539_vm7 = vcmask (!%p138_p2), 1046532   ;;  %s1108_s19 = smov (!%p138_p2), 24  }
   0x9   : > { %182 = vst.msk [vmem:[#allocation2 + $0x20] sm:$0xf] (!%p138_p2), %vm172_vm0, %v1107_v0  ;;  %188 = vst.msk [vmem:[#allocation2 + $0x38] sm:$0xf] (!%p138_p2), %vm172_vm0, %v1107_v0  ;;  %vm386_vm9 = vsmask.f32 (!%p138_p2), 3328 }
   0xa   : > { %190 = vst.msk [vmem:[#allocation2 + $0x40] sm:$0xf] (!%p138_p2), %vm172_vm0, %v1107_v0  ;;  %192 = vst.msk [vmem:[#allocation2 + $0x48] sm:$0xf] (!%p138_p2), %vm172_vm0, %v1107_v0  ;;  %vm387_vm10 = vsmask.f32 (!%p138_p2), 7440 }
   0xb   : > { %183 = vst.msk [vmem:[#allocation2 + $0x24] sm:$0x1] (!%p138_p2), %vm174_vm1, %v1107_v0  ;;  %185 = vst.msk [vmem:[#allocation2 + $0x2c] sm:$0x1] (!%p138_p2), %vm174_vm1, %v1107_v0  ;;  %s1109_s20 = smov (!%p138_p2), 16   ;;  %s1110_s21 = smov (!%p138_p2), 40  }
   0xc   : > { %175 = vst.msk [vmem:[#allocation2 + $0x4] sm:$0x1] (!%p138_p2), %vm174_vm1, %v1107_v0  ;;  %177 = vst.msk [vmem:[#allocation2 + $0xc] sm:$0x1] (!%p138_p2), %vm174_vm1, %v1107_v0  ;;  %s1111_s22 = smov (!%p138_p2), 8   ;;  %vm381_vm12 = vcmask (!%p138_p2), 64512  }
   0xd   : > { %s1527_s13 = smov (!%p1144_p3, %s974_s13), 1  ;;  %179 = vst.msk [vmem:[#allocation2 + $0x14] sm:$0x1] %vm174_vm1, %v1107_v0  ;;  %181 = vst.msk [vmem:[#allocation2 + $0x1c] sm:$0x1] %vm174_vm1, %v1107_v0  ;;  %s1112_s23 = smov 32  }
   0xe   : > { %187 = vst.msk [vmem:[#allocation2 + $0x34] sm:$0x1] %vm174_vm1, %v1107_v0  ;;  %189 = vst.msk [vmem:[#allocation2 + $0x3c] sm:$0x1] %vm174_vm1, %v1107_v0  ;;  %s1032_s15 = sshll.u32 %s1527_s13, 5  ;;  %s1113_s28 = smov 48  }
   0xf   : > { %191 = vst.msk [vmem:[#allocation2 + $0x44] sm:$0x1] %vm174_vm1, %v1107_v0  ;;  %193 = vst.msk [vmem:[#allocation2 + $0x4c] sm:$0x1] %vm174_vm1, %v1107_v0  ;;  %s1178_s18 = scalar_lea.vmem %s1513_s0, %s1032_s15  ;;  %v313_v13 = vld [vmem:[#allocation2 + $0x28] sm:$0xf]  ;;  %s170_s17 = scalar_lea.vmem %s1516_s3, %s1032_s15 }
  0x10   : > { %v198_v1 = vld [vmem:[%s1178_s18 + $0x10] sm:$0xf]  ;;  %v199_v2 = vld [vmem:[%s1178_s18 + $0x14] sm:$0xf]  ;;  %v194_v3 = vld [vmem:[%s1178_s18] sm:$0xf] }
  0x11   : > { %v235_v4 = vshrl.u32 %v198_v1, 16  ;;  %v238_v5 = vshll.u32 %v198_v1, 16  ;;  %v243_v6 = vshrl.u32 %v199_v2, 16  ;;  %v246_v7 = vshll.u32 %v199_v2, 16  ;;  %v195_v8 = vld [vmem:[%s1178_s18 + $0x4] sm:$0xf]  ;;  %vm1188_vm4 = vmand %vm172_vm0, %vm284_vm2 }
  0x12   : > { %v203_v9 = vshrl.u32 %v194_v3, 16  ;;  %v206_v10 = vshll.u32 %v194_v3, 16  ;;  %v211_v14 = vshrl.u32 %v195_v8, 16  ;;  %v214_v15 = vshll.u32 %v195_v8, 16  ;;  %v319_v17 = vld [vmem:[#allocation2 + $0x30] sm:$0xf]  ;;  %vm1215_vm6 = vmand %vm174_vm1, %vm290_vm3 }
  0x13   : > { %v237_v11 = vrot.slane %v235_v4, 7  ;;  %v1184_v12 = vrot.slane %v243_v6, 7  ;;  %v200_v19 = vld [vmem:[%s1178_s18 + $0x18] sm:$0xf]  ;;  %v286_v23 = vld [vmem:[#allocation2 + $0x8] sm:$0xf]  ;;  %vm1261_vm8 = vmor %vm538_vm5, %vm539_vm7 }
  0x14   : > { %v205_v18 = vrot.slane %v203_v9, 7  ;;  %v1194_v22 = vrot.slane %v211_v14, 7  ;;  %v201_v24 = vld [vmem:[%s1178_s18 + $0x1c] sm:$0xf]  ;;  %v251_v25 = vshrl.u32 %v200_v19, 16  ;;  %v254_v28 = vshll.u32 %v200_v19, 16  ;;  %vm1353_vm11 = vmor %vm386_vm9, %vm387_vm10 }
  0x15   : > { %v240_v20 = vor.u32 %v238_v5, %v237_v11  ;;  %v248_v21 = vor.u32 %v246_v7, %v1184_v12  ;;  %v295_v27 = vld [vmem:[#allocation2 + $0x10] sm:$0xf]  ;;  %v259_v29 = vshrl.u32 %v201_v24, 16  ;;  %v262_v30 = vshll.u32 %v201_v24, 16  ;;  %v196_v35 = vld [vmem:[%s1178_s18 + $0x8] sm:$0xf] }
  0x16   : > { %v208_v26 = vor.u32 %v206_v10, %v205_v18  ;;  %v216_v33 = vor.u32 %v214_v15, %v1194_v22  ;;  %v1202_v34 = vrot.slane %v251_v25, 7  ;;  %v197_v36 = vld [vmem:[%s1178_s18 + $0xc] sm:$0xf]  ;;  %v325_v39 = vld [vmem:[#allocation2 + $0x38] sm:$0xf]  ;;  %v219_v40 = vshrl.u32 %v196_v35, 16 }
  0x17   : > { %v314_v31 = vsel %vm1188_vm4, %v240_v20, %v313_v13  ;;  %v320_v32 = vsel %vm1188_vm4, %v248_v21, %v319_v17  ;;  %v1208_v38 = vrot.slane %v259_v29, 7  ;;  %v222_v41 = vshll.u32 %v196_v35, 16  ;;  %v331_v44 = vld [vmem:[#allocation2 + $0x40] sm:$0xf]  ;;  %v301_v47 = vld [vmem:[#allocation2 + $0x18] sm:$0xf] }
  0x18   : > { %315 = vst [vmem:[#allocation2 + $0x28] sm:$0xf] %v314_v31  ;;  %321 = vst [vmem:[#allocation2 + $0x30] sm:$0xf] %v320_v32  ;;  %v287_v37 = vsel %vm1188_vm4, %v208_v26, %v286_v23  ;;  %v296_v42 = vsel %vm1188_vm4, %v216_v33, %v295_v27  ;;  %v256_v43 = vor.u32 %v254_v28, %v1202_v34  ;;  %v227_v45 = vshrl.u32 %v197_v36, 16  ;;  %s1114_s8 = smov 56  }
  0x19   : > { %288 = vst [vmem:[#allocation2 + $0x8] sm:$0xf] %v287_v37  ;;  %v230_v46 = vshll.u32 %v197_v36, 16  ;;  %297 = vst [vmem:[#allocation2 + $0x10] sm:$0xf] %v296_v42  ;;  %v264_v49 = vor.u32 %v262_v30, %v1208_v38  ;;  %v221_v50 = vrot.slane %v219_v40, 7 }
  0x1a   : > { %v307_v51 = vld [vmem:[#allocation2 + $0x20] sm:$0xf]  ;;  %v241_v52 = vrot.slane %v237_v11, 4  ;;  %v316_v53 = vld [vmem:[#allocation2 + $0x2c] sm:$0x1]  ;;  %v209_v54 = vrot.slane %v205_v18, 4  ;;  %v326_v55 = vsel %vm1188_vm4, %v256_v43, %v325_v39 }
  0x1b   : > { %v229_v56 = vrot.slane %v227_v45, 7  ;;  %v292_v57 = vld [vmem:[#allocation2 + $0xc] sm:$0x1]  ;;  %v1222_v58 = vld [vmem:[#allocation2] sm:$0xf]  ;;  %v249_v59 = vrot.slane %v1184_v12, 4  ;;  %v332_v60 = vsel %vm1188_vm4, %v264_v49, %v331_v44  ;;  %v224_v61 = vor.u32 %v222_v41, %v221_v50 }
  0x1c   : > { %327 = vst [vmem:[#allocation2 + $0x38] sm:$0xf] %v326_v55  ;;  %v310_v62 = vld [vmem:[#allocation2 + $0x24] sm:$0x1]  ;;  %v317_v63 = vsel %vm1215_vm6, %v241_v52, %v316_v53  ;;  %v293_v0 = vsel %vm1215_vm6, %v209_v54, %v292_v57  ;;  %v322_v2 = vld [vmem:[#allocation2 + $0x34] sm:$0x1] }
  0x1d   : > { %v1231_v1 = vld [vmem:[#allocation2 + $0x4] sm:$0x1]  ;;  %333 = vst [vmem:[#allocation2 + $0x40] sm:$0xf] %v332_v60  ;;  %v232_v3 = vor.u32 %v230_v46, %v229_v56  ;;  %v233_v4 = vrot.slane %v229_v56, 4  ;;  %v991_v5 = vrot.slane %v1222_v58, 9  ;;  %v302_v7 = vsel %vm1188_vm4, %v224_v61, %v301_v47 }
  0x1e   : > { %318 = vst [vmem:[#allocation2 + $0x2c] sm:$0x1] %v317_v63  ;;  %294 = vst [vmem:[#allocation2 + $0xc] sm:$0x1] %v293_v0  ;;  %v328_v6 = vld [vmem:[#allocation2 + $0x3c] sm:$0x1]  ;;  %v323_v9 = vsel %vm1215_vm6, %v249_v59, %v322_v2 }
  0x1f   : > { %v257_v8 = vrot.slane %v1202_v34, 4  ;;  %v217_v10 = vrot.slane %v1194_v22, 4  ;;  %v298_v11 = vld [vmem:[#allocation2 + $0x14] sm:$0x1]  ;;  %v304_v12 = vld [vmem:[#allocation2 + $0x1c] sm:$0x1]  ;;  %v308_v15 = vsel %vm1188_vm4, %v232_v3, %v307_v51  ;;  %v311_v17 = vsel %vm1215_vm6, %v233_v4, %v310_v62 }
  0x20   : > { %v1240_v13 = vld [vmem:[#allocation2 + $0x28] sm:$0xf]  ;;  %v1242_v14 = vld [vmem:[#allocation2 + $0x30] sm:$0xf]  ;;  %303 = vst [vmem:[#allocation2 + $0x18] sm:$0xf] %v302_v7 }
  0x21   : > { %v543_v18 = vrot.slane %v1231_v1, 5  ;;  %324 = vst [vmem:[#allocation2 + $0x34] sm:$0x1] %v323_v9  ;;  %v225_v19 = vrot.slane %v221_v50, 4  ;;  %v1005_v20 = vcombine.low %v1240_v13, %v1242_v14  ;;  %v1251_v21 = vld [vmem:[#allocation2 + $0x8] sm:$0xf]  ;;  %v329_v16 = vsel %vm1215_vm6, %v257_v8, %v328_v6 }
  0x22   : > { %309 = vst [vmem:[#allocation2 + $0x20] sm:$0xf] %v308_v15  ;;  %312 = vst [vmem:[#allocation2 + $0x24] sm:$0x1] %v311_v17  ;;  %v996_v22 = vrot.slane %v1240_v13, 9  ;;  %v997_v23 = vrot.slane %v1242_v14, 9  ;;  %v299_v27 = vsel %vm1215_vm6, %v217_v10, %v298_v11 }
  0x23   : > { %v1257_v24 = vld [vmem:[#allocation2 + $0x10] sm:$0xf]  ;;  %v992_v26 = vrot.slane %v1251_v21, 9  ;;  %330 = vst [vmem:[#allocation2 + $0x3c] sm:$0x1] %v329_v16  ;;  %v305_v28 = vsel %vm1215_vm6, %v225_v19, %v304_v12  ;;  %v390_v29 = vshrl.u32 %v1222_v58, 16  ;;  %612 = vrot.lane.b32.xlu1 %v1005_v20, %s1108_s19  ;;  %v544_v43 = vsel %vm1261_vm8, %v991_v5, %v543_v18 }
  0x24   : > { %v1003_v30 = vcombine.low %v1251_v21, %v1257_v24  ;;  %300 = vst [vmem:[#allocation2 + $0x14] sm:$0x1] %v299_v27  ;;  %306 = vst [vmem:[#allocation2 + $0x1c] sm:$0x1] %v305_v28  ;;  %v993_v31 = vrot.slane %v1257_v24, 9  ;;  %v418_v32 = vshrl.u32 %v1257_v24, 16 }
  0x25   : > { %v421_v33 = vshll.u32 %v1257_v24, 16  ;;  %v1277_v34 = vld [vmem:[#allocation2 + $0x38] sm:$0xf]  ;;  %v1279_v35 = vrot.slane %v390_v29, 4  ;;  %v393_v36 = vshll.u32 %v1222_v58, 16  ;;  %v399_v37 = vshll.u32 %v1231_v1, 16 }
  0x26   : > { %v404_v39 = vshrl.u32 %v1251_v21, 16  ;;  %608 = vrot.lane.b32.xlu0 %v1003_v30, %s1108_s19  ;;  %v1285_v40 = vld [vmem:[#allocation2 + $0x40] sm:$0xf]  ;;  %v1287_v41 = vld [vmem:[#allocation2 + $0x2c] sm:$0x1]  ;;  %v998_v47 = vrot.slane %v1277_v34, 9 }
  0x27   : > { %v1289_v42 = vld [vmem:[#allocation2 + $0xc] sm:$0x1]  ;;  %v1006_v44 = vcombine.low %v1277_v34, %v1285_v40  ;;  %v563_v45 = vrot.slane %v1287_v41, 5  ;;  %v1298_v49 = vld [vmem:[#allocation2 + $0x18] sm:$0xf]  ;;  %v420_v51 = vrot.slane %v418_v32, 4 }
  0x28   : > { %v547_v46 = vrot.slane %v1289_v42, 5  ;;  %v1300_v50 = vld [vmem:[#allocation2 + $0x34] sm:$0x1]  ;;  %v423_v52 = vrot.slane %v421_v33, 5  ;;  %v994_v59 = vrot.slane %v1298_v49, 9  ;;  %v432_v6 = vshrl.u32 %v1298_v49, 16 }
  0x29   : > { %614 = vrot.lane.b32.xlu1 %v1006_v44, %s1108_s19  ;;  %v1303_v53 = vld [vmem:[#allocation2 + $0x20] sm:$0xf]  ;;  %v1305_v54 = vld [vmem:[#allocation2 + $0x24] sm:$0x1]  ;;  %v1309_v55 = vsel %vm1261_vm8, %v996_v22, %v563_v45  ;;  %v567_v57 = vrot.slane %v1300_v50, 5  ;;  %v435_v28 = vshll.u32 %v1298_v49, 16  ;;  %v984_v48 = vcombine.low %v1257_v24, %v1298_v49 }
  0x2a   : > { %v1313_v56 = vsel %vm1261_vm8, %v992_v26, %v547_v46  ;;  %v1004_v60 = vcombine.low %v1298_v49, %v1303_v53  ;;  %v995_v61 = vrot.slane %v1303_v53, 9  ;;  %v559_v62 = vrot.slane %v1305_v54, 5  ;;  %v1322_v0 = vld [vmem:[#allocation2 + $0x3c] sm:$0x1]  ;;  %s1115_s9 = smov 64  }
  0x2b   : > { %v999_v63 = vcombine.low %v544_v43, %v1313_v56  ;;  %v568_v1 = vsel %vm1261_vm8, %v997_v23, %v567_v57  ;;  %v571_v2 = vrot.slane %v1322_v0, 5  ;;  %v342_v3 = vld [vmem:[#allocation2 + $0x14] sm:$0x1]  ;;  %v344_v4 = vld [vmem:[#allocation2 + $0x1c] sm:$0x1]  ;;  %v424_v5 = vor.u32 %v423_v52, %v420_v51  ;;  %383 = vst.msk [vmem:[#allocation3 + $0x8] sm:$0xff] %vm381_vm12, %v984_v48 }
  0x2c   : > { %610 = vrot.lane.b32.xlu0 %v1004_v60, %s1108_s19  ;;  %v1331_v7 = vsel %vm1261_vm8, %v995_v61, %v559_v62  ;;  %v551_v8 = vrot.slane %v342_v3, 5  ;;  %v555_v9 = vrot.slane %v344_v4, 5  ;;  %v1014_v10 = vcombine.low %v1309_v55, %v568_v1 }
  0x2d   : > { %v1336_v11 = vcombine.low %v1331_v7, %v1309_v55  ;;  %v1340_v12 = vsel %vm1261_vm8, %v998_v47, %v571_v2  ;;  %v425_v15 = vrot.slane %v424_v5, 4  ;;  %v427_v17 = vshll.u32 %v342_v3, 16 }
  0x2e   : > { %v1343_v18 = vcombine.low %v568_v1, %v1340_v12  ;;  %v552_v19 = vsel %vm1261_vm8, %v993_v31, %v551_v8  ;;  %v1349_v20 = vsel %vm1261_vm8, %v994_v59, %v555_v9  ;;  %v434_v16 = vrot.slane %v432_v6, 4 }
  0x2f   : > { %589 = vrot.lane.b32.xlu1 %v1336_v11, %s1109_s20  ;;  %v1359_v23 = vcombine.low %v552_v19, %v1349_v20  ;;  %v1012_v26 = vcombine.low %v1313_v56, %v552_v19  ;;  %v429_v27 = vrot.slane %v427_v17, 5  ;;  %v441_v29 = vshll.u32 %v344_v4, 16 }
  0x30   : > { %585 = vrot.lane.b32.xlu0 %v999_v63, %s1109_s20  ;;  %v395_v30 = vrot.slane %v393_v36, 5  ;;  %v401_v31 = vrot.slane %v399_v37, 5  ;;  %v406_v32 = vrot.slane %v404_v39, 4  ;;  %v437_v43 = vrot.slane %v435_v28, 5 }
  0x31   : > { %v1365_v33 = vsel %vm1353_vm11, %v425_v15, %v429_v27  ;;  %v407_v44 = vshll.u32 %v1251_v21, 16  ;;  %v413_v45 = vshll.u32 %v1289_v42, 16  ;;  %v443_v46 = vrot.slane %v441_v29, 5 }
  0x32   : > { %v396_v47 = vor.u32 %v395_v30, %v1279_v35  ;;  %v474_v51 = vshrl.u32 %v1242_v14, 16  ;;  %v477_v52 = vshll.u32 %v1242_v14, 16  ;;  %v438_v36 = vor.u32 %v437_v43, %v434_v16  ;;  %v334_v43 = vld [vmem:[#allocation2 + $0x44] sm:$0x1] }
  0x33   : > { %591 = vrot.lane.b32.xlu1 %v1343_v18, %s1109_s20  ;;  %v409_v37 = vrot.slane %v407_v44, 5  ;;  %v415_v39 = vrot.slane %v413_v45, 5  ;;  %v483_v55 = vshll.u32 %v1300_v50, 16  ;;  %v488_v42 = vshrl.u32 %v1277_v34, 16 }
  0x34   : > { %587 = vrot.lane.b32.xlu0 %v1359_v23, %s1109_s20  ;;  %v397_v56 = vrot.slane %v396_v47, 4  ;;  %v476_v57 = vrot.slane %v474_v51, 4  ;;  %v479_v59 = vrot.slane %v477_v52, 5  ;;  %v439_v60 = vrot.slane %v438_v36, 4 }
  0x35   : > { %v410_v35 = vor.u32 %v409_v37, %v406_v32  ;;  %v485_v61 = vrot.slane %v483_v55, 5  ;;  %v491_v62 = vshll.u32 %v1277_v34, 16  ;;  %v490_v2 = vrot.slane %v488_v42, 4 }
  0x36   : > { %v402_v63 = vsel %vm1353_vm11, %v397_v56, %v401_v31  ;;  %v480_v1 = vor.u32 %v479_v59, %v476_v57  ;;  %v497_v3 = vshll.u32 %v1322_v0, 16  ;;  %v1383_v50 = vsel %vm1353_vm11, %v439_v60, %v443_v46 }
  0x37   : > { %675 = vrot.lane.b32.xlu1 %v1014_v10, %s1110_s21  ;;  %v411_v4 = vrot.slane %v410_v35, 4  ;;  %v493_v5 = vrot.slane %v491_v62, 5  ;;  %v446_v6 = vshrl.u32 %v1303_v53, 16  ;;  %v1389_v8 = vcombine.low %v1365_v33, %v1383_v50 }
  0x38   : > { %671 = vrot.lane.b32.xlu0 %v1012_v26, %s1110_s21  ;;  %v481_v9 = vrot.slane %v480_v1, 4  ;;  %v499_v15 = vrot.slane %v497_v3, 5  ;;  %v449_v0 = vshll.u32 %v1303_v53, 16  ;;  %v455_v16 = vshll.u32 %v1305_v54, 16  ;;  %v1435_v3 = vld [vmem:[#allocation2 + $0x48] sm:$0xf] }
  0x39   : > { %v416_v10 = vsel %vm1353_vm11, %v411_v4, %v415_v39  ;;  %v494_v17 = vor.u32 %v493_v5, %v490_v2  ;;  %v448_v19 = vrot.slane %v446_v6, 4  ;;  %v460_v29 = vshrl.u32 %v1240_v13, 16 }
  0x3a   : > { %v987_v27 = vcombine.low %v402_v63, %v416_v10  ;;  %v451_v28 = vrot.slane %v449_v0, 5  ;;  %v486_v26 = vsel %vm1353_vm11, %v481_v9, %v485_v61  ;;  %v463_v31 = vshll.u32 %v1240_v13, 16 }
  0x3b   : > { %515 = vrot.lane.b32.xlu1 %v1389_v8, %s1111_s22  ;;  %v495_v30 = vrot.slane %v494_v17, 4  ;;  %v469_v32 = vshll.u32 %v1287_v41, 16  ;;  %v462_v44 = vrot.slane %v460_v29, 4  ;;  %v265_v45 = vrot.slane %v1208_v38, 4  ;;  %v1094_v17 = vld [vmem:[%s1514_s1] sm:$0xff]   ;;  %v1096_v29 = vld [vmem:[%s1514_s1 + $0x10] sm:$0xff]  }
  0x3c   : > { %513 = vrot.lane.b32.xlu0 %v987_v27, %s1111_s22  ;;  %v452_v54 = vor.u32 %v451_v28, %v448_v19  ;;  %v457_v47 = vrot.slane %v455_v16, 5  ;;  %v465_v51 = vrot.slane %v463_v31, 5  ;;  %v626_v52 = vshrl.u32 %v1285_v40, 16  ;;  %v356_v19 = vld [vmem:[#allocation2 + $0x4c] sm:$0x1]  ;;  %1043 = vmatprep.subr.bf16.mxu0 %v1094_v17 }
  0x3d   : > { %v500_v46 = vsel %vm1353_vm11, %v495_v30, %v499_v15  ;;  %v335_v41 = vsel %vm1215_vm6, %v265_v45, %v334_v43  ;;  %v629_v39 = vshll.u32 %v1285_v40, 16  ;;  %v471_v56 = vrot.slane %v469_v32, 5  ;;  %1061 = vmatprep.subr.bf16.mxu1 %v1094_v17  ;;  %1044 = vmatpush3.bf16.msra.mxu0 %v1094_v17  ;;  %v1098_v30 = vld [vmem:[%s1514_s1 + $0x20] ss:$0 sps:$4 sm:$0xff]  }
  0x3e   : > { %v1407_v36 = vcombine.low %v486_v26, %v500_v46  ;;  %v453_v37 = vrot.slane %v452_v54, 4  ;;  %v466_v55 = vor.u32 %v465_v51, %v462_v44  ;;  %336 = vst [vmem:[#allocation2 + $0x44] sm:$0x1] %v335_v41  ;;  %v628_v57 = vrot.slane %v626_v52, 4  ;;  %1066 = vmatpush3.bf16.msra.mxu1 %v1094_v17 }
  0x3f   : > { %v631_v38 = vrot.slane %v629_v39, 5  ;;  %v986_v60 = vcombine.low %v1242_v14, %v1277_v34  ;;  %v985_v35 = vcombine.low %v1303_v53, %v1240_v13  ;;  %v1007_v13 = vcombine.low %v416_v10, %v1365_v33 }
  0x40   : > { %519 = vrot.lane.b32.xlu1 %v1407_v36, %s1111_s22  ;;  %v458_v59 = vsel %vm1353_vm11, %v453_v37, %v457_v47  ;;  %v467_v42 = vrot.slane %v466_v55, 4  ;;  %v983_v24 = vcombine.low %v1222_v58, %v1251_v21  ;;  %v1011_v53 = vrot.slane %v1285_v40, 9 }
  0x41   : > { %v632_v62 = vor.u32 %v631_v38, %v628_v57  ;;  %384 = vst.msk [vmem:[#allocation3 + $0x10] sm:$0xff] %vm381_vm12, %v985_v35  ;;  %385 = vst.msk [vmem:[#allocation3 + $0x18] sm:$0xff] %vm381_vm12, %v986_v60  ;;  %v1008_v5 = vcombine.low %v1383_v50, %v458_v59  ;;  %v709_v58 = vshrl.u32 %v1435_v3, 16  ;;  %v712_v21 = vshll.u32 %v1435_v3, 16 }
  0x42   : > { %v472_v61 = vsel %vm1353_vm11, %v467_v42, %v471_v56  ;;  %382 = vst.msk [vmem:[#allocation3] sm:$0xff] %vm381_vm12, %v983_v24  ;;  %v1013_v50 = vcombine.low %v1349_v20, %v1331_v7  ;;  %v718_v27 = vshll.u32 %v356_v19, 16  ;;  %v1095_v7 = vld [vmem:[%s1514_s1 + $0x8] sm:$0xff]   ;;  %vm825_vm13 = vcmask 1043456  }
  0x43   : > { %v1424_v63 = vcombine.low %v458_v59, %v472_v61  ;;  %v1009_v1 = vcombine.low %v472_v61, %v486_v26  ;;  %v633_v34 = vrot.slane %v632_v62, 4  ;;  %v711_v0 = vrot.slane %v709_v58, 4  ;;  %1045 = vmatprep.subr.bf16.mxu0 %v1095_v7  ;;  %1062 = vmatprep.subr.bf16.mxu1 %v1095_v7 }
  0x44   : > { %v714_v10 = vrot.slane %v712_v21, 5  ;;  %v720_v28 = vrot.slane %v718_v27, 5  ;;  %1046 = vmatpush3.bf16.msra.mxu0 %v1095_v7  ;;  %1067 = vmatpush3.bf16.msra.mxu1 %v1095_v7  ;;  %v1018_v31 = vrot.slane %v1435_v3, 9  ;;  %v744_v32 = vrot.slane %v356_v19, 5 }
  0x45   : > { %517 = vrot.lane.b32.xlu0 %v1424_v63, %s1111_s22  ;;  %648 = vrot.lane.b32.xlu1 %v1009_v1, %s1112_s23  ;;  %v354_v14 = vld [vmem:[#allocation2 + $0x44] sm:$0x1]  ;;  %v827_v43 = vsel %vm825_vm13, %v1098_v30, 0  ;;  %vm525_vm14 = vcmask 130112   ;;  %vm597_vm15 = vcmask 195712   ;;  %vm620_vm0 = vcmask 261312  }
  0x46   : > { %v635_v49 = vshll.u32 %v354_v14, 16  ;;  %v664_v2 = vrot.slane %v354_v14, 5  ;;  %v715_v16 = vor.u32 %v714_v10, %v711_v0  ;;  %1047 = vmatprep.subr.bf16.mxu0 %v1096_v29  ;;  %1063 = vmatprep.subr.bf16.mxu1 %v1096_v29  ;;  %v745_v54 = vsel %vm1261_vm8, %v1018_v31, %v744_v32 }
  0x47   : > { %vm656_vm1 = vcmask 326912   ;;  %vm683_vm2 = vcmask 392512   ;;  %vm703_vm3 = vcmask 458112   ;;  %vm736_vm4 = vcmask 523712  }
  0x48   : > { %v637_v4 = vrot.slane %v635_v49, 5  ;;  %v1443_v6 = vsel %vm1261_vm8, %v1011_v53, %v664_v2  ;;  %v716_v20 = vrot.slane %v715_v16, 4  ;;  %1048 = vmatpush3.bf16.msra.mxu0 %v1096_v29  ;;  %1068 = vmatpush3.bf16.msra.mxu1 %v1096_v29  ;;  %vm760_vm5 = vcmask 589312  }
  0x49   : > { %644 = vrot.lane.b32.xlu0 %v1007_v13, %s1112_s23  ;;  %v1015_v15 = vcombine.low %v1340_v12, %v1443_v6  ;;  %v1016_v12 = vcombine.low %v1285_v40, %v1435_v3  ;;  %v1097_v40 = vld [vmem:[%s1514_s1 + $0x18] sm:$0xff]   ;;  %vm812_vm6 = vcmask 588800   ;;  %vm910_vm7 = vcmask 257024  }
  0x4a   : > { %v638_v33 = vsel %vm1353_vm11, %v633_v34, %v637_v4  ;;  %v721_v26 = vsel %vm1353_vm11, %v716_v20, %v720_v28  ;;  %1049 = vmatprep.subr.bf16.mxu0 %v1097_v40  ;;  %1064 = vmatprep.subr.bf16.mxu1 %v1097_v40 }
  0x4b   : > { %v1010_v9 = vcombine.low %v500_v46, %v638_v33  ;;  %v1017_v22 = vcombine.low %v638_v33, %v721_v26 }
  0x4c   : > { %1050 = vmatpush3.bf16.msra.mxu0 %v1097_v40  ;;  %1069 = vmatpush3.bf16.msra.mxu1 %v1097_v40 }
  0x4d   : > { %650 = vrot.lane.b32.xlu1 %v1010_v9, %s1112_s23  ;;  %646 = vrot.lane.b32.xlu0 %v1008_v5, %s1112_s23  ;;  %v1020_v5 = vld [vmem:[%s1515_s2] ss:$0 sm:$0xff] }
  0x4e   : > { %1071 = vmatprep.subr.msk.bf16.mxu0 %vm825_vm13, %v1098_v30  ;;  %1072 = vmatprep.subr.msk.bf16.mxu1 %vm825_vm13, %v1098_v30 }
  0x50   : > { %1052 = vmatpush3.bf16.msra.mxu0 %v827_v43  ;;  %1070 = vmatpush3.bf16.msra.mxu1 %v827_v43 }
  0x51   : > { %677 = vrot.lane.b32.xlu1 %v1015_v15, %s1110_s21  ;;  %673 = vrot.lane.b32.xlu0 %v1013_v50, %s1110_s21 }
  0x55   : > { %695 = vrot.lane.b32.xlu1 %v986_v60, %s1113_s28  ;;  %691 = vrot.lane.b32.xlu0 %v984_v48, %s1113_s28 }
  0x59   : > { %697 = vrot.lane.b32.xlu1 %v1016_v12, %s1113_s28  ;;  %693 = vrot.lane.b32.xlu0 %v985_v35, %s1113_s28 }
  0x5d   : > { %728 = vrot.lane.b32.xlu1 %v1407_v36, %s1114_s8  ;;  %724 = vrot.lane.b32.xlu0 %v1389_v8, %s1114_s8  ;;  %v1019_v8 = vcombine.low %v1443_v6, %v745_v54 }
  0x61   : > { %730 = vrot.lane.b32.xlu1 %v1017_v22, %s1114_s8  ;;  %726 = vrot.lane.b32.xlu0 %v1424_v63, %s1114_s8 }
  0x65   : > { %752 = vrot.lane.b32.xlu1 %v1343_v18, %s1115_s9  ;;  %748 = vrot.lane.b32.xlu0 %v1359_v23, %s1115_s9 }
  0x69   : > { %754 = vrot.lane.b32.xlu1 %v1019_v8, %s1115_s9  ;;  %750 = vrot.lane.b32.xlu0 %v1336_v11, %s1115_s9 }
  0x95   : > { %v613_v44 = vpop.permute.xlu1 %612 }
  0x98   : > { %v609_v45 = vpop.permute.xlu0 %608 }
  0x9b   : > { %v615_v46 = vpop.permute.xlu1 %614 }
  0x9e   : > { %v611_v47 = vpop.permute.xlu0 %610 }
  0xa1   : > { %v590_v51 = vpop.permute.xlu1 %589 }
  0xa2   : > { %v586_v52 = vpop.permute.xlu0 %585 }
  0xa5   : > { %v592_v25 = vpop.permute.xlu1 %591 }
  0xa6   : > { %v588_v36 = vpop.permute.xlu0 %587 }
  0xa9   : > { %v676_v37 = vpop.permute.xlu1 %675 }
  0xaa   : > { %v672_v41 = vpop.permute.xlu0 %671 }
  0xad   : > { %v516_v18 = vpop.permute.xlu1 %515 }
  0xae   : > { %527 = vst.msk [vmem:[#allocation3 + $0x8] sm:$0xff] %vm525_vm14, %v516_v18  ;;  %v514_v23 = vpop.permute.xlu0 %513 }
  0xaf   : > { %599 = vst.msk [vmem:[#allocation3 + $0x8] sm:$0xff] %vm597_vm15, %v588_v36 }
  0xb0   : > { %526 = vst.msk [vmem:[#allocation3] sm:$0xff] %vm525_vm14, %v514_v23 }
  0xb1   : > { %598 = vst.msk [vmem:[#allocation3] sm:$0xff] %vm597_vm15, %v586_v52 }
  0xb2   : > { %622 = vst.msk [vmem:[#allocation3 + $0x8] sm:$0xff] %vm620_vm0, %v611_v47  ;;  %621 = vst.msk [vmem:[#allocation3] sm:$0xff] %vm620_vm0, %v609_v45  ;;  %v520_v11 = vpop.permute.xlu1 %519 }
  0xb3   : > { %529 = vst.msk [vmem:[#allocation3 + $0x18] sm:$0xff] %vm525_vm14, %v520_v11 }
  0xb4   : > { %601 = vst.msk [vmem:[#allocation3 + $0x18] sm:$0xff] %vm597_vm15, %v592_v25 }
  0xb5   : > { %624 = vst.msk [vmem:[#allocation3 + $0x18] sm:$0xff] %vm620_vm0, %v615_v46 }
  0xb7   : > { %v518_v39 = vpop.permute.xlu0 %517  ;;  %v649_v55 = vpop.permute.xlu1 %648 }
  0xb8   : > { %528 = vst.msk [vmem:[#allocation3 + $0x10] sm:$0xff] %vm525_vm14, %v518_v39 }
  0xb9   : > { %600 = vst.msk [vmem:[#allocation3 + $0x10] sm:$0xff] %vm597_vm15, %v590_v51 }
  0xba   : > { %623 = vst.msk [vmem:[#allocation3 + $0x10] sm:$0xff] %vm620_vm0, %v613_v44 }
  0xbb   : > { %659 = vst.msk [vmem:[#allocation3 + $0x10] sm:$0xff] %vm656_vm1, %v649_v55  ;;  %v645_v56 = vpop.permute.xlu0 %644 }
  0xbc   : > { %657 = vst.msk [vmem:[#allocation3] sm:$0xff] %vm656_vm1, %v645_v56 }
  0xbd   : > { %686 = vst.msk [vmem:[#allocation3 + $0x10] sm:$0xff] %vm683_vm2, %v676_v37  ;;  %684 = vst.msk [vmem:[#allocation3] sm:$0xff] %vm683_vm2, %v672_v41 }
  0xbf   : > { %v651_v57 = vpop.permute.xlu1 %650  ;;  %v647_v38 = vpop.permute.xlu0 %646 }
  0xc0   : > { %660 = vst.msk [vmem:[#allocation3 + $0x18] sm:$0xff] %vm656_vm1, %v651_v57  ;;  %658 = vst.msk [vmem:[#allocation3 + $0x8] sm:$0xff] %vm656_vm1, %v647_v38 }
  0xc3   : > { %v678_v59 = vpop.permute.xlu1 %677  ;;  %v674_v42 = vpop.permute.xlu0 %673 }
  0xc4   : > { %687 = vst.msk [vmem:[#allocation3 + $0x18] sm:$0xff] %vm683_vm2, %v678_v59  ;;  %685 = vst.msk [vmem:[#allocation3 + $0x8] sm:$0xff] %vm683_vm2, %v674_v42 }
  0xc7   : > { %v696_v60 = vpop.permute.xlu1 %695  ;;  %v692_v48 = vpop.permute.xlu0 %691 }
  0xc8   : > { %706 = vst.msk [vmem:[#allocation3 + $0x10] sm:$0xff] %vm703_vm3, %v696_v60  ;;  %704 = vst.msk [vmem:[#allocation3] sm:$0xff] %vm703_vm3, %v692_v48 }
  0xcb   : > { %v698_v35 = vpop.permute.xlu1 %697  ;;  %v694_v61 = vpop.permute.xlu0 %693 }
  0xcc   : > { %707 = vst.msk [vmem:[#allocation3 + $0x18] sm:$0xff] %vm703_vm3, %v698_v35  ;;  %705 = vst.msk [vmem:[#allocation3 + $0x8] sm:$0xff] %vm703_vm3, %v694_v61 }
  0xcf   : > { %v729_v62 = vpop.permute.xlu1 %728  ;;  %v725_v63 = vpop.permute.xlu0 %724 }
  0xd0   : > { %739 = vst.msk [vmem:[#allocation3 + $0x10] sm:$0xff] %vm736_vm4, %v729_v62  ;;  %737 = vst.msk [vmem:[#allocation3] sm:$0xff] %vm736_vm4, %v725_v63 }
  0xd3   : > { %v731_v1 = vpop.permute.xlu1 %730  ;;  %v727_v13 = vpop.permute.xlu0 %726 }
  0xd4   : > { %740 = vst.msk [vmem:[#allocation3 + $0x18] sm:$0xff] %vm736_vm4, %v731_v1  ;;  %738 = vst.msk [vmem:[#allocation3 + $0x8] sm:$0xff] %vm736_vm4, %v727_v13 }
  0xd7   : > { %v753_v14 = vpop.permute.xlu1 %752  ;;  %v749_v24 = vpop.permute.xlu0 %748 }
  0xd8   : > { %763 = vst.msk [vmem:[#allocation3 + $0x10] sm:$0xff] %vm760_vm5, %v753_v14  ;;  %761 = vst.msk [vmem:[#allocation3] sm:$0xff] %vm760_vm5, %v749_v24 }
  0xdb   : > { %v755_v34 = vpop.permute.xlu1 %754  ;;  %v751_v49 = vpop.permute.xlu0 %750 }
  0xdc   : > { %764 = vst.msk [vmem:[#allocation3 + $0x18] sm:$0xff] %vm760_vm5, %v755_v34  ;;  %762 = vst.msk [vmem:[#allocation3 + $0x8] sm:$0xff] %vm760_vm5, %v751_v49 }
  0xdf   : > { %v765_v53 = vld [vmem:[#allocation3] sm:$0xff]  ;;  %v767_v2 = vld [vmem:[#allocation3 + $0x10] sm:$0xff] }
  0xe0   : > { %1053 = vmatprep.mubr.msk.bf16.mxu0 %vm812_vm6, %v765_v53  ;;  %1057 = vmatprep.mubr.msk.bf16.mxu1 %vm812_vm6, %v767_v2 }
  0xe3   : > { %v766_v3 = vld [vmem:[#allocation3 + $0x8] sm:$0xff]  ;;  %v768_v4 = vld [vmem:[#allocation3 + $0x18] sm:$0xff] }
  0xe4   : > { %1054 = vmatmul.mubr.msk.bf16.vlgmr.msra.gmra.mrb[0].mxu0 %vm812_vm6, %v766_v3  ;;  %1058 = vmatmul.mubr.msk.bf16.vlgmr.msra.gmra.mrb[0].mxu1 %vm812_vm6, %v768_v4 }
 0x1b7   : > { %v1055_v33 = vpop.f32.mrb[0].mxu0  ;;  %v1059_v6 = vpop.f32.mrb[0].mxu1 }
 0x1b8   : > { %v872_v58 = vadd.f32 %v1055_v33, %v1020_v5  ;;  %v888_v21 = vadd.f32 %v1059_v6, %v1020_v5  ;;  %v863_v9 = vpop.f32.mrb[1].mxu0  ;;  %v879_v15 = vpop.f32.mrb[1].mxu1 }
 0x1b9   : > { %v864_v50 = vadd.f32 %v1020_v5, %v863_v9  ;;  %v880_v0 = vadd.f32 %v1020_v5, %v879_v15  ;;  %v1056_v10 = vpop.f32.mrb[2].mxu0  ;;  %v1060_v17 = vpop.f32.mrb[2].mxu1 }
 0x1ba   : > { %v896_v19 = vmax.f32 %v872_v58, 0.0  ;;  %v900_v16 = vmax.f32 %v888_v21, 0.0  ;;  %v875_v27 = vadd.f32 %v1056_v10, %v1020_v5  ;;  %v891_v7 = vadd.f32 %v1060_v17, %v1020_v5  ;;  %v866_v12 = vpop.f32.mrb[3].mxu0  ;;  %v882_v20 = vpop.f32.mrb[3].mxu1 }
 0x1bb   : > { %v894_v28 = vmax.f32 %v864_v50, 0.0  ;;  %v898_v29 = vmax.f32 %v880_v0, 0.0  ;;  %v867_v26 = vadd.f32 %v1020_v5, %v866_v12  ;;  %v883_v40 = vadd.f32 %v1020_v5, %v882_v20 }
 0x1bc   : > { %v904_v30 = vpack.c.bf16 %v896_v19, %v896_v19  ;;  %v908_v22 = vpack.c.bf16 %v900_v16, %v900_v16  ;;  %v897_v31 = vmax.f32 %v875_v27, 0.0  ;;  %v901_v32 = vmax.f32 %v891_v7, 0.0 }
 0x1bd   : > { %v902_v43 = vpack.c.bf16 %v894_v28, %v894_v28  ;;  %v906_v54 = vpack.c.bf16 %v898_v29, %v898_v29  ;;  %v895_v8 = vmax.f32 %v867_v26, 0.0  ;;  %v899_v44 = vmax.f32 %v883_v40, 0.0 }
 0x1be   : > { %913 = vst.msk [vmem:[%s170_s17 + $0x8] sm:$0xf] %vm910_vm7, %v904_v30  ;;  %917 = vst.msk [vmem:[%s170_s17 + $0x18] sm:$0xf] %vm910_vm7, %v908_v22  ;;  %v905_v45 = vpack.c.bf16 %v897_v31, %v897_v31  ;;  %v909_v46 = vpack.c.bf16 %v901_v32, %v901_v32 }
 0x1bf   : > { %911 = vst.msk [vmem:[%s170_s17] sm:$0xf] %vm910_vm7, %v902_v43  ;;  %915 = vst.msk [vmem:[%s170_s17 + $0x10] sm:$0xf] %vm910_vm7, %v906_v54  ;;  %v903_v47 = vpack.c.bf16 %v895_v8, %v895_v8  ;;  %v907_v51 = vpack.c.bf16 %v899_v44, %v899_v44 }
 0x1c0   : > { %914 = vst.msk [vmem:[%s170_s17 + $0xc] sm:$0xf] %vm910_vm7, %v905_v45  ;;  %918 = vst.msk [vmem:[%s170_s17 + $0x1c] sm:$0xf] %vm910_vm7, %v909_v46 }
 0x1c1   : > { %912 = vst.msk [vmem:[%s170_s17 + $0x4] sm:$0xf] %vm910_vm7, %v903_v47  ;;  %916 = vst.msk [vmem:[%s170_s17 + $0x14] sm:$0xf] %vm910_vm7, %v907_v51 }
 0x1c2 PF: > { %s13_s12 = sadd.s32 1, %s1105_s12  }
 0x1c3   : > { %p10_p4 = scmp.ge.s32.totalorder %s13_s12, 4  }
 0x1c5   :  { %12 = sbr.rel (!%p10_p4) target bundleno = 1 (0x1), region = 63 }

// kernel: unet_up_forward.3
= control target key start
LH: loop header
LB: loop body
LE: loop exit
PB: predicated region body
PF: predicated region fallthrough
CT: control target
= control target key end

     0   :  { %s7575_s21 = smov 0   ;;  %s11143_s0 = inlined_call_operand.vmem [shape: bf16[2,16,16,8], index: 0, kind: input, shape index: {}]   ;;  %s11144_s1 = inlined_call_operand.vmem [shape: bf16[2,16,16,8], index: 1, kind: input, shape index: {}]   ;;  %s11145_s2 = inlined_call_operand.vmem [shape: bf16[144,8], index: 2, kind: input, shape index: {}]   ;;  %s11146_s3 = inlined_call_operand.vmem [shape: f32[1,8], index: 3, kind: input, shape index: {}]   ;;  %s11147_s4 = inlined_call_operand.vmem [shape: bf16[72,8], index: 4, kind: input, shape index: {}]   ;;  %s11148_s5 = inlined_call_operand.vmem [shape: f32[1,8], index: 5, kind: input, shape index: {}]   ;;  %s11149_s6 = inlined_call_operand.vmem [shape: bf16[2,16,16,8], index: 6, kind: output, shape index: {}]  }
   0x1 LB: > { %s6927_s22 = sadd.s32 4294967295, %s7522_s21   ;;  %p6931_p0 = scmp.ge.s32.totalorder %s7522_s21, 1  ;;  %s7522_s21 = sphi %s7575_s21, %s16_s21  }
   0x2   : > { %p222_p1 = scmp.lt.s32.totalorder %s7522_s21, 3 }
   0x4   : > { %p223_p2 = pnand %p6931_p0, %p222_p1 }
   0x6   : > { %226 = sbr.rel (%p223_p2) target bundleno = 1448 (0x5a8), region = 44 }
   0xd   : > { %vm11189_vm0 = vcmask 60416   ;;  %vm276_vm1 = vcmask 57344   ;;  %v11150_v0 = vmov 0   ;;  %p257_p3 = scmp.lt.s32.totalorder %s6927_s22, 1  ;;  %vm2058_vm2 = vcmask 1042432   ;;  %s7525_s27 = smov 16  }
   0xe   : > { %274 = vst.msk [vmem:[#allocation2] sm:$0xf] %vm11189_vm0, %v11150_v0  ;;  %275 = vst.msk [vmem:[#allocation2 + $0x4] sm:$0xf] %vm11189_vm0, %v11150_v0  ;;  %4301 = vmatprep.subr.bf16.mxu0 %v11150_v0  ;;  %7398 = vmatprep.subr.bf16.mxu1 %v11150_v0  ;;  %vm1542_vm3 = vsmask.f32 3328 }
   0xf   : > { %277 = vst.msk [vmem:[#allocation2 + $0x8] sm:$0x1] %vm276_vm1, %v11150_v0  ;;  %280 = vst.msk [vmem:[#allocation2 + $0x14] sm:$0x1] %vm276_vm1, %v11150_v0  ;;  %vm2059_vm4 = vcmask 1046532   ;;  %s11557_s22 = smov (!%p257_p3, %s6927_s22), 1 }
  0x10   : > { %278 = vst.msk [vmem:[#allocation2 + $0xc] sm:$0xf] %vm11189_vm0, %v11150_v0  ;;  %279 = vst.msk [vmem:[#allocation2 + $0x10] sm:$0xf] %vm11189_vm0, %v11150_v0  ;;  %vm1543_vm5 = vsmask.f32 7440 }
  0x11   : > { %281 = vst.msk [vmem:[#allocation2 + $0x18] sm:$0xf] %vm11189_vm0, %v11150_v0  ;;  %282 = vst.msk [vmem:[#allocation2 + $0x1c] sm:$0xf] %vm11189_vm0, %v11150_v0  ;;  %s7913_s23 = sshll.u32 %s11557_s22, 7  ;;  %s7526_s28 = smov 8  }
  0x12   : > { %283 = vst.msk [vmem:[#allocation2 + $0x20] sm:$0x1] %vm276_vm1, %v11150_v0  ;;  %286 = vst.msk [vmem:[#allocation2 + $0x2c] sm:$0x1] %vm276_vm1, %v11150_v0  ;;  %s7919_s26 = scalar_lea.vmem %s11143_s0, %s7913_s23  ;;  %vm469_vm6 = vsmask.f32 256  ;;  %s8472_s7 = scalar_lea.vmem %s11144_s1, %s7913_s23 }
  0x13   : > { %284 = vst.msk [vmem:[#allocation2 + $0x24] sm:$0xf] %vm11189_vm0, %v11150_v0  ;;  %285 = vst.msk [vmem:[#allocation2 + $0x28] sm:$0xf] %vm11189_vm0, %v11150_v0  ;;  %v437_v2 = vld [vmem:[%s7919_s26] sm:$0xf] }
  0x14   : > { %287 = vst.msk [vmem:[#allocation2 + $0x30] sm:$0xf] %vm11189_vm0, %v11150_v0  ;;  %288 = vst.msk [vmem:[#allocation2 + $0x34] sm:$0xf] %vm11189_vm0, %v11150_v0  ;;  %vm470_vm8 = vsmask.f32 4368 }
  0x15   : > { %289 = vst.msk [vmem:[#allocation2 + $0x38] sm:$0x1] %vm276_vm1, %v11150_v0  ;;  %292 = vst.msk [vmem:[#allocation2 + $0x44] sm:$0x1] %vm276_vm1, %v11150_v0  ;;  %vm794_vm9 = vsmask.f32 7938 }
  0x16   : > { %290 = vst.msk [vmem:[#allocation2 + $0x3c] sm:$0xf] %vm11189_vm0, %v11150_v0  ;;  %291 = vst.msk [vmem:[#allocation2 + $0x40] sm:$0xf] %vm11189_vm0, %v11150_v0  ;;  %v1375_v3 = vld [vmem:[#allocation2] sm:$0xf] }
  0x17   : > { %293 = vst.msk [vmem:[#allocation2 + $0x48] sm:$0xf] %vm11189_vm0, %v11150_v0  ;;  %294 = vst.msk [vmem:[#allocation2 + $0x4c] sm:$0xf] %vm11189_vm0, %v11150_v0  ;;  %v1376_v4 = vld [vmem:[#allocation2 + $0x4] sm:$0xf] }
  0x18   : > { %295 = vst.msk [vmem:[#allocation2 + $0x50] sm:$0x1] %vm276_vm1, %v11150_v0  ;;  %298 = vst.msk [vmem:[#allocation2 + $0x5c] sm:$0x1] %vm276_vm1, %v11150_v0  ;;  %v1377_v5 = vld [vmem:[#allocation2 + $0x8] sm:$0x1] }
  0x19   : > { %296 = vst.msk [vmem:[#allocation2 + $0x54] sm:$0xf] %vm11189_vm0, %v11150_v0  ;;  %297 = vst.msk [vmem:[#allocation2 + $0x58] sm:$0xf] %vm11189_vm0, %v11150_v0  ;;  %v1565_v6 = vshll.u32 %v1377_v5, 16  ;;  %v6970_v7 = vrot.slane %v1375_v3, 9 }
  0x1a   : > { %299 = vst.msk [vmem:[#allocation2 + $0x60] sm:$0xf] %vm11189_vm0, %v11150_v0  ;;  %300 = vst.msk [vmem:[#allocation2 + $0x64] sm:$0xf] %vm11189_vm0, %v11150_v0  ;;  %v2063_v8 = vrot.slane %v1376_v4, 5  ;;  %v2066_v9 = vrot.slane %v1377_v5, 5 }
  0x1b   : > { %301 = vst.msk [vmem:[#allocation2 + $0x68] sm:$0x1] %vm276_vm1, %v11150_v0  ;;  %304 = vst.msk [vmem:[#allocation2 + $0x74] sm:$0x1] %vm276_vm1, %v11150_v0  ;;  %v1546_v10 = vshrl.u32 %v1375_v3, 16  ;;  %v1549_v11 = vshll.u32 %v1375_v3, 16 }
  0x1c   : > { %302 = vst.msk [vmem:[#allocation2 + $0x6c] sm:$0xf] %vm11189_vm0, %v11150_v0  ;;  %303 = vst.msk [vmem:[#allocation2 + $0x70] sm:$0xf] %vm11189_vm0, %v11150_v0  ;;  %v1555_v12 = vshll.u32 %v1376_v4, 16  ;;  %v1559_v13 = vshrl.u32 %v1376_v4, 16 }
  0x1d   : > { %305 = vst.msk [vmem:[#allocation2 + $0x78] sm:$0xf] %vm11189_vm0, %v11150_v0  ;;  %306 = vst.msk [vmem:[#allocation2 + $0x7c] sm:$0xf] %vm11189_vm0, %v11150_v0  ;;  %v438_v14 = vld [vmem:[%s7919_s26 + $0x4] sm:$0xf] }
  0x1e   : > { %307 = vst.msk [vmem:[#allocation2 + $0x80] sm:$0x1] %vm276_vm1, %v11150_v0  ;;  %310 = vst.msk [vmem:[#allocation2 + $0x8c] sm:$0x1] %vm276_vm1, %v11150_v0  ;;  %v2065_v16 = vrot.slane %v2063_v8, 4  ;;  %v1567_v17 = vrot.slane %v1565_v6, 5 }
  0x1f   : > { %308 = vst.msk [vmem:[#allocation2 + $0x84] sm:$0xf] %vm11189_vm0, %v11150_v0  ;;  %309 = vst.msk [vmem:[#allocation2 + $0x88] sm:$0xf] %vm11189_vm0, %v11150_v0  ;;  %v473_v18 = vshrl.u32 %v437_v2, 16  ;;  %v1548_v19 = vrot.slane %v1546_v10, 4 }
  0x20   : > { %311 = vst.msk [vmem:[#allocation2 + $0x90] sm:$0xf] %vm11189_vm0, %v11150_v0  ;;  %312 = vst.msk [vmem:[#allocation2 + $0x94] sm:$0xf] %vm11189_vm0, %v11150_v0  ;;  %v1551_v20 = vrot.slane %v1549_v11, 5  ;;  %v1557_v21 = vrot.slane %v1555_v12, 5 }
  0x21   : > { %313 = vst.msk [vmem:[#allocation2 + $0x98] sm:$0x1] %vm276_vm1, %v11150_v0  ;;  %316 = vst.msk [vmem:[#allocation2 + $0xa4] sm:$0x1] %vm276_vm1, %v11150_v0  ;;  %v1561_v22 = vrot.slane %v1559_v13, 4  ;;  %v475_v26 = vrot.slane %v473_v18, 7 }
  0x22   : > { %314 = vst.msk [vmem:[#allocation2 + $0x9c] sm:$0xf] %vm11189_vm0, %v11150_v0  ;;  %315 = vst.msk [vmem:[#allocation2 + $0xa0] sm:$0xf] %vm11189_vm0, %v11150_v0  ;;  %v439_v23 = vld [vmem:[%s7919_s26 + $0x8] sm:$0xf]  ;;  %v1552_v31 = vor.u32 %v1551_v20, %v1548_v19 }
  0x23   : > { %317 = vst.msk [vmem:[#allocation2 + $0xa8] sm:$0xf] %vm11189_vm0, %v11150_v0  ;;  %318 = vst.msk [vmem:[#allocation2 + $0xac] sm:$0xf] %vm11189_vm0, %v11150_v0  ;;  %v476_v27 = vshll.u32 %v437_v2, 16  ;;  %v481_v28 = vshrl.u32 %v438_v14, 16  ;;  %v1562_v32 = vor.u32 %v1561_v22, %v1557_v21 }
  0x24   : > { %319 = vst.msk [vmem:[#allocation2 + $0xb0] sm:$0x1] %vm276_vm1, %v11150_v0  ;;  %322 = vst.msk [vmem:[#allocation2 + $0xbc] sm:$0x1] %vm276_vm1, %v11150_v0  ;;  %v440_v29 = vld [vmem:[%s7919_s26 + $0xc] sm:$0xf] }
  0x25   : > { %320 = vst.msk [vmem:[#allocation2 + $0xb4] sm:$0xf] %vm11189_vm0, %v11150_v0  ;;  %321 = vst.msk [vmem:[#allocation2 + $0xb8] sm:$0xf] %vm11189_vm0, %v11150_v0  ;;  %v484_v33 = vshll.u32 %v438_v14, 16  ;;  %v478_v37 = vor.u32 %v476_v27, %v475_v26  ;;  %v479_v38 = vrot.slane %v475_v26, 4 }
  0x26   : > { %323 = vst.msk [vmem:[#allocation2 + $0xc0] sm:$0xf] %vm11189_vm0, %v11150_v0  ;;  %324 = vst.msk [vmem:[#allocation2 + $0xc4] sm:$0xf] %vm11189_vm0, %v11150_v0  ;;  %v796_v35 = vld [vmem:[#allocation2 + $0xc] sm:$0xf] }
  0x27   : > { %325 = vst.msk [vmem:[#allocation2 + $0xc8] sm:$0x1] %vm276_vm1, %v11150_v0  ;;  %328 = vst.msk [vmem:[#allocation2 + $0xd4] sm:$0x1] %vm276_vm1, %v11150_v0  ;;  %v483_v39 = vrot.slane %v481_v28, 7  ;;  %v490_v40 = vshrl.u32 %v439_v23, 16 }
  0x28   : > { %326 = vst.msk [vmem:[#allocation2 + $0xcc] sm:$0xf] %vm11189_vm0, %v11150_v0  ;;  %327 = vst.msk [vmem:[#allocation2 + $0xd0] sm:$0xf] %vm11189_vm0, %v11150_v0  ;;  %v1553_v41 = vrot.slane %v1552_v31, 4  ;;  %v1563_v42 = vrot.slane %v1562_v32, 4 }
  0x29   : > { %329 = vst.msk [vmem:[#allocation3] sm:$0xf] %vm11189_vm0, %v11150_v0  ;;  %330 = vst.msk [vmem:[#allocation3 + $0x4] sm:$0xf] %vm11189_vm0, %v11150_v0  ;;  %v802_v44 = vld [vmem:[#allocation2 + $0x14] sm:$0x1]  ;;  %v486_v47 = vor.u32 %v484_v33, %v483_v39 }
  0x2a   : > { %331 = vst.msk [vmem:[#allocation3 + $0x8] sm:$0x1] %vm276_vm1, %v11150_v0  ;;  %334 = vst.msk [vmem:[#allocation3 + $0x14] sm:$0x1] %vm276_vm1, %v11150_v0  ;;  %v493_v45 = vshll.u32 %v439_v23, 16  ;;  %v498_v46 = vshrl.u32 %v440_v29, 16 }
  0x2b   : > { %332 = vst.msk [vmem:[#allocation3 + $0xc] sm:$0xf] %vm11189_vm0, %v11150_v0  ;;  %333 = vst.msk [vmem:[#allocation3 + $0x10] sm:$0xf] %vm11189_vm0, %v11150_v0  ;;  %v488_v48 = vrot.slane %v483_v39, 4  ;;  %v492_v50 = vrot.slane %v490_v40, 7 }
  0x2c   : > { %335 = vst.msk [vmem:[#allocation3 + $0x18] sm:$0xf] %vm11189_vm0, %v11150_v0  ;;  %336 = vst.msk [vmem:[#allocation3 + $0x1c] sm:$0xf] %vm11189_vm0, %v11150_v0  ;;  %v441_v51 = vld [vmem:[%s7919_s26 + $0x10] sm:$0xf] }
  0x2d   : > { %337 = vst.msk [vmem:[#allocation3 + $0x20] sm:$0x1] %vm276_vm1, %v11150_v0  ;;  %340 = vst.msk [vmem:[#allocation3 + $0x2c] sm:$0x1] %vm276_vm1, %v11150_v0  ;;  %v500_v54 = vrot.slane %v498_v46, 7  ;;  %v501_v55 = vshll.u32 %v440_v29, 16  ;;  %v495_v61 = vor.u32 %v493_v45, %v492_v50 }
  0x2e   : > { %338 = vst.msk [vmem:[#allocation3 + $0x24] sm:$0xf] %vm11189_vm0, %v11150_v0  ;;  %339 = vst.msk [vmem:[#allocation3 + $0x28] sm:$0xf] %vm11189_vm0, %v11150_v0  ;;  %v805_v56 = vld [vmem:[#allocation2 + $0x18] sm:$0xf] }
  0x2f   : > { %341 = vst.msk [vmem:[#allocation3 + $0x30] sm:$0xf] %vm11189_vm0, %v11150_v0  ;;  %342 = vst.msk [vmem:[#allocation3 + $0x34] sm:$0xf] %vm11189_vm0, %v11150_v0  ;;  %v442_v57 = vld [vmem:[%s7919_s26 + $0x14] sm:$0xf]  ;;  %v503_v3 = vor.u32 %v501_v55, %v500_v54 }
  0x30   : > { %343 = vst.msk [vmem:[#allocation3 + $0x38] sm:$0x1] %vm276_vm1, %v11150_v0  ;;  %346 = vst.msk [vmem:[#allocation3 + $0x44] sm:$0x1] %vm276_vm1, %v11150_v0  ;;  %v809_v62 = vld [vmem:[#allocation2 + $0x20] sm:$0x1] }
  0x31   : > { %344 = vst.msk [vmem:[#allocation3 + $0x3c] sm:$0xf] %vm11189_vm0, %v11150_v0  ;;  %345 = vst.msk [vmem:[#allocation3 + $0x40] sm:$0xf] %vm11189_vm0, %v11150_v0  ;;  %v443_v63 = vld [vmem:[%s7919_s26 + $0x18] sm:$0xf] }
  0x32   : > { %347 = vst.msk [vmem:[#allocation3 + $0x48] sm:$0xf] %vm11189_vm0, %v11150_v0  ;;  %348 = vst.msk [vmem:[#allocation3 + $0x4c] sm:$0xf] %vm11189_vm0, %v11150_v0  ;;  %v496_v2 = vrot.slane %v492_v50, 4  ;;  %v505_v4 = vrot.slane %v500_v54, 4 }
  0x33   : > { %349 = vst.msk [vmem:[#allocation3 + $0x50] sm:$0x1] %vm276_vm1, %v11150_v0  ;;  %352 = vst.msk [vmem:[#allocation3 + $0x5c] sm:$0x1] %vm276_vm1, %v11150_v0  ;;  %v507_v5 = vshrl.u32 %v441_v51, 16  ;;  %v518_v10 = vshll.u32 %v442_v57, 16 }
  0x34   : > { %350 = vst.msk [vmem:[#allocation3 + $0x54] sm:$0xf] %vm11189_vm0, %v11150_v0  ;;  %351 = vst.msk [vmem:[#allocation3 + $0x58] sm:$0xf] %vm11189_vm0, %v11150_v0  ;;  %v444_v6 = vld [vmem:[%s7919_s26 + $0x1c] sm:$0xf] }
  0x35   : > { %353 = vst.msk [vmem:[#allocation3 + $0x60] sm:$0xf] %vm11189_vm0, %v11150_v0  ;;  %354 = vst.msk [vmem:[#allocation3 + $0x64] sm:$0xf] %vm11189_vm0, %v11150_v0  ;;  %v7977_v11 = vld [vmem:[%s7919_s26 + $0x20] sm:$0xf] }
  0x36   : > { %355 = vst.msk [vmem:[#allocation3 + $0x68] sm:$0x1] %vm276_vm1, %v11150_v0  ;;  %358 = vst.msk [vmem:[#allocation3 + $0x74] sm:$0x1] %vm276_vm1, %v11150_v0  ;;  %v509_v14 = vrot.slane %v507_v5, 7  ;;  %v527_v18 = vshll.u32 %v443_v63, 16 }
  0x37   : > { %356 = vst.msk [vmem:[#allocation3 + $0x6c] sm:$0xf] %vm11189_vm0, %v11150_v0  ;;  %357 = vst.msk [vmem:[#allocation3 + $0x70] sm:$0xf] %vm11189_vm0, %v11150_v0  ;;  %v532_v19 = vshrl.u32 %v444_v6, 16  ;;  %v535_v20 = vshll.u32 %v444_v6, 16 }
  0x38   : > { %359 = vst.msk [vmem:[#allocation3 + $0x78] sm:$0xf] %vm11189_vm0, %v11150_v0  ;;  %360 = vst.msk [vmem:[#allocation3 + $0x7c] sm:$0xf] %vm11189_vm0, %v11150_v0  ;;  %v513_v22 = vrot.slane %v509_v14, 4  ;;  %v541_v26 = vshrl.u32 %v7977_v11, 16 }
  0x39   : > { %361 = vst.msk [vmem:[#allocation3 + $0x80] sm:$0x1] %vm276_vm1, %v11150_v0  ;;  %364 = vst.msk [vmem:[#allocation3 + $0x8c] sm:$0x1] %vm276_vm1, %v11150_v0  ;;  %v816_v23 = vld [vmem:[#allocation2 + $0x2c] sm:$0x1] }
  0x3a   : > { %362 = vst.msk [vmem:[#allocation3 + $0x84] sm:$0xf] %vm11189_vm0, %v11150_v0  ;;  %363 = vst.msk [vmem:[#allocation3 + $0x88] sm:$0xf] %vm11189_vm0, %v11150_v0  ;;  %v544_v31 = vshll.u32 %v7977_v11, 16  ;;  %s7527_s8 = smov 32  }
  0x3b   : > { %365 = vst.msk [vmem:[#allocation3 + $0x90] sm:$0xf] %vm11189_vm0, %v11150_v0  ;;  %366 = vst.msk [vmem:[#allocation3 + $0x94] sm:$0xf] %vm11189_vm0, %v11150_v0  ;;  %s7528_s9 = smov 48   ;;  %vm11191_vm14 = vcmask 64512  }
  0x3c   : > { %367 = vst.msk [vmem:[#allocation3 + $0x98] sm:$0x1] %vm276_vm1, %v11150_v0  ;;  %370 = vst.msk [vmem:[#allocation3 + $0xa4] sm:$0x1] %vm276_vm1, %v11150_v0  ;;  %vm11190_vm15 = vcmask 130112   ;;  %s7529_s12 = smov 64  }
  0x3d   : > { %368 = vst.msk [vmem:[#allocation3 + $0x9c] sm:$0xf] %vm11189_vm0, %v11150_v0  ;;  %369 = vst.msk [vmem:[#allocation3 + $0xa0] sm:$0xf] %vm11189_vm0, %v11150_v0  ;;  %s7530_s15 = smov 24   ;;  %s7531_s16 = smov 80  }
  0x3e   : > { %371 = vst.msk [vmem:[#allocation3 + $0xa8] sm:$0xf] %vm11189_vm0, %v11150_v0  ;;  %372 = vst.msk [vmem:[#allocation3 + $0xac] sm:$0xf] %vm11189_vm0, %v11150_v0  ;;  %s7532_s19 = smov 40   ;;  %s7533_s20 = smov 88  }
  0x3f   : > { %373 = vst.msk [vmem:[#allocation3 + $0xb0] sm:$0x1] %vm276_vm1, %v11150_v0  ;;  %376 = vst.msk [vmem:[#allocation3 + $0xbc] sm:$0x1] %vm276_vm1, %v11150_v0  ;;  %s7534_s25 = smov 56   ;;  %s7535_s29 = smov 96  }
  0x40   : > { %374 = vst.msk [vmem:[#allocation3 + $0xb4] sm:$0xf] %vm11189_vm0, %v11150_v0  ;;  %375 = vst.msk [vmem:[#allocation3 + $0xb8] sm:$0xf] %vm11189_vm0, %v11150_v0  ;;  %s7536_s11 = smov 72   ;;  %s7537_s13 = smov 104  }
  0x41   : > { %377 = vst.msk [vmem:[#allocation3 + $0xc0] sm:$0xf] %vm11189_vm0, %v11150_v0  ;;  %378 = vst.msk [vmem:[#allocation3 + $0xc4] sm:$0xf] %vm11189_vm0, %v11150_v0  ;;  %s7538_s18 = smov 112   ;;  %s7539_s22 = smov 120  }
  0x42   : > { %379 = vst.msk [vmem:[#allocation3 + $0xc8] sm:$0x1] %vm276_vm1, %v11150_v0  ;;  %382 = vst.msk [vmem:[#allocation3 + $0xd4] sm:$0x1] %vm276_vm1, %v11150_v0 }
  0x43   : > { %380 = vst.msk [vmem:[#allocation3 + $0xcc] sm:$0xf] %vm11189_vm0, %v11150_v0  ;;  %381 = vst.msk [vmem:[#allocation3 + $0xd0] sm:$0xf] %vm11189_vm0, %v11150_v0 }
  0x44   : > { %383 = vst.msk [vmem:[#allocation5] sm:$0xf] %vm11189_vm0, %v11150_v0  ;;  %384 = vst.msk [vmem:[#allocation5 + $0x4] sm:$0xf] %vm11189_vm0, %v11150_v0 }
  0x45   : > { %385 = vst.msk [vmem:[#allocation5 + $0x8] sm:$0x1] %vm276_vm1, %v11150_v0  ;;  %388 = vst.msk [vmem:[#allocation5 + $0x14] sm:$0x1] %vm276_vm1, %v11150_v0 }
  0x46   : > { %386 = vst.msk [vmem:[#allocation5 + $0xc] sm:$0xf] %vm11189_vm0, %v11150_v0  ;;  %387 = vst.msk [vmem:[#allocation5 + $0x10] sm:$0xf] %vm11189_vm0, %v11150_v0 }
  0x47   : > { %389 = vst.msk [vmem:[#allocation5 + $0x18] sm:$0xf] %vm11189_vm0, %v11150_v0  ;;  %390 = vst.msk [vmem:[#allocation5 + $0x1c] sm:$0xf] %vm11189_vm0, %v11150_v0 }
  0x48   : > { %391 = vst.msk [vmem:[#allocation5 + $0x20] sm:$0x1] %vm276_vm1, %v11150_v0  ;;  %394 = vst.msk [vmem:[#allocation5 + $0x2c] sm:$0x1] %vm276_vm1, %v11150_v0 }
  0x49   : > { %392 = vst.msk [vmem:[#allocation5 + $0x24] sm:$0xf] %vm11189_vm0, %v11150_v0  ;;  %393 = vst.msk [vmem:[#allocation5 + $0x28] sm:$0xf] %vm11189_vm0, %v11150_v0 }
  0x4a   : > { %395 = vst.msk [vmem:[#allocation5 + $0x30] sm:$0xf] %vm11189_vm0, %v11150_v0  ;;  %396 = vst.msk [vmem:[#allocation5 + $0x34] sm:$0xf] %vm11189_vm0, %v11150_v0 }
  0x4b   : > { %397 = vst.msk [vmem:[#allocation5 + $0x38] sm:$0x1] %vm276_vm1, %v11150_v0  ;;  %400 = vst.msk [vmem:[#allocation5 + $0x44] sm:$0x1] %vm276_vm1, %v11150_v0 }
  0x4c   : > { %398 = vst.msk [vmem:[#allocation5 + $0x3c] sm:$0xf] %vm11189_vm0, %v11150_v0  ;;  %399 = vst.msk [vmem:[#allocation5 + $0x40] sm:$0xf] %vm11189_vm0, %v11150_v0 }
  0x4d   : > { %401 = vst.msk [vmem:[#allocation5 + $0x48] sm:$0xf] %vm11189_vm0, %v11150_v0  ;;  %402 = vst.msk [vmem:[#allocation5 + $0x4c] sm:$0xf] %vm11189_vm0, %v11150_v0 }
  0x4e   : > { %403 = vst.msk [vmem:[#allocation5 + $0x50] sm:$0x1] %vm276_vm1, %v11150_v0  ;;  %406 = vst.msk [vmem:[#allocation5 + $0x5c] sm:$0x1] %vm276_vm1, %v11150_v0 }
  0x4f   : > { %404 = vst.msk [vmem:[#allocation5 + $0x54] sm:$0xf] %vm11189_vm0, %v11150_v0  ;;  %405 = vst.msk [vmem:[#allocation5 + $0x58] sm:$0xf] %vm11189_vm0, %v11150_v0 }
  0x50   : > { %407 = vst.msk [vmem:[#allocation5 + $0x60] sm:$0xf] %vm11189_vm0, %v11150_v0  ;;  %408 = vst.msk [vmem:[#allocation5 + $0x64] sm:$0xf] %vm11189_vm0, %v11150_v0 }
  0x51   : > { %409 = vst.msk [vmem:[#allocation5 + $0x68] sm:$0x1] %vm276_vm1, %v11150_v0  ;;  %412 = vst.msk [vmem:[#allocation5 + $0x74] sm:$0x1] %vm276_vm1, %v11150_v0 }
  0x52   : > { %410 = vst.msk [vmem:[#allocation5 + $0x6c] sm:$0xf] %vm11189_vm0, %v11150_v0  ;;  %411 = vst.msk [vmem:[#allocation5 + $0x70] sm:$0xf] %vm11189_vm0, %v11150_v0 }
  0x53   : > { %413 = vst.msk [vmem:[#allocation5 + $0x78] sm:$0xf] %vm11189_vm0, %v11150_v0  ;;  %414 = vst.msk [vmem:[#allocation5 + $0x7c] sm:$0xf] %vm11189_vm0, %v11150_v0 }
  0x54   : > { %415 = vst.msk [vmem:[#allocation5 + $0x80] sm:$0x1] %vm276_vm1, %v11150_v0  ;;  %418 = vst.msk [vmem:[#allocation5 + $0x8c] sm:$0x1] %vm276_vm1, %v11150_v0 }
  0x55   : > { %416 = vst.msk [vmem:[#allocation5 + $0x84] sm:$0xf] %vm11189_vm0, %v11150_v0  ;;  %417 = vst.msk [vmem:[#allocation5 + $0x88] sm:$0xf] %vm11189_vm0, %v11150_v0 }
  0x56   : > { %419 = vst.msk [vmem:[#allocation5 + $0x90] sm:$0xf] %vm11189_vm0, %v11150_v0  ;;  %420 = vst.msk [vmem:[#allocation5 + $0x94] sm:$0xf] %vm11189_vm0, %v11150_v0 }
  0x57   : > { %421 = vst.msk [vmem:[#allocation5 + $0x98] sm:$0x1] %vm276_vm1, %v11150_v0  ;;  %424 = vst.msk [vmem:[#allocation5 + $0xa4] sm:$0x1] %vm276_vm1, %v11150_v0 }
  0x58   : > { %422 = vst.msk [vmem:[#allocation5 + $0x9c] sm:$0xf] %vm11189_vm0, %v11150_v0  ;;  %423 = vst.msk [vmem:[#allocation5 + $0xa0] sm:$0xf] %vm11189_vm0, %v11150_v0 }
  0x59   : > { %425 = vst.msk [vmem:[#allocation5 + $0xa8] sm:$0xf] %vm11189_vm0, %v11150_v0  ;;  %426 = vst.msk [vmem:[#allocation5 + $0xac] sm:$0xf] %vm11189_vm0, %v11150_v0 }
  0x5a   : > { %427 = vst.msk [vmem:[#allocation5 + $0xb0] sm:$0x1] %vm276_vm1, %v11150_v0  ;;  %430 = vst.msk [vmem:[#allocation5 + $0xbc] sm:$0x1] %vm276_vm1, %v11150_v0 }
  0x5b   : > { %428 = vst.msk [vmem:[#allocation5 + $0xb4] sm:$0xf] %vm11189_vm0, %v11150_v0  ;;  %429 = vst.msk [vmem:[#allocation5 + $0xb8] sm:$0xf] %vm11189_vm0, %v11150_v0 }
  0x5c   : > { %431 = vst.msk [vmem:[#allocation5 + $0xc0] sm:$0xf] %vm11189_vm0, %v11150_v0  ;;  %432 = vst.msk [vmem:[#allocation5 + $0xc4] sm:$0xf] %vm11189_vm0, %v11150_v0 }
  0x5d   : > { %433 = vst.msk [vmem:[#allocation5 + $0xc8] sm:$0x1] %vm276_vm1, %v11150_v0  ;;  %436 = vst.msk [vmem:[#allocation5 + $0xd4] sm:$0x1] %vm276_vm1, %v11150_v0 }
  0x5e   : > { %434 = vst.msk [vmem:[#allocation5 + $0xcc] sm:$0xf] %vm11189_vm0, %v11150_v0  ;;  %435 = vst.msk [vmem:[#allocation5 + $0xd0] sm:$0xf] %vm11189_vm0, %v11150_v0 }
  0x5f   : > { %vm7921_vm7 = vmor %vm2058_vm2, %vm2059_vm4  ;;  %vm11198_vm2 = vcmask 261312   ;;  %vm11194_vm4 = vcmask 392512  }
  0x60   : > { %v2064_v15 = vsel %vm7921_vm7, %v6970_v7, %v2063_v8  ;;  %v2067_v24 = vsel %vm7921_vm7, %v2065_v16, %v2066_v9  ;;  %vm7934_vm10 = vmor %vm1542_vm3, %vm1543_vm5  ;;  %v510_v8 = vshll.u32 %v441_v51, 16  ;;  %v515_v9 = vshrl.u32 %v442_v57, 16 }
  0x61   : > { %v6986_v30 = vcombine.low %v2064_v15, %v2067_v24  ;;  %vm7941_vm11 = vmand %vm11189_vm0, %vm794_vm9  ;;  %v1558_v52 = vsel %vm7934_vm10, %v1553_v41, %v1557_v21  ;;  %v1568_v53 = vsel %vm7934_vm10, %v1563_v42, %v1567_v17  ;;  %v524_v15 = vshrl.u32 %v443_v63, 16  ;;  %v812_v17 = vld [vmem:[#allocation2 + $0x24] sm:$0xf] }
  0x62   : > { %vm7947_vm12 = vmor %vm469_vm6, %vm470_vm8  ;;  %v797_v49 = vsel %vm7941_vm11, %v478_v37, %v796_v35  ;;  %v6954_v58 = vcombine.low %v1558_v52, %v1568_v53  ;;  %v806_v7 = vsel %vm7941_vm11, %v495_v61, %v805_v56  ;;  %v517_v16 = vrot.slane %v515_v9, 7 }
  0x63   : > { %2221 = vrot.lane.b32.xlu0 %v6986_v30, %s7525_s27  ;;  %vm7954_vm13 = vmand %vm276_vm1, %vm469_vm6  ;;  %798 = vst [vmem:[#allocation2 + $0xc] sm:$0xf] %v797_v49  ;;  %v487_v59 = vsel %vm7947_vm12, %v479_v38, %v486_v47  ;;  %v504_v12 = vsel %vm7947_vm12, %v496_v2, %v503_v3  ;;  %v512_v21 = vor.u32 %v510_v8, %v509_v14  ;;  %v7984_v24 = vrot.slane %v524_v15, 7  ;;  %v819_v38 = vld [vmem:[#allocation2 + $0x30] sm:$0xf] }
  0x64   : > { %v803_v60 = vsel %vm7954_vm13, %v488_v48, %v802_v44  ;;  %799 = vst.msk [vmem:[#allocation2 + $0x10] sm:$0xf] %vm11189_vm0, %v487_v59  ;;  %807 = vst [vmem:[#allocation2 + $0x18] sm:$0xf] %v806_v7  ;;  %v810_v13 = vsel %vm7954_vm13, %v505_v4, %v809_v62  ;;  %v520_v28 = vor.u32 %v518_v10, %v517_v16  ;;  %v522_v29 = vrot.slane %v517_v16, 4 }
  0x65   : > { %804 = vst [vmem:[#allocation2 + $0x14] sm:$0x1] %v803_v60  ;;  %808 = vst.msk [vmem:[#allocation2 + $0x1c] sm:$0xf] %vm11189_vm0, %v504_v12  ;;  %v7989_v30 = vrot.slane %v532_v19, 7  ;;  %v813_v37 = vsel %vm7941_vm11, %v512_v21, %v812_v17  ;;  %v529_v44 = vor.u32 %v527_v18, %v7984_v24  ;;  %v530_v45 = vrot.slane %v7984_v24, 4 }
  0x66   : > { %811 = vst [vmem:[#allocation2 + $0x20] sm:$0x1] %v810_v13  ;;  %v521_v41 = vsel %vm7947_vm12, %v513_v22, %v520_v28  ;;  %814 = vst [vmem:[#allocation2 + $0x24] sm:$0xf] %v813_v37  ;;  %v817_v42 = vsel %vm7954_vm13, %v522_v29, %v816_v23  ;;  %vm11188_vm1 = vcmask 195712   ;;  %vm11193_vm3 = vcmask 326912  }
  0x67   : > { %1977 = vrot.lane.b32.xlu0 %v6954_v58, %s7526_s28  ;;  %815 = vst.msk [vmem:[#allocation2 + $0x28] sm:$0xf] %vm11189_vm0, %v521_v41  ;;  %818 = vst [vmem:[#allocation2 + $0x2c] sm:$0x1] %v817_v42  ;;  %v537_v54 = vor.u32 %v535_v20, %v7989_v30  ;;  %v820_v60 = vsel %vm7941_vm11, %v529_v44, %v819_v38  ;;  %vm11195_vm5 = vcmask 458112   ;;  %vm2669_vm6 = vcmask 523712  }
  0x68   : > { %821 = vst [vmem:[#allocation2 + $0x30] sm:$0xf] %v820_v60  ;;  %vm11192_vm8 = vcmask 589312   ;;  %vm2944_vm9 = vcmask 654912  }
  0x6a   : > { %v7987_v27 = vld [vmem:[#allocation2 + $0xc] sm:$0xf] }
  0x6b   : > { %v6971_v32 = vrot.slane %v7987_v27, 9  ;;  %v1570_v33 = vshrl.u32 %v7987_v27, 16  ;;  %v1573_v35 = vshll.u32 %v7987_v27, 16  ;;  %v7997_v39 = vld [vmem:[#allocation2 + $0x10] sm:$0xf] }
  0x6c   : > { %v1380_v40 = vld [vmem:[#allocation2 + $0x14] sm:$0x1]  ;;  %v2070_v47 = vrot.slane %v7997_v39, 5  ;;  %v1381_v50 = vld [vmem:[#allocation2 + $0x18] sm:$0xf]  ;;  %v1579_v52 = vshll.u32 %v7997_v39, 16 }
  0x6d   : > { %v1589_v46 = vshll.u32 %v1380_v40, 16  ;;  %v2073_v48 = vrot.slane %v1380_v40, 5  ;;  %v1572_v49 = vrot.slane %v1570_v33, 4  ;;  %v1575_v51 = vrot.slane %v1573_v35, 5  ;;  %v1382_v57 = vld [vmem:[#allocation2 + $0x1c] sm:$0xf] }
  0x6e   : > { %v1583_v53 = vshrl.u32 %v7997_v39, 16  ;;  %v2071_v55 = vsel %vm7921_vm7, %v6971_v32, %v2070_v47  ;;  %v2072_v56 = vrot.slane %v2070_v47, 4  ;;  %v1383_v58 = vld [vmem:[#allocation2 + $0x20] sm:$0x1]  ;;  %v1594_v59 = vshrl.u32 %v1381_v50, 16 }
  0x6f   : > { %v1597_v61 = vshll.u32 %v1381_v50, 16  ;;  %v1603_v62 = vshll.u32 %v1382_v57, 16  ;;  %v1607_v63 = vshrl.u32 %v1382_v57, 16  ;;  %v1613_v2 = vshll.u32 %v1383_v58, 16  ;;  %v8018_v16 = vld [vmem:[#allocation2 + $0x24] sm:$0xf] }
  0x70   : > { %v2074_v3 = vsel %vm7921_vm7, %v2072_v56, %v2073_v48  ;;  %v1596_v4 = vrot.slane %v1594_v59, 4  ;;  %v1576_v5 = vor.u32 %v1575_v51, %v1572_v49  ;;  %v1581_v6 = vrot.slane %v1579_v52, 5  ;;  %v8022_v19 = vld [vmem:[#allocation2 + $0x28] sm:$0xf]  ;;  %v8024_v20 = vld [vmem:[#allocation2 + $0x2c] sm:$0x1] }
  0x71   : > { %v8016_v7 = vcombine.low %v2071_v55, %v2074_v3  ;;  %v1599_v8 = vrot.slane %v1597_v61, 5  ;;  %v1605_v9 = vrot.slane %v1603_v62, 5  ;;  %v1609_v10 = vrot.slane %v1607_v63, 4  ;;  %v8033_v44 = vld [vmem:[#allocation2 + $0x30] sm:$0xf] }
  0x72   : > { %v1615_v12 = vrot.slane %v1613_v2, 5  ;;  %v1577_v13 = vrot.slane %v1576_v5, 4  ;;  %v1585_v14 = vrot.slane %v1583_v53, 4  ;;  %v1591_v15 = vrot.slane %v1589_v46, 5  ;;  %v446_v50 = vld [vmem:[%s7919_s26 + $0x24] sm:$0xf] }
  0x73   : > { %2223 = vrot.lane.b32.xlu1 %v8016_v7, %s7525_s27  ;;  %v1600_v17 = vor.u32 %v1599_v8, %v1596_v4  ;;  %v1610_v18 = vor.u32 %v1609_v10, %v1605_v9  ;;  %v1618_v21 = vshrl.u32 %v8018_v16, 16  ;;  %v1621_v22 = vshll.u32 %v8018_v16, 16  ;;  %v823_v56 = vld [vmem:[#allocation2 + $0x38] sm:$0x1]  ;;  %v447_v63 = vld [vmem:[%s7919_s26 + $0x28] sm:$0xf] }
  0x74   : > { %v1582_v23 = vsel %vm7934_vm10, %v1577_v13, %v1581_v6  ;;  %v1586_v24 = vor.u32 %v1585_v14, %v1581_v6  ;;  %v1627_v28 = vshll.u32 %v8022_v19, 16  ;;  %v1631_v29 = vshrl.u32 %v8022_v19, 16  ;;  %v826_v5 = vld [vmem:[#allocation2 + $0x3c] sm:$0xf]  ;;  %v448_v6 = vld [vmem:[%s7919_s26 + $0x2c] sm:$0xf] }
  0x75   : > { %v1601_v32 = vrot.slane %v1600_v17, 4  ;;  %v1611_v33 = vrot.slane %v1610_v18, 4  ;;  %v1620_v35 = vrot.slane %v1618_v21, 4  ;;  %v1623_v37 = vrot.slane %v1621_v22, 5  ;;  %v830_v22 = vld [vmem:[#allocation2 + $0x44] sm:$0x1] }
  0x76   : > { %v1587_v38 = vrot.slane %v1586_v24, 4  ;;  %v1629_v40 = vrot.slane %v1627_v28, 5  ;;  %v1633_v41 = vrot.slane %v1631_v29, 4  ;;  %v1637_v42 = vshll.u32 %v8024_v20, 16  ;;  %v833_v28 = vld [vmem:[#allocation2 + $0x48] sm:$0xf] }
  0x77   : > { %v1606_v46 = vsel %vm7934_vm10, %v1601_v32, %v1605_v9  ;;  %v1616_v47 = vsel %vm7934_vm10, %v1611_v33, %v1615_v12  ;;  %v1624_v48 = vor.u32 %v1623_v37, %v1620_v35  ;;  %v538_v49 = vsel %vm7947_vm12, %v530_v45, %v537_v54  ;;  %v449_v12 = vld [vmem:[%s7919_s26 + $0x30] sm:$0xf] }
  0x78   : > { %v8042_v51 = vcombine.low %v1606_v46, %v1616_v47  ;;  %v1592_v52 = vsel %vm7934_vm10, %v1587_v38, %v1591_v15  ;;  %v1634_v53 = vor.u32 %v1633_v41, %v1629_v40  ;;  %v1639_v55 = vrot.slane %v1637_v42, 5  ;;  %822 = vst.msk [vmem:[#allocation2 + $0x34] sm:$0xf] %vm11189_vm0, %v538_v49  ;;  %v450_v41 = vld [vmem:[%s7919_s26 + $0x34] sm:$0xf] }
  0x79   : > { %v8047_v57 = vcombine.low %v1582_v23, %v1592_v52  ;;  %v1625_v58 = vrot.slane %v1624_v48, 4  ;;  %v539_v59 = vrot.slane %v7989_v30, 4  ;;  %v1642_v45 = vshrl.u32 %v8033_v44, 16  ;;  %v837_v49 = vld [vmem:[#allocation2 + $0x50] sm:$0x1] }
  0x7a   : > { %1981 = vrot.lane.b32.xlu1 %v8042_v51, %s7526_s28  ;;  %v1635_v54 = vrot.slane %v1634_v53, 4  ;;  %v1645_v60 = vshll.u32 %v8033_v44, 16  ;;  %v543_v61 = vrot.slane %v541_v26, 7  ;;  %v549_v62 = vshrl.u32 %v446_v50, 16 }
  0x7b   : > { %1979 = vrot.lane.b32.xlu0 %v8047_v57, %s7526_s28  ;;  %v1630_v30 = vsel %vm7934_vm10, %v1625_v58, %v1629_v40  ;;  %v824_v2 = vsel %vm7954_vm13, %v539_v59, %v823_v56  ;;  %v1644_v3 = vrot.slane %v1642_v45, 4  ;;  %v552_v4 = vshll.u32 %v446_v50, 16  ;;  %v451_v56 = vld [vmem:[%s7919_s26 + $0x38] sm:$0xf] }
  0x7c   : > { %v1640_v8 = vsel %vm7934_vm10, %v1635_v54, %v1639_v55  ;;  %825 = vst [vmem:[#allocation2 + $0x38] sm:$0x1] %v824_v2  ;;  %v1647_v26 = vrot.slane %v1645_v60, 5  ;;  %v546_v9 = vor.u32 %v544_v31, %v543_v61  ;;  %v547_v10 = vrot.slane %v543_v61, 4  ;;  %v840_v2 = vld [vmem:[#allocation2 + $0x54] sm:$0xf] }
  0x7d   : > { %v8069_v13 = vcombine.low %v1630_v30, %v1640_v8  ;;  %v551_v14 = vrot.slane %v549_v62, 7  ;;  %v558_v15 = vshrl.u32 %v447_v63, 16  ;;  %v561_v17 = vshll.u32 %v447_v63, 16  ;;  %v844_v8 = vld [vmem:[#allocation2 + $0x5c] sm:$0x1] }
  0x7e   : > { %v1648_v18 = vor.u32 %v1647_v26, %v1644_v3  ;;  %v827_v21 = vsel %vm7941_vm11, %v546_v9, %v826_v5  ;;  %v566_v23 = vshrl.u32 %v448_v6, 16  ;;  %v569_v24 = vshll.u32 %v448_v6, 16 }
  0x7f   : > { %11210 = vst [vmem:[#allocation7_spill] sm:$0xff] %v8069_v13  ;;  %1983 = vrot.lane.b32.xlu1 %v8069_v13, %s7526_s28  ;;  %v8075_v11 = vld [vmem:[#allocation2 + $0x34] sm:$0xf]  ;;  %v554_v31 = vor.u32 %v552_v4, %v551_v14  ;;  %v556_v29 = vrot.slane %v551_v14, 4  ;;  %828 = vst [vmem:[#allocation2 + $0x3c] sm:$0xf] %v827_v21 }
  0x80   : > { %v560_v32 = vrot.slane %v558_v15, 7  ;;  %v575_v33 = vshrl.u32 %v449_v12, 16  ;;  %v1649_v35 = vrot.slane %v1648_v18, 4  ;;  %v1651_v37 = vshll.u32 %v8075_v11, 16 }
  0x81   : > { %v1655_v38 = vshrl.u32 %v8075_v11, 16  ;;  %v568_v40 = vrot.slane %v566_v23, 7  ;;  %v555_v42 = vsel %vm7947_vm12, %v547_v10, %v554_v31  ;;  %v831_v46 = vsel %vm7954_vm13, %v556_v29, %v830_v22 }
  0x82   : > { %v563_v47 = vor.u32 %v561_v17, %v560_v32  ;;  %v564_v48 = vrot.slane %v560_v32, 4  ;;  %v1653_v50 = vrot.slane %v1651_v37, 5  ;;  %829 = vst.msk [vmem:[#allocation2 + $0x40] sm:$0xf] %vm11189_vm0, %v555_v42  ;;  %832 = vst [vmem:[#allocation2 + $0x44] sm:$0x1] %v831_v46 }
  0x83   : > { %v1657_v52 = vrot.slane %v1655_v38, 4  ;;  %v571_v53 = vor.u32 %v569_v24, %v568_v40  ;;  %v573_v55 = vrot.slane %v568_v40, 4  ;;  %v8086_v58 = vld [vmem:[#allocation2 + $0x38] sm:$0x1]  ;;  %v577_v45 = vrot.slane %v575_v33, 7 }
  0x84   : > { %v834_v59 = vsel %vm7941_vm11, %v563_v47, %v833_v28  ;;  %v578_v54 = vshll.u32 %v449_v12, 16  ;;  %v583_v60 = vshrl.u32 %v450_v41, 16  ;;  %v1654_v61 = vsel %vm7934_vm10, %v1649_v35, %v1653_v50  ;;  %v8107_v24 = vld [vmem:[%s7919_s26 + $0x3c] sm:$0xf] }
  0x85   : > { %v1658_v62 = vor.u32 %v1657_v52, %v1653_v50  ;;  %v1661_v63 = vshll.u32 %v8086_v58, 16  ;;  %v572_v30 = vsel %vm7947_vm12, %v564_v48, %v571_v53  ;;  %835 = vst [vmem:[#allocation2 + $0x48] sm:$0xf] %v834_v59  ;;  %v838_v3 = vsel %vm7954_vm13, %v573_v55, %v837_v49 }
  0x86   : > { %836 = vst.msk [vmem:[#allocation2 + $0x4c] sm:$0xf] %vm11189_vm0, %v572_v30  ;;  %v580_v4 = vor.u32 %v578_v54, %v577_v45  ;;  %v581_v5 = vrot.slane %v577_v45, 4  ;;  %v585_v6 = vrot.slane %v583_v60, 7  ;;  %v8098_v10 = vld [vmem:[#allocation2 + $0x3c] sm:$0xf] }
  0x87   : > { %v1659_v26 = vrot.slane %v1658_v62, 4  ;;  %v1663_v9 = vrot.slane %v1661_v63, 5  ;;  %839 = vst [vmem:[#allocation2 + $0x50] sm:$0x1] %v838_v3  ;;  %v586_v12 = vshll.u32 %v450_v41, 16  ;;  %v592_v14 = vshrl.u32 %v451_v56, 16 }
  0x88   : > { %v1666_v15 = vshrl.u32 %v8098_v10, 16  ;;  %v1669_v17 = vshll.u32 %v8098_v10, 16  ;;  %v590_v18 = vrot.slane %v585_v6, 4  ;;  %v841_v21 = vsel %vm7941_vm11, %v580_v4, %v840_v2 }
  0x89   : > { %v1664_v22 = vsel %vm7934_vm10, %v1659_v26, %v1663_v9  ;;  %v588_v23 = vor.u32 %v586_v12, %v585_v6  ;;  %842 = vst [vmem:[#allocation2 + $0x54] sm:$0xf] %v841_v21  ;;  %v8109_v28 = vrot.slane %v592_v14, 7  ;;  %v595_v31 = vshll.u32 %v451_v56, 16  ;;  %v8113_v32 = vld [vmem:[#allocation2 + $0x40] sm:$0xf] }
  0x8a   : > { %v8111_v29 = vcombine.low %v1654_v61, %v1664_v22  ;;  %v8115_v33 = vld [vmem:[#allocation2 + $0x44] sm:$0x1]  ;;  %v1668_v35 = vrot.slane %v1666_v15, 4  ;;  %v1671_v37 = vrot.slane %v1669_v17, 5  ;;  %v845_v38 = vsel %vm7954_vm13, %v590_v18, %v844_v8 }
  0x8b   : > { %v1675_v40 = vshll.u32 %v8113_v32, 16  ;;  %v1679_v41 = vshrl.u32 %v8113_v32, 16  ;;  %v1685_v42 = vshll.u32 %v8115_v33, 16  ;;  %v589_v46 = vsel %vm7947_vm12, %v581_v5, %v588_v23  ;;  %846 = vst [vmem:[#allocation2 + $0x5c] sm:$0x1] %v845_v38 }
  0x8c   : > { %11211 = vst [vmem:[#allocation8_spill] sm:$0xff] %v8111_v29  ;;  %1985 = vrot.lane.b32.xlu0 %v8111_v29, %s7526_s28  ;;  %v1672_v47 = vor.u32 %v1671_v37, %v1668_v35  ;;  %v8126_v48 = vld [vmem:[#allocation2 + $0x48] sm:$0xf]  ;;  %843 = vst.msk [vmem:[#allocation2 + $0x58] sm:$0xf] %vm11189_vm0, %v589_v46  ;;  %v597_v49 = vor.u32 %v595_v31, %v8109_v28  ;;  %v598_v50 = vrot.slane %v8109_v28, 4 }
  0x8d   : > { %v600_v52 = vshrl.u32 %v8107_v24, 16  ;;  %v1677_v53 = vrot.slane %v1675_v40, 5  ;;  %v1681_v55 = vrot.slane %v1679_v41, 4  ;;  %v1687_v56 = vrot.slane %v1685_v42, 5  ;;  %v8132_v59 = vld [vmem:[#allocation2 + $0x4c] sm:$0xf] }
  0x8e   : > { %v1690_v45 = vshrl.u32 %v8126_v48, 16  ;;  %v1673_v54 = vrot.slane %v1672_v47, 4  ;;  %v8135_v60 = vld [vmem:[#allocation2 + $0x50] sm:$0x1]  ;;  %v1693_v61 = vshll.u32 %v8126_v48, 16  ;;  %v1699_v62 = vshll.u32 %v8132_v59, 16 }
  0x8f   : > { %v1703_v63 = vshrl.u32 %v8132_v59, 16  ;;  %v1682_v30 = vor.u32 %v1681_v55, %v1677_v53  ;;  %v1709_v3 = vshll.u32 %v8135_v60, 16  ;;  %v602_v4 = vrot.slane %v600_v52, 7  ;;  %v847_v31 = vld [vmem:[#allocation2 + $0x60] sm:$0xf] }
  0x90   : > { %v1692_v2 = vrot.slane %v1690_v45, 4  ;;  %v1678_v5 = vsel %vm7934_vm10, %v1673_v54, %v1677_v53  ;;  %v1695_v6 = vrot.slane %v1693_v61, 5  ;;  %v1701_v8 = vrot.slane %v1699_v62, 5  ;;  %v8143_v9 = vld [vmem:[#allocation2 + $0x54] sm:$0xf] }
  0x91   : > { %v1705_v26 = vrot.slane %v1703_v63, 4  ;;  %v1683_v12 = vrot.slane %v1682_v30, 4  ;;  %v1711_v14 = vrot.slane %v1709_v3, 5  ;;  %v1714_v15 = vshrl.u32 %v8143_v9, 16  ;;  %v851_v52 = vld [vmem:[#allocation2 + $0x68] sm:$0x1] }
  0x92   : > { %v1717_v17 = vshll.u32 %v8143_v9, 16  ;;  %v1696_v18 = vor.u32 %v1695_v6, %v1692_v2  ;;  %v8147_v22 = vld [vmem:[#allocation2 + $0x5c] sm:$0x1]  ;;  %v603_v23 = vshll.u32 %v8107_v24, 16  ;;  %v607_v28 = vrot.slane %v602_v4, 4 }
  0x93   : > { %v1706_v21 = vor.u32 %v1705_v26, %v1701_v8  ;;  %v1688_v35 = vsel %vm7934_vm10, %v1683_v12, %v1687_v56  ;;  %v8152_v37 = vld [vmem:[#allocation2 + $0x58] sm:$0xf]  ;;  %v1716_v38 = vrot.slane %v1714_v15, 4  ;;  %v1733_v41 = vshll.u32 %v8147_v22, 16  ;;  %v453_v54 = vld [vmem:[%s7919_s26 + $0x40] sm:$0xf] }
  0x94   : > { %v1719_v40 = vrot.slane %v1717_v17, 5  ;;  %v8155_v42 = vcombine.low %v1678_v5, %v1688_v35  ;;  %v1697_v46 = vrot.slane %v1696_v18, 4  ;;  %v1723_v24 = vshll.u32 %v8152_v37, 16  ;;  %v454_v61 = vld [vmem:[%s7919_s26 + $0x44] sm:$0xf] }
  0x95   : > { %v1707_v47 = vrot.slane %v1706_v21, 4  ;;  %v1727_v55 = vshrl.u32 %v8152_v37, 16  ;;  %v1735_v45 = vrot.slane %v1733_v41, 5  ;;  %v605_v56 = vor.u32 %v603_v23, %v602_v4  ;;  %v455_v3 = vld [vmem:[%s7919_s26 + $0x48] sm:$0xf] }
  0x96   : > { %11212 = vst [vmem:[#allocation9_spill] sm:$0xff] %v8155_v42  ;;  %v1720_v53 = vor.u32 %v1719_v40, %v1716_v38  ;;  %1987 = vrot.lane.b32.xlu1 %v8155_v42, %s7526_s28  ;;  %v1702_v62 = vsel %vm7934_vm10, %v1697_v46, %v1701_v8  ;;  %v1725_v30 = vrot.slane %v1723_v24, 5  ;;  %v848_v2 = vsel %vm7941_vm11, %v597_v49, %v847_v31  ;;  %v456_v12 = vld [vmem:[%s7919_s26 + $0x4c] sm:$0xf]  ;;  %v8176_v15 = vld [vmem:[%s7919_s26 + $0x50] sm:$0xf] }
  0x97   : > { %v1712_v63 = vsel %vm7934_vm10, %v1707_v47, %v1711_v14  ;;  %v1729_v4 = vrot.slane %v1727_v55, 4  ;;  %v606_v26 = vsel %vm7947_vm12, %v598_v50, %v605_v56  ;;  %849 = vst [vmem:[#allocation2 + $0x60] sm:$0xf] %v848_v2  ;;  %v852_v8 = vsel %vm7954_vm13, %v607_v28, %v851_v52  ;;  %v854_v23 = vld [vmem:[#allocation2 + $0x6c] sm:$0xf] }
  0x98   : > { %v8170_v5 = vcombine.low %v1702_v62, %v1712_v63  ;;  %v1721_v6 = vrot.slane %v1720_v53, 4  ;;  %850 = vst.msk [vmem:[#allocation2 + $0x64] sm:$0xf] %vm11189_vm0, %v606_v26  ;;  %v609_v14 = vshrl.u32 %v453_v54, 16  ;;  %v612_v17 = vshll.u32 %v453_v54, 16 }
  0x99   : > { %v617_v49 = vshrl.u32 %v454_v61, 16  ;;  %v1730_v21 = vor.u32 %v1729_v4, %v1725_v30  ;;  %853 = vst [vmem:[#allocation2 + $0x68] sm:$0x1] %v852_v8  ;;  %v620_v50 = vshll.u32 %v454_v61, 16  ;;  %v626_v31 = vshrl.u32 %v455_v3, 16 }
  0x9a   : > { %11213 = vst [vmem:[#allocation10_spill] sm:$0xff] %v8170_v5  ;;  %1989 = vrot.lane.b32.xlu0 %v8170_v5, %s7526_s28  ;;  %v1726_v18 = vsel %vm7934_vm10, %v1721_v6, %v1725_v30  ;;  %v611_v35 = vrot.slane %v609_v14, 7  ;;  %v858_v40 = vld [vmem:[#allocation2 + $0x74] sm:$0x1]  ;;  %v629_v41 = vshll.u32 %v455_v3, 16  ;;  %v634_v46 = vshrl.u32 %v456_v12, 16 }
  0x9b   : > { %v619_v38 = vrot.slane %v617_v49, 7  ;;  %v1731_v28 = vrot.slane %v1730_v21, 4  ;;  %v628_v47 = vrot.slane %v626_v31, 7  ;;  %v637_v24 = vshll.u32 %v456_v12, 16  ;;  %v861_v52 = vld [vmem:[#allocation2 + $0x78] sm:$0xf] }
  0x9c   : > { %v643_v53 = vshrl.u32 %v8176_v15, 16  ;;  %v614_v55 = vor.u32 %v612_v17, %v611_v35  ;;  %v615_v56 = vrot.slane %v611_v35, 4  ;;  %v636_v2 = vrot.slane %v634_v46, 7  ;;  %v865_v6 = vld [vmem:[#allocation2 + $0x80] sm:$0x1] }
  0x9d   : > { %v622_v54 = vor.u32 %v620_v50, %v619_v38  ;;  %v624_v62 = vrot.slane %v619_v38, 4  ;;  %v1736_v61 = vsel %vm7934_vm10, %v1731_v28, %v1735_v45  ;;  %v631_v63 = vor.u32 %v629_v41, %v628_v47  ;;  %v8199_v14 = vld [vmem:[%s7919_s26 + $0x54] sm:$0xf] }
  0x9e   : > { %v632_v30 = vrot.slane %v628_v47, 4  ;;  %v8188_v3 = vcombine.low %v1726_v18, %v1736_v61  ;;  %v8190_v4 = vld [vmem:[#allocation2 + $0x60] sm:$0xf]  ;;  %v855_v12 = vsel %vm7941_vm11, %v614_v55, %v854_v23  ;;  %v639_v18 = vor.u32 %v637_v24, %v636_v2  ;;  %v8228_v61 = vld [vmem:[%s7919_s26 + $0x5c] sm:$0xf] }
  0x9f   : > { %v623_v26 = vsel %vm7947_vm12, %v615_v56, %v622_v54  ;;  %v859_v8 = vsel %vm7954_vm13, %v624_v62, %v858_v40  ;;  %v8201_v45 = vld [vmem:[#allocation2 + $0x64] sm:$0xf]  ;;  %v1738_v17 = vshrl.u32 %v8190_v4, 16  ;;  %v1741_v49 = vshll.u32 %v8190_v4, 16  ;;  %856 = vst [vmem:[#allocation2 + $0x6c] sm:$0xf] %v855_v12 }
  0xa0   : > { %11214 = vst [vmem:[#allocation11_spill] sm:$0xff] %v8188_v3  ;;  %857 = vst.msk [vmem:[#allocation2 + $0x70] sm:$0xf] %vm11189_vm0, %v623_v26  ;;  %v641_v21 = vrot.slane %v636_v2, 4  ;;  %1991 = vrot.lane.b32.xlu1 %v8188_v3, %s7526_s28  ;;  %v8208_v50 = vld [vmem:[#allocation2 + $0x68] sm:$0x1]  ;;  %v862_v35 = vsel %vm7941_vm11, %v631_v63, %v861_v52  ;;  %v640_v28 = vsel %vm7947_vm12, %v632_v30, %v639_v18 }
  0xa1   : > { %860 = vst [vmem:[#allocation2 + $0x74] sm:$0x1] %v859_v8  ;;  %v1747_v23 = vshll.u32 %v8201_v45, 16  ;;  %v1751_v31 = vshrl.u32 %v8201_v45, 16  ;;  %v8214_v38 = vrot.slane %v643_v53, 7  ;;  %v1740_v40 = vrot.slane %v1738_v17, 4 }
  0xa2   : > { %v1743_v41 = vrot.slane %v1741_v49, 5  ;;  %v1757_v46 = vshll.u32 %v8208_v50, 16  ;;  %863 = vst [vmem:[#allocation2 + $0x78] sm:$0xf] %v862_v35  ;;  %864 = vst.msk [vmem:[#allocation2 + $0x7c] sm:$0xf] %vm11189_vm0, %v640_v28  ;;  %v866_v55 = vsel %vm7954_vm13, %v641_v21, %v865_v6 }
  0xa3   : > { %v1749_v47 = vrot.slane %v1747_v23, 5  ;;  %v1753_v24 = vrot.slane %v1751_v31, 4  ;;  %v646_v52 = vshll.u32 %v8176_v15, 16  ;;  %v8224_v53 = vld [vmem:[%s7919_s26 + $0x58] sm:$0xf]  ;;  %v651_v54 = vshrl.u32 %v8199_v14, 16 }
  0xa4   : > { %v1744_v56 = vor.u32 %v1743_v41, %v1740_v40  ;;  %867 = vst [vmem:[#allocation2 + $0x80] sm:$0x1] %v866_v55  ;;  %v868_v62 = vld [vmem:[#allocation2 + $0x84] sm:$0xf]  ;;  %v1759_v30 = vrot.slane %v1757_v46, 5  ;;  %v649_v26 = vrot.slane %v8214_v38, 4  ;;  %v8243_v31 = vcombine.low %v7987_v27, %v7997_v39 }
  0xa5   : > { %v1754_v63 = vor.u32 %v1753_v24, %v1749_v47  ;;  %v648_v2 = vor.u32 %v646_v52, %v8214_v38  ;;  %v653_v8 = vrot.slane %v651_v54, 7  ;;  %v654_v6 = vshll.u32 %v8199_v14, 16 }
  0xa6   : > { %v1745_v12 = vrot.slane %v1744_v56, 4  ;;  %v660_v15 = vshrl.u32 %v8224_v53, 16  ;;  %v8234_v49 = vld [vmem:[#allocation2 + $0x6c] sm:$0xf]  ;;  %v663_v23 = vshll.u32 %v8224_v53, 16  ;;  %v668_v27 = vshrl.u32 %v8228_v61, 16 }
  0xa7   : > { %v1755_v17 = vrot.slane %v1754_v63, 4  ;;  %v8236_v18 = vld [vmem:[#allocation2 + $0x70] sm:$0xf]  ;;  %v869_v21 = vsel %vm7941_vm11, %v648_v2, %v868_v62  ;;  %v1762_v38 = vshrl.u32 %v8234_v49, 16  ;;  %v1765_v40 = vshll.u32 %v8234_v49, 16  ;;  %1527 = vst.msk [vmem:[#allocation4 + $0x10] sm:$0xff] %vm11191_vm14, %v8243_v31 }
  0xa8   : > { %v1750_v35 = vsel %vm7934_vm10, %v1745_v12, %v1749_v47  ;;  %v1404_v14 = vld [vmem:[#allocation2 + $0x74] sm:$0x1]  ;;  %v1771_v41 = vshll.u32 %v8236_v18, 16  ;;  %870 = vst [vmem:[#allocation2 + $0x84] sm:$0xf] %v869_v21  ;;  %v1775_v28 = vshrl.u32 %v8236_v18, 16  ;;  %v656_v29 = vor.u32 %v654_v6, %v653_v8 }
  0xa9   : > { %v1760_v46 = vsel %vm7934_vm10, %v1755_v17, %v1759_v30  ;;  %v1781_v24 = vshll.u32 %v1404_v14, 16  ;;  %v8253_v55 = vld [vmem:[#allocation2 + $0x78] sm:$0xf]  ;;  %v1764_v47 = vrot.slane %v1762_v38, 4  ;;  %v1767_v52 = vrot.slane %v1765_v40, 5 }
  0xaa   : > { %v8256_v39 = vcombine.low %v1750_v35, %v1760_v46  ;;  %v1773_v53 = vrot.slane %v1771_v41, 5  ;;  %v8258_v56 = vld [vmem:[#allocation2 + $0x7c] sm:$0xf]  ;;  %v1777_v54 = vrot.slane %v1775_v28, 4  ;;  %v1786_v63 = vshrl.u32 %v8253_v55, 16 }
  0xab   : > { %v1407_v62 = vld [vmem:[#allocation2 + $0x80] sm:$0x1]  ;;  %v1789_v30 = vshll.u32 %v8253_v55, 16  ;;  %v8262_v2 = vrot.slane %v660_v15, 7  ;;  %v1768_v12 = vor.u32 %v1767_v52, %v1764_v47  ;;  %v1795_v17 = vshll.u32 %v8258_v56, 16 }
  0xac   : > { %11215 = vst [vmem:[#allocation12_spill] sm:$0xff] %v8256_v39  ;;  %1993 = vrot.lane.b32.xlu0 %v8256_v39, %s7526_s28  ;;  %v1799_v21 = vshrl.u32 %v8258_v56, 16  ;;  %v1805_v35 = vshll.u32 %v1407_v62, 16  ;;  %v872_v14 = vld [vmem:[#allocation2 + $0x8c] sm:$0x1]  ;;  %v1778_v38 = vor.u32 %v1777_v54, %v1773_v53  ;;  %v1783_v40 = vrot.slane %v1781_v24, 5 }
  0xad   : > { %v1788_v41 = vrot.slane %v1786_v63, 4  ;;  %v1791_v46 = vrot.slane %v1789_v30, 5  ;;  %v1769_v28 = vrot.slane %v1768_v12, 4  ;;  %v1797_v0 = vrot.slane %v1795_v17, 5  ;;  %v461_v6 = vld [vmem:[%s7919_s26 + $0x60] sm:$0xf] }
  0xae   : > { %v1801_v3 = vrot.slane %v1799_v21, 4  ;;  %v1807_v15 = vrot.slane %v1805_v35, 5  ;;  %v1779_v5 = vrot.slane %v1778_v38, 4  ;;  %v658_v39 = vrot.slane %v653_v8, 4  ;;  %v875_v35 = vld [vmem:[#allocation2 + $0x90] sm:$0xf] }
  0xaf   : > { %v1792_v42 = vor.u32 %v1791_v46, %v1788_v41  ;;  %v8268_v47 = vld [vmem:[#allocation2 + $0x84] sm:$0xf]  ;;  %v1774_v52 = vsel %vm7934_vm10, %v1769_v28, %v1773_v53  ;;  %v657_v12 = vsel %vm7947_vm12, %v649_v26, %v656_v29  ;;  %v670_v29 = vrot.slane %v668_v27, 7  ;;  %v879_v26 = vld [vmem:[#allocation2 + $0x98] sm:$0x1] }
  0xb0   : > { %v1802_v62 = vor.u32 %v1801_v3, %v1797_v0  ;;  %v1810_v54 = vshrl.u32 %v8268_v47, 16  ;;  %v1813_v24 = vshll.u32 %v8268_v47, 16  ;;  %v1784_v63 = vsel %vm7934_vm10, %v1779_v5, %v1783_v40  ;;  %871 = vst.msk [vmem:[#allocation2 + $0x88] sm:$0xf] %vm11189_vm0, %v657_v12  ;;  %v462_v38 = vld [vmem:[%s7919_s26 + $0x64] sm:$0xf] }
  0xb1   : > { %v1793_v30 = vrot.slane %v1792_v42, 4  ;;  %v873_v8 = vsel %vm7954_vm13, %v658_v39, %v872_v14  ;;  %v8281_v17 = vcombine.low %v1774_v52, %v1784_v63  ;;  %v665_v5 = vor.u32 %v663_v23, %v8262_v2  ;;  %v463_v46 = vld [vmem:[%s7919_s26 + $0x68] sm:$0xf]  ;;  %v464_v63 = vld [vmem:[%s7919_s26 + $0x6c] sm:$0xf] }
  0xb2   : > { %v1803_v53 = vrot.slane %v1802_v62, 4  ;;  %874 = vst [vmem:[#allocation2 + $0x8c] sm:$0x1] %v873_v8  ;;  %v1812_v3 = vrot.slane %v1810_v54, 4  ;;  %v1815_v21 = vrot.slane %v1813_v24, 5  ;;  %v666_v14 = vrot.slane %v8262_v2, 4 }
  0xb3   : > { %11216 = vst [vmem:[#allocation13_spill] sm:$0xff] %v8281_v17  ;;  %v1798_v42 = vsel %vm7934_vm10, %v1793_v30, %v1797_v0  ;;  %1995 = vrot.lane.b32.xlu1 %v8281_v17, %s7526_s28  ;;  %v671_v40 = vshll.u32 %v8228_v61, 16  ;;  %v677_v41 = vshrl.u32 %v461_v6, 16  ;;  %v675_v0 = vrot.slane %v670_v29, 4 }
  0xb4   : > { %v1808_v39 = vsel %vm7934_vm10, %v1803_v53, %v1807_v15  ;;  %v876_v23 = vsel %vm7941_vm11, %v665_v5, %v875_v35  ;;  %v680_v27 = vshll.u32 %v461_v6, 16  ;;  %v1816_v52 = vor.u32 %v1815_v21, %v1812_v3  ;;  %v882_v3 = vld [vmem:[#allocation2 + $0x9c] sm:$0xf] }
  0xb5   : > { %v8295_v28 = vcombine.low %v1798_v42, %v1808_v39  ;;  %v673_v62 = vor.u32 %v671_v40, %v670_v29  ;;  %877 = vst [vmem:[#allocation2 + $0x90] sm:$0xf] %v876_v23  ;;  %v679_v54 = vrot.slane %v677_v41, 7  ;;  %v685_v24 = vshrl.u32 %v462_v38, 16  ;;  %v886_v40 = vld [vmem:[#allocation2 + $0xa4] sm:$0x1] }
  0xb6   : > { %v880_v61 = vsel %vm7954_vm13, %v675_v0, %v879_v26  ;;  %v688_v2 = vshll.u32 %v462_v38, 16  ;;  %v694_v15 = vshrl.u32 %v463_v46, 16  ;;  %v697_v30 = vshll.u32 %v463_v46, 16 }
  0xb7   : > { %11217 = vst [vmem:[#allocation14_spill] sm:$0xff] %v8295_v28  ;;  %1997 = vrot.lane.b32.xlu0 %v8295_v28, %s7526_s28  ;;  %v674_v12 = vsel %vm7947_vm12, %v666_v14, %v673_v62  ;;  %881 = vst [vmem:[#allocation2 + $0x98] sm:$0x1] %v880_v61  ;;  %v682_v8 = vor.u32 %v680_v27, %v679_v54  ;;  %v683_v6 = vrot.slane %v679_v54, 4  ;;  %v687_v53 = vrot.slane %v685_v24, 7 }
  0xb8   : > { %v8306_v21 = vld [vmem:[#allocation2 + $0x88] sm:$0xf]  ;;  %878 = vst.msk [vmem:[#allocation2 + $0x94] sm:$0xf] %vm11189_vm0, %v674_v12  ;;  %v696_v42 = vrot.slane %v694_v15, 7  ;;  %v702_v5 = vshrl.u32 %v464_v63, 16 }
  0xb9   : > { %v1410_v35 = vld [vmem:[#allocation2 + $0x8c] sm:$0x1]  ;;  %v1817_v29 = vrot.slane %v1816_v52, 4  ;;  %v1819_v26 = vshll.u32 %v8306_v21, 16  ;;  %v1823_v38 = vshrl.u32 %v8306_v21, 16  ;;  %v690_v14 = vor.u32 %v688_v2, %v687_v53 }
  0xba   : > { %v1829_v39 = vshll.u32 %v1410_v35, 16  ;;  %v692_v41 = vrot.slane %v687_v53, 4  ;;  %v883_v46 = vsel %vm7941_vm11, %v682_v8, %v882_v3  ;;  %v699_v0 = vor.u32 %v697_v30, %v696_v42  ;;  %v889_v54 = vld [vmem:[#allocation2 + $0xa8] sm:$0xf]  ;;  %v465_v3 = vld [vmem:[%s7919_s26 + $0x70] sm:$0xf] }
  0xbb   : > { %v1821_v23 = vrot.slane %v1819_v26, 5  ;;  %v1825_v27 = vrot.slane %v1823_v38, 4  ;;  %884 = vst [vmem:[#allocation2 + $0x9c] sm:$0xf] %v883_v46  ;;  %v700_v62 = vrot.slane %v696_v42, 4  ;;  %v691_v52 = vsel %vm7947_vm12, %v683_v6, %v690_v14 }
  0xbc   : > { %v8313_v24 = vld [vmem:[#allocation2 + $0x90] sm:$0xf]  ;;  %v887_v61 = vsel %vm7954_vm13, %v692_v41, %v886_v40  ;;  %v704_v2 = vrot.slane %v702_v5, 7  ;;  %v705_v15 = vshll.u32 %v464_v63, 16  ;;  %v1831_v53 = vrot.slane %v1829_v39, 5 }
  0xbd   : > { %v1826_v12 = vor.u32 %v1825_v27, %v1821_v23  ;;  %v1834_v30 = vshrl.u32 %v8313_v24, 16  ;;  %v1837_v8 = vshll.u32 %v8313_v24, 16  ;;  %885 = vst.msk [vmem:[#allocation2 + $0xa0] sm:$0xf] %vm11189_vm0, %v691_v52  ;;  %888 = vst [vmem:[#allocation2 + $0xa4] sm:$0x1] %v887_v61  ;;  %v1822_v35 = vsel %vm7934_vm10, %v1817_v29, %v1821_v23 }
  0xbe   : > { %v1413_v42 = vld [vmem:[#allocation2 + $0x98] sm:$0x1]  ;;  %v707_v6 = vor.u32 %v705_v15, %v704_v2  ;;  %v709_v26 = vrot.slane %v704_v2, 4  ;;  %v890_v5 = vsel %vm7941_vm11, %v699_v0, %v889_v54  ;;  %v893_v63 = vld [vmem:[#allocation2 + $0xb0] sm:$0x1]  ;;  %v711_v23 = vshrl.u32 %v465_v3, 16 }
  0xbf   : > { %v1827_v38 = vrot.slane %v1826_v12, 4  ;;  %v8327_v39 = vld [vmem:[#allocation2 + $0x94] sm:$0xf]  ;;  %v1836_v40 = vrot.slane %v1834_v30, 4  ;;  %v1839_v14 = vrot.slane %v1837_v8, 5  ;;  %v1853_v41 = vshll.u32 %v1413_v42, 16 }
  0xc0   : > { %891 = vst [vmem:[#allocation2 + $0xa8] sm:$0xf] %v890_v5  ;;  %v1843_v46 = vshll.u32 %v8327_v39, 16  ;;  %v1847_v27 = vshrl.u32 %v8327_v39, 16  ;;  %v708_v29 = vsel %vm7947_vm12, %v700_v62, %v707_v6  ;;  %v894_v52 = vsel %vm7954_vm13, %v709_v26, %v893_v63  ;;  %v8343_v30 = vld [vmem:[%s7919_s26 + $0x74] sm:$0xf] }
  0xc1   : > { %v1832_v0 = vsel %vm7934_vm10, %v1827_v38, %v1831_v53  ;;  %v1840_v54 = vor.u32 %v1839_v14, %v1836_v40  ;;  %892 = vst.msk [vmem:[#allocation2 + $0xac] sm:$0xf] %vm11189_vm0, %v708_v29  ;;  %895 = vst [vmem:[#allocation2 + $0xb0] sm:$0x1] %v894_v52  ;;  %v1855_v8 = vrot.slane %v1853_v41, 5  ;;  %v8351_v5 = vrot.slane %v711_v23, 7 }
  0xc2   : > { %v8338_v61 = vcombine.low %v1822_v35, %v1832_v0  ;;  %v1845_v2 = vrot.slane %v1843_v46, 5  ;;  %v1849_v15 = vrot.slane %v1847_v27, 4  ;;  %v8340_v12 = vld [vmem:[#allocation2 + $0x9c] sm:$0xf]  ;;  %v714_v63 = vshll.u32 %v465_v3, 16 }
  0xc3   : > { %11219 = vst [vmem:[#allocation16_spill] sm:$0xff] %v8340_v12  ;;  %v1841_v62 = vrot.slane %v1840_v54, 4  ;;  %v1858_v42 = vshrl.u32 %v8340_v12, 16  ;;  %v1861_v53 = vshll.u32 %v8340_v12, 16  ;;  %v719_v41 = vshrl.u32 %v8343_v30, 16 }
  0xc4   : > { %11218 = vst [vmem:[#allocation15_spill] sm:$0xff] %v8338_v61  ;;  %1999 = vrot.lane.b32.xlu1 %v8338_v61, %s7526_s28  ;;  %v1850_v6 = vor.u32 %v1849_v15, %v1845_v2  ;;  %v8349_v26 = vld [vmem:[#allocation2 + $0xa0] sm:$0xf]  ;;  %v1416_v35 = vld [vmem:[#allocation2 + $0xa4] sm:$0x1] }
  0xc5   : > { %v1860_v38 = vrot.slane %v1858_v42, 4  ;;  %v1863_v40 = vrot.slane %v1861_v53, 5  ;;  %v1867_v14 = vshll.u32 %v8349_v26, 16  ;;  %v1846_v46 = vsel %vm7934_vm10, %v1841_v62, %v1845_v2  ;;  %v896_v12 = vld [vmem:[#allocation2 + $0xb4] sm:$0xf] }
  0xc6   : > { %v1851_v27 = vrot.slane %v1850_v6, 4  ;;  %v1871_v29 = vshrl.u32 %v8349_v26, 16  ;;  %v1877_v0 = vshll.u32 %v1416_v35, 16  ;;  %v716_v2 = vor.u32 %v714_v63, %v8351_v5 }
  0xc7   : > { %v8358_v54 = vld [vmem:[#allocation2 + $0xa8] sm:$0xf]  ;;  %v1864_v52 = vor.u32 %v1863_v40, %v1860_v38  ;;  %v1869_v15 = vrot.slane %v1867_v14, 5 }
  0xc8   : > { %11220 = vst [vmem:[#allocation17_spill] sm:$0xff] %v8358_v54  ;;  %v1882_v23 = vshrl.u32 %v8358_v54, 16  ;;  %v1885_v3 = vshll.u32 %v8358_v54, 16  ;;  %v1856_v42 = vsel %vm7934_vm10, %v1851_v27, %v1855_v8  ;;  %v1873_v53 = vrot.slane %v1871_v29, 4  ;;  %v8364_v28 = vld [vmem:[#allocation2 + $0xac] sm:$0xf] }
  0xc9   : > { %v1879_v61 = vrot.slane %v1877_v0, 5  ;;  %11221 = vst [vmem:[#allocation18_spill] sm:$0xff] %v8364_v28  ;;  %v8367_v62 = vcombine.low %v1846_v46, %v1856_v42  ;;  %v1865_v6 = vrot.slane %v1864_v52, 4  ;;  %v1419_v35 = vld [vmem:[#allocation2 + $0xb0] sm:$0x1]  ;;  %v1891_v14 = vshll.u32 %v8364_v28, 16 }
  0xca   : > { %v1884_v17 = vrot.slane %v1882_v23, 4  ;;  %v1887_v38 = vrot.slane %v1885_v3, 5  ;;  %v1874_v40 = vor.u32 %v1873_v53, %v1869_v15  ;;  %v1895_v13 = vshrl.u32 %v8364_v28, 16  ;;  %v900_v3 = vld [vmem:[#allocation2 + $0xbc] sm:$0x1] }
  0xcb   : > { %11222 = vst [vmem:[#allocation19_spill] sm:$0xff] %v8367_v62  ;;  %v1901_v54 = vshll.u32 %v1419_v35, 16  ;;  %2001 = vrot.lane.b32.xlu0 %v8367_v62, %s7526_s28  ;;  %v1870_v8 = vsel %vm7934_vm10, %v1865_v6, %v1869_v15  ;;  %v717_v46 = vrot.slane %v8351_v5, 4  ;;  %v721_v27 = vrot.slane %v719_v41, 7  ;;  %v7479_v41 = vld [vmem:[#allocation2 + $0x1c] sm:$0xf] }
  0xcc   : > { %v1888_v63 = vor.u32 %v1887_v38, %v1884_v17  ;;  %v1875_v29 = vrot.slane %v1874_v40, 4  ;;  %v1893_v0 = vrot.slane %v1891_v14, 5  ;;  %v1897_v52 = vrot.slane %v1895_v13, 4  ;;  %v7478_v17 = vld [vmem:[#allocation2 + $0x18] sm:$0xf] }
  0xcd   : > { %v1903_v23 = vrot.slane %v1901_v54, 5  ;;  %v722_v53 = vshll.u32 %v8343_v30, 16  ;;  %v726_v35 = vrot.slane %v721_v27, 4  ;;  %v897_v28 = vsel %vm7941_vm11, %v716_v2, %v896_v12 }
  0xce   : > { %v1889_v42 = vrot.slane %v1888_v63, 4  ;;  %v1880_v62 = vsel %vm7934_vm10, %v1875_v29, %v1879_v61  ;;  %v1898_v15 = vor.u32 %v1897_v52, %v1893_v0  ;;  %898 = vst [vmem:[#allocation2 + $0xb4] sm:$0xf] %v897_v28  ;;  %v6972_v5 = vrot.slane %v7478_v17, 9  ;;  %v7480_v28 = vld [vmem:[#allocation2 + $0x20] sm:$0x1] }
  0xcf   : > { %v2077_v6 = vrot.slane %v7479_v41, 5  ;;  %v8381_v38 = vcombine.low %v1870_v8, %v1880_v62  ;;  %v724_v54 = vor.u32 %v722_v53, %v721_v27  ;;  %v901_v30 = vsel %vm7954_vm13, %v726_v35, %v900_v3 }
  0xd0   : > { %v1894_v13 = vsel %vm7934_vm10, %v1889_v42, %v1893_v0  ;;  %v1899_v40 = vrot.slane %v1898_v15, 4  ;;  %902 = vst [vmem:[#allocation2 + $0xbc] sm:$0x1] %v901_v30  ;;  %v2080_v2 = vrot.slane %v7480_v28, 5  ;;  %v6973_v14 = vrot.slane %v8018_v16, 9 }
  0xd1   : > { %v2078_v61 = vsel %vm7921_vm7, %v6972_v5, %v2077_v6  ;;  %v2079_v12 = vrot.slane %v2077_v6, 4  ;;  %2003 = vrot.lane.b32.xlu1 %v8381_v38, %s7526_s28  ;;  %v725_v62 = vsel %vm7947_vm12, %v717_v46, %v724_v54  ;;  %v2084_v8 = vrot.slane %v8022_v19, 5 }
  0xd2   : > { %v2087_v63 = vrot.slane %v8024_v20, 5  ;;  %v1904_v27 = vsel %vm7934_vm10, %v1899_v40, %v1903_v23  ;;  %899 = vst.msk [vmem:[#allocation2 + $0xb8] sm:$0xf] %vm11189_vm0, %v725_v62  ;;  %v6974_v0 = vrot.slane %v8033_v44, 9  ;;  %v2091_v52 = vrot.slane %v8075_v11, 5 }
  0xd3   : > { %v2081_v29 = vsel %vm7921_vm7, %v2079_v12, %v2080_v2  ;;  %v8403_v3 = vcombine.low %v1894_v13, %v1904_v27  ;;  %v2086_v16 = vrot.slane %v2084_v8, 4  ;;  %v8407_v19 = vcombine.low %v7478_v17, %v7479_v41 }
  0xd4   : > { %v8405_v46 = vcombine.low %v2078_v61, %v2081_v29  ;;  %v2085_v20 = vsel %vm7921_vm7, %v6973_v14, %v2084_v8  ;;  %v2092_v23 = vsel %vm7921_vm7, %v6974_v0, %v2091_v52  ;;  %v2093_v42 = vrot.slane %v2091_v52, 4  ;;  %v7482_v61 = vld [vmem:[#allocation2 + $0x28] sm:$0xf] }
  0xd5   : > { %11223 = vst [vmem:[#allocation20_spill] sm:$0xff] %v8403_v3  ;;  %v2094_v53 = vrot.slane %v8086_v58, 5  ;;  %2005 = vrot.lane.b32.xlu0 %v8403_v3, %s7526_s28  ;;  %v8416_v44 = vld [vmem:[#allocation2 + $0xb4] sm:$0xf]  ;;  %v2088_v11 = vsel %vm7921_vm7, %v2086_v16, %v2087_v63  ;;  %v6975_v35 = vrot.slane %v8098_v10, 9  ;;  %v2098_v15 = vrot.slane %v8113_v32, 5 }
  0xd6   : > { %v2101_v17 = vrot.slane %v8115_v33, 5  ;;  %v1906_v5 = vshrl.u32 %v8416_v44, 16  ;;  %v1909_v41 = vshll.u32 %v8416_v44, 16  ;;  %v6976_v6 = vrot.slane %v8126_v48, 9  ;;  %v7481_v10 = vld [vmem:[#allocation2 + $0x24] sm:$0xf] }
  0xd7   : > { %v2095_v58 = vsel %vm7921_vm7, %v2093_v42, %v2094_v53  ;;  %v1422_v13 = vld [vmem:[#allocation2 + $0xbc] sm:$0x1]  ;;  %v8428_v54 = vcombine.low %v2085_v20, %v2088_v11  ;;  %v2100_v30 = vrot.slane %v2098_v15, 4  ;;  %v2105_v40 = vrot.slane %v8132_v59, 5  ;;  %v8452_v42 = vld [vmem:[#allocation3] sm:$0xf] }
  0xd8   : > { %v8431_v32 = vcombine.low %v7481_v10, %v7482_v61  ;;  %v1908_v33 = vrot.slane %v1906_v5, 4  ;;  %v1911_v12 = vrot.slane %v1909_v41, 5  ;;  %v1925_v28 = vshll.u32 %v1422_v13, 16  ;;  %1528 = vst.msk [vmem:[#allocation4 + $0x20] sm:$0xff] %vm11191_vm14, %v8407_v19 }
  0xd9   : > { %v8433_v2 = vcombine.low %v2092_v23, %v2095_v58  ;;  %v8435_v62 = vld [vmem:[#allocation2 + $0xb8] sm:$0xf]  ;;  %2225 = vrot.lane.b32.xlu0 %v8405_v46, %s7525_s27  ;;  %v2099_v48 = vsel %vm7921_vm7, %v6975_v35, %v2098_v15  ;;  %v2102_v59 = vsel %vm7921_vm7, %v2100_v30, %v2101_v17  ;;  %v2107_v14 = vrot.slane %v2105_v40, 4  ;;  %v8456_v15 = vld [vmem:[#allocation3 + $0x4] sm:$0xf] }
  0xda   : > { %v2108_v8 = vrot.slane %v8135_v60, 5  ;;  %v1912_v63 = vor.u32 %v1911_v12, %v1908_v33  ;;  %v1915_v27 = vshll.u32 %v8435_v62, 16  ;;  %v1919_v29 = vshrl.u32 %v8435_v62, 16  ;;  %1529 = vst.msk [vmem:[#allocation4 + $0x30] sm:$0xff] %vm11191_vm14, %v8431_v32 }
  0xdb   : > { %v2106_v0 = vsel %vm7921_vm7, %v6976_v6, %v2105_v40  ;;  %v1927_v52 = vrot.slane %v1925_v28, 5  ;;  %v6977_v20 = vrot.slane %v8143_v9, 9  ;;  %v2112_v23 = vrot.slane %v8152_v37, 5 }
  0xdc   : > { %v2109_v16 = vsel %vm7921_vm7, %v2107_v14, %v2108_v8  ;;  %v1913_v60 = vrot.slane %v1912_v63, 4  ;;  %v1917_v53 = vrot.slane %v1915_v27, 5  ;;  %v1921_v11 = vrot.slane %v1919_v29, 4  ;;  %v910_v63 = vld [vmem:[%s8472_s7] sm:$0xf] }
  0xdd   : > { %v8454_v35 = vcombine.low %v2099_v48, %v2102_v59  ;;  %2229 = vrot.lane.b32.xlu0 %v8433_v2, %s7525_s27  ;;  %v8460_v17 = vcombine.low %v2106_v0, %v2109_v16  ;;  %v2114_v5 = vrot.slane %v2112_v23, 4  ;;  %v2115_v9 = vrot.slane %v8147_v22, 5  ;;  %v2764_v22 = vld [vmem:[#allocation3 + $0x8] sm:$0x1] }
  0xde   : > { %v6978_v37 = vrot.slane %v8190_v4, 9  ;;  %v1922_v41 = vor.u32 %v1921_v11, %v1917_v53  ;;  %v2113_v58 = vsel %vm7921_vm7, %v6977_v20, %v2112_v23  ;;  %v2119_v6 = vrot.slane %v8201_v45, 5  ;;  %v911_v20 = vld [vmem:[%s8472_s7 + $0x4] sm:$0xf] }
  0xdf   : > { %v2122_v13 = vrot.slane %v8208_v50, 5  ;;  %v1918_v30 = vsel %vm7934_vm10, %v1913_v60, %v1917_v53  ;;  %v2962_v40 = vshrl.u32 %v8452_v42, 16  ;;  %v2965_v10 = vshll.u32 %v8452_v42, 16 }
  0xe0   : > { %v2971_v61 = vshll.u32 %v8456_v15, 16  ;;  %v1923_v33 = vrot.slane %v1922_v41, 4  ;;  %v2116_v50 = vsel %vm7921_vm7, %v2114_v5, %v2115_v9  ;;  %v2120_v12 = vsel %vm7921_vm7, %v6978_v37, %v2119_v6 }
  0xe1   : > { %v2121_v28 = vrot.slane %v2119_v6, 4  ;;  %2233 = vrot.lane.b32.xlu0 %v8460_v17, %s7525_s27  ;;  %v2964_v48 = vrot.slane %v2962_v40, 4  ;;  %v2967_v59 = vrot.slane %v2965_v10, 5  ;;  %v2975_v8 = vshrl.u32 %v8456_v15, 16  ;;  %v912_v6 = vld [vmem:[%s8472_s7 + $0x8] sm:$0xf] }
  0xe2   : > { %v2973_v14 = vrot.slane %v2971_v61, 5  ;;  %v1928_v27 = vsel %vm7934_vm10, %v1923_v33, %v1927_v52  ;;  %v2981_v0 = vshll.u32 %v2764_v22, 16  ;;  %v7042_v16 = vrot.slane %v8452_v42, 9  ;;  %v8499_v52 = vpop.permute.xlu0 %2221 }
  0xe3   : > { %v2123_v29 = vsel %vm7921_vm7, %v2121_v28, %v2122_v13  ;;  %v8493_v23 = vcombine.low %v1918_v30, %v1928_v27  ;;  %v2968_v53 = vor.u32 %v2967_v59, %v2964_v48  ;;  %v2977_v11 = vrot.slane %v2975_v8, 4  ;;  %v1263_v28 = vld [vmem:[#allocation3 + $0xc] sm:$0xf]  ;;  %v913_v27 = vld [vmem:[%s8472_s7 + $0xc] sm:$0xf] }
  0xe4   : > { %v8495_v60 = vcombine.low %v2120_v12, %v2123_v29  ;;  %v2983_v5 = vrot.slane %v2981_v0, 5  ;;  %v3476_v9 = vrot.slane %v8456_v15, 5  ;;  %v3479_v37 = vrot.slane %v2764_v22, 5 }
  0xe5   : > { %11224 = vst [vmem:[#allocation21_spill] sm:$0xff] %v8493_v23  ;;  %v943_v41 = vshrl.u32 %v910_v63, 16  ;;  %2007 = vrot.lane.b32.xlu1 %v8493_v23, %s7526_s28  ;;  %v2969_v13 = vrot.slane %v2968_v53, 4  ;;  %v2978_v30 = vor.u32 %v2977_v11, %v2973_v14  ;;  %v946_v40 = vshll.u32 %v910_v63, 16  ;;  %v8510_v0 = vpop.permute.xlu1 %2223  ;;  %v1267_v53 = vld [vmem:[#allocation3 + $0x14] sm:$0x1] }
  0xe6   : > { %2237 = vrot.lane.b32.xlu0 %v8495_v60, %s7525_s27  ;;  %v951_v10 = vshrl.u32 %v911_v20, 16  ;;  %v8505_v61 = vcombine.low %v2113_v58, %v2116_v50  ;;  %v3478_v33 = vrot.slane %v3476_v9, 4  ;;  %v954_v22 = vshll.u32 %v911_v20, 16  ;;  %v1281_v23 = vld [vmem:[#allocation3 + $0x2c] sm:$0x1] }
  0xe7   : > { %v945_v12 = vrot.slane %v943_v41, 7  ;;  %v2974_v48 = vsel %vm7934_vm10, %v2969_v13, %v2973_v14  ;;  %v2979_v59 = vrot.slane %v2978_v30, 4  ;;  %v960_v29 = vshrl.u32 %v912_v6, 16  ;;  %v914_v41 = vld [vmem:[%s8472_s7 + $0x10] sm:$0xf] }
  0xe8   : > { %v953_v8 = vrot.slane %v951_v10, 7  ;;  %v8514_v63 = vsel %vm7921_vm7, %v7042_v16, %v3476_v9  ;;  %v963_v20 = vshll.u32 %v912_v6, 16  ;;  %v8524_v11 = vsel %vm7921_vm7, %v3478_v33, %v3479_v37  ;;  %v915_v10 = vld [vmem:[%s8472_s7 + $0x14] sm:$0xf]  ;;  %v1270_v33 = vld [vmem:[#allocation3 + $0x18] sm:$0xf] }
  0xe9   : > { %v948_v58 = vor.u32 %v946_v40, %v945_v12  ;;  %v949_v50 = vrot.slane %v945_v12, 4  ;;  %2227 = vrot.lane.b32.xlu1 %v8428_v54, %s7525_s27  ;;  %v2984_v14 = vsel %vm7934_vm10, %v2979_v59, %v2983_v5  ;;  %v962_v30 = vrot.slane %v960_v29, 7  ;;  %v8532_v12 = vpop.permute.xlu0 %1977 }
  0xea   : > { %2383 = vrot.lane.b32.xlu0 %v8047_v57, %s7527_s8  ;;  %v956_v16 = vor.u32 %v954_v22, %v953_v8  ;;  %v958_v9 = vrot.slane %v953_v8, 4  ;;  %v8527_v13 = vcombine.low %v2974_v48, %v2984_v14  ;;  %v968_v40 = vshrl.u32 %v913_v27, 16  ;;  %v7483_v22 = vld [vmem:[#allocation2 + $0x30] sm:$0xf]  ;;  %v7484_v48 = vld [vmem:[#allocation2 + $0x34] sm:$0xf] }
  0xeb   : > { %v1264_v6 = vsel %vm7941_vm11, %v948_v58, %v1263_v28  ;;  %v971_v37 = vshll.u32 %v913_v27, 16  ;;  %v8538_v59 = vcombine.low %v7483_v22, %v7484_v48  ;;  %v965_v28 = vor.u32 %v963_v20, %v962_v30  ;;  %v1274_v27 = vld [vmem:[#allocation3 + $0x20] sm:$0x1]  ;;  %v7488_v22 = vld [vmem:[#allocation2 + $0x40] sm:$0xf] }
  0xec   : > { %v957_v57 = vsel %vm7947_vm12, %v949_v50, %v956_v16  ;;  %1265 = vst [vmem:[#allocation3 + $0xc] sm:$0xf] %v1264_v6  ;;  %v1268_v5 = vsel %vm7954_vm13, %v958_v9, %v1267_v53  ;;  %v966_v8 = vrot.slane %v962_v30, 4  ;;  %v970_v29 = vrot.slane %v968_v40, 7  ;;  %v1982_v16 = vpop.permute.xlu1 %1981 }
  0xed   : > { %1266 = vst.msk [vmem:[#allocation3 + $0x10] sm:$0xf] %vm11189_vm0, %v957_v57  ;;  %1269 = vst [vmem:[#allocation3 + $0x14] sm:$0x1] %v1268_v5  ;;  %v977_v58 = vshrl.u32 %v914_v41, 16  ;;  %2231 = vrot.lane.b32.xlu1 %v8454_v35, %s7525_s27  ;;  %v980_v50 = vshll.u32 %v914_v41, 16  ;;  %v1271_v20 = vsel %vm7941_vm11, %v965_v28, %v1270_v33  ;;  %v1980_v41 = vpop.permute.xlu0 %1979 }
  0xee   : > { %2529 = vrot.lane.b32.xlu0 %v8407_v19, %s7528_s9  ;;  %v985_v53 = vshrl.u32 %v915_v10, 16  ;;  %v988_v14 = vshll.u32 %v915_v10, 16  ;;  %v973_v9 = vor.u32 %v971_v37, %v970_v29  ;;  %v975_v6 = vrot.slane %v970_v29, 4  ;;  %1530 = vst.msk [vmem:[#allocation4 + $0x40] sm:$0xff] %vm11191_vm14, %v8538_v59  ;;  %1272 = vst [vmem:[#allocation3 + $0x18] sm:$0xf] %v1271_v20 }
  0xef   : > { %v979_v30 = vrot.slane %v977_v58, 7  ;;  %v1277_v10 = vld [vmem:[#allocation3 + $0x24] sm:$0xf]  ;;  %v7485_v57 = vld [vmem:[#allocation2] sm:$0xf]  ;;  %2028 = vst.msk [vmem:[#allocation4 + $0x20] sm:$0xff] %vm11190_vm15, %v1982_v16 }
  0xf0   : > { %v987_v40 = vrot.slane %v985_v53, 7  ;;  %v7486_v5 = vld [vmem:[#allocation2 + $0x4] sm:$0xf]  ;;  %v7487_v33 = vld [vmem:[#allocation2 + $0x3c] sm:$0xf]  ;;  %v974_v29 = vsel %vm7947_vm12, %v966_v8, %v973_v9  ;;  %v1275_v58 = vsel %vm7954_vm13, %v975_v6, %v1274_v27  ;;  %2027 = vst.msk [vmem:[#allocation4 + $0x10] sm:$0xff] %vm11190_vm15, %v1980_v41 }
  0xf1   : > { %v6938_v37 = vcombine.low %v7485_v57, %v7486_v5  ;;  %v8555_v48 = vcombine.low %v7487_v33, %v7488_v22  ;;  %v7444_v28 = vld [vmem:[%s11145_s2] sm:$0xff]   ;;  %v982_v53 = vor.u32 %v980_v50, %v979_v30  ;;  %v983_v20 = vrot.slane %v979_v30, 4  ;;  %2235 = vrot.lane.b32.xlu1 %v8505_v61, %s7525_s27  ;;  %1273 = vst.msk [vmem:[#allocation3 + $0x1c] sm:$0xf] %vm11189_vm0, %v974_v29  ;;  %v7489_v27 = vld [vmem:[#allocation2 + $0x48] sm:$0xf] }
  0xf2   : > { %2697 = vrot.lane.b32.xlu0 %v8405_v46, %s7529_s12  ;;  %1276 = vst [vmem:[#allocation3 + $0x20] sm:$0x1] %v1275_v58  ;;  %v990_v8 = vor.u32 %v988_v14, %v987_v40  ;;  %v992_v9 = vrot.slane %v987_v40, 4  ;;  %v7490_v50 = vld [vmem:[#allocation2 + $0x4c] sm:$0xf]  ;;  %v1984_v14 = vpop.permute.xlu1 %1983  ;;  %v8586_v40 = vcombine.low %v8190_v4, %v8201_v45  ;;  %v8594_v33 = vcombine.low %v8253_v55, %v8258_v56 }
  0xf3   : > { %1526 = vst.msk [vmem:[#allocation4] sm:$0xff] %vm11191_vm14, %v6938_v37  ;;  %1531 = vst.msk [vmem:[#allocation4 + $0x50] sm:$0xff] %vm11191_vm14, %v8555_v48  ;;  %v8574_v16 = vcombine.low %v7489_v27, %v7490_v50  ;;  %v7491_v6 = vld [vmem:[#allocation2 + $0x54] sm:$0xf]  ;;  %v7492_v30 = vld [vmem:[#allocation2 + $0x58] sm:$0xf]  ;;  %v1278_v5 = vsel %vm7941_vm11, %v982_v53, %v1277_v10  ;;  %v8590_v37 = vcombine.low %v8234_v49, %v8236_v18  ;;  %4302 = vmatpush1.bf16.msra.mxu0 %v7444_v28 }
  0xf4   : > { %v8576_v41 = vcombine.low %v7491_v6, %v7492_v30  ;;  %v8578_v57 = vld [vmem:[#allocation3 + $0xc] sm:$0xf]  ;;  %2026 = vst.msk [vmem:[#allocation4] sm:$0xff] %vm11190_vm15, %v8532_v12  ;;  %v8596_v22 = vld [vmem:[#allocation3 + $0x10] sm:$0xf]  ;;  %v991_v4 = vsel %vm7947_vm12, %v983_v20, %v990_v8  ;;  %v1282_v45 = vsel %vm7954_vm13, %v992_v9, %v1281_v23  ;;  %2029 = vst.msk [vmem:[#allocation4 + $0x30] sm:$0xff] %vm11190_vm15, %v1984_v14  ;;  %7407 = vmatpush1.bf16.msra.mxu1 %v7444_v28 }
  0xf5   : > { %v2986_v10 = vshrl.u32 %v8578_v57, 16  ;;  %v2989_v12 = vshll.u32 %v8578_v57, 16  ;;  %v8600_v29 = vld [vmem:[#allocation3 + $0x14] sm:$0x1]  ;;  %1279 = vst [vmem:[#allocation3 + $0x24] sm:$0xf] %v1278_v5  ;;  %2291 = vrot.lane.b32.xlu1 %v8243_v31, %s7530_s15  ;;  %v7058_v28 = vcombine.low %v8514_v63, %v8524_v11  ;;  %v8643_v30 = vcombine.low %v8268_v47, %v8306_v21 }
  0xf6   : > { %1532 = vst.msk [vmem:[#allocation4 + $0x60] sm:$0xff] %vm11191_vm14, %v8574_v16  ;;  %1533 = vst.msk [vmem:[#allocation4 + $0x70] sm:$0xff] %vm11191_vm14, %v8576_v41  ;;  %v11225_v49 = vmov 0   ;;  %v2999_v18 = vshrl.u32 %v8596_v22, 16  ;;  %v2995_v55 = vshll.u32 %v8596_v22, 16  ;;  %v3005_v56 = vshll.u32 %v8600_v29, 16  ;;  %3393 = vrot.lane.b32.xlu0 %v8527_v13, %s7531_s16 }
  0xf7   : > { %4303 = vmatprep.subr.bf16.mxu0 %v11225_v49  ;;  %1280 = vst.msk [vmem:[#allocation3 + $0x28] sm:$0xf] %vm11189_vm0, %v991_v4  ;;  %1283 = vst [vmem:[#allocation3 + $0x2c] sm:$0x1] %v1282_v45  ;;  %v7445_v23 = vld [vmem:[%s11145_s2 + $0x8] sm:$0xff]   ;;  %7399 = vmatprep.subr.bf16.mxu1 %v11225_v49  ;;  %v2988_v58 = vrot.slane %v2986_v10, 4  ;;  %v8651_v5 = vcombine.low %v8578_v57, %v8596_v22 }
  0xf8   : > { %1534 = vst.msk [vmem:[#allocation4 + $0x80] sm:$0xff] %vm11191_vm14, %v8586_v40  ;;  %1535 = vst.msk [vmem:[#allocation4 + $0x90] sm:$0xff] %vm11191_vm14, %v8590_v37  ;;  %v2991_v53 = vrot.slane %v2989_v12, 5  ;;  %v2997_v20 = vrot.slane %v2995_v55, 5  ;;  %v3001_v8 = vrot.slane %v2999_v18, 4  ;;  %v3483_v9 = vrot.slane %v8596_v22, 5  ;;  %4304 = vmatpush1.bf16.msra.mxu0 %v7445_v23  ;;  %7408 = vmatpush1.bf16.msra.mxu1 %v7445_v23 }
  0xf9   : > { %1536 = vst.msk [vmem:[#allocation4 + $0xa0] sm:$0xff] %vm11191_vm14, %v8594_v33  ;;  %v3007_v50 = vrot.slane %v3005_v56, 5  ;;  %v8633_v6 = vld [vmem:[#allocation3 + $0x18] sm:$0xf]  ;;  %4305 = vmatprep.subr.bf16.mxu0 %v11225_v49  ;;  %7400 = vmatprep.subr.bf16.mxu1 %v11225_v49  ;;  %v7043_v10 = vrot.slane %v8578_v57, 9  ;;  %v3486_v47 = vrot.slane %v8600_v29, 5 }
  0xfa   : > { %v2992_v27 = vor.u32 %v2991_v53, %v2988_v58  ;;  %v7446_v31 = vld [vmem:[%s11145_s2 + $0x10] sm:$0xff]   ;;  %v3002_v13 = vor.u32 %v3001_v8, %v2997_v20  ;;  %v3010_v63 = vshrl.u32 %v8633_v6, 16  ;;  %v3013_v11 = vshll.u32 %v8633_v6, 16  ;;  %2459 = vrot.lane.b32.xlu1 %v8016_v7, %s7532_s19  ;;  %3634 = vrot.lane.b32.xlu0 %v7058_v28, %s7533_s20  ;;  %1537 = vst.msk [vmem:[#allocation4 + $0xb0] sm:$0xff] %vm11191_vm14, %v8643_v30  ;;  %v8661_v18 = vld [vmem:[#allocation3 + $0x20] sm:$0x1] }
  0xfb   : > { %v3485_v4 = vrot.slane %v3483_v9, 4  ;;  %v8659_v45 = vld [vmem:[#allocation3 + $0x1c] sm:$0xf]  ;;  %v3029_v56 = vshll.u32 %v8661_v18, 16  ;;  %v7447_v23 = vld [vmem:[%s11145_s2 + $0x18] sm:$0xff]   ;;  %v7010_v28 = vcombine.low %v8452_v42, %v8456_v15  ;;  %2270 = vst.msk [vmem:[#allocation4] sm:$0xff] %vm11188_vm1, %v8499_v52 }
  0xfc   : > { %v2993_v14 = vrot.slane %v2992_v27, 4  ;;  %v3003_v12 = vrot.slane %v3002_v13, 4  ;;  %v3012_v21 = vrot.slane %v3010_v63, 4  ;;  %4306 = vmatpush1.bf16.msra.mxu0 %v7446_v31  ;;  %v3015_v22 = vrot.slane %v3013_v11, 5  ;;  %7409 = vmatpush1.bf16.msra.mxu1 %v7446_v31  ;;  %v8685_v31 = vld [vmem:[#allocation3 + $0x24] sm:$0xf] }
  0xfd   : > { %4307 = vmatprep.subr.bf16.mxu0 %v11225_v49  ;;  %v3019_v29 = vshll.u32 %v8659_v45, 16  ;;  %v3023_v55 = vshrl.u32 %v8659_v45, 16  ;;  %7401 = vmatprep.subr.bf16.mxu1 %v11225_v49  ;;  %v3487_v8 = vsel %vm7921_vm7, %v3485_v4, %v3486_v47  ;;  %v3031_v15 = vrot.slane %v3029_v56, 5  ;;  %v916_v4 = vld [vmem:[%s8472_s7 + $0x18] sm:$0xf]  ;;  %2271 = vst.msk [vmem:[#allocation4 + $0x10] sm:$0xff] %vm11188_vm1, %v8510_v0 }
  0xfe   : > { %v2998_v7 = vsel %vm7934_vm10, %v2993_v14, %v2997_v20  ;;  %v3008_v57 = vsel %vm7934_vm10, %v3003_v12, %v3007_v50  ;;  %2621 = vrot.lane.b32.xlu1 %v8042_v51, %s7534_s25  ;;  %3704 = vrot.lane.b32.xlu0 %v8651_v5, %s7535_s29  ;;  %v3016_v53 = vor.u32 %v3015_v22, %v3012_v21  ;;  %v1986_v13 = vpop.permute.xlu0 %1985  ;;  %v8687_v63 = vld [vmem:[#allocation3 + $0x28] sm:$0xf]  ;;  %v3034_v14 = vshrl.u32 %v8685_v31, 16 }
  0xff   : > { %v8679_v58 = vcombine.low %v2998_v7, %v3008_v57  ;;  %v3484_v20 = vsel %vm7921_vm7, %v7043_v10, %v3483_v9  ;;  %v3021_v27 = vrot.slane %v3019_v29, 5  ;;  %v3025_v50 = vrot.slane %v3023_v55, 4  ;;  %2030 = vst.msk [vmem:[#allocation4 + $0x40] sm:$0xff] %vm11190_vm15, %v1986_v13  ;;  %v7448_v9 = vld [vmem:[%s11145_s2 + $0x20] sm:$0xff]   ;;  %v917_v57 = vld [vmem:[%s8472_s7 + $0x1c] sm:$0xf] }
 0x100   : > { %4308 = vmatpush1.bf16.msra.mxu0 %v7447_v23  ;;  %v3017_v42 = vrot.slane %v3016_v53, 4  ;;  %7410 = vmatpush1.bf16.msra.mxu1 %v7447_v23  ;;  %v3037_v10 = vshll.u32 %v8685_v31, 16  ;;  %v3043_v12 = vshll.u32 %v8687_v63, 16  ;;  %v8702_v47 = vcombine.low %v3484_v20, %v3487_v8  ;;  %v8709_v55 = vld [vmem:[#allocation3 + $0x2c] sm:$0x1] }
 0x101   : > { %4309 = vmatprep.subr.bf16.mxu0 %v11225_v49  ;;  %v3026_v11 = vor.u32 %v3025_v50, %v3021_v27  ;;  %7402 = vmatprep.subr.bf16.mxu1 %v11225_v49  ;;  %v3047_v22 = vshrl.u32 %v8687_v63, 16  ;;  %v3036_v56 = vrot.slane %v3034_v14, 4  ;;  %v3490_v53 = vrot.slane %v8659_v45, 5 }
 0x102   : > { %2896 = vrot.lane.b32.xlu1 %v7010_v28, %s7536_s11  ;;  %3796 = vrot.lane.b32.xlu0 %v8679_v58, %s7537_s13  ;;  %v3022_v7 = vsel %vm7934_vm10, %v3017_v42, %v3021_v27  ;;  %v3039_v23 = vrot.slane %v3037_v10, 5  ;;  %v3045_v28 = vrot.slane %v3043_v12, 5  ;;  %v3053_v20 = vshll.u32 %v8709_v55, 16  ;;  %v7449_v27 = vld [vmem:[%s11145_s2 + $0x28] sm:$0xff]  }
 0x103   : > { %v3027_v29 = vrot.slane %v3026_v11, 4  ;;  %v3049_v50 = vrot.slane %v3047_v22, 4  ;;  %v994_v8 = vshrl.u32 %v916_v4, 16  ;;  %v997_v14 = vshll.u32 %v916_v4, 16 }
 0x104   : > { %4310 = vmatpush1.bf16.msra.mxu0 %v7448_v9  ;;  %7411 = vmatpush1.bf16.msra.mxu1 %v7448_v9  ;;  %v3040_v11 = vor.u32 %v3039_v23, %v3036_v56  ;;  %v3055_v12 = vrot.slane %v3053_v20, 5  ;;  %v1002_v21 = vshrl.u32 %v917_v57, 16  ;;  %v8729_v4 = vcombine.low %v8313_v24, %v8327_v39  ;;  %v11227_v23 = vld [vmem:[#allocation16_spill] sm:$0xff]  ;;  %v918_v20 = vld [vmem:[%s8472_s7 + $0x20] sm:$0xf] }
 0x105   : > { %4311 = vmatprep.subr.bf16.mxu0 %v11225_v49  ;;  %v3032_v42 = vsel %vm7934_vm10, %v3027_v29, %v3031_v15  ;;  %7403 = vmatprep.subr.bf16.mxu1 %v11225_v49  ;;  %v3050_v9 = vor.u32 %v3049_v50, %v3045_v28  ;;  %v996_v22 = vrot.slane %v994_v8, 7  ;;  %v1005_v15 = vshll.u32 %v917_v57, 16  ;;  %v1284_v29 = vld [vmem:[#allocation3 + $0x30] sm:$0xf]  ;;  %v7450_v24 = vld [vmem:[%s11145_s2 + $0x30] sm:$0xff]  }
 0x106   : > { %2293 = vrot.lane.b32.xlu1 %v8407_v19, %s7530_s15  ;;  %3872 = vrot.lane.b32.xlu0 %v8702_v47, %s7538_s18  ;;  %v8725_v10 = vcombine.low %v3022_v7, %v3032_v42  ;;  %v3041_v13 = vrot.slane %v3040_v11, 4  ;;  %11226 = vst [vmem:[#allocation22_spill] sm:$0xff] %v8729_v4  ;;  %v8735_v50 = vcombine.low %v11227_v23, %v8349_v26  ;;  %v1004_v8 = vrot.slane %v1002_v21, 7  ;;  %v11229_v42 = vld [vmem:[#allocation18_spill] sm:$0xff]  ;;  %v11230_v11 = vld [vmem:[#allocation17_spill] sm:$0xff] }
 0x107   : > { %v3051_v19 = vrot.slane %v3050_v9, 4  ;;  %v999_v56 = vor.u32 %v997_v14, %v996_v22  ;;  %v1000_v7 = vrot.slane %v996_v22, 4  ;;  %1538 = vst.msk [vmem:[#allocation4 + $0xc0] sm:$0xff] %vm11191_vm14, %v8729_v4  ;;  %v8748_v26 = vcombine.low %v11230_v11, %v11229_v42  ;;  %v919_v9 = vld [vmem:[%s8472_s7 + $0x24] sm:$0xf]  ;;  %v7451_v23 = vld [vmem:[%s11145_s2 + $0x38] sm:$0xff]  }
 0x108   : > { %4312 = vmatpush1.bf16.msra.mxu0 %v7449_v27  ;;  %4050 = vst.msk [vmem:[#allocation4 + $0x8] sm:$0xff] %vm11191_vm14, %v8725_v10  ;;  %11228 = vst [vmem:[#allocation16_spill] sm:$0xff] %v8735_v50  ;;  %7412 = vmatpush1.bf16.msra.mxu1 %v7449_v27  ;;  %v1988_v39 = vpop.permute.xlu1 %1987  ;;  %v3046_v57 = vsel %vm7934_vm10, %v3041_v13, %v3045_v28  ;;  %v8752_v14 = vcombine.low %v8416_v44, %v8435_v62  ;;  %v11233_v28 = vld [vmem:[#allocation7_spill] sm:$0xff]  ;;  %v3492_v21 = vrot.slane %v3490_v53, 4  ;;  %v1288_v62 = vld [vmem:[#allocation3 + $0x38] sm:$0x1] }
 0x109   : > { %4313 = vmatprep.subr.bf16.mxu0 %v11225_v49  ;;  %11231 = vst [vmem:[#allocation18_spill] sm:$0xff] %v8748_v26  ;;  %7404 = vmatprep.subr.bf16.mxu1 %v11225_v49  ;;  %2031 = vst.msk [vmem:[#allocation4 + $0x50] sm:$0xff] %vm11190_vm15, %v1988_v39  ;;  %v3056_v27 = vsel %vm7934_vm10, %v3051_v19, %v3055_v12  ;;  %v1285_v44 = vsel %vm7941_vm11, %v999_v56, %v1284_v29  ;;  %v1009_v22 = vrot.slane %v1004_v8, 4  ;;  %v1291_v39 = vld [vmem:[#allocation3 + $0x3c] sm:$0xf] }
 0x10a   : > { %11232 = vst [vmem:[#allocation17_spill] sm:$0xff] %v8752_v14  ;;  %2385 = vrot.lane.b32.xlu1 %v8042_v51, %s7527_s8  ;;  %2623 = vrot.lane.b32.xlu0 %v11233_v28, %s7534_s25  ;;  %1539 = vst.msk [vmem:[#allocation4 + $0xd0] sm:$0xff] %vm11191_vm14, %v8735_v50  ;;  %v8769_v51 = vcombine.low %v3046_v57, %v3056_v27  ;;  %v1007_v13 = vor.u32 %v1005_v15, %v1004_v8  ;;  %v1011_v12 = vshrl.u32 %v918_v20, 16  ;;  %v8797_v57 = vld [vmem:[%s8472_s7 + $0x28] sm:$0xf] }
 0x10b   : > { %1286 = vst [vmem:[#allocation3 + $0x30] sm:$0xf] %v1285_v44  ;;  %1540 = vst.msk [vmem:[#allocation4 + $0xe0] sm:$0xff] %vm11191_vm14, %v8748_v26  ;;  %v1014_v19 = vshll.u32 %v918_v20, 16  ;;  %v1019_v56 = vshrl.u32 %v919_v9, 16  ;;  %v1022_v15 = vshll.u32 %v919_v9, 16  ;;  %v1289_v0 = vsel %vm7954_vm13, %v1009_v22, %v1288_v62 }
 0x10c   : > { %1541 = vst.msk [vmem:[#allocation4 + $0xf0] sm:$0xff] %vm11191_vm14, %v8752_v14  ;;  %4314 = vmatpush1.bf16.msra.mxu0 %v7450_v24  ;;  %v1990_v29 = vpop.permute.xlu0 %1989  ;;  %7413 = vmatpush1.bf16.msra.mxu1 %v7450_v24  ;;  %4051 = vst.msk [vmem:[#allocation4 + $0x18] sm:$0xff] %vm11191_vm14, %v8769_v51  ;;  %v1008_v52 = vsel %vm7947_vm12, %v1000_v7, %v1007_v13  ;;  %v1013_v20 = vrot.slane %v1011_v12, 7  ;;  %v11234_v7 = vrot.slane %v8633_v6, 9  ;;  %v11235_v42 = vrot.slane %v8661_v18, 5  ;;  %v7452_v22 = vld [vmem:[%s11145_s2 + $0x40] sm:$0xff]  }
 0x10d   : > { %4315 = vmatprep.subr.bf16.mxu0 %v11225_v49  ;;  %2032 = vst.msk [vmem:[#allocation4 + $0x60] sm:$0xff] %vm11190_vm15, %v1990_v29  ;;  %7405 = vmatprep.subr.bf16.mxu1 %v11225_v49  ;;  %1290 = vst [vmem:[#allocation3 + $0x38] sm:$0x1] %v1289_v0  ;;  %v1021_v24 = vrot.slane %v1019_v56, 7  ;;  %v1295_v27 = vld [vmem:[#allocation3 + $0x44] sm:$0x1] }
 0x10e   : > { %2461 = vrot.lane.b32.xlu1 %v8405_v46, %s7532_s19  ;;  %2699 = vrot.lane.b32.xlu0 %v8428_v54, %s7529_s12  ;;  %1287 = vst.msk [vmem:[#allocation3 + $0x34] sm:$0xf] %vm11189_vm0, %v1008_v52  ;;  %v3491_v8 = vsel %vm7921_vm7, %v11234_v7, %v3490_v53  ;;  %v3494_v46 = vsel %vm7921_vm7, %v3492_v21, %v11235_v42  ;;  %v1017_v9 = vrot.slane %v1013_v20, 4  ;;  %v921_v44 = vld [vmem:[%s8472_s7 + $0x2c] sm:$0xf]  ;;  %v1028_v53 = vshrl.u32 %v8797_v57, 16 }
 0x10f   : > { %v1016_v11 = vor.u32 %v1014_v19, %v1013_v20  ;;  %v1024_v62 = vor.u32 %v1022_v15, %v1021_v24  ;;  %v1026_v13 = vrot.slane %v1021_v24, 4  ;;  %v8820_v21 = vcombine.low %v3491_v8, %v3494_v46 }
 0x110   : > { %4316 = vmatpush1.bf16.msra.mxu0 %v7451_v23  ;;  %7414 = vmatpush1.bf16.msra.mxu1 %v7451_v23  ;;  %v1036_v56 = vshrl.u32 %v921_v44, 16  ;;  %v1030_v52 = vrot.slane %v1028_v53, 7  ;;  %v1039_v0 = vshll.u32 %v921_v44, 16  ;;  %v11177_v20 = vrot.slane %v8687_v63, 5 }
 0x111   : > { %4317 = vmatprep.subr.bf16.mxu0 %v11225_v49  ;;  %v1292_v18 = vsel %vm7941_vm11, %v1016_v11, %v1291_v39  ;;  %7406 = vmatprep.subr.bf16.mxu1 %v11225_v49  ;;  %v1025_v29 = vsel %vm7947_vm12, %v1017_v9, %v1024_v62  ;;  %v1296_v19 = vsel %vm7954_vm13, %v1026_v13, %v1295_v27  ;;  %v1031_v11 = vshll.u32 %v8797_v57, 16 }
 0x112   : > { %2531 = vrot.lane.b32.xlu1 %v8431_v32, %s7528_s9  ;;  %3395 = vrot.lane.b32.xlu0 %v8679_v58, %s7531_s16  ;;  %v8824_v12 = vld [vmem:[#allocation3 + $0x30] sm:$0xf]  ;;  %1293 = vst [vmem:[#allocation3 + $0x3c] sm:$0xf] %v1292_v18  ;;  %v1992_v15 = vpop.permute.xlu1 %1991  ;;  %1294 = vst.msk [vmem:[#allocation3 + $0x40] sm:$0xf] %vm11189_vm0, %v1025_v29  ;;  %v8843_v8 = vcombine.low %v8633_v6, %v8659_v45 }
 0x113   : > { %v3058_v49 = vshrl.u32 %v8824_v12, 16  ;;  %v3061_v23 = vshll.u32 %v8824_v12, 16  ;;  %1297 = vst [vmem:[#allocation3 + $0x44] sm:$0x1] %v1296_v19  ;;  %2033 = vst.msk [vmem:[#allocation4 + $0x70] sm:$0xff] %vm11190_vm15, %v1992_v15  ;;  %v8834_v58 = vrot.slane %v1036_v56, 7 }
 0x114   : > { %4318 = vmatpush1.bf16.msra.mxu0 %v7452_v22  ;;  %7415 = vmatpush1.bf16.msra.mxu1 %v7452_v22  ;;  %v8847_v42 = vld [vmem:[#allocation3 + $0x38] sm:$0x1]  ;;  %v1034_v62 = vrot.slane %v1030_v52, 4  ;;  %v7045_v13 = vrot.slane %v8685_v31, 9 }
 0x115   : > { %v8837_v24 = vld [vmem:[#allocation3 + $0x34] sm:$0xf]  ;;  %v3060_v39 = vrot.slane %v3058_v49, 4  ;;  %v3063_v7 = vrot.slane %v3061_v23, 5  ;;  %v3077_v44 = vshll.u32 %v8847_v42, 16  ;;  %v1041_v22 = vor.u32 %v1039_v0, %v8834_v58 }
 0x116   : > { %4077 = vrot.lane.b32.xlu1 %v8820_v21, %s7526_s28  ;;  %3636 = vrot.lane.b32.xlu0 %v8702_v47, %s7533_s20  ;;  %v3067_v46 = vshll.u32 %v8837_v24, 16  ;;  %v3071_v27 = vshrl.u32 %v8837_v24, 16  ;;  %v8858_v47 = vrot.slane %v11177_v20, 4  ;;  %v1033_v23 = vor.u32 %v1031_v11, %v1030_v52  ;;  %v1302_v11 = vld [vmem:[#allocation3 + $0x50] sm:$0x1] }
 0x117   : > { %v3064_v9 = vor.u32 %v3063_v7, %v3060_v39  ;;  %v3079_v57 = vrot.slane %v3077_v44, 5  ;;  %v1042_v0 = vsel %vm7947_vm12, %v1034_v62, %v1041_v22 }
 0x118   : > { %v3069_v45 = vrot.slane %v3067_v46, 5  ;;  %v3073_v53 = vrot.slane %v3071_v27, 4  ;;  %v1298_v27 = vld [vmem:[#allocation3 + $0x48] sm:$0xf]  ;;  %1301 = vst.msk [vmem:[#allocation3 + $0x4c] sm:$0xf] %vm11189_vm0, %v1042_v0 }
 0x119   : > { %v3065_v18 = vrot.slane %v3064_v9, 4  ;;  %v2777_v29 = vld [vmem:[#allocation3 + $0x3c] sm:$0xf]  ;;  %v2778_v19 = vld [vmem:[#allocation3 + $0x40] sm:$0xf]  ;;  %v1043_v9 = vrot.slane %v8834_v58, 4 }
 0x11a   : > { %3942 = vrot.lane.b32.xlu1 %v8843_v8, %s7539_s22  ;;  %3706 = vrot.lane.b32.xlu0 %v8843_v8, %s7535_s29  ;;  %v2779_v56 = vld [vmem:[#allocation3 + $0x44] sm:$0x1]  ;;  %v7047_v15 = vrot.slane %v2777_v29, 9  ;;  %v3082_v49 = vshrl.u32 %v2777_v29, 16  ;;  %v3074_v7 = vor.u32 %v3073_v53, %v3069_v45  ;;  %v3511_v46 = vrot.slane %v2778_v19, 5 }
 0x11b   : > { %v3070_v39 = vsel %vm7934_vm10, %v3065_v18, %v3069_v45  ;;  %v3514_v44 = vrot.slane %v2779_v56, 5  ;;  %v8870_v6 = vcombine.low %v2777_v29, %v2778_v19  ;;  %v3085_v52 = vshll.u32 %v2777_v29, 16  ;;  %v922_v45 = vld [vmem:[%s8472_s7 + $0x30] sm:$0xf] }
 0x11c   : > { %v3084_v20 = vrot.slane %v3082_v49, 4  ;;  %v3075_v14 = vrot.slane %v3074_v7, 4  ;;  %v3512_v62 = vsel %vm7921_vm7, %v7047_v15, %v3511_v46  ;;  %v3513_v22 = vrot.slane %v3511_v46, 4  ;;  %v923_v49 = vld [vmem:[%s8472_s7 + $0x34] sm:$0xf] }
 0x11d   : > { %v3091_v18 = vshll.u32 %v2778_v19, 16  ;;  %v3087_v53 = vrot.slane %v3085_v52, 5  ;;  %v3095_v0 = vshrl.u32 %v2778_v19, 16  ;;  %v3101_v4 = vshll.u32 %v2779_v56, 16 }
 0x11e   : > { %2898 = vrot.lane.b32.xlu1 %v8651_v5, %s7536_s11  ;;  %3798 = vrot.lane.b32.xlu0 %v8725_v10, %s7537_s13  ;;  %v1994_v58 = vpop.permute.xlu0 %1993  ;;  %v1299_v29 = vsel %vm7941_vm11, %v1033_v23, %v1298_v27  ;;  %v3080_v15 = vsel %vm7934_vm10, %v3075_v14, %v3079_v57  ;;  %v3515_v7 = vsel %vm7921_vm7, %v3513_v22, %v3514_v44  ;;  %v11236_v27 = vrot.slane %v8687_v63, 5 }
 0x11f   : > { %2034 = vst.msk [vmem:[#allocation4 + $0x80] sm:$0xff] %vm11190_vm15, %v1994_v58  ;;  %v3093_v5 = vrot.slane %v3091_v18, 5  ;;  %1300 = vst [vmem:[#allocation3 + $0x48] sm:$0xf] %v1299_v29  ;;  %v1303_v46 = vsel %vm7954_vm13, %v1043_v9, %v1302_v11  ;;  %v8889_v52 = vcombine.low %v3070_v39, %v3080_v15  ;;  %v8891_v19 = vcombine.low %v3512_v62, %v3515_v7  ;;  %v2781_v11 = vld [vmem:[#allocation3 + $0x4c] sm:$0xf] }
 0x120   : > { %v3088_v56 = vor.u32 %v3087_v53, %v3084_v20  ;;  %v3097_v23 = vrot.slane %v3095_v0, 4  ;;  %1304 = vst [vmem:[#allocation3 + $0x50] sm:$0x1] %v1303_v46  ;;  %v8897_v14 = vsel %vm7921_vm7, %v7045_v13, %v11236_v27  ;;  %v1045_v57 = vshrl.u32 %v922_v45, 16 }
 0x121   : > { %v1048_v44 = vshll.u32 %v922_v45, 16  ;;  %v1053_v22 = vshrl.u32 %v923_v49, 16  ;;  %4052 = vst.msk [vmem:[#allocation4 + $0x28] sm:$0xff] %vm11191_vm14, %v8889_v52  ;;  %v3103_v9 = vrot.slane %v3101_v4, 5  ;;  %v1056_v62 = vshll.u32 %v923_v49, 16 }
 0x122   : > { %2295 = vrot.lane.b32.xlu1 %v8431_v32, %s7530_s15  ;;  %3874 = vrot.lane.b32.xlu0 %v8820_v21, %s7538_s18  ;;  %v3089_v20 = vrot.slane %v3088_v56, 4  ;;  %v3098_v39 = vor.u32 %v3097_v23, %v3093_v5  ;;  %v3518_v18 = vrot.slane %v2781_v11, 5  ;;  %v3115_v13 = vshll.u32 %v2781_v11, 16  ;;  %v1305_v56 = vld [vmem:[#allocation3 + $0x54] sm:$0xf] }
 0x123   : > { %v3119_v58 = vshrl.u32 %v2781_v11, 16  ;;  %v1047_v53 = vrot.slane %v1045_v57, 7  ;;  %v11237_v45 = vrot.slane %v8709_v55, 5  ;;  %v1055_v15 = vrot.slane %v1053_v22, 7  ;;  %v11238_v55 = vld [vmem:[#allocation8_spill] sm:$0xff] }
 0x124   : > { %v3094_v0 = vsel %vm7934_vm10, %v3089_v20, %v3093_v5  ;;  %v3099_v29 = vrot.slane %v3098_v39, 4  ;;  %v3520_v7 = vrot.slane %v3518_v18, 4  ;;  %v8912_v46 = vrot.slane %v3115_v13, 5  ;;  %v1309_v20 = vld [vmem:[#allocation3 + $0x5c] sm:$0x1] }
 0x125   : > { %v3501_v32 = vsel %vm7921_vm7, %v8858_v47, %v11237_v45  ;;  %v3121_v4 = vrot.slane %v3119_v58, 4  ;;  %v1050_v49 = vor.u32 %v1048_v44, %v1047_v53  ;;  %v1996_v23 = vpop.permute.xlu1 %1995  ;;  %v1051_v27 = vrot.slane %v1047_v53, 4  ;;  %v924_v45 = vld [vmem:[%s8472_s7 + $0x38] sm:$0xf] }
 0x126   : > { %2387 = vrot.lane.b32.xlu1 %v11233_v28, %s7527_s8  ;;  %2625 = vrot.lane.b32.xlu0 %v11238_v55, %s7534_s25  ;;  %v3104_v47 = vsel %vm7934_vm10, %v3099_v29, %v3103_v9  ;;  %v2780_v5 = vld [vmem:[#allocation3 + $0x48] sm:$0xf]  ;;  %v1058_v57 = vor.u32 %v1056_v62, %v1055_v15  ;;  %v1060_v22 = vrot.slane %v1055_v15, 4  ;;  %2035 = vst.msk [vmem:[#allocation4 + $0x90] sm:$0xff] %vm11190_vm15, %v1996_v23  ;;  %v925_v29 = vld [vmem:[%s8472_s7 + $0x3c] sm:$0xf] }
 0x127   : > { %v8921_v44 = vcombine.low %v3094_v0, %v3104_v47  ;;  %v2782_v39 = vld [vmem:[#allocation3 + $0x50] sm:$0x1]  ;;  %v7048_v13 = vrot.slane %v2780_v5, 9  ;;  %v8923_v28 = vcombine.low %v2780_v5, %v2781_v11  ;;  %v3106_v58 = vshrl.u32 %v2780_v5, 16 }
 0x128   : > { %v3125_v3 = vshll.u32 %v2782_v39, 16  ;;  %v3521_v26 = vrot.slane %v2782_v39, 5  ;;  %v3109_v50 = vshll.u32 %v2780_v5, 16  ;;  %v3122_v9 = vor.u32 %v3121_v4, %v8912_v46 }
 0x129   : > { %v1998_v53 = vpop.permute.xlu0 %1997  ;;  %4053 = vst.msk [vmem:[#allocation4 + $0x38] sm:$0xff] %vm11191_vm14, %v8921_v44  ;;  %v3519_v62 = vsel %vm7921_vm7, %v7048_v13, %v3518_v18  ;;  %v3108_v0 = vrot.slane %v3106_v58, 4  ;;  %v1059_v11 = vsel %vm7947_vm12, %v1051_v27, %v1058_v57  ;;  %v1306_v15 = vsel %vm7941_vm11, %v1050_v49, %v1305_v56 }
 0x12a   : > { %2463 = vrot.lane.b32.xlu1 %v8428_v54, %s7532_s19  ;;  %2701 = vrot.lane.b32.xlu0 %v8433_v2, %s7529_s12  ;;  %2036 = vst.msk [vmem:[#allocation4 + $0xa0] sm:$0xff] %vm11190_vm15, %v1998_v53  ;;  %v3127_v4 = vrot.slane %v3125_v3, 5  ;;  %v3522_v23 = vsel %vm7921_vm7, %v3520_v7, %v3521_v26  ;;  %v3111_v18 = vrot.slane %v3109_v50, 5  ;;  %v3123_v47 = vrot.slane %v3122_v9, 4  ;;  %1307 = vst [vmem:[#allocation3 + $0x54] sm:$0xf] %v1306_v15 }
 0x12b   : > { %1308 = vst.msk [vmem:[#allocation3 + $0x58] sm:$0xf] %vm11189_vm0, %v1059_v11  ;;  %v8944_v5 = vcombine.low %v3519_v62, %v3522_v23  ;;  %v1310_v49 = vsel %vm7954_vm13, %v1060_v22, %v1309_v20  ;;  %v1062_v54 = vshrl.u32 %v924_v45, 16  ;;  %v1070_v56 = vshrl.u32 %v925_v29, 16  ;;  %v1312_v9 = vld [vmem:[#allocation3 + $0x60] sm:$0xf] }
 0x12c   : > { %v3112_v27 = vor.u32 %v3111_v18, %v3108_v0  ;;  %1311 = vst [vmem:[#allocation3 + $0x5c] sm:$0x1] %v1310_v49  ;;  %v1065_v57 = vshll.u32 %v924_v45, 16  ;;  %v1073_v39 = vshll.u32 %v925_v29, 16  ;;  %v8951_v50 = vcombine.low %v8897_v14, %v3501_v32  ;;  %v1316_v29 = vld [vmem:[#allocation3 + $0x68] sm:$0x1] }
 0x12d   : > { %v1064_v3 = vrot.slane %v1062_v54, 7  ;;  %v1072_v13 = vrot.slane %v1070_v56, 7  ;;  %v3128_v7 = vsel %vm7934_vm10, %v3123_v47, %v3127_v4  ;;  %v8959_v53 = vcombine.low %v8685_v31, %v8687_v63 }
 0x12e   : > { %2533 = vrot.lane.b32.xlu1 %v8538_v59, %s7528_s9  ;;  %3397 = vrot.lane.b32.xlu0 %v8725_v10, %s7531_s16  ;;  %v3113_v26 = vrot.slane %v3112_v27, 4 }
 0x12f   : > { %v1067_v22 = vor.u32 %v1065_v57, %v1064_v3  ;;  %v1068_v20 = vrot.slane %v1064_v3, 4  ;;  %v1075_v58 = vor.u32 %v1073_v39, %v1072_v13  ;;  %v1077_v45 = vrot.slane %v1072_v13, 4 }
 0x130   : > { %v3118_v14 = vsel %vm7934_vm10, %v3113_v26, %v8912_v46 }
 0x131   : > { %v8964_v32 = vcombine.low %v3118_v14, %v3128_v7  ;;  %v2783_v10 = vld [vmem:[#allocation3 + $0x54] sm:$0xf]  ;;  %v1076_v0 = vsel %vm7947_vm12, %v1068_v20, %v1075_v58  ;;  %v1313_v11 = vsel %vm7941_vm11, %v1067_v22, %v1312_v9  ;;  %v1317_v15 = vsel %vm7954_vm13, %v1077_v45, %v1316_v29 }
 0x132   : > { %v2784_v62 = vld [vmem:[#allocation3 + $0x58] sm:$0xf]  ;;  %4079 = vrot.lane.b32.xlu1 %v8951_v50, %s7526_s28  ;;  %3638 = vrot.lane.b32.xlu0 %v8820_v21, %s7533_s20  ;;  %v7049_v31 = vrot.slane %v2783_v10, 9  ;;  %v3130_v4 = vshrl.u32 %v2783_v10, 16  ;;  %1314 = vst [vmem:[#allocation3 + $0x60] sm:$0xf] %v1313_v11 }
 0x133   : > { %v3525_v63 = vrot.slane %v2784_v62, 5  ;;  %v8976_v46 = vcombine.low %v2783_v10, %v2784_v62  ;;  %1315 = vst.msk [vmem:[#allocation3 + $0x64] sm:$0xf] %vm11189_vm0, %v1076_v0  ;;  %1318 = vst [vmem:[#allocation3 + $0x68] sm:$0x1] %v1317_v15  ;;  %v3133_v18 = vshll.u32 %v2783_v10, 16 }
 0x134   : > { %4054 = vst.msk [vmem:[#allocation4 + $0x48] sm:$0xff] %vm11191_vm14, %v8964_v32  ;;  %v2785_v23 = vld [vmem:[#allocation3 + $0x5c] sm:$0x1]  ;;  %v3139_v47 = vshll.u32 %v2784_v62, 16  ;;  %v3143_v49 = vshrl.u32 %v2784_v62, 16  ;;  %v3132_v27 = vrot.slane %v3130_v4, 4 }
 0x135   : > { %v3526_v54 = vsel %vm7921_vm7, %v7049_v31, %v3525_v63  ;;  %v3527_v21 = vrot.slane %v3525_v63, 4  ;;  %v3528_v56 = vrot.slane %v2785_v23, 5  ;;  %v3135_v57 = vrot.slane %v3133_v18, 5 }
 0x136   : > { %v3141_v39 = vrot.slane %v3139_v47, 5  ;;  %v3145_v3 = vrot.slane %v3143_v49, 4  ;;  %v3149_v13 = vshll.u32 %v2785_v23, 16  ;;  %3944 = vrot.lane.b32.xlu1 %v8959_v53, %s7539_s22  ;;  %3708 = vrot.lane.b32.xlu0 %v8959_v53, %s7535_s29  ;;  %v2000_v7 = vpop.permute.xlu1 %1999  ;;  %v3504_v18 = vrot.slane %v8837_v24, 5 }
 0x137   : > { %v3529_v26 = vsel %vm7921_vm7, %v3527_v21, %v3528_v56  ;;  %v3136_v20 = vor.u32 %v3135_v57, %v3132_v27  ;;  %2037 = vst.msk [vmem:[#allocation4 + $0xb0] sm:$0xff] %vm11190_vm15, %v2000_v7  ;;  %v11239_v56 = vld [vmem:[#allocation9_spill] sm:$0xff]  ;;  %v3507_v57 = vrot.slane %v8847_v42, 5 }
 0x138   : > { %v8989_v22 = vcombine.low %v3526_v54, %v3529_v26  ;;  %v3146_v58 = vor.u32 %v3145_v3, %v3141_v39  ;;  %v3151_v45 = vrot.slane %v3149_v13, 5  ;;  %v3506_v27 = vrot.slane %v3504_v18, 4  ;;  %v927_v3 = vld [vmem:[%s8472_s7 + $0x44] sm:$0xf] }
 0x139   : > { %v3137_v9 = vrot.slane %v3136_v20, 4  ;;  %v2786_v14 = vld [vmem:[#allocation3 + $0x60] sm:$0xf]  ;;  %v1087_v7 = vshrl.u32 %v927_v3, 16 }
 0x13a   : > { %v3147_v29 = vrot.slane %v3146_v58, 4  ;;  %v2787_v10 = vld [vmem:[#allocation3 + $0x64] sm:$0xf]  ;;  %2900 = vrot.lane.b32.xlu1 %v8843_v8, %s7536_s11  ;;  %3800 = vrot.lane.b32.xlu0 %v8769_v51, %s7537_s13  ;;  %v8996_v62 = vld [vmem:[#allocation3 + $0x68] sm:$0x1]  ;;  %v7050_v0 = vrot.slane %v2786_v14, 9 }
 0x13b   : > { %v3532_v11 = vrot.slane %v2787_v10, 5  ;;  %v3142_v15 = vsel %vm7934_vm10, %v3137_v9, %v3141_v39  ;;  %v3535_v63 = vrot.slane %v8996_v62, 5  ;;  %v9019_v21 = vcombine.low %v2786_v14, %v2787_v10  ;;  %v926_v39 = vld [vmem:[%s8472_s7 + $0x40] sm:$0xf] }
 0x13c   : > { %v3152_v31 = vsel %vm7934_vm10, %v3147_v29, %v3151_v45  ;;  %v1079_v26 = vshrl.u32 %v926_v39, 16  ;;  %v1089_v58 = vrot.slane %v1087_v7, 7  ;;  %v1090_v45 = vshll.u32 %v927_v3, 16  ;;  %v1319_v3 = vld [vmem:[#allocation3 + $0x6c] sm:$0xf] }
 0x13d   : > { %v9003_v4 = vcombine.low %v3142_v15, %v3152_v31  ;;  %v3533_v8 = vsel %vm7921_vm7, %v7050_v0, %v3532_v11  ;;  %v3534_v23 = vrot.slane %v3532_v11, 4  ;;  %v2002_v47 = vpop.permute.xlu0 %2001  ;;  %v3154_v9 = vshrl.u32 %v2786_v14, 16 }
 0x13e   : > { %2297 = vrot.lane.b32.xlu1 %v8538_v59, %s7530_s15  ;;  %3876 = vrot.lane.b32.xlu0 %v8951_v50, %s7538_s18  ;;  %2038 = vst.msk [vmem:[#allocation4 + $0xc0] sm:$0xff] %vm11190_vm15, %v2002_v47  ;;  %v7046_v59 = vrot.slane %v8824_v12, 9  ;;  %v1081_v42 = vrot.slane %v1079_v26, 7  ;;  %v3157_v29 = vshll.u32 %v2786_v14, 16  ;;  %v3163_v0 = vshll.u32 %v2787_v10, 16 }
 0x13f   : > { %4055 = vst.msk [vmem:[#allocation4 + $0x58] sm:$0xff] %vm11191_vm14, %v9003_v4  ;;  %v3536_v49 = vsel %vm7921_vm7, %v3534_v23, %v3535_v63  ;;  %v3167_v11 = vshrl.u32 %v2787_v10, 16  ;;  %v1082_v31 = vshll.u32 %v926_v39, 16  ;;  %v3173_v39 = vshll.u32 %v8996_v62, 16 }
 0x140   : > { %v9017_v54 = vcombine.low %v3533_v8, %v3536_v49  ;;  %v3505_v20 = vsel %vm7921_vm7, %v7046_v59, %v3504_v18  ;;  %v1085_v63 = vrot.slane %v1081_v42, 4  ;;  %v1092_v8 = vor.u32 %v1090_v45, %v1089_v58 }
 0x141   : > { %v3159_v23 = vrot.slane %v3157_v29, 5  ;;  %v3165_v18 = vrot.slane %v3163_v0, 5  ;;  %v3169_v47 = vrot.slane %v3167_v11, 4  ;;  %v1084_v14 = vor.u32 %v1082_v31, %v1081_v42 }
 0x142   : > { %2389 = vrot.lane.b32.xlu1 %v11238_v55, %s7527_s8  ;;  %2627 = vrot.lane.b32.xlu0 %v11239_v56, %s7534_s25  ;;  %v3508_v55 = vsel %vm7921_vm7, %v3506_v27, %v3507_v57  ;;  %v1093_v10 = vsel %vm7947_vm12, %v1085_v63, %v1092_v8  ;;  %v1094_v59 = vrot.slane %v1089_v58, 4  ;;  %v3175_v42 = vrot.slane %v3173_v39, 5 }
 0x143   : > { %v2004_v13 = vpop.permute.xlu1 %2003  ;;  %v9041_v49 = vcombine.low %v3505_v20, %v3508_v55  ;;  %v3170_v57 = vor.u32 %v3169_v47, %v3165_v18  ;;  %1322 = vst.msk [vmem:[#allocation3 + $0x70] sm:$0xf] %vm11189_vm0, %v1093_v10  ;;  %v1320_v7 = vsel %vm7941_vm11, %v1084_v14, %v1319_v3  ;;  %v9058_v62 = vcombine.low %v8824_v12, %v8837_v24 }
 0x144   : > { %2039 = vst.msk [vmem:[#allocation4 + $0xd0] sm:$0xff] %vm11190_vm15, %v2004_v13  ;;  %v1323_v13 = vld [vmem:[#allocation3 + $0x74] sm:$0x1]  ;;  %1321 = vst [vmem:[#allocation3 + $0x6c] sm:$0xf] %v1320_v7 }
 0x145   : > { %v3171_v55 = vrot.slane %v3170_v57, 4  ;;  %v929_v57 = vld [vmem:[%s8472_s7 + $0x4c] sm:$0xf] }
 0x146   : > { %2465 = vrot.lane.b32.xlu1 %v8433_v2, %s7532_s19  ;;  %2703 = vrot.lane.b32.xlu0 %v8454_v35, %s7529_s12  ;;  %v3156_v2 = vrot.slane %v3154_v9, 4 }
 0x147   : > { %v2006_v15 = vpop.permute.xlu0 %2005  ;;  %v3176_v45 = vsel %vm7934_vm10, %v3171_v55, %v3175_v42 }
 0x148   : > { %2040 = vst.msk [vmem:[#allocation4 + $0xe0] sm:$0xff] %vm11190_vm15, %v2006_v15  ;;  %v3160_v27 = vor.u32 %v3159_v23, %v3156_v2 }
 0x14a   : > { %2535 = vrot.lane.b32.xlu1 %v8555_v48, %s7528_s9  ;;  %3399 = vrot.lane.b32.xlu0 %v8769_v51, %s7531_s16  ;;  %v1324_v51 = vsel %vm7954_vm13, %v1094_v59, %v1323_v13  ;;  %v3161_v20 = vrot.slane %v3160_v27, 4  ;;  %v9075_v12 = vld [vmem:[#allocation3 + $0x70] sm:$0xf]  ;;  %v11240_v59 = vld [vmem:[#allocation10_spill] sm:$0xff]  ;;  %v1104_v13 = vshrl.u32 %v929_v57, 16 }
 0x14b   : > { %v2226_v26 = vpop.permute.xlu0 %2225  ;;  %1325 = vst [vmem:[#allocation3 + $0x74] sm:$0x1] %v1324_v51  ;;  %v3539_v24 = vrot.slane %v9075_v12, 5  ;;  %v2789_v0 = vld [vmem:[#allocation3 + $0x6c] sm:$0xf] }
 0x14c   : > { %2272 = vst.msk [vmem:[#allocation4 + $0x20] sm:$0xff] %vm11188_vm1, %v2226_v26  ;;  %v3166_v58 = vsel %vm7934_vm10, %v3161_v20, %v3165_v18  ;;  %v7051_v15 = vrot.slane %v2789_v0, 9  ;;  %v9099_v10 = vcombine.low %v2789_v0, %v9075_v12  ;;  %v928_v27 = vld [vmem:[%s8472_s7 + $0x48] sm:$0xf]  ;;  %v1106_v7 = vrot.slane %v1104_v13, 7 }
 0x14d   : > { %v9066_v29 = vcombine.low %v3166_v58, %v3176_v45  ;;  %v3541_v31 = vrot.slane %v3539_v24, 4  ;;  %v1096_v3 = vshrl.u32 %v928_v27, 16  ;;  %v1099_v55 = vshll.u32 %v928_v27, 16 }
 0x14e   : > { %4081 = vrot.lane.b32.xlu1 %v9041_v49, %s7526_s28  ;;  %3640 = vrot.lane.b32.xlu0 %v8951_v50, %s7533_s20  ;;  %v3540_v8 = vsel %vm7921_vm7, %v7051_v15, %v3539_v24  ;;  %v3178_v24 = vshrl.u32 %v2789_v0, 16  ;;  %v3187_v15 = vshll.u32 %v9075_v12, 16 }
 0x14f   : > { %v2230_v9 = vpop.permute.xlu0 %2229  ;;  %4056 = vst.msk [vmem:[#allocation4 + $0x68] sm:$0xff] %vm11191_vm14, %v9066_v29  ;;  %v1098_v26 = vrot.slane %v1096_v3, 7 }
 0x150   : > { %2274 = vst.msk [vmem:[#allocation4 + $0x40] sm:$0xff] %vm11188_vm1, %v2230_v9  ;;  %v1111_v9 = vrot.slane %v1106_v7, 4  ;;  %v3189_v27 = vrot.slane %v3187_v15, 5 }
 0x151   : > { %v1102_v42 = vrot.slane %v1098_v26, 4 }
 0x152   : > { %3946 = vrot.lane.b32.xlu1 %v9058_v62, %s7539_s22  ;;  %3710 = vrot.lane.b32.xlu0 %v9058_v62, %s7535_s29  ;;  %v9078_v11 = vld [vmem:[#allocation3 + $0x74] sm:$0x1] }
 0x153   : > { %v2234_v50 = vpop.permute.xlu0 %2233  ;;  %v3542_v63 = vrot.slane %v9078_v11, 5  ;;  %v3197_v3 = vshll.u32 %v9078_v11, 16 }
 0x154   : > { %2276 = vst.msk [vmem:[#allocation4 + $0x60] sm:$0xff] %vm11188_vm1, %v2234_v50  ;;  %v3181_v50 = vshll.u32 %v2789_v0, 16 }
 0x155   : > { %v3543_v2 = vsel %vm7921_vm7, %v3541_v31, %v3542_v63  ;;  %v3191_v31 = vshrl.u32 %v9075_v12, 16  ;;  %v1326_v63 = vld [vmem:[#allocation3 + $0x78] sm:$0xf] }
 0x156   : > { %2902 = vrot.lane.b32.xlu1 %v8959_v53, %s7536_s11  ;;  %3802 = vrot.lane.b32.xlu0 %v8889_v52, %s7537_s13  ;;  %v9090_v47 = vcombine.low %v3540_v8, %v3543_v2 }
 0x157   : > { %v2008_v23 = vpop.permute.xlu1 %2007 }
 0x158   : > { %v2238_v18 = vpop.permute.xlu0 %2237  ;;  %2041 = vst.msk [vmem:[#allocation4 + $0xf0] sm:$0xff] %vm11190_vm15, %v2008_v23  ;;  %vm11199_vm15 = vcmask 851712  }
 0x159   : > { %2278 = vst.msk [vmem:[#allocation4 + $0x80] sm:$0xff] %vm11188_vm1, %v2238_v18  ;;  %v3180_v18 = vrot.slane %v3178_v24, 4 }
 0x15a   : > { %2299 = vrot.lane.b32.xlu1 %v8555_v48, %s7530_s15  ;;  %3878 = vrot.lane.b32.xlu0 %v9041_v49, %s7538_s18 }
 0x15b   : > { %v2228_v53 = vpop.permute.xlu1 %2227 }
 0x15c   : > { %v2384_v14 = vpop.permute.xlu0 %2383  ;;  %2273 = vst.msk [vmem:[#allocation4 + $0x30] sm:$0xff] %vm11188_vm1, %v2228_v53  ;;  %v3183_v53 = vrot.slane %v3181_v50, 5 }
 0x15e   : > { %2391 = vrot.lane.b32.xlu1 %v11239_v56, %s7527_s8  ;;  %2629 = vrot.lane.b32.xlu0 %v11240_v59, %s7534_s25  ;;  %v1107_v56 = vshll.u32 %v929_v57, 16  ;;  %v3193_v57 = vrot.slane %v3191_v31, 4  ;;  %v3184_v0 = vor.u32 %v3183_v53, %v3180_v18 }
 0x15f   : > { %v2232_v39 = vpop.permute.xlu1 %2231 }
 0x160   : > { %v2530_v48 = vpop.permute.xlu0 %2529  ;;  %2275 = vst.msk [vmem:[#allocation4 + $0x50] sm:$0xff] %vm11188_vm1, %v2232_v39  ;;  %v1109_v58 = vor.u32 %v1107_v56, %v1106_v7  ;;  %v3194_v39 = vor.u32 %v3193_v57, %v3189_v27  ;;  %v3185_v7 = vrot.slane %v3184_v0, 4 }
 0x162   : > { %2467 = vrot.lane.b32.xlu1 %v8454_v35, %s7532_s19  ;;  %2705 = vrot.lane.b32.xlu0 %v8460_v17, %s7529_s12  ;;  %v1101_v35 = vor.u32 %v1099_v55, %v1098_v26  ;;  %v1110_v45 = vsel %vm7947_vm12, %v1102_v42, %v1109_v58  ;;  %v3195_v56 = vrot.slane %v3194_v39, 4  ;;  %v3190_v11 = vsel %vm7934_vm10, %v3185_v7, %v3189_v27 }
 0x163   : > { %v2236_v51 = vpop.permute.xlu1 %2235  ;;  %1329 = vst.msk [vmem:[#allocation3 + $0x7c] sm:$0xf] %vm11189_vm0, %v1110_v45  ;;  %vm3682_vm0 = vcmask 786112  }
 0x164   : > { %v2698_v20 = vpop.permute.xlu0 %2697  ;;  %2277 = vst.msk [vmem:[#allocation4 + $0x70] sm:$0xff] %vm11188_vm1, %v2236_v51  ;;  %v1327_v23 = vsel %vm7941_vm11, %v1101_v35, %v1326_v63  ;;  %vm3441_vm1 = vcmask 720512  }
 0x165   : > { %1328 = vst [vmem:[#allocation3 + $0x78] sm:$0xf] %v1327_v23 }
 0x166   : > { %2537 = vrot.lane.b32.xlu1 %v8574_v16, %s7528_s9  ;;  %3401 = vrot.lane.b32.xlu0 %v8889_v52, %s7531_s16  ;;  %v1330_v52 = vld [vmem:[#allocation3 + $0x80] sm:$0x1] }
 0x167   : > { %v2292_v8 = vpop.permute.xlu1 %2291  ;;  %v1331_v12 = vsel %vm7954_vm13, %v1111_v9, %v1330_v52 }
 0x168   : > { %v3394_v2 = vpop.permute.xlu0 %3393  ;;  %2340 = vst.msk [vmem:[#allocation4] sm:$0xff] %vm11198_vm2, %v2292_v8  ;;  %1332 = vst [vmem:[#allocation3 + $0x80] sm:$0x1] %v1331_v12  ;;  %v931_v12 = vld [vmem:[%s8472_s7 + $0x54] sm:$0xf] }
 0x169   : > { %2432 = vst.msk [vmem:[#allocation4] sm:$0xff] %vm11193_vm3, %v2384_v14  ;;  %v3199_v14 = vrot.slane %v3197_v3, 5 }
 0x16a   : > { %4083 = vrot.lane.b32.xlu1 %v8891_v19, %s7526_s28  ;;  %3642 = vrot.lane.b32.xlu0 %v9041_v49, %s7533_s20  ;;  %v9140_v49 = vld [vmem:[#allocation3 + $0x7c] sm:$0xf] }
 0x16b   : > { %v3200_v51 = vsel %vm7934_vm10, %v3195_v56, %v3199_v14  ;;  %v3546_v55 = vrot.slane %v9140_v49, 5  ;;  %v3211_v14 = vshll.u32 %v9140_v49, 16 }
 0x16c   : > { %v2460_v13 = vpop.permute.xlu1 %2459  ;;  %v3635_v26 = vpop.permute.xlu0 %3634  ;;  %v9147_v35 = vcombine.low %v3190_v11, %v3200_v51  ;;  %v3215_v11 = vshrl.u32 %v9140_v49, 16 }
 0x16d   : > { %2508 = vst.msk [vmem:[#allocation4] sm:$0xff] %vm11194_vm4, %v2460_v13  ;;  %v3548_v9 = vrot.slane %v3546_v55, 4 }
 0x16e   : > { %3948 = vrot.lane.b32.xlu1 %v8870_v6, %s7539_s22  ;;  %2578 = vst.msk [vmem:[#allocation4] sm:$0xff] %vm11195_vm5, %v2530_v48  ;;  %3712 = vrot.lane.b32.xlu0 %v8870_v6, %s7535_s29  ;;  %v9149_v48 = vld [vmem:[#allocation3 + $0x78] sm:$0xf] }
 0x16f   : > { %v7052_v45 = vrot.slane %v9149_v48, 9  ;;  %4057 = vst.msk [vmem:[#allocation4 + $0x78] sm:$0xff] %vm11191_vm14, %v9147_v35  ;;  %v9160_v24 = vld [vmem:[#allocation3 + $0x80] sm:$0x1]  ;;  %vm11196_vm14 = vcmask 917312   ;;  %v9179_v52 = vcombine.low %v9149_v48, %v9140_v49  ;;  %v3202_v7 = vshrl.u32 %v9149_v48, 16 }
 0x170   : > { %v2622_v42 = vpop.permute.xlu1 %2621  ;;  %v3705_v58 = vpop.permute.xlu0 %3704  ;;  %v3549_v15 = vrot.slane %v9160_v24, 5  ;;  %v3205_v56 = vshll.u32 %v9149_v48, 16 }
 0x171   : > { %2670 = vst.msk [vmem:[#allocation4] sm:$0xff] %vm2669_vm6, %v2622_v42  ;;  %v3547_v50 = vsel %vm7921_vm7, %v7052_v45, %v3546_v55 }
 0x172   : > { %2904 = vrot.lane.b32.xlu1 %v9058_v62, %s7536_s11  ;;  %2746 = vst.msk [vmem:[#allocation4] sm:$0xff] %vm11192_vm8, %v2698_v20  ;;  %3804 = vrot.lane.b32.xlu0 %v8921_v44, %s7537_s13  ;;  %v3550_v20 = vsel %vm7921_vm7, %v3548_v9, %v3549_v15  ;;  %vm11197_vm8 = vcmask 982912   ;;  %v3204_v9 = vrot.slane %v3202_v7, 4  ;;  %v3213_v15 = vrot.slane %v3211_v14, 5 }
 0x173   : > { %v9173_v63 = vcombine.low %v3547_v50, %v3550_v20  ;;  %v3207_v50 = vrot.slane %v3205_v56, 5 }
 0x174   : > { %v2897_v31 = vpop.permute.xlu1 %2896  ;;  %v3797_v62 = vpop.permute.xlu0 %3796 }
 0x175   : > { %2945 = vst.msk [vmem:[#allocation4] sm:$0xff] %vm2944_vm9, %v2897_v31  ;;  %v3217_v31 = vrot.slane %v3215_v11, 4  ;;  %v3208_v20 = vor.u32 %v3207_v50, %v3204_v9  ;;  %v932_v9 = vld [vmem:[%s8472_s7 + $0x58] sm:$0xf]  ;;  %v933_v50 = vld [vmem:[%s8472_s7 + $0x5c] sm:$0xf] }
 0x176   : > { %2301 = vrot.lane.b32.xlu1 %v8574_v16, %s7530_s15  ;;  %3442 = vst.msk [vmem:[#allocation4] sm:$0xff] %vm3441_vm1, %v3394_v2  ;;  %3880 = vrot.lane.b32.xlu0 %v8891_v19, %s7538_s18  ;;  %v11241_v16 = vld [vmem:[#allocation11_spill] sm:$0xff] }
 0x177   : > { %3683 = vst.msk [vmem:[#allocation4] sm:$0xff] %vm3682_vm0, %v3635_v26 }
 0x178   : > { %v2294_v8 = vpop.permute.xlu1 %2293  ;;  %3753 = vst.msk [vmem:[#allocation4] sm:$0xff] %vm11199_vm15, %v3705_v58  ;;  %v3873_v23 = vpop.permute.xlu0 %3872 }
 0x179   : > { %2341 = vst.msk [vmem:[#allocation4 + $0x10] sm:$0xff] %vm11198_vm2, %v2294_v8  ;;  %v3218_v8 = vor.u32 %v3217_v31, %v3213_v15 }
 0x17a   : > { %3845 = vst.msk [vmem:[#allocation4] sm:$0xff] %vm11196_vm14, %v3797_v62  ;;  %2393 = vrot.lane.b32.xlu1 %v11240_v59, %s7527_s8  ;;  %2631 = vrot.lane.b32.xlu0 %v11241_v16, %s7534_s25 }
 0x17b   : > { %3921 = vst.msk [vmem:[#allocation4] sm:$0xff] %vm11197_vm8, %v3873_v23  ;;  %v3221_v23 = vshll.u32 %v9160_v24, 16 }
 0x17c   : > { %v2386_v2 = vpop.permute.xlu1 %2385  ;;  %v2624_v18 = vpop.permute.xlu0 %2623 }
 0x17d   : > { %2433 = vst.msk [vmem:[#allocation4 + $0x10] sm:$0xff] %vm11193_vm3, %v2386_v2  ;;  %vm11242_vm3 = vcmask 589312   ;;  %v1333_v2 = vld [vmem:[#allocation3 + $0x84] sm:$0xf]  ;;  %v3223_v24 = vrot.slane %v3221_v23, 5  ;;  %v1141_v23 = vshll.u32 %v933_v50, 16 }
 0x17e   : > { %2469 = vrot.lane.b32.xlu1 %v8460_v17, %s7532_s19  ;;  %2707 = vrot.lane.b32.xlu0 %v8505_v61, %s7529_s12  ;;  %v930_v17 = vld [vmem:[%s8472_s7 + $0x50] sm:$0xf] }
 0x17f   : > { %v1113_v3 = vshrl.u32 %v930_v17, 16  ;;  %v1116_v42 = vshll.u32 %v930_v17, 16 }
 0x180   : > { %v2462_v53 = vpop.permute.xlu1 %2461  ;;  %v2700_v27 = vpop.permute.xlu0 %2699 }
 0x181   : > { %2509 = vst.msk [vmem:[#allocation4 + $0x10] sm:$0xff] %vm11194_vm4, %v2462_v53  ;;  %vm11243_vm4 = vcmask 130112   ;;  %v1115_v13 = vrot.slane %v1113_v3, 7 }
 0x182   : > { %2539 = vrot.lane.b32.xlu1 %v8576_v41, %s7528_s9  ;;  %3403 = vrot.lane.b32.xlu0 %v8921_v44, %s7531_s16  ;;  %v1121_v44 = vshrl.u32 %v931_v12, 16 }
 0x183   : > { %v1119_v58 = vrot.slane %v1115_v13, 4  ;;  %v1118_v48 = vor.u32 %v1116_v42, %v1115_v13 }
 0x184   : > { %v2532_v59 = vpop.permute.xlu1 %2531  ;;  %v3396_v57 = vpop.permute.xlu0 %3395  ;;  %v1123_v26 = vrot.slane %v1121_v44, 7 }
 0x185   : > { %2579 = vst.msk [vmem:[#allocation4 + $0x10] sm:$0xff] %vm11195_vm5, %v2532_v59  ;;  %vm3990_vm5 = vcmask 1048512   ;;  %v1334_v59 = vsel %vm7941_vm11, %v1118_v48, %v1333_v2 }
 0x186   : > { %4085 = vrot.lane.b32.xlu1 %v8944_v5, %s7526_s28  ;;  %2671 = vst.msk [vmem:[#allocation4 + $0x10] sm:$0xff] %vm2669_vm6, %v2624_v18  ;;  %3644 = vrot.lane.b32.xlu0 %v8891_v19, %s7533_s20  ;;  %v1124_v19 = vshll.u32 %v931_v12, 16  ;;  %v1128_v62 = vrot.slane %v1123_v26, 4  ;;  %v1337_v18 = vld [vmem:[#allocation3 + $0x8c] sm:$0x1]  ;;  %v3209_v12 = vrot.slane %v3208_v20, 4 }
 0x187   : > { %2747 = vst.msk [vmem:[#allocation4 + $0x10] sm:$0xff] %vm11242_vm3, %v2700_v27  ;;  %vm4252_vm3 = vcmask 130048   ;;  %1335 = vst [vmem:[#allocation3 + $0x84] sm:$0xf] %v1334_v59  ;;  %v1133_v20 = vshll.u32 %v932_v9, 16 }
 0x188   : > { %v4078_v0 = vpop.permute.xlu1 %4077  ;;  %v3637_v39 = vpop.permute.xlu0 %3636  ;;  %v1126_v45 = vor.u32 %v1124_v19, %v1123_v26  ;;  %v1338_v17 = vsel %vm7954_vm13, %v1128_v62, %v1337_v18  ;;  %v3214_v3 = vsel %vm7934_vm10, %v3209_v12, %v3213_v15  ;;  %v1138_v62 = vshrl.u32 %v933_v50, 16  ;;  %v1340_v59 = vld [vmem:[#allocation3 + $0x90] sm:$0xf] }
 0x189   : > { %4125 = vst.msk [vmem:[#allocation4 + $0x8] sm:$0xff] %vm11243_vm4, %v4078_v0  ;;  %vm11244_vm4 = vcmask 60416   ;;  %v3219_v0 = vrot.slane %v3218_v8, 4  ;;  %1339 = vst [vmem:[#allocation3 + $0x8c] sm:$0x1] %v1338_v17 }
 0x18a   : > { %3950 = vrot.lane.b32.xlu1 %v8923_v28, %s7539_s22  ;;  %3714 = vrot.lane.b32.xlu0 %v8923_v28, %s7535_s29  ;;  %v1127_v49 = vsel %vm7947_vm12, %v1119_v58, %v1126_v45  ;;  %v1140_v8 = vrot.slane %v1138_v62, 7 }
 0x18b   : > { %1336 = vst.msk [vmem:[#allocation3 + $0x88] sm:$0xf] %vm11244_vm4, %v1127_v49  ;;  %v3224_v44 = vsel %vm7934_vm10, %v3219_v0, %v3223_v24  ;;  %vm11246_vm4 = vcmask 64512   ;;  %v1130_v49 = vshrl.u32 %v932_v9, 16 }
 0x18c   : > { %v3943_v51 = vpop.permute.xlu1 %3942  ;;  %v3707_v55 = vpop.permute.xlu0 %3706 }
 0x18d   : > { %3991 = vst.msk [vmem:[#allocation4] sm:$0xff] %vm3990_vm5, %v3943_v51 }
 0x18e   : > { %2906 = vrot.lane.b32.xlu1 %v8870_v6, %s7536_s11  ;;  %3806 = vrot.lane.b32.xlu0 %v8964_v32, %s7537_s13  ;;  %v9256_v11 = vld [vmem:[#allocation3 + $0x84] sm:$0xf] }
 0x190   : > { %v2899_v53 = vpop.permute.xlu1 %2898  ;;  %v4142_v27 = vld [vmem:[#allocation4 + $0x8] sm:$0xff]  ;;  %v3799_v6 = vpop.permute.xlu0 %3798  ;;  %v9258_v51 = vld [vmem:[#allocation3 + $0x8c] sm:$0x1] }
 0x191   : > { %2946 = vst.msk [vmem:[#allocation4 + $0x10] sm:$0xff] %vm2944_vm9, %v2899_v53  ;;  %7092 = vmatprep.mubr.msk.bf16.mxu0 %vm4252_vm3, %v4142_v27  ;;  %v3556_v42 = vrot.slane %v9258_v51, 5 }
 0x192   : > { %3443 = vst.msk [vmem:[#allocation4 + $0x10] sm:$0xff] %vm3441_vm1, %v3396_v57  ;;  %2303 = vrot.lane.b32.xlu1 %v8576_v41, %s7530_s15  ;;  %3882 = vrot.lane.b32.xlu0 %v8944_v5, %s7538_s18  ;;  %v9242_v57 = vcombine.low %v3214_v3, %v3224_v44  ;;  %v11245_v41 = vld [vmem:[#allocation12_spill] sm:$0xff]  ;;  %v1145_v3 = vrot.slane %v1140_v8, 4 }
 0x193   : > { %3684 = vst.msk [vmem:[#allocation4 + $0x10] sm:$0xff] %vm3682_vm0, %v3637_v39  ;;  %v9253_v39 = vld [vmem:[#allocation3 + $0x88] sm:$0xf]  ;;  %v7493_v44 = vld [vmem:[#allocation2 + $0x70] sm:$0xf] }
 0x194   : > { %v2296_v13 = vpop.permute.xlu1 %2295  ;;  %v4141_v26 = vld [vmem:[#allocation4] sm:$0xff]  ;;  %3754 = vst.msk [vmem:[#allocation4 + $0x10] sm:$0xff] %vm11199_vm15, %v3707_v55  ;;  %v3875_v19 = vpop.permute.xlu0 %3874  ;;  %v3553_v7 = vrot.slane %v9253_v39, 5  ;;  %v9294_v24 = vcombine.low %v9256_v11, %v9253_v39 }
 0x195   : > { %2342 = vst.msk [vmem:[#allocation4 + $0x20] sm:$0xff] %vm11198_vm2, %v2296_v13  ;;  %4334 = vmatmul.mubr.bf16.vlgmr.msra.gmra.mrb[0].mxu0 %v4141_v26  ;;  %v2126_v13 = vrot.slane %v7493_v44, 5  ;;  %v11255_v44 = vld [vmem:[#allocation13_spill] sm:$0xff] }
 0x196   : > { %3846 = vst.msk [vmem:[#allocation4 + $0x10] sm:$0xff] %vm11196_vm14, %v3799_v6  ;;  %2395 = vrot.lane.b32.xlu1 %v11241_v16, %s7527_s8  ;;  %2633 = vrot.lane.b32.xlu0 %v11245_v41, %s7534_s25  ;;  %vm11247_vm14 = vcmask 326912   ;;  %v7053_v16 = vrot.slane %v9256_v11, 9  ;;  %v3555_v55 = vrot.slane %v3553_v7, 4  ;;  %v1143_v6 = vor.u32 %v1141_v23, %v1140_v8 }
 0x197   : > { %3922 = vst.msk [vmem:[#allocation4 + $0x10] sm:$0xff] %vm11197_vm8, %v3875_v19  ;;  %vm11251_vm8 = vcmask 60416  }
 0x198   : > { %4058 = vst.msk [vmem:[#allocation4 + $0x88] sm:$0xff] %vm11246_vm4, %v9242_v57  ;;  %v2388_v56 = vpop.permute.xlu1 %2387  ;;  %v2626_v14 = vpop.permute.xlu0 %2625  ;;  %v3554_v58 = vsel %vm7921_vm7, %v7053_v16, %v3553_v7  ;;  %v3557_v45 = vsel %vm7921_vm7, %v3555_v55, %v3556_v42  ;;  %vm11249_vm4 = vcmask 458112   ;;  %v7495_v16 = vld [vmem:[#allocation2 + $0x6c] sm:$0xf]  ;;  %v2128_v42 = vrot.slane %v2126_v13, 4 }
 0x199   : > { %2434 = vst.msk [vmem:[#allocation4 + $0x20] sm:$0xff] %vm11247_vm14, %v2388_v56  ;;  %v9273_v48 = vcombine.low %v3554_v58, %v3557_v45  ;;  %vm11248_vm14 = vcmask 392512   ;;  %v7494_v56 = vld [vmem:[#allocation2 + $0x74] sm:$0x1]  ;;  %v6979_v55 = vrot.slane %v7495_v16, 9 }
 0x19a   : > { %2471 = vrot.lane.b32.xlu1 %v8505_v61, %s7532_s19  ;;  %2709 = vrot.lane.b32.xlu0 %v8495_v60, %s7529_s12  ;;  %v1132_v61 = vrot.slane %v1130_v49, 7 }
 0x19c   : > { %v2464_v15 = vpop.permute.xlu1 %2463  ;;  %v2702_v31 = vpop.permute.xlu0 %2701  ;;  %v1135_v53 = vor.u32 %v1133_v20, %v1132_v61  ;;  %v1136_v27 = vrot.slane %v1132_v61, 4 }
 0x19d   : > { %2510 = vst.msk [vmem:[#allocation4 + $0x20] sm:$0xff] %vm11248_vm14, %v2464_v15  ;;  %vm11250_vm14 = vcmask 589312  }
 0x19e   : > { %2541 = vrot.lane.b32.xlu1 %v8586_v40, %s7528_s9  ;;  %3405 = vrot.lane.b32.xlu0 %v8964_v32, %s7531_s16  ;;  %v1144_v32 = vsel %vm7947_vm12, %v1136_v27, %v1143_v6  ;;  %v1341_v17 = vsel %vm7941_vm11, %v1135_v53, %v1340_v59  ;;  %v2127_v53 = vsel %vm7921_vm7, %v6979_v55, %v2126_v13 }
 0x19f   : > { %1342 = vst [vmem:[#allocation3 + $0x90] sm:$0xf] %v1341_v17  ;;  %1343 = vst.msk [vmem:[#allocation3 + $0x94] sm:$0xf] %vm11251_vm8, %v1144_v32  ;;  %vm11253_vm8 = vcmask 917312  }
 0x1a0   : > { %v2534_v2 = vpop.permute.xlu1 %2533  ;;  %v3398_v18 = vpop.permute.xlu0 %3397 }
 0x1a1   : > { %2580 = vst.msk [vmem:[#allocation4 + $0x20] sm:$0xff] %vm11249_vm4, %v2534_v2  ;;  %vm11252_vm4 = vcmask 130112  }
 0x1a2   : > { %4087 = vrot.lane.b32.xlu1 %v8989_v22, %s7526_s28  ;;  %2672 = vst.msk [vmem:[#allocation4 + $0x20] sm:$0xff] %vm2669_vm6, %v2626_v14  ;;  %3646 = vrot.lane.b32.xlu0 %v8944_v5, %s7533_s20  ;;  %v1344_v5 = vld [vmem:[#allocation3 + $0x98] sm:$0x1]  ;;  %v2129_v14 = vrot.slane %v7494_v56, 5  ;;  %v935_v56 = vld [vmem:[%s8472_s7 + $0x64] sm:$0xf] }
 0x1a3   : > { %2748 = vst.msk [vmem:[#allocation4 + $0x20] sm:$0xff] %vm11250_vm14, %v2702_v31  ;;  %v1345_v26 = vsel %vm7954_vm13, %v1145_v3, %v1344_v5  ;;  %vm11254_vm14 = vcmask 982912  }
 0x1a4   : > { %v4080_v12 = vpop.permute.xlu1 %4079  ;;  %v3639_v0 = vpop.permute.xlu0 %3638  ;;  %1346 = vst [vmem:[#allocation3 + $0x98] sm:$0x1] %v1345_v26  ;;  %v2130_v6 = vsel %vm7921_vm7, %v2128_v42, %v2129_v14  ;;  %v1155_v42 = vshrl.u32 %v935_v56, 16 }
 0x1a5   : > { %4126 = vst.msk [vmem:[#allocation4 + $0x18] sm:$0xff] %vm11252_vm4, %v4080_v12  ;;  %v9340_v13 = vcombine.low %v2127_v53, %v2130_v6  ;;  %vm11256_vm4 = vcmask 326912   ;;  %v1347_v6 = vld [vmem:[#allocation3 + $0x9c] sm:$0xf] }
 0x1a6   : > { %3952 = vrot.lane.b32.xlu1 %v8976_v46, %s7539_s22  ;;  %3716 = vrot.lane.b32.xlu0 %v8976_v46, %s7535_s29  ;;  %v9308_v58 = vld [vmem:[#allocation3 + $0x90] sm:$0xf]  ;;  %v9310_v45 = vld [vmem:[#allocation3 + $0x94] sm:$0xf] }
 0x1a7   : > { %v3250_v9 = vshrl.u32 %v9308_v58, 16  ;;  %v3253_v50 = vshll.u32 %v9308_v58, 16  ;;  %v3263_v15 = vshrl.u32 %v9310_v45, 16  ;;  %v3259_v31 = vshll.u32 %v9310_v45, 16 }
 0x1a8   : > { %v3945_v19 = vpop.permute.xlu1 %3944  ;;  %v3709_v7 = vpop.permute.xlu0 %3708  ;;  %v9318_v61 = vcombine.low %v9308_v58, %v9310_v45 }
 0x1a9   : > { %3992 = vst.msk [vmem:[#allocation4 + $0x10] sm:$0xff] %vm3990_vm5, %v3945_v19  ;;  %v3252_v20 = vrot.slane %v3250_v9, 4  ;;  %v3255_v8 = vrot.slane %v3253_v50, 5  ;;  %v3261_v23 = vrot.slane %v3259_v31, 5  ;;  %v3265_v2 = vrot.slane %v3263_v15, 4 }
 0x1aa   : > { %2908 = vrot.lane.b32.xlu1 %v8923_v28, %s7536_s11  ;;  %3808 = vrot.lane.b32.xlu0 %v9003_v4, %s7537_s13  ;;  %v1157_v15 = vrot.slane %v1155_v42, 7  ;;  %v1158_v31 = vshll.u32 %v935_v56, 16  ;;  %v9393_v56 = vld [vmem:[#allocation2 + $0x80] sm:$0x1] }
 0x1ab   : > { %v2800_v27 = vld [vmem:[#allocation3 + $0x98] sm:$0x1]  ;;  %v3256_v59 = vor.u32 %v3255_v8, %v3252_v20  ;;  %v3266_v32 = vor.u32 %v3265_v2, %v3261_v23 }
 0x1ac   : > { %v2901_v49 = vpop.permute.xlu1 %2900  ;;  %v4144_v28 = vld [vmem:[#allocation4 + $0x18] sm:$0xff]  ;;  %v3801_v62 = vpop.permute.xlu0 %3800  ;;  %v3269_v17 = vshll.u32 %v2800_v27, 16  ;;  %v3563_v53 = vrot.slane %v2800_v27, 5 }
 0x1ad   : > { %2947 = vst.msk [vmem:[#allocation4 + $0x20] sm:$0xff] %vm2944_vm9, %v2901_v49  ;;  %7093 = vmatprep.mubr.msk.bf16.mxu0 %vm4252_vm3, %v4144_v28  ;;  %v3257_v3 = vrot.slane %v3256_v59, 4  ;;  %v3560_v49 = vrot.slane %v9310_v45, 5 }
 0x1ae   : > { %3444 = vst.msk [vmem:[#allocation4 + $0x20] sm:$0xff] %vm3441_vm1, %v3398_v18  ;;  %2305 = vrot.lane.b32.xlu1 %v8586_v40, %s7530_s15  ;;  %3884 = vrot.lane.b32.xlu0 %v8989_v22, %s7538_s18  ;;  %v3271_v5 = vrot.slane %v3269_v17, 5 }
 0x1af   : > { %3685 = vst.msk [vmem:[#allocation4 + $0x20] sm:$0xff] %vm3682_vm0, %v3639_v0  ;;  %v3267_v0 = vrot.slane %v3266_v32, 4  ;;  %v3262_v26 = vsel %vm7934_vm10, %v3257_v3, %v3261_v23  ;;  %v1160_v23 = vor.u32 %v1158_v31, %v1157_v15  ;;  %v3562_v2 = vrot.slane %v3560_v49, 4 }
 0x1b0   : > { %v2298_v12 = vpop.permute.xlu1 %2297  ;;  %v4143_v18 = vld [vmem:[#allocation4 + $0x10] sm:$0xff]  ;;  %3755 = vst.msk [vmem:[#allocation4 + $0x20] sm:$0xff] %vm11199_vm15, %v3709_v7  ;;  %v3877_v40 = vpop.permute.xlu0 %3876 }
 0x1b1   : > { %2343 = vst.msk [vmem:[#allocation4 + $0x30] sm:$0xff] %vm11198_vm2, %v2298_v12  ;;  %4342 = vmatmul.mubr.bf16.gmra.mrb[4].mxu0 %v4143_v18  ;;  %v3272_v19 = vsel %vm7934_vm10, %v3267_v0, %v3271_v5  ;;  %v934_v7 = vld [vmem:[%s8472_s7 + $0x60] sm:$0xf]  ;;  %v1351_v18 = vld [vmem:[#allocation3 + $0xa4] sm:$0x1]  ;;  %v3226_v5 = vshrl.u32 %v9256_v11, 16 }
 0x1b2   : > { %3847 = vst.msk [vmem:[#allocation4 + $0x20] sm:$0xff] %vm11253_vm8, %v3801_v62  ;;  %2397 = vrot.lane.b32.xlu1 %v11245_v41, %s7527_s8  ;;  %2635 = vrot.lane.b32.xlu0 %v11255_v44, %s7534_s25  ;;  %v9348_v55 = vcombine.low %v3262_v26, %v3272_v19  ;;  %v1147_v41 = vshrl.u32 %v934_v7, 16  ;;  %vm11257_vm8 = vcmask 64512   ;;  %v1150_v50 = vshll.u32 %v934_v7, 16 }
 0x1b3   : > { %3923 = vst.msk [vmem:[#allocation4 + $0x20] sm:$0xff] %vm11254_vm14, %v3877_v40  ;;  %vm11258_vm14 = vcmask 392512   ;;  %v9383_v40 = vld [vmem:[#allocation2 + $0x7c] sm:$0xf]  ;;  %v3229_v26 = vshll.u32 %v9256_v11, 16  ;;  %v3235_v19 = vshll.u32 %v9253_v39, 16 }
 0x1b4   : > { %v2390_v14 = vpop.permute.xlu1 %2389  ;;  %v2628_v16 = vpop.permute.xlu0 %2627  ;;  %4060 = vst.msk [vmem:[#allocation4 + $0xa8] sm:$0xff] %vm11257_vm8, %v9348_v55  ;;  %v1149_v9 = vrot.slane %v1147_v41, 7  ;;  %vm11260_vm8 = vcmask 458112   ;;  %v2133_v3 = vrot.slane %v9383_v40, 5  ;;  %v3239_v7 = vshrl.u32 %v9253_v39, 16 }
 0x1b5   : > { %2435 = vst.msk [vmem:[#allocation4 + $0x30] sm:$0xff] %vm11256_vm4, %v2390_v14  ;;  %vm11259_vm4 = vcmask 60416   ;;  %v3228_v41 = vrot.slane %v3226_v5, 4  ;;  %v3231_v42 = vrot.slane %v3229_v26, 5  ;;  %v7498_v39 = vld [vmem:[#allocation2 + $0x78] sm:$0xf] }
 0x1b6   : > { %2473 = vrot.lane.b32.xlu1 %v8495_v60, %s7532_s19  ;;  %2711 = vrot.lane.b32.xlu0 %v9340_v13, %s7529_s12  ;;  %v1152_v20 = vor.u32 %v1150_v50, %v1149_v9  ;;  %v1153_v8 = vrot.slane %v1149_v9, 4  ;;  %v7054_v60 = vrot.slane %v9308_v58, 9  ;;  %v3564_v58 = vsel %vm7921_vm7, %v3562_v2, %v3563_v53 }
 0x1b7   : > { %v3237_v9 = vrot.slane %v3235_v19, 5  ;;  %v3241_v50 = vrot.slane %v3239_v7, 4  ;;  %v6980_v11 = vrot.slane %v7498_v39, 9 }
 0x1b8   : > { %v2466_v28 = vpop.permute.xlu1 %2465  ;;  %v2704_v62 = vpop.permute.xlu0 %2703  ;;  %v1161_v45 = vsel %vm7947_vm12, %v1153_v8, %v1160_v23  ;;  %v1348_v59 = vsel %vm7941_vm11, %v1152_v20, %v1347_v6  ;;  %v3561_v32 = vsel %vm7921_vm7, %v7054_v60, %v3560_v49  ;;  %v3232_v8 = vor.u32 %v3231_v42, %v3228_v41  ;;  %v936_v23 = vld [vmem:[%s8472_s7 + $0x68] sm:$0xf] }
 0x1b9   : > { %2511 = vst.msk [vmem:[#allocation4 + $0x30] sm:$0xff] %vm11258_vm14, %v2466_v28  ;;  %1349 = vst [vmem:[#allocation3 + $0x9c] sm:$0xf] %v1348_v59  ;;  %v9375_v12 = vcombine.low %v3561_v32, %v3564_v58  ;;  %vm11261_vm14 = vcmask 589312   ;;  %v3242_v6 = vor.u32 %v3241_v50, %v3237_v9  ;;  %v937_v32 = vld [vmem:[%s8472_s7 + $0x6c] sm:$0xf] }
 0x1ba   : > { %2543 = vrot.lane.b32.xlu1 %v8590_v37, %s7528_s9  ;;  %3407 = vrot.lane.b32.xlu0 %v9003_v4, %s7531_s16  ;;  %1350 = vst.msk [vmem:[#allocation3 + $0xa0] sm:$0xf] %vm11259_vm4, %v1161_v45  ;;  %v1162_v4 = vrot.slane %v1157_v15, 4  ;;  %vm11262_vm4 = vcmask 130112   ;;  %v2135_v15 = vrot.slane %v2133_v3, 4  ;;  %v3245_v45 = vshll.u32 %v9258_v51, 16 }
 0x1bb   : > { %v3233_v58 = vrot.slane %v3232_v8, 4  ;;  %v1164_v19 = vshrl.u32 %v936_v23, 16  ;;  %v1172_v42 = vshrl.u32 %v937_v32, 16  ;;  %v1167_v8 = vshll.u32 %v936_v23, 16 }
 0x1bc   : > { %v2536_v27 = vpop.permute.xlu1 %2535  ;;  %v9373_v17 = vpop.permute.xlu0 %3399  ;;  %v1352_v0 = vsel %vm7954_vm13, %v1162_v4, %v1351_v18  ;;  %v3247_v5 = vrot.slane %v3245_v45, 5 }
 0x1bd   : > { %2581 = vst.msk [vmem:[#allocation4 + $0x30] sm:$0xff] %vm11260_vm8, %v2536_v27  ;;  %1353 = vst [vmem:[#allocation3 + $0xa4] sm:$0x1] %v1352_v0  ;;  %v3243_v0 = vrot.slane %v3242_v6, 4  ;;  %v3238_v7 = vsel %vm7934_vm10, %v3233_v58, %v3237_v9  ;;  %v1174_v45 = vrot.slane %v1172_v42, 7  ;;  %vm11263_vm8 = vcmask 64512  }
 0x1be   : > { %4089 = vrot.lane.b32.xlu1 %v9017_v54, %s7526_s28  ;;  %2673 = vst.msk [vmem:[#allocation4 + $0x30] sm:$0xff] %vm2669_vm6, %v2628_v16  ;;  %3648 = vrot.lane.b32.xlu0 %v8989_v22, %s7533_s20  ;;  %v2136_v22 = vrot.slane %v9393_v56, 5 }
 0x1bf   : > { %2749 = vst.msk [vmem:[#allocation4 + $0x30] sm:$0xff] %vm11261_vm14, %v2704_v62  ;;  %vm11264_vm14 = vcmask 917312  }
 0x1c0   : > { %v4082_v14 = vpop.permute.xlu1 %4081  ;;  %v3641_v16 = vpop.permute.xlu0 %3640  ;;  %v9403_v31 = vld [vmem:[#allocation3 + $0x9c] sm:$0xf] }
 0x1c1   : > { %4127 = vst.msk [vmem:[#allocation4 + $0x28] sm:$0xff] %vm11262_vm4, %v4082_v14  ;;  %v9405_v49 = vld [vmem:[#allocation3 + $0xa0] sm:$0xf]  ;;  %v3274_v28 = vshrl.u32 %v9403_v31, 16  ;;  %v3277_v62 = vshll.u32 %v9403_v31, 16  ;;  %vm11265_vm4 = vcmask 982912  }
 0x1c2   : > { %3954 = vrot.lane.b32.xlu1 %v9019_v21, %s7539_s22  ;;  %3718 = vrot.lane.b32.xlu0 %v9019_v21, %s7535_s29  ;;  %v3287_v20 = vshrl.u32 %v9405_v49, 16  ;;  %v9413_v53 = vcombine.low %v9403_v31, %v9405_v49  ;;  %v3283_v59 = vshll.u32 %v9405_v49, 16 }
 0x1c3   : > { %v3276_v27 = vrot.slane %v3274_v28, 4  ;;  %v3279_v4 = vrot.slane %v3277_v62, 5 }
 0x1c4   : > { %v3947_v60 = vpop.permute.xlu1 %3946  ;;  %v3711_v2 = vpop.permute.xlu0 %3710  ;;  %v3289_v18 = vrot.slane %v3287_v20, 4  ;;  %v9423_v26 = vld [vmem:[#allocation3 + $0xa4] sm:$0x1]  ;;  %v3285_v51 = vrot.slane %v3283_v59, 5  ;;  %v1166_v20 = vrot.slane %v1164_v19, 7 }
 0x1c5   : > { %3993 = vst.msk [vmem:[#allocation4 + $0x20] sm:$0xff] %vm3990_vm5, %v3947_v60  ;;  %v3280_v14 = vor.u32 %v3279_v4, %v3276_v27  ;;  %v3293_v41 = vshll.u32 %v9423_v26, 16  ;;  %v1175_v27 = vshll.u32 %v937_v32, 16  ;;  %v2134_v4 = vsel %vm7921_vm7, %v6980_v11, %v2133_v3  ;;  %v1354_v32 = vld [vmem:[#allocation3 + $0xa8] sm:$0xf] }
 0x1c6   : > { %2910 = vrot.lane.b32.xlu1 %v8976_v46, %s7536_s11  ;;  %3810 = vrot.lane.b32.xlu0 %v9066_v29, %s7537_s13  ;;  %v3248_v46 = vsel %vm7934_vm10, %v3243_v0, %v3247_v5  ;;  %v3290_v62 = vor.u32 %v3289_v18, %v3285_v51  ;;  %v1169_v23 = vor.u32 %v1167_v8, %v1166_v20  ;;  %v1170_v58 = vrot.slane %v1166_v20, 4  ;;  %v1358_v0 = vld [vmem:[#allocation3 + $0xb0] sm:$0x1] }
 0x1c7   : > { %v9432_v60 = vcombine.low %v3238_v7, %v3248_v46  ;;  %v3281_v9 = vrot.slane %v3280_v14, 4  ;;  %v3295_v6 = vrot.slane %v3293_v41, 5  ;;  %v1179_v18 = vrot.slane %v1174_v45, 4 }
 0x1c8   : > { %v2903_v50 = vpop.permute.xlu1 %2902  ;;  %v4146_v39 = vld [vmem:[#allocation4 + $0x28] sm:$0xff]  ;;  %v3803_v28 = vpop.permute.xlu0 %3802  ;;  %v3291_v59 = vrot.slane %v3290_v62, 4  ;;  %v1177_v56 = vor.u32 %v1175_v27, %v1174_v45  ;;  %v3567_v7 = vrot.slane %v9405_v49, 5  ;;  %v7055_v41 = vrot.slane %v9403_v31, 9 }
 0x1c9   : > { %2948 = vst.msk [vmem:[#allocation4 + $0x30] sm:$0xff] %vm2944_vm9, %v2903_v50  ;;  %7094 = vmatprep.mubr.msk.bf16.mxu0 %vm4252_vm3, %v4146_v39  ;;  %v3570_v50 = vrot.slane %v9423_v26, 5 }
 0x1ca   : > { %3445 = vst.msk [vmem:[#allocation4 + $0x30] sm:$0xff] %vm3441_vm1, %v9373_v17  ;;  %2307 = vrot.lane.b32.xlu1 %v8590_v37, %s7530_s15  ;;  %3886 = vrot.lane.b32.xlu0 %v9017_v54, %s7538_s18  ;;  %v2137_v17 = vsel %vm7921_vm7, %v2135_v15, %v2136_v22  ;;  %v3286_v37 = vsel %vm7934_vm10, %v3281_v9, %v3285_v51  ;;  %v3569_v42 = vrot.slane %v3567_v7, 4 }
 0x1cb   : > { %3686 = vst.msk [vmem:[#allocation4 + $0x30] sm:$0xff] %vm3682_vm0, %v3641_v16  ;;  %v3296_v3 = vsel %vm7934_vm10, %v3291_v59, %v3295_v6  ;;  %v1355_v22 = vsel %vm7941_vm11, %v1169_v23, %v1354_v32  ;;  %v1359_v15 = vsel %vm7954_vm13, %v1179_v18, %v1358_v0  ;;  %v9469_v51 = vcombine.low %v2134_v4, %v2137_v17 }
 0x1cc   : > { %4059 = vst.msk [vmem:[#allocation4 + $0x98] sm:$0xff] %vm11263_vm8, %v9432_v60  ;;  %v2300_v16 = vpop.permute.xlu1 %2299  ;;  %v4145_v5 = vld [vmem:[#allocation4 + $0x20] sm:$0xff]  ;;  %v3879_v40 = vpop.permute.xlu0 %3878  ;;  %v9460_v11 = vcombine.low %v3286_v37, %v3296_v3  ;;  %1356 = vst [vmem:[#allocation3 + $0xa8] sm:$0xf] %v1355_v22  ;;  %v1178_v19 = vsel %vm7947_vm12, %v1170_v58, %v1177_v56  ;;  %v3568_v49 = vsel %vm7921_vm7, %v7055_v41, %v3567_v7 }
 0x1cd   : > { %3756 = vst.msk [vmem:[#allocation4 + $0x30] sm:$0xff] %vm11199_vm15, %v3711_v2  ;;  %4350 = vmatmul.mubr.bf16.gmra.mrb[8].mxu0 %v4145_v5  ;;  %v11266_v2 = vld [vmem:[#allocation14_spill] sm:$0xff]  ;;  %1360 = vst [vmem:[#allocation3 + $0xb0] sm:$0x1] %v1359_v15  ;;  %v3571_v39 = vsel %vm7921_vm7, %v3569_v42, %v3570_v50  ;;  %v7501_v15 = vld [vmem:[#allocation2 + $0x90] sm:$0xf] }
 0x1ce   : > { %2344 = vst.msk [vmem:[#allocation4 + $0x40] sm:$0xff] %vm11198_vm2, %v2300_v16  ;;  %2399 = vrot.lane.b32.xlu1 %v11255_v44, %s7527_s8  ;;  %2637 = vrot.lane.b32.xlu0 %v11266_v2, %s7534_s25  ;;  %vm11268_vm2 = vcmask 326912   ;;  %v9488_v62 = vcombine.low %v3568_v49, %v3571_v39  ;;  %v467_v39 = vld [vmem:[%s7919_s26 + $0x78] sm:$0xf] }
 0x1cf   : > { %3848 = vst.msk [vmem:[#allocation4 + $0x30] sm:$0xff] %vm11264_vm14, %v3803_v28  ;;  %vm11267_vm14 = vcmask 60416  }
 0x1d0   : > { %3924 = vst.msk [vmem:[#allocation4 + $0x30] sm:$0xff] %vm11265_vm4, %v3879_v40  ;;  %v2392_v14 = vpop.permute.xlu1 %2391  ;;  %v2630_v44 = vpop.permute.xlu0 %2629  ;;  %vm11270_vm4 = vcmask 458112  }
 0x1d1   : > { %4061 = vst.msk [vmem:[#allocation4 + $0xb8] sm:$0xff] %vm11263_vm8, %v9460_v11  ;;  %vm11271_vm8 = vcmask 589312  }
 0x1d2   : > { %1357 = vst.msk [vmem:[#allocation3 + $0xac] sm:$0xf] %vm11267_vm14, %v1178_v19  ;;  %2475 = vrot.lane.b32.xlu1 %v9340_v13, %s7532_s19  ;;  %2713 = vrot.lane.b32.xlu0 %v9469_v51, %s7529_s12  ;;  %vm11272_vm14 = vcmask 130112  }
 0x1d3   : > { %2436 = vst.msk [vmem:[#allocation4 + $0x40] sm:$0xff] %vm11268_vm2, %v2392_v14  ;;  %v9490_v31 = vld [vmem:[#allocation3 + $0xa8] sm:$0xf]  ;;  %vm11269_vm2 = vcmask 392512  }
 0x1d4   : > { %v2468_v28 = vpop.permute.xlu1 %2467  ;;  %v2706_v46 = vpop.permute.xlu0 %2705  ;;  %v9493_v26 = vld [vmem:[#allocation3 + $0xb0] sm:$0x1]  ;;  %v7056_v20 = vrot.slane %v9490_v31, 9 }
 0x1d5   : > { %2512 = vst.msk [vmem:[#allocation4 + $0x40] sm:$0xff] %vm11269_vm2, %v2468_v28  ;;  %v3577_v6 = vrot.slane %v9493_v26, 5  ;;  %vm11273_vm2 = vcmask 261312   ;;  %v468_v28 = vld [vmem:[%s7919_s26 + $0x7c] sm:$0xf] }
 0x1d6   : > { %2545 = vrot.lane.b32.xlu1 %v8594_v33, %s7528_s9  ;;  %2239 = vrot.lane.b32.xlu0 %v9340_v13, %s7525_s27 }
 0x1d8   : > { %v2538_v45 = vpop.permute.xlu1 %2537  ;;  %v3402_v59 = vpop.permute.xlu0 %3401 }
 0x1d9   : > { %v9500_v8 = vld [vmem:[#allocation3 + $0xac] sm:$0xf]  ;;  %2582 = vst.msk [vmem:[#allocation4 + $0x40] sm:$0xff] %vm11270_vm4, %v2538_v45  ;;  %vm11274_vm4 = vcmask 917312  }
 0x1da   : > { %v3574_v9 = vrot.slane %v9500_v8, 5  ;;  %4091 = vrot.lane.b32.xlu1 %v9090_v47, %s7526_s28  ;;  %2674 = vst.msk [vmem:[#allocation4 + $0x40] sm:$0xff] %vm2669_vm6, %v2630_v44  ;;  %2309 = vrot.lane.b32.xlu0 %v8594_v33, %s7530_s15  ;;  %v9524_v33 = vcombine.low %v9490_v31, %v9500_v8  ;;  %v7504_v45 = vld [vmem:[#allocation2 + $0x84] sm:$0xf] }
 0x1db   : > { %2750 = vst.msk [vmem:[#allocation4 + $0x40] sm:$0xff] %vm11271_vm8, %v2706_v46  ;;  %vm11275_vm8 = vcmask 982912   ;;  %v728_v46 = vshrl.u32 %v467_v39, 16 }
 0x1dc   : > { %v3575_v23 = vsel %vm7921_vm7, %v7056_v20, %v3574_v9  ;;  %v3576_v58 = vrot.slane %v3574_v9, 4  ;;  %v4084_v27 = vpop.permute.xlu1 %4083  ;;  %v3643_v4 = vpop.permute.xlu0 %3642  ;;  %v736_v20 = vshrl.u32 %v468_v28, 16  ;;  %v7503_v9 = vld [vmem:[#allocation2 + $0x8c] sm:$0x1] }
 0x1dd   : > { %4128 = vst.msk [vmem:[#allocation4 + $0x38] sm:$0xff] %vm11272_vm14, %v4084_v27  ;;  %vm11276_vm14 = vcmask 326912   ;;  %v731_v27 = vshll.u32 %v467_v39, 16 }
 0x1de   : > { %v3578_v13 = vsel %vm7921_vm7, %v3576_v58, %v3577_v6  ;;  %3956 = vrot.lane.b32.xlu1 %v9099_v10, %s7539_s22  ;;  %2401 = vrot.lane.b32.xlu0 %v11266_v2, %s7527_s8  ;;  %v6982_v2 = vrot.slane %v7501_v15, 9  ;;  %v2143_v6 = vrot.slane %v7503_v9, 5 }
 0x1df   : > { %v9515_v17 = vcombine.low %v3575_v23, %v3578_v13  ;;  %v730_v13 = vrot.slane %v728_v46, 7 }
 0x1e0   : > { %v3949_v37 = vpop.permute.xlu1 %3948  ;;  %v3713_v18 = vpop.permute.xlu0 %3712 }
 0x1e1   : > { %3994 = vst.msk [vmem:[#allocation4 + $0x30] sm:$0xff] %vm3990_vm5, %v3949_v37  ;;  %v739_v37 = vshll.u32 %v468_v28, 16 }
 0x1e2   : > { %2912 = vrot.lane.b32.xlu1 %v9019_v21, %s7536_s11  ;;  %2477 = vrot.lane.b32.xlu0 %v9469_v51, %s7532_s19  ;;  %v7499_v21 = vld [vmem:[#allocation2 + $0x94] sm:$0xf] }
 0x1e3   : > { %v2147_v5 = vrot.slane %v7499_v21, 5  ;;  %v733_v21 = vor.u32 %v731_v27, %v730_v13 }
 0x1e4   : > { %v2905_v32 = vpop.permute.xlu1 %2904  ;;  %v4148_v0 = vld [vmem:[#allocation4 + $0x38] sm:$0xff]  ;;  %v3805_v16 = vpop.permute.xlu0 %3804 }
 0x1e5   : > { %2949 = vst.msk [vmem:[#allocation4 + $0x40] sm:$0xff] %vm2944_vm9, %v2905_v32  ;;  %7095 = vmatprep.mubr.msk.bf16.mxu0 %vm4252_vm3, %v4148_v0  ;;  %v2149_v19 = vrot.slane %v2147_v5, 4  ;;  %v2148_v41 = vsel %vm7921_vm7, %v6982_v2, %v2147_v5  ;;  %v938_v0 = vld [vmem:[%s8472_s7 + $0x70] sm:$0xf]  ;;  %v734_v5 = vrot.slane %v730_v13, 4 }
 0x1e6   : > { %3446 = vst.msk [vmem:[#allocation4 + $0x40] sm:$0xff] %vm3441_vm1, %v3402_v59  ;;  %3409 = vrot.lane.b32.xlu1 %v9066_v29, %s7531_s16  ;;  %2547 = vrot.lane.b32.xlu0 %v8643_v30, %s7528_s9  ;;  %v7500_v29 = vld [vmem:[#allocation2 + $0x98] sm:$0x1]  ;;  %v6981_v59 = vrot.slane %v7504_v45, 9 }
 0x1e7   : > { %3687 = vst.msk [vmem:[#allocation4 + $0x40] sm:$0xff] %vm3682_vm0, %v3643_v4  ;;  %v2150_v22 = vrot.slane %v7500_v29, 5  ;;  %v9565_v4 = vrot.slane %v736_v20, 7  ;;  %v903_v29 = vld [vmem:[#allocation2 + $0xc0] sm:$0xf] }
 0x1e8   : > { %v2302_v40 = vpop.permute.xlu1 %2301  ;;  %v4147_v3 = vld [vmem:[#allocation4 + $0x30] sm:$0xff]  ;;  %3757 = vst.msk [vmem:[#allocation4 + $0x40] sm:$0xff] %vm11199_vm15, %v3713_v18  ;;  %v3881_v56 = vpop.permute.xlu0 %3880 }
 0x1e9   : > { %2345 = vst.msk [vmem:[#allocation4 + $0x50] sm:$0xff] %vm11273_vm2, %v2302_v40  ;;  %4358 = vmatmul.mubr.bf16.gmra.mrb[12].mxu0 %v4147_v3  ;;  %v2151_v42 = vsel %vm7921_vm7, %v2149_v19, %v2150_v22  ;;  %vm11277_vm2 = vcmask 392512   ;;  %v1181_v40 = vshrl.u32 %v938_v0, 16  ;;  %v904_v19 = vsel %vm7941_vm11, %v733_v21, %v903_v29 }
 0x1ea   : > { %3849 = vst.msk [vmem:[#allocation4 + $0x40] sm:$0xff] %vm11274_vm4, %v3805_v16  ;;  %3650 = vrot.lane.b32.xlu1 %v9017_v54, %s7533_s20  ;;  %4093 = vrot.lane.b32.xlu0 %v9173_v63, %s7526_s28  ;;  %v7502_v54 = vld [vmem:[#allocation2 + $0x88] sm:$0xf]  ;;  %v9563_v58 = vcombine.low %v2148_v41, %v2151_v42  ;;  %v939_v16 = vld [vmem:[%s8472_s7 + $0x74] sm:$0xf]  ;;  %vm11278_vm4 = vcmask 458112  }
 0x1eb   : > { %3925 = vst.msk [vmem:[#allocation4 + $0x40] sm:$0xff] %vm11275_vm8, %v3881_v56  ;;  %v2140_v44 = vrot.slane %v7502_v54, 5  ;;  %v1189_v22 = vshrl.u32 %v939_v16, 16  ;;  %v1192_v15 = vshll.u32 %v939_v16, 16  ;;  %vm11279_vm8 = vcmask 589312  }
 0x1ec   : > { %v2394_v7 = vpop.permute.xlu1 %2393  ;;  %v2632_v14 = vpop.permute.xlu0 %2631  ;;  %905 = vst [vmem:[#allocation2 + $0xc0] sm:$0xf] %v904_v19  ;;  %v3307_v41 = vshll.u32 %v9500_v8, 16  ;;  %v3311_v42 = vshrl.u32 %v9500_v8, 16 }
 0x1ed   : > { %2437 = vst.msk [vmem:[#allocation4 + $0x50] sm:$0xff] %vm11276_vm14, %v2394_v7  ;;  %v2142_v23 = vrot.slane %v2140_v44, 4  ;;  %v2141_v3 = vsel %vm7921_vm7, %v6981_v59, %v2140_v44  ;;  %v3298_v7 = vshrl.u32 %v9490_v31, 16  ;;  %vm11280_vm14 = vcmask 60416  }
 0x1ee   : > { %3720 = vrot.lane.b32.xlu1 %v9099_v10, %s7535_s29  ;;  %3958 = vrot.lane.b32.xlu0 %v9179_v52, %s7539_s22  ;;  %v1191_v20 = vrot.slane %v1189_v22, 7  ;;  %v3309_v9 = vrot.slane %v3307_v41, 5 }
 0x1ef   : > { %v2144_v56 = vsel %vm7921_vm7, %v2142_v23, %v2143_v6  ;;  %v3300_v28 = vrot.slane %v3298_v7, 4  ;;  %v3313_v6 = vrot.slane %v3311_v42, 4  ;;  %v3317_v23 = vshll.u32 %v9493_v26, 16 }
 0x1f0   : > { %v2470_v50 = vpop.permute.xlu1 %2469  ;;  %v2708_v49 = vpop.permute.xlu0 %2707  ;;  %v9593_v39 = vcombine.low %v2141_v3, %v2144_v56  ;;  %v1194_v13 = vor.u32 %v1192_v15, %v1191_v20  ;;  %v1196_v27 = vrot.slane %v1191_v20, 4  ;;  %v907_v56 = vld [vmem:[#allocation2 + $0xc8] sm:$0x1] }
 0x1f1   : > { %2513 = vst.msk [vmem:[#allocation4 + $0x50] sm:$0xff] %vm11277_vm2, %v2470_v50  ;;  %v1183_v50 = vrot.slane %v1181_v40, 7  ;;  %vm11281_vm2 = vcmask 130112   ;;  %v3314_v21 = vor.u32 %v3313_v6, %v3309_v9  ;;  %v3319_v40 = vrot.slane %v3317_v23, 5 }
 0x1f2   : > { %3812 = vrot.lane.b32.xlu1 %v9147_v35, %s7537_s13  ;;  %2914 = vrot.lane.b32.xlu0 %v9099_v10, %s7536_s11  ;;  %v741_v10 = vor.u32 %v739_v37, %v9565_v4  ;;  %v1361_v37 = vld [vmem:[#allocation3 + $0xb4] sm:$0xf] }
 0x1f3   : > { %v1187_v59 = vrot.slane %v1183_v50, 4  ;;  %v3315_v29 = vrot.slane %v3314_v21, 4  ;;  %v11291_v21 = vld [vmem:[#allocation18_spill] sm:$0xff] }
 0x1f4   : > { %v2540_v18 = vpop.permute.xlu1 %2539  ;;  %v9567_v32 = vpop.permute.xlu0 %3403  ;;  %v742_v2 = vsel %vm7947_vm12, %v734_v5, %v741_v10  ;;  %v743_v10 = vrot.slane %v9565_v4, 4 }
 0x1f5   : > { %2583 = vst.msk [vmem:[#allocation4 + $0x50] sm:$0xff] %vm11278_vm4, %v2540_v18  ;;  %v1365_v18 = vld [vmem:[#allocation3 + $0xbc] sm:$0x1]  ;;  %v1195_v3 = vsel %vm7947_vm12, %v1187_v59, %v1194_v13  ;;  %vm11283_vm4 = vmmov %vm11280_vm14  ;;  %v3320_v7 = vsel %vm7934_vm10, %v3315_v29, %v3319_v40  ;;  %v7507_v13 = vld [vmem:[#allocation2 + $0x9c] sm:$0xf] }
 0x1f6   : > { %3888 = vrot.lane.b32.xlu1 %v9090_v47, %s7538_s18  ;;  %2675 = vst.msk [vmem:[#allocation4 + $0x50] sm:$0xff] %vm2669_vm6, %v2632_v14  ;;  %2245 = vrot.lane.b32.xlu0 %v9563_v58, %s7525_s27  ;;  %v3301_v14 = vshll.u32 %v9490_v31, 16  ;;  %v11282_v31 = vld [vmem:[#allocation15_spill] sm:$0xff]  ;;  %v1366_v26 = vsel %vm7954_vm13, %v1196_v27, %v1365_v18  ;;  %v908_v4 = vsel %vm7954_vm13, %v743_v10, %v907_v56  ;;  %v6983_v27 = vrot.slane %v7507_v13, 9  ;;  %v941_v56 = vld [vmem:[%s8472_s7 + $0x7c] sm:$0xf] }
 0x1f7   : > { %2751 = vst.msk [vmem:[#allocation4 + $0x50] sm:$0xff] %vm11279_vm8, %v2708_v49  ;;  %v1184_v49 = vshll.u32 %v938_v0, 16  ;;  %1367 = vst [vmem:[#allocation3 + $0xbc] sm:$0x1] %v1366_v26  ;;  %vm11284_vm8 = vcmask 64512  }
 0x1f8   : > { %v4086_v54 = vpop.permute.xlu1 %4085  ;;  %v3645_v44 = vpop.permute.xlu0 %3644  ;;  %906 = vst.msk [vmem:[#allocation2 + $0xc4] sm:$0xf] %vm11280_vm14, %v742_v2  ;;  %v3303_v46 = vrot.slane %v3301_v14, 5  ;;  %909 = vst [vmem:[#allocation2 + $0xc8] sm:$0x1] %v908_v4  ;;  %vm11285_vm14 = vcmask 261312  }
 0x1f9   : > { %4129 = vst.msk [vmem:[#allocation4 + $0x48] sm:$0xff] %vm11281_vm2, %v4086_v54  ;;  %v1186_v45 = vor.u32 %v1184_v49, %v1183_v50  ;;  %vm11286_vm2 = vcmask 917312   ;;  %v940_v26 = vld [vmem:[%s8472_s7 + $0x78] sm:$0xf] }
 0x1fa   : > { %2639 = vrot.lane.b32.xlu1 %v11282_v31, %s7534_s25  ;;  %2311 = vrot.lane.b32.xlu0 %v8643_v30, %s7530_s15  ;;  %v3304_v8 = vor.u32 %v3303_v46, %v3300_v28  ;;  %1364 = vst.msk [vmem:[#allocation3 + $0xb8] sm:$0xf] %vm11283_vm4, %v1195_v3  ;;  %vm11287_vm4 = vcmask 982912   ;;  %v7505_v28 = vld [vmem:[#allocation2 + $0xa0] sm:$0xf] }
 0x1fb   : > { %v1362_v5 = vsel %vm7941_vm11, %v1186_v45, %v1361_v37  ;;  %v2154_v46 = vrot.slane %v7505_v28, 5  ;;  %v11296_v28 = vld [vmem:[#allocation22_spill] sm:$0xff] }
 0x1fc   : > { %v3951_v0 = vpop.permute.xlu1 %3950  ;;  %v3715_v16 = vpop.permute.xlu0 %3714  ;;  %v3305_v30 = vrot.slane %v3304_v8, 4  ;;  %1363 = vst [vmem:[#allocation3 + $0xb4] sm:$0xf] %v1362_v5  ;;  %v7506_v8 = vld [vmem:[#allocation2 + $0xa4] sm:$0x1] }
 0x1fd   : > { %3995 = vst.msk [vmem:[#allocation4 + $0x40] sm:$0xff] %vm3990_vm5, %v3951_v0  ;;  %v2157_v23 = vrot.slane %v7506_v8, 5  ;;  %v2156_v37 = vrot.slane %v2154_v46, 4  ;;  %v2155_v5 = vsel %vm7921_vm7, %v6983_v27, %v2154_v46  ;;  %v7508_v46 = vld [vmem:[#allocation2 + $0xac] sm:$0xf] }
 0x1fe   : > { %2715 = vrot.lane.b32.xlu1 %v9593_v39, %s7529_s12  ;;  %3652 = vrot.lane.b32.xlu0 %v9090_v47, %s7533_s20  ;;  %v3310_v22 = vsel %vm7934_vm10, %v3305_v30, %v3309_v9  ;;  %v1368_v27 = vld [vmem:[#allocation3 + $0xc0] sm:$0xf] }
 0x1ff   : > { %v9621_v47 = vcombine.low %v3310_v22, %v3320_v7  ;;  %v2158_v10 = vsel %vm7921_vm7, %v2156_v37, %v2157_v23  ;;  %v1198_v22 = vshrl.u32 %v940_v26, 16 }
 0x200   : > { %v2907_v15 = vpop.permute.xlu1 %2906  ;;  %v4150_v2 = vld [vmem:[#allocation4 + $0x48] sm:$0xff]  ;;  %v3807_v19 = vpop.permute.xlu0 %3806 }
 0x201   : > { %2950 = vst.msk [vmem:[#allocation4 + $0x50] sm:$0xff] %vm2944_vm9, %v2907_v15  ;;  %7096 = vmatprep.mubr.msk.bf16.mxu0 %vm4252_vm3, %v4150_v2  ;;  %v1206_v15 = vshrl.u32 %v941_v56, 16  ;;  %v11295_v2 = vld [vmem:[#allocation20_spill] sm:$0xff] }
 0x202   : > { %3447 = vst.msk [vmem:[#allocation4 + $0x50] sm:$0xff] %vm3441_vm1, %v9567_v32  ;;  %2241 = vrot.lane.b32.xlu1 %v9469_v51, %s7525_s27  ;;  %2407 = vrot.lane.b32.xlu0 %v8381_v38, %s7527_s8  ;;  %v9637_v51 = vld [vmem:[#allocation3 + $0xb8] sm:$0xf]  ;;  %v9639_v32 = vld [vmem:[#allocation3 + $0xbc] sm:$0x1] }
 0x203   : > { %3688 = vst.msk [vmem:[#allocation4 + $0x50] sm:$0xff] %vm3682_vm0, %v3645_v44  ;;  %v9633_v42 = vld [vmem:[#allocation3 + $0xb4] sm:$0xf]  ;;  %v3581_v50 = vrot.slane %v9637_v51, 5  ;;  %v3584_v49 = vrot.slane %v9639_v32, 5  ;;  %v1208_v7 = vrot.slane %v1206_v15, 7 }
 0x204   : > { %4062 = vst.msk [vmem:[#allocation4 + $0xc8] sm:$0xff] %vm11284_vm8, %v9621_v47  ;;  %v2304_v14 = vpop.permute.xlu1 %2303  ;;  %v4149_v54 = vld [vmem:[#allocation4 + $0x40] sm:$0xff]  ;;  %v3883_v41 = vpop.permute.xlu0 %3882  ;;  %v7057_v44 = vrot.slane %v9633_v42, 9  ;;  %vm11288_vm8 = vcmask 326912   ;;  %v9671_v3 = vcombine.low %v9633_v42, %v9637_v51  ;;  %v3325_v8 = vshll.u32 %v9633_v42, 16 }
 0x205   : > { %3758 = vst.msk [vmem:[#allocation4 + $0x50] sm:$0xff] %vm11199_vm15, %v3715_v16  ;;  %4366 = vmatmul.mubr.bf16.gmra.mrb[16].mxu0 %v4149_v54  ;;  %v3583_v45 = vrot.slane %v3581_v50, 4  ;;  %v3331_v23 = vshll.u32 %v9637_v51, 16  ;;  %v3335_v13 = vshrl.u32 %v9637_v51, 16  ;;  %v7509_v51 = vld [vmem:[#allocation2 + $0xb0] sm:$0x1] }
 0x206   : > { %2346 = vst.msk [vmem:[#allocation4 + $0x60] sm:$0xff] %vm11285_vm14, %v2304_v14  ;;  %3411 = vrot.lane.b32.xlu1 %v9147_v35, %s7531_s16  ;;  %2479 = vrot.lane.b32.xlu0 %v9593_v39, %s7532_s19  ;;  %v3582_v6 = vsel %vm7921_vm7, %v7057_v44, %v3581_v50  ;;  %v11289_v35 = vld [vmem:[#allocation16_spill] sm:$0xff]  ;;  %vm11290_vm14 = vcmask 392512   ;;  %v1209_v14 = vshll.u32 %v941_v56, 16  ;;  %v1201_v44 = vshll.u32 %v940_v26, 16 }
 0x207   : > { %3850 = vst.msk [vmem:[#allocation4 + $0x50] sm:$0xff] %vm11286_vm2, %v3807_v19  ;;  %v3585_v59 = vsel %vm7921_vm7, %v3583_v45, %v3584_v49  ;;  %vm11292_vm2 = vcmask 458112   ;;  %v1200_v19 = vrot.slane %v1198_v22, 7  ;;  %v1213_v45 = vrot.slane %v1208_v7, 4  ;;  %v7510_v22 = vld [vmem:[#allocation2 + $0xa8] sm:$0xf] }
 0x208   : > { %3926 = vst.msk [vmem:[#allocation4 + $0x50] sm:$0xff] %vm11287_vm4, %v3883_v41  ;;  %v2396_v20 = vpop.permute.xlu1 %2395  ;;  %v2634_v9 = vpop.permute.xlu0 %2633  ;;  %v9658_v18 = vcombine.low %v3582_v6, %v3585_v59  ;;  %vm11293_vm4 = vcmask 589312   ;;  %v1211_v49 = vor.u32 %v1209_v14, %v1208_v7  ;;  %v3322_v59 = vshrl.u32 %v9633_v42, 16 }
 0x209   : > { %2438 = vst.msk [vmem:[#allocation4 + $0x60] sm:$0xff] %vm11288_vm8, %v2396_v20  ;;  %vm11294_vm8 = vcmask 130112   ;;  %v1204_v50 = vrot.slane %v1200_v19, 4  ;;  %v2161_v20 = vrot.slane %v7508_v46, 5  ;;  %v3327_v42 = vrot.slane %v3325_v8, 5 }
 0x20a   : > { %2315 = vrot.lane.b32.xlu1 %v11289_v35, %s7530_s15  ;;  %3814 = vrot.lane.b32.xlu0 %v9242_v57, %s7537_s13  ;;  %v3333_v26 = vrot.slane %v3331_v23, 5  ;;  %v3337_v56 = vrot.slane %v3335_v13, 4  ;;  %v6984_v15 = vrot.slane %v7510_v22, 9 }
 0x20b   : > { %v1212_v6 = vsel %vm7947_vm12, %v1204_v50, %v1211_v49  ;;  %v2163_v7 = vrot.slane %v2161_v20, 4 }
 0x20c   : > { %v2472_v0 = vpop.permute.xlu1 %2471  ;;  %v2710_v16 = vpop.permute.xlu0 %2709 }
 0x20d   : > { %2514 = vst.msk [vmem:[#allocation4 + $0x60] sm:$0xff] %vm11290_vm14, %v2472_v0  ;;  %vm11297_vm14 = vcmask 60416  }
 0x20e   : > { %2403 = vrot.lane.b32.xlu1 %v11282_v31, %s7527_s8  ;;  %2553 = vrot.lane.b32.xlu0 %v11291_v21, %s7528_s9  ;;  %v9677_v31 = vcombine.low %v2155_v5, %v2158_v10  ;;  %1371 = vst.msk [vmem:[#allocation3 + $0xc4] sm:$0xf] %vm11297_vm14, %v1212_v6  ;;  %v1372_v10 = vld [vmem:[#allocation3 + $0xc8] sm:$0x1]  ;;  %vm11302_vm14 = vcmask 326912  }
 0x210   : > { %v2542_v30 = vpop.permute.xlu1 %2541  ;;  %v3406_v40 = vpop.permute.xlu0 %3405 }
 0x211   : > { %2584 = vst.msk [vmem:[#allocation4 + $0x60] sm:$0xff] %vm11292_vm2, %v2542_v30  ;;  %v3324_v30 = vrot.slane %v3322_v59, 4  ;;  %vm11298_vm2 = vcmask 261312  }
 0x212   : > { %3722 = vrot.lane.b32.xlu1 %v9179_v52, %s7535_s29  ;;  %2676 = vst.msk [vmem:[#allocation4 + $0x60] sm:$0xff] %vm2669_vm6, %v2634_v9  ;;  %4095 = vrot.lane.b32.xlu0 %v9273_v48, %s7526_s28  ;;  %v1203_v9 = vor.u32 %v1201_v44, %v1200_v19  ;;  %v1373_v19 = vsel %vm7954_vm13, %v1213_v45, %v1372_v10  ;;  %v3341_v44 = vshll.u32 %v9639_v32, 16 }
 0x213   : > { %2752 = vst.msk [vmem:[#allocation4 + $0x60] sm:$0xff] %vm11293_vm4, %v2710_v16  ;;  %v3328_v14 = vor.u32 %v3327_v42, %v3324_v30  ;;  %1374 = vst [vmem:[#allocation3 + $0xc8] sm:$0x1] %v1373_v19  ;;  %vm11299_vm4 = vcmask 917312  }
 0x214   : > { %v4088_v29 = vpop.permute.xlu1 %4087  ;;  %v3647_v4 = vpop.permute.xlu0 %3646  ;;  %v1369_v5 = vsel %vm7941_vm11, %v1203_v9, %v1368_v27  ;;  %v3343_v9 = vrot.slane %v3341_v44, 5 }
 0x215   : > { %4130 = vst.msk [vmem:[#allocation4 + $0x58] sm:$0xff] %vm11294_vm8, %v4088_v29  ;;  %1370 = vst [vmem:[#allocation3 + $0xc0] sm:$0xf] %v1369_v5  ;;  %v2164_v29 = vrot.slane %v7509_v51, 5  ;;  %vm11301_vm8 = vcmask 982912  }
 0x216   : > { %2483 = vrot.lane.b32.xlu1 %v9677_v31, %s7532_s19  ;;  %2645 = vrot.lane.b32.xlu0 %v11295_v2, %s7534_s25  ;;  %v2811_v32 = vld [vmem:[#allocation3 + $0xc4] sm:$0xf] }
 0x217   : > { %v2165_v6 = vsel %vm7921_vm7, %v2163_v7, %v2164_v29  ;;  %v3864_v27 = vrot.slane %v2811_v32, 5  ;;  %v3779_v7 = vshll.u32 %v2811_v32, 16 }
 0x218   : > { %v3953_v54 = vpop.permute.xlu1 %3952  ;;  %v3717_v41 = vpop.permute.xlu0 %3716 }
 0x219   : > { %3996 = vst.msk [vmem:[#allocation4 + $0x50] sm:$0xff] %vm3990_vm5, %v3953_v54  ;;  %v3338_v54 = vor.u32 %v3337_v56, %v3333_v26 }
 0x21a   : > { %2549 = vrot.lane.b32.xlu1 %v11296_v28, %s7528_s9  ;;  %2717 = vrot.lane.b32.xlu0 %v9563_v58, %s7529_s12 }
 0x21b   : > { %v3339_v46 = vrot.slane %v3338_v54, 4 }
 0x21c   : > { %v2909_v37 = vpop.permute.xlu1 %2908  ;;  %v4152_v0 = vld [vmem:[#allocation4 + $0x58] sm:$0xff]  ;;  %v3809_v16 = vpop.permute.xlu0 %3808  ;;  %v2810_v13 = vld [vmem:[#allocation3 + $0xc0] sm:$0xf] }
 0x21d   : > { %2951 = vst.msk [vmem:[#allocation4 + $0x60] sm:$0xff] %vm2944_vm9, %v2909_v37  ;;  %7097 = vmatprep.mubr.msk.bf16.mxu0 %vm4252_vm3, %v4152_v0  ;;  %v3344_v23 = vsel %vm7934_vm10, %v3339_v46, %v3343_v9  ;;  %v7076_v37 = vrot.slane %v2810_v13, 9  ;;  %v2812_v0 = vld [vmem:[#allocation3 + $0xc8] sm:$0x1]  ;;  %v9752_v29 = vcombine.low %v2810_v13, %v2811_v32  ;;  %v3770_v22 = vshrl.u32 %v2810_v13, 16 }
 0x21e   : > { %3448 = vst.msk [vmem:[#allocation4 + $0x60] sm:$0xff] %vm3441_vm1, %v3406_v40  ;;  %3890 = vrot.lane.b32.xlu1 %v9173_v63, %s7538_s18  ;;  %2916 = vrot.lane.b32.xlu0 %v9179_v52, %s7536_s11  ;;  %v3329_v52 = vrot.slane %v3328_v14, 4  ;;  %v3867_v10 = vrot.slane %v2812_v0, 5  ;;  %v3783_v14 = vshrl.u32 %v2811_v32, 16 }
 0x21f   : > { %3689 = vst.msk [vmem:[#allocation4 + $0x60] sm:$0xff] %vm3682_vm0, %v3647_v4  ;;  %v11300_v4 = vld [vmem:[#allocation19_spill] sm:$0xff]  ;;  %v3865_v5 = vsel %vm7921_vm7, %v7076_v37, %v3864_v27  ;;  %v3772_v54 = vrot.slane %v3770_v22, 4 }
 0x220   : > { %v2306_v40 = vpop.permute.xlu1 %2305  ;;  %v4151_v50 = vld [vmem:[#allocation4 + $0x50] sm:$0xff]  ;;  %3759 = vst.msk [vmem:[#allocation4 + $0x60] sm:$0xff] %vm11199_vm15, %v3717_v41  ;;  %v3885_v49 = vpop.permute.xlu0 %3884  ;;  %v2162_v41 = vsel %vm7921_vm7, %v6984_v15, %v2161_v20  ;;  %v3334_v45 = vsel %vm7934_vm10, %v3329_v52, %v3333_v26 }
 0x221   : > { %2347 = vst.msk [vmem:[#allocation4 + $0x70] sm:$0xff] %vm11298_vm2, %v2306_v40  ;;  %4374 = vmatmul.mubr.bf16.gmra.mrb[20].mxu0 %v4151_v50  ;;  %v9735_v20 = vcombine.low %v2162_v41, %v2165_v6  ;;  %vm11303_vm2 = vcmask 64512   ;;  %v3781_v40 = vrot.slane %v3779_v7, 5 }
 0x222   : > { %3851 = vst.msk [vmem:[#allocation4 + $0x60] sm:$0xff] %vm11299_vm4, %v3809_v16  ;;  %2641 = vrot.lane.b32.xlu1 %v11300_v4, %s7534_s25  ;;  %2243 = vrot.lane.b32.xlu0 %v9593_v39, %s7525_s27  ;;  %v9731_v39 = vcombine.low %v3334_v45, %v3344_v23  ;;  %v3866_v16 = vrot.slane %v3864_v27, 4  ;;  %vm11304_vm4 = vcmask 392512  }
 0x223   : > { %3927 = vst.msk [vmem:[#allocation4 + $0x60] sm:$0xff] %vm11301_vm8, %v3885_v49  ;;  %vm11305_vm8 = vcmask 458112   ;;  %v3789_v49 = vshll.u32 %v2812_v0, 16 }
 0x224   : > { %v2398_v59 = vpop.permute.xlu1 %2397  ;;  %v2636_v8 = vpop.permute.xlu0 %2635  ;;  %4063 = vst.msk [vmem:[#allocation4 + $0xd8] sm:$0xff] %vm11303_vm2, %v9731_v39  ;;  %v3868_v26 = vsel %vm7921_vm7, %v3866_v16, %v3867_v10  ;;  %vm11307_vm2 = vcmask 130112  }
 0x225   : > { %2439 = vst.msk [vmem:[#allocation4 + $0x70] sm:$0xff] %vm11302_vm14, %v2398_v59  ;;  %vm11306_vm14 = vcmask 589312   ;;  %v3791_v41 = vrot.slane %v3789_v49, 5 }
 0x226   : > { %3960 = vrot.lane.b32.xlu1 %v9294_v24, %s7539_s22  ;;  %3413 = vrot.lane.b32.xlu0 %v9242_v57, %s7531_s16  ;;  %v9750_v57 = vcombine.low %v3865_v5, %v3868_v26 }
 0x228   : > { %v2474_v30 = vpop.permute.xlu1 %2473  ;;  %v2712_v42 = vpop.permute.xlu0 %2711 }
 0x229   : > { %2515 = vst.msk [vmem:[#allocation4 + $0x70] sm:$0xff] %vm11304_vm4, %v2474_v30  ;;  %vm11308_vm4 = vcmask 64512  }
 0x22a   : > { %2721 = vrot.lane.b32.xlu1 %v9735_v20, %s7529_s12  ;;  %2313 = vrot.lane.b32.xlu0 %v11296_v28, %s7530_s15  ;;  %v3773_v28 = vshll.u32 %v2810_v13, 16 }
 0x22c   : > { %v2544_v56 = vpop.permute.xlu1 %2543  ;;  %v3408_v51 = vpop.permute.xlu0 %3407  ;;  %v3775_v44 = vrot.slane %v3773_v28, 5 }
 0x22d   : > { %2585 = vst.msk [vmem:[#allocation4 + $0x70] sm:$0xff] %vm11305_vm8, %v2544_v56  ;;  %vm11309_vm8 = vcmask 261312   ;;  %v11320_v56 = vld [vmem:[#allocation17_spill] sm:$0xff] }
 0x22e   : > { %2920 = vrot.lane.b32.xlu1 %v9318_v61, %s7536_s11  ;;  %2677 = vst.msk [vmem:[#allocation4 + $0x70] sm:$0xff] %vm2669_vm6, %v2636_v8  ;;  %3654 = vrot.lane.b32.xlu0 %v9173_v63, %s7533_s20  ;;  %v3785_v63 = vrot.slane %v3783_v14, 4  ;;  %v3776_v50 = vor.u32 %v3775_v44, %v3772_v54  ;;  %v7512_v54 = vld [vmem:[#allocation2 + $0xbc] sm:$0x1] }
 0x22f   : > { %2753 = vst.msk [vmem:[#allocation4 + $0x70] sm:$0xff] %vm11306_vm14, %v2712_v42  ;;  %vm11310_vm14 = vcmask 917312   ;;  %v2171_v44 = vrot.slane %v7512_v54, 5 }
 0x230   : > { %v4090_v15 = vpop.permute.xlu1 %4089  ;;  %v3649_v19 = vpop.permute.xlu0 %3648  ;;  %v3786_v9 = vor.u32 %v3785_v63, %v3781_v40  ;;  %v3777_v32 = vrot.slane %v3776_v50, 4 }
 0x231   : > { %4131 = vst.msk [vmem:[#allocation4 + $0x68] sm:$0xff] %vm11307_vm2, %v4090_v15  ;;  %vm11311_vm2 = vcmask 982912  }
 0x232   : > { %2247 = vrot.lane.b32.xlu1 %v9677_v31, %s7525_s27  ;;  %2405 = vrot.lane.b32.xlu0 %v11300_v4, %s7527_s8  ;;  %v3787_v6 = vrot.slane %v3786_v9, 4  ;;  %v3782_v4 = vsel %vm7934_vm10, %v3777_v32, %v3781_v40  ;;  %v7513_v40 = vld [vmem:[#allocation2 + $0xb4] sm:$0xf] }
 0x234   : > { %v3955_v52 = vpop.permute.xlu1 %3954  ;;  %v3719_v46 = vpop.permute.xlu0 %3718  ;;  %v3792_v23 = vsel %vm7934_vm10, %v3787_v6, %v3791_v41 }
 0x235   : > { %3997 = vst.msk [vmem:[#allocation4 + $0x60] sm:$0xff] %vm3990_vm5, %v3955_v52  ;;  %v9777_v13 = vcombine.low %v3782_v4, %v3792_v23  ;;  %v11324_v52 = vld [vmem:[#allocation21_spill] sm:$0xff] }
 0x236   : > { %3417 = vrot.lane.b32.xlu1 %v9348_v55, %s7531_s16  ;;  %3724 = vrot.lane.b32.xlu0 %v9294_v24, %s7535_s29 }
 0x237   : > { %4064 = vst.msk [vmem:[#allocation4 + $0xe8] sm:$0xff] %vm11308_vm4, %v9777_v13  ;;  %vm11312_vm4 = vcmask 326912  }
 0x238   : > { %v2911_v45 = vpop.permute.xlu1 %2910  ;;  %v4154_v59 = vld [vmem:[#allocation4 + $0x68] sm:$0xff]  ;;  %v3811_v8 = vpop.permute.xlu0 %3810 }
 0x239   : > { %2952 = vst.msk [vmem:[#allocation4 + $0x70] sm:$0xff] %vm2944_vm9, %v2911_v45  ;;  %7098 = vmatprep.mubr.msk.bf16.mxu0 %vm4252_vm3, %v4154_v59  ;;  %v9862_v45 = vld [vmem:[%s11146_s3] ss:$0 sm:$0xff] }
 0x23a   : > { %3449 = vst.msk [vmem:[#allocation4 + $0x70] sm:$0xff] %vm3441_vm1, %v3408_v51  ;;  %2317 = vrot.lane.b32.xlu1 %v11291_v21, %s7530_s15  ;;  %2481 = vrot.lane.b32.xlu0 %v9563_v58, %s7532_s19 }
 0x23b   : > { %3690 = vst.msk [vmem:[#allocation4 + $0x70] sm:$0xff] %vm3682_vm0, %v3649_v19 }
 0x23c   : > { %v2308_v27 = vpop.permute.xlu1 %2307  ;;  %v4153_v37 = vld [vmem:[#allocation4 + $0x60] sm:$0xff]  ;;  %3760 = vst.msk [vmem:[#allocation4 + $0x70] sm:$0xff] %vm11199_vm15, %v3719_v46  ;;  %v3887_v0 = vpop.permute.xlu0 %3886  ;;  %vm11318_vm15 = vcmask 261312  }
 0x23d   : > { %2348 = vst.msk [vmem:[#allocation4 + $0x80] sm:$0xff] %vm11309_vm8, %v2308_v27  ;;  %4382 = vmatmul.mubr.bf16.gmra.mrb[24].mxu0 %v4153_v37  ;;  %vm11313_vm8 = vcmask 392512  }
 0x23e   : > { %3852 = vst.msk [vmem:[#allocation4 + $0x70] sm:$0xff] %vm11310_vm14, %v3811_v8  ;;  %3658 = vrot.lane.b32.xlu1 %v9375_v12, %s7533_s20  ;;  %3816 = vrot.lane.b32.xlu0 %v9432_v60, %s7537_s13  ;;  %vm11314_vm14 = vcmask 458112  }
 0x23f   : > { %3928 = vst.msk [vmem:[#allocation4 + $0x70] sm:$0xff] %vm11311_vm2, %v3887_v0  ;;  %vm11315_vm2 = vcmask 195712  }
 0x240   : > { %v2400_v58 = vpop.permute.xlu1 %2399  ;;  %v2638_v21 = vpop.permute.xlu0 %2637 }
 0x241   : > { %2440 = vst.msk [vmem:[#allocation4 + $0x80] sm:$0xff] %vm11312_vm4, %v2400_v58  ;;  %vm11316_vm4 = vcmask 589312  }
 0x242   : > { %2409 = vrot.lane.b32.xlu1 %v11295_v2, %s7527_s8  ;;  %2551 = vrot.lane.b32.xlu0 %v11289_v35, %s7528_s9 }
 0x244   : > { %v2476_v16 = vpop.permute.xlu1 %2475  ;;  %v2714_v5 = vpop.permute.xlu0 %2713 }
 0x245   : > { %2516 = vst.msk [vmem:[#allocation4 + $0x80] sm:$0xff] %vm11313_vm8, %v2476_v16  ;;  %vm11317_vm8 = vcmask 130112  }
 0x246   : > { %3728 = vrot.lane.b32.xlu1 %v9413_v53, %s7535_s29  ;;  %3892 = vrot.lane.b32.xlu0 %v9273_v48, %s7538_s18 }
 0x248   : > { %v2546_v10 = vpop.permute.xlu1 %2545  ;;  %v2240_v30 = vpop.permute.xlu0 %2239 }
 0x249   : > { %2586 = vst.msk [vmem:[#allocation4 + $0x80] sm:$0xff] %vm11314_vm14, %v2546_v10  ;;  %vm11319_vm14 = vcmask 326912  }
 0x24a   : > { %2279 = vst.msk [vmem:[#allocation4 + $0x90] sm:$0xff] %vm11315_vm2, %v2240_v30  ;;  %2485 = vrot.lane.b32.xlu1 %v9735_v20, %s7532_s19  ;;  %4097 = vrot.lane.b32.xlu0 %v9375_v12, %s7526_s28  ;;  %vm11322_vm2 = vcmask 458112  }
 0x24b   : > { %2678 = vst.msk [vmem:[#allocation4 + $0x80] sm:$0xff] %vm2669_vm6, %v2638_v21 }
 0x24c   : > { %2754 = vst.msk [vmem:[#allocation4 + $0x80] sm:$0xff] %vm11316_vm4, %v2714_v5  ;;  %v4092_v35 = vpop.permute.xlu1 %4091  ;;  %v2310_v2 = vpop.permute.xlu0 %2309  ;;  %vm11323_vm4 = vmmov %vm11317_vm8 }
 0x24d   : > { %4132 = vst.msk [vmem:[#allocation4 + $0x78] sm:$0xff] %vm11317_vm8, %v4092_v35  ;;  %vm11325_vm8 = vcmask 851712  }
 0x24e   : > { %2349 = vst.msk [vmem:[#allocation4 + $0x90] sm:$0xff] %vm11318_vm15, %v2310_v2  ;;  %3820 = vrot.lane.b32.xlu1 %v9460_v11, %s7537_s13  ;;  %2643 = vrot.lane.b32.xlu0 %v8381_v38, %s7534_s25  ;;  %vm11321_vm15 = vcmask 392512   ;;  %v7511_v38 = vld [vmem:[#allocation2 + $0xb8] sm:$0xf] }
 0x24f   : > { %v2168_v15 = vrot.slane %v7511_v38, 5 }
 0x250   : > { %v3957_v42 = vpop.permute.xlu1 %3956  ;;  %v2402_v26 = vpop.permute.xlu0 %2401 }
 0x251   : > { %3998 = vst.msk [vmem:[#allocation4 + $0x70] sm:$0xff] %vm3990_vm5, %v3957_v42  ;;  %v2170_v63 = vrot.slane %v2168_v15, 4 }
 0x252   : > { %2441 = vst.msk [vmem:[#allocation4 + $0x90] sm:$0xff] %vm11319_vm14, %v2402_v26  ;;  %2555 = vrot.lane.b32.xlu1 %v11320_v56, %s7528_s9  ;;  %3962 = vrot.lane.b32.xlu0 %v9318_v61, %s7539_s22  ;;  %vm11326_vm14 = vcmask 917312   ;;  %v9880_v26 = vld [vmem:[#allocation2 + $0xc0] sm:$0xf] }
 0x253   : > { %v2172_v46 = vsel %vm7921_vm7, %v2170_v63, %v2171_v44 }
 0x254   : > { %v2913_v51 = vpop.permute.xlu1 %2912  ;;  %v4156_v22 = vld [vmem:[#allocation4 + $0x78] sm:$0xff]  ;;  %v2478_v28 = vpop.permute.xlu0 %2477 }
 0x255   : > { %2953 = vst.msk [vmem:[#allocation4 + $0x80] sm:$0xff] %vm2944_vm9, %v2913_v51  ;;  %7099 = vmatprep.mubr.msk.bf16.mxu0 %vm4252_vm3, %v4156_v22  ;;  %v9882_v51 = vld [vmem:[#allocation2 + $0xc4] sm:$0xf] }
 0x256   : > { %2517 = vst.msk [vmem:[#allocation4 + $0x90] sm:$0xff] %vm11321_vm15, %v2478_v28  ;;  %3896 = vrot.lane.b32.xlu1 %v9488_v62, %s7538_s18  ;;  %2719 = vrot.lane.b32.xlu0 %v9677_v31, %s7529_s12  ;;  %v6985_v31 = vrot.slane %v7513_v40, 9  ;;  %vm11327_vm15 = vcmask 982912   ;;  %v9892_v44 = vcombine.low %v9880_v26, %v9882_v51  ;;  %v4915_v40 = vld [vmem:[#allocation5 + $0x14] sm:$0x1] }
 0x258   : > { %v3410_v19 = vpop.permute.xlu1 %3409  ;;  %v4155_v7 = vld [vmem:[#allocation4 + $0x70] sm:$0xff]  ;;  %v2548_v14 = vpop.permute.xlu0 %2547 }
 0x259   : > { %3450 = vst.msk [vmem:[#allocation4 + $0x80] sm:$0xff] %vm3441_vm1, %v3410_v19  ;;  %4390 = vmatmul.mubr.bf16.gmra.mrb[28].mxu0 %v4155_v7  ;;  %v4911_v7 = vld [vmem:[#allocation5 + $0xc] sm:$0xf] }
 0x25a   : > { %2587 = vst.msk [vmem:[#allocation4 + $0x90] sm:$0xff] %vm11322_vm2, %v2548_v14  ;;  %4101 = vrot.lane.b32.xlu1 %v9515_v17, %s7526_s28  ;;  %2918 = vrot.lane.b32.xlu0 %v9294_v24, %s7536_s11  ;;  %v2169_v24 = vsel %vm7921_vm7, %v6985_v31, %v2168_v15  ;;  %vm11328_vm2 = vcmask 195712  }
 0x25b   : > { %v9851_v41 = vcombine.low %v2169_v24, %v2172_v46 }
 0x25c   : > { %v3651_v50 = vpop.permute.xlu1 %3650  ;;  %v4094_v49 = vpop.permute.xlu0 %4093 }
 0x25d   : > { %3691 = vst.msk [vmem:[#allocation4 + $0x80] sm:$0xff] %vm3682_vm0, %v3651_v50 }
 0x25e   : > { %4133 = vst.msk [vmem:[#allocation4 + $0x88] sm:$0xff] %vm11323_vm4, %v4094_v49  ;;  %2647 = vrot.lane.b32.xlu1 %v11324_v52, %s7534_s25  ;;  %2249 = vrot.lane.b32.xlu0 %v9735_v20, %s7525_s27  ;;  %vm11329_vm4 = vcmask 589312  }
 0x260   : > { %v3721_v9 = vpop.permute.xlu1 %3720  ;;  %v3959_v32 = vpop.permute.xlu0 %3958 }
 0x261   : > { %3761 = vst.msk [vmem:[#allocation4 + $0x80] sm:$0xff] %vm11325_vm8, %v3721_v9  ;;  %vm11330_vm8 = vmmov %vm11328_vm2  ;;  %v2370_v9 = vshrl.u32 %v9882_v51, 16 }
 0x262   : > { %3966 = vrot.lane.b32.xlu1 %v9524_v33, %s7539_s22  ;;  %3419 = vrot.lane.b32.xlu0 %v9460_v11, %s7531_s16 }
 0x264   : > { %v3813_v6 = vpop.permute.xlu1 %3812  ;;  %v2915_v20 = vpop.permute.xlu0 %2914 }
 0x265   : > { %v4158_v4 = vld [vmem:[#allocation4 + $0x88] sm:$0xff]  ;;  %3853 = vst.msk [vmem:[#allocation4 + $0x80] sm:$0xff] %vm11326_vm14, %v3813_v6  ;;  %vm11331_vm14 = vcmask 261312  }
 0x266   : > { %7100 = vmatprep.mubr.msk.bf16.mxu0 %vm4252_vm3, %v4158_v4  ;;  %2723 = vrot.lane.b32.xlu1 %v9851_v41, %s7529_s12 }
 0x267   : > { %3656 = vrot.lane.b32.xlu0 %v9273_v48, %s7533_s20 }
 0x268   : > { %v4335_v59 = vpop.f32.mrb[0].mxu0  ;;  %v3889_v11 = vpop.permute.xlu1 %3888 }
 0x269   : > { %v4336_v8 = vadd.f32 %v9862_v45, %v4335_v59  ;;  %3929 = vst.msk [vmem:[#allocation4 + $0x80] sm:$0xff] %vm11327_vm15, %v3889_v11  ;;  %v4337_v23 = vpop.f32.mrb[1].mxu0  ;;  %v2246_v27 = vpop.permute.xlu0 %2245  ;;  %vm11332_vm15 = vcmask 60416   ;;  %v1425_v59 = vld [vmem:[#allocation2 + $0xc8] sm:$0x1] }
 0x26a   : > { %v4338_v37 = vpop.f32.mrb[2].mxu0  ;;  %2922 = vrot.lane.b32.xlu1 %v9413_v53, %s7536_s11  ;;  %3999 = vst.msk [vmem:[#allocation4 + $0x80] sm:$0xff] %vm3990_vm5, %v3959_v32  ;;  %v2366_v32 = vshll.u32 %v9882_v51, 16 }
 0x26b   : > { %2282 = vst.msk [vmem:[#allocation4 + $0xc0] sm:$0xff] %vm11328_vm2, %v2246_v27  ;;  %2411 = vrot.lane.b32.xlu0 %v11324_v52, %s7527_s8  ;;  %v4462_v48 = vmax.f32 %v4336_v8, 0.0  ;;  %v4339_v0 = vadd.f32 %v9862_v45, %v4338_v37  ;;  %v4340_v58 = vpop.f32.mrb[3].mxu0  ;;  %v2360_v52 = vshll.u32 %v9880_v26, 16  ;;  %v2372_v27 = vrot.slane %v2370_v9, 4  ;;  %vm11333_vm2 = vmmov %vm11331_vm14 }
 0x26c   : > { %v2640_v21 = vpop.permute.xlu1 %2639  ;;  %v2368_v23 = vrot.slane %v2366_v32, 5  ;;  %v2454_v58 = vrot.slane %v1425_v59, 5 }
 0x26d   : > { %v7271_v16 = vpack.c.bf16 %v4462_v48, %v4462_v48  ;;  %v4463_v5 = vmax.f32 %v4339_v0, 0.0  ;;  %2679 = vst.msk [vmem:[#allocation4 + $0x90] sm:$0xff] %vm2669_vm6, %v2640_v21  ;;  %v2312_v10 = vpop.permute.xlu0 %2311  ;;  %v2362_v8 = vrot.slane %v2360_v52, 5  ;;  %v7004_v48 = vrot.slane %v9880_v26, 9 }
 0x26e   : > { %3415 = vrot.lane.b32.xlu1 %v9432_v60, %s7531_s16 }
 0x26f   : > { %3730 = vrot.lane.b32.xlu0 %v9524_v33, %s7535_s29  ;;  %v4591_v30 = vshrl.u32 %v7271_v16, 16  ;;  %v4594_v35 = vshll.u32 %v7271_v16, 16  ;;  %v7272_v2 = vpack.c.bf16 %v4463_v5, %v4463_v5  ;;  %v2373_v16 = vor.u32 %v2372_v27, %v2368_v23 }
 0x270   : > { %v2716_v42 = vpop.permute.xlu1 %2715  ;;  %v2376_v5 = vshll.u32 %v1425_v59, 16 }
 0x271   : > { %v4593_v22 = vrot.slane %v4591_v30, 7  ;;  %v4599_v28 = vshrl.u32 %v7272_v2, 16  ;;  %v4602_v38 = vshll.u32 %v7272_v2, 16  ;;  %2755 = vst.msk [vmem:[#allocation4 + $0x90] sm:$0xff] %vm11329_vm4, %v2716_v42  ;;  %v4157_v15 = vld [vmem:[#allocation4 + $0x80] sm:$0xff]  ;;  %v3653_v19 = vpop.permute.xlu0 %3652  ;;  %vm11334_vm4 = vcmask 326912  }
 0x272   : > { %2954 = vst.msk [vmem:[#allocation4 + $0x90] sm:$0xff] %vm2944_vm9, %v2915_v20  ;;  %2319 = vrot.lane.b32.xlu1 %v11320_v56, %s7530_s15  ;;  %4398 = vmatmul.mubr.bf16.gmra.mrb[32].mxu0 %v4157_v15  ;;  %v2451_v20 = vrot.slane %v9882_v51, 5 }
 0x273   : > { %v4596_v60 = vor.u32 %v4594_v35, %v4593_v22  ;;  %v4597_v14 = vrot.slane %v4593_v22, 4  ;;  %v4601_v54 = vrot.slane %v4599_v28, 7  ;;  %3818 = vrot.lane.b32.xlu0 %v9348_v55, %s7537_s13  ;;  %v2357_v55 = vshrl.u32 %v9880_v26, 16 }
 0x274   : > { %v2242_v31 = vpop.permute.xlu1 %2241  ;;  %v2453_v0 = vrot.slane %v2451_v20, 4  ;;  %v2452_v35 = vsel %vm7921_vm7, %v7004_v48, %v2451_v20  ;;  %v2374_v28 = vrot.slane %v2373_v16, 4 }
 0x275   : > { %v4912_v63 = vsel %vm7941_vm11, %v4596_v60, %v4911_v7  ;;  %v4604_v50 = vor.u32 %v4602_v38, %v4601_v54  ;;  %v4606_v49 = vrot.slane %v4601_v54, 4  ;;  %2280 = vst.msk [vmem:[#allocation4 + $0xa0] sm:$0xff] %vm11330_vm8, %v2242_v31  ;;  %v2408_v56 = vpop.permute.xlu0 %2407  ;;  %v2359_v11 = vrot.slane %v2357_v55, 4  ;;  %vm11335_vm8 = vmmov %vm11334_vm4 }
 0x276   : > { %4913 = vst [vmem:[#allocation5 + $0xc] sm:$0xf] %v4912_v63  ;;  %3660 = vrot.lane.b32.xlu1 %v9488_v62, %s7533_s20  ;;  %2350 = vst.msk [vmem:[#allocation4 + $0xa0] sm:$0xff] %vm11331_vm14, %v2312_v10  ;;  %v2455_v2 = vsel %vm7921_vm7, %v2453_v0, %v2454_v58  ;;  %vm11336_vm14 = vcmask 392512   ;;  %v2378_v38 = vrot.slane %v2376_v5, 5 }
 0x277   : > { %v4605_v24 = vsel %vm7947_vm12, %v4597_v14, %v4604_v50  ;;  %v4916_v46 = vsel %vm7954_vm13, %v4606_v49, %v4915_v40  ;;  %2557 = vrot.lane.b32.xlu0 %v9892_v44, %s7528_s9  ;;  %v9943_v15 = vcombine.low %v2452_v35, %v2455_v2  ;;  %v9972_v0 = vld [vmem:[#allocation2 + $0xcc] sm:$0xf]  ;;  %v9977_v5 = vld [vmem:[#allocation2 + $0xd0] sm:$0xf] }
 0x278   : > { %4914 = vst.msk [vmem:[#allocation5 + $0x10] sm:$0xf] %vm11332_vm15, %v4605_v24  ;;  %4917 = vst [vmem:[#allocation5 + $0x14] sm:$0x1] %v4916_v46  ;;  %v3412_v6 = vpop.permute.xlu1 %3411  ;;  %vm11337_vm15 = vcmask 64512   ;;  %v2379_v49 = vsel %vm7934_vm10, %v2374_v28, %v2378_v38  ;;  %v2595_v35 = vshrl.u32 %v9972_v0, 16 }
 0x279   : > { %3451 = vst.msk [vmem:[#allocation4 + $0x90] sm:$0xff] %vm3441_vm1, %v3412_v6  ;;  %v2480_v4 = vpop.permute.xlu0 %2479  ;;  %v2598_v2 = vshll.u32 %v9972_v0, 16  ;;  %v2604_v28 = vshll.u32 %v9977_v5, 16 }
 0x27a   : > { %3726 = vrot.lane.b32.xlu1 %v9318_v61, %s7535_s29  ;;  %3692 = vst.msk [vmem:[#allocation4 + $0x90] sm:$0xff] %vm3682_vm0, %v3653_v19  ;;  %v2363_v61 = vor.u32 %v2362_v8, %v2359_v11 }
 0x27b   : > { %3898 = vrot.lane.b32.xlu0 %v9515_v17, %s7538_s18 }
 0x27c   : > { %v2316_v37 = vpop.permute.xlu1 %2315  ;;  %v2364_v22 = vrot.slane %v2363_v61, 4 }
 0x27d   : > { %2352 = vst.msk [vmem:[#allocation4 + $0xc0] sm:$0xff] %vm11333_vm2, %v2316_v37  ;;  %v3815_v21 = vpop.permute.xlu0 %3814  ;;  %v9931_v42 = vld [vmem:[#allocation5 + $0xc] sm:$0xf]  ;;  %vm11338_vm2 = vcmask 851712  }
 0x27e   : > { %2487 = vrot.lane.b32.xlu1 %v9851_v41, %s7532_s19  ;;  %2444 = vst.msk [vmem:[#allocation4 + $0xc0] sm:$0xff] %vm11334_vm4, %v2408_v56  ;;  %vm11339_vm4 = vcmask 917312   ;;  %v2369_v50 = vsel %vm7934_vm10, %v2364_v22, %v2368_v23  ;;  %v2608_v22 = vshrl.u32 %v9977_v5, 16 }
 0x27f   : > { %4103 = vrot.lane.b32.xlu0 %v9658_v18, %s7526_s28  ;;  %v9925_v10 = vld [vmem:[#allocation5 + $0x10] sm:$0xf]  ;;  %v7003_v24 = vcombine.low %v2369_v50, %v2379_v49  ;;  %v10014_v49 = vld [vmem:[#allocation5 + $0x4] sm:$0xf] }
 0x280   : > { %v2404_v30 = vpop.permute.xlu1 %2403  ;;  %v9936_v51 = vcombine.low %v9931_v42, %v9925_v10 }
 0x281   : > { %2442 = vst.msk [vmem:[#allocation4 + $0xa0] sm:$0xff] %vm11335_vm8, %v2404_v30  ;;  %v2554_v26 = vpop.permute.xlu0 %2553  ;;  %vm11340_vm8 = vcmask 130112  }
 0x282   : > { %3822 = vrot.lane.b32.xlu1 %v9621_v47, %s7537_s13  ;;  %2518 = vst.msk [vmem:[#allocation4 + $0xa0] sm:$0xff] %vm11336_vm14, %v2480_v4 }
 0x283   : > { %3964 = vrot.lane.b32.xlu0 %v9413_v53, %s7539_s22  ;;  %5174 = vst.msk [vmem:[#allocation6 + $0x8] sm:$0xff] %vm11337_vm15, %v9936_v51  ;;  %vm11341_vm15 = vcmask 458112  }
 0x284   : > { %v3723_v19 = vpop.permute.xlu1 %3722  ;;  %v4343_v7 = vpop.f32.mrb[4].mxu0 }
 0x285   : > { %3762 = vst.msk [vmem:[#allocation4 + $0x90] sm:$0xff] %vm11338_vm2, %v3723_v19  ;;  %v4344_v60 = vadd.f32 %v9862_v45, %v4343_v7  ;;  %v4345_v14 = vpop.f32.mrb[5].mxu0  ;;  %v4096_v54 = vpop.permute.xlu0 %4095  ;;  %vm11342_vm2 = vmmov %vm11341_vm15  ;;  %v7006_v19 = vcombine.low %v9972_v0, %v9977_v5  ;;  %v2597_v7 = vrot.slane %v2595_v35, 4 }
 0x286   : > { %3894 = vrot.lane.b32.xlu1 %v9375_v12, %s7538_s18  ;;  %v4346_v53 = vpop.f32.mrb[6].mxu0  ;;  %3854 = vst.msk [vmem:[#allocation4 + $0x90] sm:$0xff] %vm11339_vm4, %v3815_v21  ;;  %vm11343_vm4 = vcmask 982912   ;;  %v10001_v14 = vld [vmem:[#allocation5] sm:$0xf] }
 0x287   : > { %4134 = vst.msk [vmem:[#allocation4 + $0x98] sm:$0xff] %vm11340_vm8, %v4096_v54  ;;  %v4464_v40 = vmax.f32 %v4344_v60, 0.0  ;;  %v4347_v31 = vadd.f32 %v9862_v45, %v4346_v53  ;;  %v4348_v63 = vpop.f32.mrb[7].mxu0  ;;  %2725 = vrot.lane.b32.xlu0 %v9943_v15, %s7529_s12  ;;  %vm11344_vm8 = vcmask 60416   ;;  %v2600_v60 = vrot.slane %v2598_v2, 5 }
 0x288   : > { %v2484_v56 = vpop.permute.xlu1 %2483  ;;  %v10003_v53 = vrot.slane %v2604_v28, 5  ;;  %v5193_v63 = vshll.u32 %v10001_v14, 16 }
 0x289   : > { %v7273_v12 = vpack.c.bf16 %v4464_v40, %v4464_v40  ;;  %v4465_v55 = vmax.f32 %v4347_v31, 0.0  ;;  %2520 = vst.msk [vmem:[#allocation4 + $0xc0] sm:$0xff] %vm11336_vm14, %v2484_v56  ;;  %v2646_v52 = vpop.permute.xlu0 %2645  ;;  %vm11345_vm14 = vcmask 589312   ;;  %v10006_v31 = vld [vmem:[#allocation2 + $0xd4] sm:$0x1]  ;;  %v2601_v50 = vor.u32 %v2600_v60, %v2597_v7 }
 0x28a   : > { %4099 = vrot.lane.b32.xlu1 %v9488_v62, %s7526_s28  ;;  %2590 = vst.msk [vmem:[#allocation4 + $0xc0] sm:$0xff] %vm11341_vm15, %v2554_v26  ;;  %v4918_v62 = vld [vmem:[#allocation5 + $0x18] sm:$0xf]  ;;  %vm11346_vm15 = vcmask 195712   ;;  %v10058_v60 = vld [vmem:[#allocation5 + $0x8] sm:$0x1] }
 0x28b   : > { %v4608_v46 = vshrl.u32 %v7273_v12, 16  ;;  %v4611_v9 = vshll.u32 %v7273_v12, 16  ;;  %v7274_v32 = vpack.c.bf16 %v4465_v55, %v4465_v55  ;;  %2682 = vst.msk [vmem:[#allocation4 + $0xc0] sm:$0xff] %vm2669_vm6, %v2646_v52  ;;  %2251 = vrot.lane.b32.xlu0 %v9851_v41, %s7525_s27  ;;  %v4922_v41 = vld [vmem:[#allocation5 + $0x20] sm:$0x1] }
 0x28c   : > { %v2550_v6 = vpop.permute.xlu1 %2549 }
 0x28d   : > { %v4610_v20 = vrot.slane %v4608_v46, 7  ;;  %v4616_v4 = vshrl.u32 %v7274_v32, 16  ;;  %v4619_v59 = vshll.u32 %v7274_v32, 16  ;;  %2588 = vst.msk [vmem:[#allocation4 + $0xa0] sm:$0xff] %vm11342_vm2, %v2550_v6  ;;  %v2718_v11 = vpop.permute.xlu0 %2717  ;;  %vm11347_vm2 = vmmov %vm11345_vm14  ;;  %v2689_v32 = vrot.slane %v9977_v5, 5 }
 0x28e   : > { %v4160_v8 = vld [vmem:[#allocation4 + $0x98] sm:$0xff]  ;;  %2649 = vrot.lane.b32.xlu1 %v7003_v24, %s7534_s25 }
 0x28f   : > { %7101 = vmatprep.mubr.msk.bf16.mxu0 %vm4252_vm3, %v4160_v8  ;;  %v4613_v23 = vor.u32 %v4611_v9, %v4610_v20  ;;  %v4614_v27 = vrot.slane %v4610_v20, 4  ;;  %v4618_v37 = vrot.slane %v4616_v4, 7  ;;  %2321 = vrot.lane.b32.xlu0 %v9892_v44, %s7530_s15  ;;  %v5195_v20 = vrot.slane %v5193_v63, 5  ;;  %v10039_v8 = vld [vmem:[#allocation3 + $0xcc] sm:$0xf] }
 0x290   : > { %v3891_v48 = vpop.permute.xlu1 %3890  ;;  %v5199_v4 = vshll.u32 %v10014_v49, 16  ;;  %v2691_v5 = vrot.slane %v2689_v32, 4  ;;  %v7080_v35 = vrot.slane %v10039_v8, 9 }
 0x291   : > { %v4919_v58 = vsel %vm7941_vm11, %v4613_v23, %v4918_v62  ;;  %v4621_v21 = vor.u32 %v4619_v59, %v4618_v37  ;;  %v4623_v61 = vrot.slane %v4618_v37, 4  ;;  %3930 = vst.msk [vmem:[#allocation4 + $0x90] sm:$0xff] %vm11343_vm4, %v3891_v48  ;;  %v2917_v16 = vpop.permute.xlu0 %2916  ;;  %vm11348_vm4 = vcmask 261312   ;;  %v10042_v48 = vld [vmem:[#allocation3 + $0xd4] sm:$0x1] }
 0x292   : > { %4920 = vst [vmem:[#allocation5 + $0x18] sm:$0xf] %v4919_v58  ;;  %3968 = vrot.lane.b32.xlu1 %v9671_v3, %s7539_s22  ;;  %v5203_v59 = vshrl.u32 %v10014_v49, 16  ;;  %v4072_v7 = vrot.slane %v10042_v48, 5 }
 0x293   : > { %v4622_v44 = vsel %vm7947_vm12, %v4614_v27, %v4621_v21  ;;  %v4923_v30 = vsel %vm7954_vm13, %v4623_v61, %v4922_v41  ;;  %2413 = vrot.lane.b32.xlu0 %v7003_v24, %s7527_s8  ;;  %v10022_v24 = vld [vmem:[#allocation3 + $0xd0] sm:$0xf] }
 0x294   : > { %4921 = vst.msk [vmem:[#allocation5 + $0x1c] sm:$0xf] %vm11344_vm8, %v4622_v44  ;;  %4924 = vst [vmem:[#allocation5 + $0x20] sm:$0x1] %v4923_v30  ;;  %v2642_v26 = vpop.permute.xlu1 %2641  ;;  %vm11349_vm8 = vcmask 64512   ;;  %v4069_v62 = vrot.slane %v10022_v24, 5 }
 0x295   : > { %2680 = vst.msk [vmem:[#allocation4 + $0xa0] sm:$0xff] %vm2669_vm6, %v2642_v26  ;;  %v2244_v38 = vpop.permute.xlu0 %2243  ;;  %v2692_v44 = vrot.slane %v10006_v31, 5  ;;  %v10052_v26 = vrot.slane %v5199_v4, 5 }
 0x296   : > { %2924 = vrot.lane.b32.xlu1 %v9524_v33, %s7536_s11  ;;  %2756 = vst.msk [vmem:[#allocation4 + $0xa0] sm:$0xff] %vm11345_vm14, %v2718_v11  ;;  %v2610_v33 = vrot.slane %v2608_v22, 4  ;;  %v2602_v11 = vrot.slane %v2601_v50, 4  ;;  %v5205_v22 = vrot.slane %v5203_v59, 4  ;;  %vm11350_vm14 = vmmov %vm11346_vm15 }
 0x297   : > { %2281 = vst.msk [vmem:[#allocation4 + $0xb0] sm:$0xff] %vm11346_vm15, %v2244_v38  ;;  %2489 = vrot.lane.b32.xlu0 %v9943_v15, %s7532_s19  ;;  %v5190_v15 = vshrl.u32 %v10001_v14, 16  ;;  %vm11351_vm15 = vcmask 326912  }
 0x298   : > { %2955 = vst.msk [vmem:[#allocation4 + $0xa0] sm:$0xff] %vm2944_vm9, %v2917_v16  ;;  %v3961_v54 = vpop.permute.xlu1 %3960  ;;  %v2611_v52 = vor.u32 %v2610_v33, %v10003_v53  ;;  %v7008_v16 = vrot.slane %v9972_v0, 9  ;;  %v4071_v0 = vrot.slane %v4069_v62, 4  ;;  %v2607_v33 = vsel %vm7934_vm10, %v2602_v11, %v10003_v53 }
 0x299   : > { %4000 = vst.msk [vmem:[#allocation4 + $0x90] sm:$0xff] %vm3990_vm5, %v3961_v54  ;;  %v3414_v40 = vpop.permute.xlu0 %3413  ;;  %v10016_v56 = vld [vmem:[#allocation5 + $0x18] sm:$0xf]  ;;  %v5192_v6 = vrot.slane %v5190_v15, 4  ;;  %v10079_v53 = vsel %vm7921_vm7, %v7080_v35, %v4069_v62  ;;  %v5703_v62 = vrot.slane %v10014_v49, 5  ;;  %v7172_v35 = vrot.slane %v10001_v14, 9 }
 0x29a   : > { %3421 = vrot.lane.b32.xlu1 %v9621_v47, %s7531_s16  ;;  %3452 = vst.msk [vmem:[#allocation4 + $0xa0] sm:$0xff] %vm3441_vm1, %v3414_v40  ;;  %v2614_v47 = vshll.u32 %v10006_v31, 16  ;;  %v2612_v37 = vrot.slane %v2611_v52, 4  ;;  %v10068_v50 = vsel %vm7921_vm7, %v7008_v16, %v2689_v32  ;;  %v4073_v4 = vsel %vm7921_vm7, %v4071_v0, %v4072_v7 }
 0x29b   : > { %2559 = vrot.lane.b32.xlu0 %v7006_v19, %s7528_s9  ;;  %v10018_v12 = vld [vmem:[#allocation5 + $0x1c] sm:$0xf]  ;;  %v5196_v2 = vor.u32 %v5195_v20, %v5192_v6  ;;  %v5227_v0 = vshrl.u32 %v9925_v10, 16 }
 0x29c   : > { %v2722_v55 = vpop.permute.xlu1 %2721  ;;  %v10026_v46 = vcombine.low %v10016_v56, %v10018_v12  ;;  %v2616_v41 = vrot.slane %v2614_v47, 5  ;;  %v5206_v47 = vor.u32 %v5205_v22, %v10052_v26 }
 0x29d   : > { %2758 = vst.msk [vmem:[#allocation4 + $0xc0] sm:$0xff] %vm11347_vm2, %v2722_v55  ;;  %v2314_v9 = vpop.permute.xlu0 %2313  ;;  %v10072_v55 = vsel %vm7921_vm7, %v2691_v5, %v2692_v44  ;;  %v10081_v52 = vrot.slane %v5196_v2, 4  ;;  %vm11352_vm2 = vcmask 851712   ;;  %v4929_v2 = vld [vmem:[#allocation5 + $0x2c] sm:$0x1] }
 0x29e   : > { %3662 = vrot.lane.b32.xlu1 %v9515_v17, %s7533_s20  ;;  %2351 = vst.msk [vmem:[#allocation4 + $0xb0] sm:$0xff] %vm11348_vm4, %v2314_v9  ;;  %v2617_v40 = vsel %vm7934_vm10, %v2612_v37, %v2616_v41  ;;  %v5209_v9 = vshll.u32 %v10058_v60, 16  ;;  %v7009_v37 = vcombine.low %v10068_v50, %v10072_v55  ;;  %v5214_v55 = vshrl.u32 %v9931_v42, 16 }
 0x29f   : > { %5175 = vst.msk [vmem:[#allocation6 + $0x10] sm:$0xff] %vm11349_vm8, %v10026_v46  ;;  %4105 = vrot.lane.b32.xlu0 %v9750_v57, %s7526_s28  ;;  %v7007_v11 = vcombine.low %v2607_v33, %v2617_v40  ;;  %vm11353_vm8 = vcmask 392512   ;;  %v4011_v40 = vshll.u32 %v10039_v8, 16 }
 0x2a0   : > { %v2921_v17 = vpop.permute.xlu1 %2920  ;;  %v4351_v23 = vpop.f32.mrb[8].mxu0  ;;  %v4159_v27 = vld [vmem:[#allocation4 + $0x90] sm:$0xff]  ;;  %v5211_v16 = vrot.slane %v5209_v9, 5 }
 0x2a1   : > { %2957 = vst.msk [vmem:[#allocation4 + $0xc0] sm:$0xff] %vm2944_vm9, %v2921_v17  ;;  %v4352_v58 = vadd.f32 %v9862_v45, %v4351_v23  ;;  %v4353_v21 = vpop.f32.mrb[9].mxu0  ;;  %4406 = vmatmul.mubr.bf16.gmra.mrb[36].mxu0 %v4159_v27  ;;  %v3655_v61 = vpop.permute.xlu0 %3654  ;;  %v4013_v9 = vrot.slane %v4011_v40, 5 }
 0x2a2   : > { %3732 = vrot.lane.b32.xlu1 %v9671_v3, %s7535_s29  ;;  %v4354_v30 = vpop.f32.mrb[10].mxu0  ;;  %3693 = vst.msk [vmem:[#allocation4 + $0xa0] sm:$0xff] %vm3682_vm0, %v3655_v61  ;;  %v5202_v21 = vsel %vm7934_vm10, %v10081_v52, %v10052_v26  ;;  %v5207_v61 = vrot.slane %v5206_v47, 4  ;;  %v5217_v47 = vshll.u32 %v9931_v42, 16 }
 0x2a3   : > { %v4466_v28 = vmax.f32 %v4352_v58, 0.0  ;;  %v4355_v38 = vadd.f32 %v9862_v45, %v4354_v30  ;;  %v4356_v19 = vpop.f32.mrb[11].mxu0  ;;  %3970 = vrot.lane.b32.xlu0 %v9752_v29, %s7539_s22  ;;  %v4925_v58 = vld [vmem:[#allocation5 + $0x24] sm:$0xf] }
 0x2a4   : > { %v2248_v54 = vpop.permute.xlu1 %2247  ;;  %v5223_v19 = vshll.u32 %v9925_v10, 16 }
 0x2a5   : > { %v7275_v31 = vpack.c.bf16 %v4466_v28, %v4466_v28  ;;  %v4467_v15 = vmax.f32 %v4355_v38, 0.0  ;;  %2283 = vst.msk [vmem:[#allocation4 + $0xd0] sm:$0xff] %vm11350_vm14, %v2248_v54  ;;  %v2406_v63 = vpop.permute.xlu0 %2405  ;;  %v5705_v28 = vrot.slane %v5703_v62, 4  ;;  %v5706_v38 = vrot.slane %v10058_v60, 5 }
 0x2a6   : > { %3824 = vrot.lane.b32.xlu1 %v9731_v39, %s7537_s13  ;;  %2443 = vst.msk [vmem:[#allocation4 + $0xb0] sm:$0xff] %vm11351_vm15, %v2406_v63  ;;  %v5212_v60 = vsel %vm7934_vm10, %v5207_v61, %v5211_v16  ;;  %vm11354_vm14 = vcmask 60416   ;;  %vm11355_vm15 = vcmask 917312   ;;  %v5216_v16 = vrot.slane %v5214_v55, 4 }
 0x2a7   : > { %v4625_v32 = vshrl.u32 %v7275_v31, 16  ;;  %v4628_v6 = vshll.u32 %v7275_v31, 16  ;;  %v7276_v20 = vpack.c.bf16 %v4467_v15, %v4467_v15  ;;  %2926 = vrot.lane.b32.xlu0 %v9671_v3, %s7536_s11  ;;  %v7081_v3 = vcombine.low %v10079_v53, %v4073_v4 }
 0x2a8   : > { %v3418_v59 = vpop.permute.xlu1 %3417  ;;  %v4017_v31 = vshll.u32 %v10022_v24, 16  ;;  %v4021_v15 = vshrl.u32 %v10022_v24, 16  ;;  %v10128_v4 = vrot.slane %v5223_v19, 5 }
 0x2a9   : > { %v4627_v17 = vrot.slane %v4625_v32, 7  ;;  %v4633_v23 = vshrl.u32 %v7276_v20, 16  ;;  %v4636_v27 = vshll.u32 %v7276_v20, 16  ;;  %3454 = vst.msk [vmem:[#allocation4 + $0xc0] sm:$0xff] %vm3441_vm1, %v3418_v59  ;;  %v3725_v41 = vpop.permute.xlu0 %3724  ;;  %v5229_v59 = vrot.slane %v5227_v0, 4 }
 0x2aa   : > { %3900 = vrot.lane.b32.xlu1 %v9658_v18, %s7538_s18  ;;  %3763 = vst.msk [vmem:[#allocation4 + $0xa0] sm:$0xff] %vm11352_vm2, %v3725_v41  ;;  %v4019_v32 = vrot.slane %v4017_v31, 5  ;;  %v5707_v41 = vsel %vm7921_vm7, %v5705_v28, %v5706_v38  ;;  %vm11356_vm2 = vcmask 326912  }
 0x2ab   : > { %v4630_v5 = vor.u32 %v4628_v6, %v4627_v17  ;;  %v4631_v44 = vrot.slane %v4627_v17, 4  ;;  %v4635_v30 = vrot.slane %v4633_v23, 7  ;;  %3664 = vrot.lane.b32.xlu0 %v9658_v18, %s7533_s20  ;;  %v4008_v18 = vshrl.u32 %v10039_v8, 16 }
 0x2ac   : > { %v2318_v22 = vpop.permute.xlu1 %2317  ;;  %v4023_v6 = vrot.slane %v4021_v15, 4  ;;  %v7156_v23 = vcombine.low %v5202_v21, %v5212_v60  ;;  %v7140_v60 = vcombine.low %v10001_v14, %v10014_v49  ;;  %v7078_v14 = vcombine.low %v10039_v8, %v10022_v24 }
 0x2ad   : > { %v4926_v26 = vsel %vm7941_vm11, %v4630_v5, %v4925_v58  ;;  %v4638_v7 = vor.u32 %v4636_v27, %v4635_v30  ;;  %v4640_v54 = vrot.slane %v4635_v30, 4  ;;  %2353 = vst.msk [vmem:[#allocation4 + $0xd0] sm:$0xff] %vm11348_vm4, %v2318_v22  ;;  %v2482_v33 = vpop.permute.xlu0 %2481  ;;  %v4010_v53 = vrot.slane %v4008_v18, 4  ;;  %v10139_v30 = vld [vmem:[#allocation5 + $0x14] sm:$0x1] }
 0x2ae   : > { %4927 = vst [vmem:[#allocation5 + $0x24] sm:$0xf] %v4926_v26  ;;  %2651 = vrot.lane.b32.xlu1 %v7007_v11, %s7534_s25  ;;  %2519 = vst.msk [vmem:[#allocation4 + $0xb0] sm:$0xff] %vm11353_vm8, %v2482_v33  ;;  %v4024_v17 = vor.u32 %v4023_v6, %v4019_v32  ;;  %v5704_v27 = vsel %vm7921_vm7, %v7172_v35, %v5703_v62  ;;  %v5219_v5 = vrot.slane %v5217_v47, 5  ;;  %vm11357_vm4 = vcmask 458112  }
 0x2af   : > { %v4639_v63 = vsel %vm7947_vm12, %v4631_v44, %v4638_v7  ;;  %v4930_v50 = vsel %vm7954_vm13, %v4640_v54, %v4929_v2  ;;  %3826 = vrot.lane.b32.xlu0 %v9777_v13, %s7537_s13  ;;  %v4027_v13 = vshll.u32 %v10042_v48, 16  ;;  %v4014_v11 = vor.u32 %v4013_v9, %v4010_v53  ;;  %s10945_s13 = scalar_lea.vmem %s11149_s6, %s7913_s23 }
 0x2b0   : > { %4928 = vst.msk [vmem:[#allocation5 + $0x28] sm:$0xf] %vm11354_vm14, %v4639_v63  ;;  %4931 = vst [vmem:[#allocation5 + $0x2c] sm:$0x1] %v4930_v50  ;;  %v3659_v52 = vpop.permute.xlu1 %3658  ;;  %v4025_v44 = vrot.slane %v4024_v17, 4  ;;  %v7188_v62 = vcombine.low %v5704_v27, %v5707_v41  ;;  %v5220_v38 = vor.u32 %v5219_v5, %v5216_v16  ;;  %v5233_v19 = vshll.u32 %v10139_v30, 16 }
 0x2b1   : > { %3695 = vst.msk [vmem:[#allocation4 + $0xc0] sm:$0xff] %vm3682_vm0, %v3659_v52  ;;  %v3817_v20 = vpop.permute.xlu0 %3816  ;;  %v4029_v58 = vrot.slane %v4027_v13, 5  ;;  %v4015_v48 = vrot.slane %v4014_v11, 4  ;;  %vm11358_vm8 = vcmask 851712   ;;  %v5710_v7 = vrot.slane %v9925_v10, 5 }
 0x2b2   : > { %2727 = vrot.lane.b32.xlu1 %v7009_v37, %s7529_s12  ;;  %3855 = vst.msk [vmem:[#allocation4 + $0xa0] sm:$0xff] %vm11355_vm15, %v3817_v20  ;;  %vm11359_vm14 = vcmask 982912   ;;  %v5251_v54 = vshrl.u32 %v10018_v12, 16  ;;  %v5247_v33 = vshll.u32 %v10018_v12, 16  ;;  %vm11360_vm15 = vcmask 64512  }
 0x2b3   : > { %4107 = vrot.lane.b32.xlu0 %v7081_v3, %s7526_s28  ;;  %v5230_v3 = vor.u32 %v5229_v59, %v10128_v4  ;;  %v4020_v2 = vsel %vm7934_vm10, %v4015_v48, %v4019_v32  ;;  %v4030_v22 = vsel %vm7934_vm10, %v4025_v44, %v4029_v58  ;;  %v5221_v31 = vrot.slane %v5220_v38, 4 }
 0x2b4   : > { %v2410_v61 = vpop.permute.xlu1 %2409  ;;  %v7079_v18 = vcombine.low %v4020_v2, %v4030_v22  ;;  %v5235_v15 = vrot.slane %v5233_v19, 5  ;;  %v5241_v63 = vshll.u32 %v10016_v56, 16  ;;  %v5713_v53 = vrot.slane %v10139_v30, 5  ;;  %v4932_v19 = vld [vmem:[#allocation5 + $0x30] sm:$0xf] }
 0x2b5   : > { %2445 = vst.msk [vmem:[#allocation4 + $0xd0] sm:$0xff] %vm11356_vm2, %v2410_v61  ;;  %v2552_v37 = vpop.permute.xlu0 %2551  ;;  %v10146_v21 = vld [vmem:[#allocation5 + $0x24] sm:$0xf]  ;;  %v5231_v26 = vrot.slane %v5230_v3, 4  ;;  %vm11361_vm2 = vmmov %vm11360_vm15  ;;  %v5712_v9 = vrot.slane %v5710_v7, 4  ;;  %v10185_v32 = vrot.slane %v5247_v33, 5 }
 0x2b6   : > { %3423 = vrot.lane.b32.xlu1 %v9731_v39, %s7531_s16  ;;  %2589 = vst.msk [vmem:[#allocation4 + $0xb0] sm:$0xff] %vm11357_vm4, %v2552_v37  ;;  %vm11362_vm4 = vmmov %vm11361_vm2  ;;  %v5253_v6 = vrot.slane %v5251_v54, 4  ;;  %v7173_v13 = vrot.slane %v9931_v42, 9  ;;  %v5243_v17 = vrot.slane %v5241_v63, 5  ;;  %v10195_v61 = vld [vmem:[#allocation5 + $0x20] sm:$0x1] }
 0x2b7   : > { %5621 = vrot.lane.b32.xlu0 %v7156_v23, %s7526_s28  ;;  %v10148_v35 = vld [vmem:[#allocation5 + $0x28] sm:$0xf]  ;;  %4065 = vst.msk [vmem:[#allocation4 + $0xf8] sm:$0xff] %vm11361_vm2, %v7079_v18  ;;  %v5236_v47 = vsel %vm7934_vm10, %v5231_v26, %v5235_v15  ;;  %v5257_v30 = vshll.u32 %v10195_v61, 16  ;;  %vm11366_vm2 = vcmask 458112   ;;  %v5717_v26 = vrot.slane %v10018_v12, 5 }
 0x2b8   : > { %v3729_v28 = vpop.permute.xlu1 %3728  ;;  %v10157_v39 = vcombine.low %v10146_v21, %v10148_v35  ;;  %5173 = vst.msk [vmem:[#allocation6] sm:$0xff] %vm11362_vm4, %v7140_v60  ;;  %v5711_v44 = vsel %vm7921_vm7, %v7173_v13, %v5710_v7  ;;  %v4936_v18 = vld [vmem:[#allocation5 + $0x38] sm:$0x1]  ;;  %v10216_v15 = vld [vmem:[%s11147_s4] sm:$0xff]   ;;  %vm11367_vm4 = vcmask 982912  }
 0x2b9   : > { %3765 = vst.msk [vmem:[#allocation4 + $0xc0] sm:$0xff] %vm11358_vm8, %v3729_v28  ;;  %v3893_v0 = vpop.permute.xlu0 %3892  ;;  %vm11363_vm8 = vcmask 392512   ;;  %7356 = vmatprep.subr.bf16.mxu1 %v10216_v15 }
 0x2ba   : > { %3734 = vrot.lane.b32.xlu1 %v9752_v29, %s7535_s29  ;;  %3931 = vst.msk [vmem:[#allocation4 + $0xa0] sm:$0xff] %vm11359_vm14, %v3893_v0  ;;  %v5238_v29 = vshrl.u32 %v10016_v56, 16  ;;  %vm11364_vm14 = vcmask 130112  }
 0x2bb   : > { %5176 = vst.msk [vmem:[#allocation6 + $0x18] sm:$0xff] %vm11360_vm15, %v10157_v39  ;;  %5861 = vrot.lane.b32.xlu0 %v7188_v62, %s7525_s27  ;;  %vm11365_vm15 = vcmask 917312  }
 0x2bc   : > { %v2486_v40 = vpop.permute.xlu1 %2485  ;;  %v4359_v10 = vpop.f32.mrb[12].mxu0  ;;  %v5240_v11 = vrot.slane %v5238_v29, 4 }
 0x2bd   : > { %2521 = vst.msk [vmem:[#allocation4 + $0xd0] sm:$0xff] %vm11363_vm8, %v2486_v40  ;;  %v4360_v50 = vadd.f32 %v9862_v45, %v4359_v10  ;;  %v4361_v55 = vpop.f32.mrb[13].mxu0  ;;  %v4098_v49 = vpop.permute.xlu0 %4097  ;;  %v5259_v10 = vrot.slane %v5257_v30, 5  ;;  %vm11368_vm8 = vcmask 589312  }
 0x2be   : > { %3902 = vrot.lane.b32.xlu1 %v9750_v57, %s7538_s18  ;;  %v4362_v52 = vpop.f32.mrb[14].mxu0  ;;  %4135 = vst.msk [vmem:[#allocation4 + $0xa8] sm:$0xff] %vm11364_vm14, %v4098_v49  ;;  %v5226_v57 = vsel %vm7934_vm10, %v5221_v31, %v10128_v4  ;;  %v5254_v4 = vor.u32 %v5253_v6, %v10185_v32  ;;  %v5244_v37 = vor.u32 %v5243_v17, %v5240_v11  ;;  %v5275_v31 = vshrl.u32 %v10148_v35, 16 }
 0x2bf   : > { %v4468_v20 = vmax.f32 %v4360_v50, 0.0  ;;  %v4363_v59 = vadd.f32 %v9862_v45, %v4362_v52  ;;  %v4364_v24 = vpop.f32.mrb[15].mxu0  ;;  %5930 = vrot.lane.b32.xlu0 %v9936_v51, %s7530_s15  ;;  %v7157_v41 = vcombine.low %v5226_v57, %v5236_v47  ;;  %v5714_v51 = vsel %vm7921_vm7, %v5712_v9, %v5713_v53 }
 0x2c0   : > { %v3821_v8 = vpop.permute.xlu1 %3820  ;;  %v7189_v22 = vcombine.low %v5711_v44, %v5714_v51  ;;  %v5255_v0 = vrot.slane %v5254_v4, 4  ;;  %v5245_v40 = vrot.slane %v5244_v37, 4  ;;  %v5271_v55 = vshll.u32 %v10148_v35, 16 }
 0x2c1   : > { %v7277_v23 = vpack.c.bf16 %v4468_v20, %v4468_v20  ;;  %v4469_v27 = vmax.f32 %v4363_v59, 0.0  ;;  %3857 = vst.msk [vmem:[#allocation4 + $0xc0] sm:$0xff] %vm11365_vm15, %v3821_v8  ;;  %v2644_v58 = vpop.permute.xlu0 %2643  ;;  %v5719_v49 = vrot.slane %v5717_v26, 4  ;;  %v5720_v53 = vrot.slane %v10195_v61, 5  ;;  %v5034_v59 = vld [vmem:[#allocation5 + $0x2c] sm:$0x1] }
 0x2c2   : > { %3972 = vrot.lane.b32.xlu1 %v7078_v14, %s7539_s22  ;;  %2681 = vst.msk [vmem:[#allocation4 + $0xb0] sm:$0xff] %vm2669_vm6, %v2644_v58  ;;  %v5260_v14 = vsel %vm7934_vm10, %v5255_v0, %v5259_v10  ;;  %v5724_v52 = vrot.slane %v10148_v35, 5  ;;  %v5262_v6 = vshrl.u32 %v10146_v21, 16  ;;  %v5265_v20 = vshll.u32 %v10146_v21, 16 }
 0x2c3   : > { %v4642_v42 = vshrl.u32 %v7277_v23, 16  ;;  %v4645_v16 = vshll.u32 %v7277_v23, 16  ;;  %v7278_v5 = vpack.c.bf16 %v4469_v27, %v4469_v27  ;;  %6021 = vrot.lane.b32.xlu0 %v7157_v41, %s7527_s8  ;;  %vm11369_vm14 = vcmask 60416  }
 0x2c4   : > { %v2556_v48 = vpop.permute.xlu1 %2555  ;;  %v5250_v24 = vsel %vm7934_vm10, %v5245_v40, %v10185_v32  ;;  %v7174_v8 = vrot.slane %v10016_v56, 9  ;;  %vm11370_vm15 = vcmask 130112   ;;  %v5273_v17 = vrot.slane %v5271_v55, 5  ;;  %v7465_v55 = vld [vmem:[%s11147_s4 + $0x8] sm:$0xff]  }
 0x2c5   : > { %v4644_v3 = vrot.slane %v4642_v42, 7  ;;  %v4650_v62 = vshrl.u32 %v7278_v5, 16  ;;  %v4653_v2 = vshll.u32 %v7278_v5, 16  ;;  %2591 = vst.msk [vmem:[#allocation4 + $0xd0] sm:$0xff] %vm11366_vm2, %v2556_v48  ;;  %v3963_v28 = vpop.permute.xlu0 %3962  ;;  %v4162_v38 = vld [vmem:[#allocation4 + $0xa8] sm:$0xff]  ;;  %v10243_v57 = vcombine.low %v5250_v24, %v5260_v14 }
 0x2c6   : > { %5623 = vrot.lane.b32.xlu1 %v7157_v41, %s7526_s28  ;;  %4001 = vst.msk [vmem:[#allocation4 + $0xa0] sm:$0xff] %vm3990_vm5, %v3963_v28  ;;  %7102 = vmatprep.mubr.msk.bf16.mxu0 %vm4252_vm3, %v4162_v38  ;;  %v5277_v23 = vrot.slane %v5275_v31, 4  ;;  %v5721_v27 = vsel %vm7921_vm7, %v5719_v49, %v5720_v53  ;;  %v5726_v32 = vrot.slane %v5724_v52, 4  ;;  %v5727_v41 = vrot.slane %v5034_v59, 5 }
 0x2c7   : > { %v4647_v7 = vor.u32 %v4645_v16, %v4644_v3  ;;  %v4648_v54 = vrot.slane %v4644_v3, 4  ;;  %v4652_v33 = vrot.slane %v4650_v62, 7  ;;  %6096 = vrot.lane.b32.xlu0 %v7189_v22, %s7532_s19  ;;  %v5264_v56 = vrot.slane %v5262_v6, 4 }
 0x2c8   : > { %v3897_v60 = vpop.permute.xlu1 %3896  ;;  %v5267_v58 = vrot.slane %v5265_v20, 5  ;;  %v5718_v51 = vsel %vm7921_vm7, %v7174_v8, %v5717_v26  ;;  %v7175_v4 = vrot.slane %v10146_v21, 9  ;;  %v5278_v16 = vor.u32 %v5277_v23, %v5273_v17 }
 0x2c9   : > { %v4933_v29 = vsel %vm7941_vm11, %v4647_v7, %v4932_v19  ;;  %v4655_v12 = vor.u32 %v4653_v2, %v4652_v33  ;;  %v4657_v63 = vrot.slane %v4652_v33, 4  ;;  %3933 = vst.msk [vmem:[#allocation4 + $0xc0] sm:$0xff] %vm11367_vm4, %v3897_v60  ;;  %v2720_v50 = vpop.permute.xlu0 %2719  ;;  %vm11371_vm2 = vcmask 195712  }
 0x2ca   : > { %4934 = vst [vmem:[#allocation5 + $0x30] sm:$0xf] %v4933_v29  ;;  %5863 = vrot.lane.b32.xlu1 %v7189_v22, %s7525_s27  ;;  %2757 = vst.msk [vmem:[#allocation4 + $0xb0] sm:$0xff] %vm11368_vm8, %v2720_v50  ;;  %v5728_v5 = vsel %vm7921_vm7, %v5726_v32, %v5727_v41  ;;  %v5268_v48 = vor.u32 %v5267_v58, %v5264_v56  ;;  %v5281_v44 = vshll.u32 %v5034_v59, 16  ;;  %v5279_v22 = vrot.slane %v5278_v16, 4 }
 0x2cb   : > { %v4656_v47 = vsel %vm7947_vm12, %v4648_v54, %v4655_v12  ;;  %v4937_v9 = vsel %vm7954_vm13, %v4657_v63, %v4936_v18  ;;  %6165 = vrot.lane.b32.xlu0 %v10026_v46, %s7528_s9  ;;  %v5725_v62 = vsel %vm7921_vm7, %v7175_v4, %v5724_v52  ;;  %vm11372_vm4 = vcmask 64512   ;;  %v4939_v58 = vld [vmem:[#allocation5 + $0x3c] sm:$0xf] }
 0x2cc   : > { %4935 = vst.msk [vmem:[#allocation5 + $0x34] sm:$0xf] %vm11369_vm14, %v4656_v47  ;;  %4938 = vst [vmem:[#allocation5 + $0x38] sm:$0x1] %v4937_v9  ;;  %v4102_v35 = vpop.permute.xlu1 %4101  ;;  %v10274_v38 = vcombine.low %v5725_v62, %v5728_v5  ;;  %v5269_v19 = vrot.slane %v5268_v48, 4  ;;  %v5283_v0 = vrot.slane %v5281_v44, 5 }
 0x2cd   : > { %4137 = vst.msk [vmem:[#allocation4 + $0xc8] sm:$0xff] %vm11370_vm15, %v4102_v35  ;;  %v2919_v13 = vpop.permute.xlu0 %2918  ;;  %v4161_v11 = vld [vmem:[#allocation4 + $0xa0] sm:$0xff]  ;;  %vm11373_vm14 = vcmask 261312   ;;  %vm11374_vm15 = vcmask 326912  }
 0x2ce   : > { %5932 = vrot.lane.b32.xlu1 %v10026_v46, %s7530_s15  ;;  %2956 = vst.msk [vmem:[#allocation4 + $0xb0] sm:$0xff] %vm2944_vm9, %v2919_v13  ;;  %4414 = vmatmul.mubr.bf16.gmra.mrb[40].mxu0 %v4161_v11  ;;  %v7190_v46 = vcombine.low %v5718_v51, %v5721_v27  ;;  %v5284_v18 = vsel %vm7934_vm10, %v5279_v22, %v5283_v0  ;;  %v7466_v13 = vld [vmem:[%s11147_s4 + $0x10] sm:$0xff]   ;;  %v7468_v0 = vld [vmem:[%s11147_s4 + $0x20] ss:$0 sps:$4 sm:$0xff]  }
 0x2cf   : > { %6256 = vrot.lane.b32.xlu0 %v10243_v57, %s7534_s25  ;;  %v5274_v50 = vsel %vm7934_vm10, %v5269_v19, %v5273_v17 }
 0x2d0   : > { %v2648_v61 = vpop.permute.xlu1 %2647  ;;  %v7159_v53 = vcombine.low %v5274_v50, %v5284_v18 }
 0x2d1   : > { %2683 = vst.msk [vmem:[#allocation4 + $0xd0] sm:$0xff] %vm2669_vm6, %v2648_v61  ;;  %v2250_v42 = vpop.permute.xlu0 %2249  ;;  %v10262_v37 = vld [vmem:[#allocation5 + $0x30] sm:$0xf] }
 0x2d2   : > { %6023 = vrot.lane.b32.xlu1 %v10243_v57, %s7527_s8  ;;  %2284 = vst.msk [vmem:[#allocation4 + $0xe0] sm:$0xff] %vm11371_vm2, %v2250_v42  ;;  %v5286_v52 = vshrl.u32 %v10262_v37, 16  ;;  %v5289_v47 = vshll.u32 %v10262_v37, 16  ;;  %v4943_v42 = vld [vmem:[#allocation5 + $0x44] sm:$0x1]  ;;  %vm11375_vm2 = vcmask 60416  }
 0x2d3   : > { %6331 = vrot.lane.b32.xlu0 %v7190_v46, %s7529_s12  ;;  %v10264_v21 = vld [vmem:[#allocation5 + $0x34] sm:$0xf]  ;;  %v5037_v56 = vld [vmem:[#allocation5 + $0x38] sm:$0x1] }
 0x2d4   : > { %v3967_v30 = vpop.permute.xlu1 %3966  ;;  %v4166_v3 = vld [vmem:[#allocation4 + $0xc8] sm:$0xff]  ;;  %v10270_v2 = vcombine.low %v10262_v37, %v10264_v21  ;;  %v5299_v10 = vshrl.u32 %v10264_v21, 16  ;;  %v5295_v31 = vshll.u32 %v10264_v21, 16  ;;  %v5288_v17 = vrot.slane %v5286_v52, 4 }
 0x2d5   : > { %4003 = vst.msk [vmem:[#allocation4 + $0xc0] sm:$0xff] %vm3990_vm5, %v3967_v30  ;;  %7104 = vmatprep.mubr.msk.bf16.mxu1 %vm4252_vm3, %v4166_v3  ;;  %v3420_v28 = vpop.permute.xlu0 %3419  ;;  %v5291_v23 = vrot.slane %v5289_v47, 5  ;;  %v5305_v48 = vshll.u32 %v5037_v56, 16  ;;  %v5734_v19 = vrot.slane %v5037_v56, 5 }
 0x2d6   : > { %6098 = vrot.lane.b32.xlu1 %v7190_v46, %s7532_s19  ;;  %5177 = vst.msk [vmem:[#allocation6 + $0x20] sm:$0xff] %vm11372_vm4, %v10270_v2  ;;  %v10301_v20 = vrot.slane %v5295_v31, 5  ;;  %v5301_v59 = vrot.slane %v5299_v10, 4  ;;  %vm6503_vm4 = vcmask 1043456  }
 0x2d7   : > { %6333 = vrot.lane.b32.xlu0 %v10274_v38, %s7529_s12  ;;  %v5292_v5 = vor.u32 %v5291_v23, %v5288_v17  ;;  %v6505_v10 = vsel %vm6503_vm4, %v7468_v0, 0 }
 0x2d8   : > { %v2724_v26 = vpop.permute.xlu1 %2723  ;;  %v4367_v7 = vpop.f32.mrb[16].mxu0 }
 0x2d9   : > { %2759 = vst.msk [vmem:[#allocation4 + $0xd0] sm:$0xff] %vm11368_vm8, %v2724_v26  ;;  %v4368_v54 = vadd.f32 %v9862_v45, %v4367_v7  ;;  %v4369_v33 = vpop.f32.mrb[17].mxu0  ;;  %v3657_v60 = vpop.permute.xlu0 %3656  ;;  %v5293_v7 = vrot.slane %v5292_v5, 4  ;;  %vm11376_vm8 = vcmask 851712  }
 0x2da   : > { %v4370_v40 = vpop.f32.mrb[18].mxu0  ;;  %6167 = vrot.lane.b32.xlu1 %v10157_v39, %s7528_s9 }
 0x2db   : > { %v4470_v29 = vmax.f32 %v4368_v54, 0.0  ;;  %v4371_v12 = vadd.f32 %v9862_v45, %v4370_v40  ;;  %v4372_v63 = vpop.f32.mrb[19].mxu0  ;;  %5865 = vrot.lane.b32.xlu0 %v7190_v46, %s7525_s27  ;;  %v7467_v46 = vld [vmem:[%s11147_s4 + $0x18] sm:$0xff]   ;;  %v5307_v54 = vrot.slane %v5305_v48, 5  ;;  %v7176_v40 = vrot.slane %v10262_v37, 9 }
 0x2dc   : > { %v2923_v14 = vpop.permute.xlu1 %2922  ;;  %v4165_v49 = vld [vmem:[#allocation4 + $0xc0] sm:$0xff] }
 0x2dd   : > { %v7279_v9 = vpack.c.bf16 %v4470_v29, %v4470_v29  ;;  %v4471_v6 = vmax.f32 %v4371_v12, 0.0  ;;  %2958 = vst.msk [vmem:[#allocation4 + $0xd0] sm:$0xff] %vm2944_vm9, %v2923_v14  ;;  %4430 = vmatmul.mubr.bf16.vlgmr.msra.gmra.mrb[0].mxu1 %v4165_v49  ;;  %v2412_v45 = vpop.permute.xlu0 %2411  ;;  %v5298_v29 = vsel %vm7934_vm10, %v5293_v7, %v10301_v20 }
 0x2de   : > { %6258 = vrot.lane.b32.xlu1 %v7159_v53, %s7534_s25  ;;  %3455 = vst.msk [vmem:[#allocation4 + $0xd0] sm:$0xff] %vm3441_vm1, %v3420_v28  ;;  %7357 = vmatpush3.bf16.msra.mxu1 %v10216_v15 }
 0x2df   : > { %v4659_v35 = vshrl.u32 %v7279_v9, 16  ;;  %v4662_v24 = vshll.u32 %v7279_v9, 16  ;;  %v7280_v8 = vpack.c.bf16 %v4471_v6, %v4471_v6  ;;  %5934 = vrot.lane.b32.xlu0 %v10157_v39, %s7530_s15  ;;  %7358 = vmatprep.subr.bf16.mxu1 %v7465_v55  ;;  %v5302_v39 = vor.u32 %v5301_v59, %v10301_v20 }
 0x2e0   : > { %v3416_v11 = vpop.permute.xlu1 %3415 }
 0x2e1   : > { %v4661_v27 = vrot.slane %v4659_v35, 7  ;;  %v4667_v32 = vshrl.u32 %v7280_v8, 16  ;;  %v4670_v41 = vshll.u32 %v7280_v8, 16  ;;  %3453 = vst.msk [vmem:[#allocation4 + $0xb0] sm:$0xff] %vm3441_vm1, %v3416_v11  ;;  %v3731_v15 = vpop.permute.xlu0 %3730  ;;  %v5303_v22 = vrot.slane %v5302_v39, 4 }
 0x2e2   : > { %5625 = vrot.lane.b32.xlu1 %v10243_v57, %s7526_s28  ;;  %3694 = vst.msk [vmem:[#allocation4 + $0xb0] sm:$0xff] %vm3682_vm0, %v3657_v60  ;;  %7359 = vmatpush3.bf16.msra.mxu1 %v7465_v55  ;;  %v5731_v57 = vrot.slane %v10264_v21, 5 }
 0x2e3   : > { %v4664_v61 = vor.u32 %v4662_v24, %v4661_v27  ;;  %v4665_v51 = vrot.slane %v4661_v27, 4  ;;  %v4669_v4 = vrot.slane %v4667_v32, 7  ;;  %6025 = vrot.lane.b32.xlu0 %v7159_v53, %s7527_s8  ;;  %7360 = vmatprep.subr.bf16.mxu1 %v7466_v13  ;;  %v5308_v60 = vsel %vm7934_vm10, %v5303_v22, %v5307_v54 }
 0x2e4   : > { %v2320_v16 = vpop.permute.xlu1 %2319  ;;  %v5733_v33 = vrot.slane %v5731_v57, 4  ;;  %v10349_v12 = vcombine.low %v5298_v29, %v5308_v60  ;;  %v5732_v50 = vsel %vm7921_vm7, %v7176_v40, %v5731_v57  ;;  %v4946_v29 = vld [vmem:[#allocation5 + $0x48] sm:$0xf] }
 0x2e5   : > { %v4940_v44 = vsel %vm7941_vm11, %v4664_v61, %v4939_v58  ;;  %v4672_v30 = vor.u32 %v4670_v41, %v4669_v4  ;;  %v4674_v3 = vrot.slane %v4669_v4, 4  ;;  %2354 = vst.msk [vmem:[#allocation4 + $0xe0] sm:$0xff] %vm11373_vm14, %v2320_v16  ;;  %v3819_v62 = vpop.permute.xlu0 %3818  ;;  %vm11377_vm14 = vmmov %vm11376_vm8 }
 0x2e6   : > { %4941 = vst [vmem:[#allocation5 + $0x3c] sm:$0xf] %v4940_v44  ;;  %5627 = vrot.lane.b32.xlu1 %v7159_v53, %s7526_s28  ;;  %2446 = vst.msk [vmem:[#allocation4 + $0xe0] sm:$0xff] %vm11374_vm15, %v2412_v45  ;;  %7361 = vmatpush3.bf16.msra.mxu1 %v7466_v13  ;;  %vm11378_vm15 = vcmask 917312  }
 0x2e7   : > { %v4673_v28 = vsel %vm7947_vm12, %v4665_v51, %v4672_v30  ;;  %v4944_v21 = vsel %vm7954_vm13, %v4674_v3, %v4943_v42  ;;  %6100 = vrot.lane.b32.xlu0 %v10274_v38, %s7532_s19  ;;  %7362 = vmatprep.subr.bf16.mxu1 %v7467_v46 }
 0x2e8   : > { %4942 = vst.msk [vmem:[#allocation5 + $0x40] sm:$0xf] %vm11375_vm2, %v4673_v28  ;;  %4945 = vst [vmem:[#allocation5 + $0x44] sm:$0x1] %v4944_v21  ;;  %v3661_v26 = vpop.permute.xlu1 %3660  ;;  %vm11379_vm2 = vcmask 392512  }
 0x2e9   : > { %3696 = vst.msk [vmem:[#allocation4 + $0xd0] sm:$0xff] %vm3682_vm0, %v3661_v26  ;;  %v2558_v18 = vpop.permute.xlu0 %2557 }
 0x2ea   : > { %5867 = vrot.lane.b32.xlu1 %v10274_v38, %s7525_s27  ;;  %3766 = vst.msk [vmem:[#allocation4 + $0xd0] sm:$0xff] %vm11376_vm8, %v3731_v15  ;;  %7363 = vmatpush3.bf16.msra.mxu1 %v7467_v46  ;;  %v5735_v38 = vsel %vm7921_vm7, %v5733_v33, %v5734_v19  ;;  %vm11381_vm8 = vcmask 64512   ;;  %v10372_v15 = vld [vmem:[%s11146_s3] ss:$0 sm:$0xff] }
 0x2eb   : > { %6169 = vrot.lane.b32.xlu0 %v10270_v2, %s7528_s9  ;;  %7416 = vmatprep.subr.msk.bf16.mxu1 %vm6503_vm4, %v7468_v0  ;;  %v7192_v49 = vcombine.low %v5732_v50, %v5735_v38  ;;  %vm11380_vm4 = vcmask 458112   ;;  %v4950_v50 = vld [vmem:[#allocation5 + $0x50] sm:$0x1] }
 0x2ec   : > { %v3727_v31 = vpop.permute.xlu1 %3726 }
 0x2ed   : > { %3764 = vst.msk [vmem:[#allocation4 + $0xb0] sm:$0xff] %vm11377_vm14, %v3727_v31  ;;  %v3899_v63 = vpop.permute.xlu0 %3898  ;;  %v5038_v37 = vld [vmem:[#allocation5 + $0x3c] sm:$0xf]  ;;  %vm11382_vm14 = vcmask 130112  }
 0x2ee   : > { %5936 = vrot.lane.b32.xlu1 %v10270_v2, %s7530_s15  ;;  %3856 = vst.msk [vmem:[#allocation4 + $0xb0] sm:$0xff] %vm11378_vm15, %v3819_v62  ;;  %v5310_v55 = vshrl.u32 %v5038_v37, 16  ;;  %v5313_v14 = vshll.u32 %v5038_v37, 16  ;;  %7365 = vmatpush3.bf16.msra.mxu1 %v6505_v10  ;;  %v7177_v35 = vrot.slane %v5038_v37, 9 }
 0x2ef   : > { %6260 = vrot.lane.b32.xlu0 %v10349_v12, %s7534_s25  ;;  %v5039_v53 = vld [vmem:[#allocation5 + $0x40] sm:$0xf]  ;;  %v5040_v52 = vld [vmem:[#allocation5 + $0x44] sm:$0x1] }
 0x2f0   : > { %v2488_v47 = vpop.permute.xlu1 %2487  ;;  %v10358_v9 = vcombine.low %v5038_v37, %v5039_v53  ;;  %v5323_v6 = vshrl.u32 %v5039_v53, 16  ;;  %v5312_v45 = vrot.slane %v5310_v55, 4  ;;  %v5315_v2 = vrot.slane %v5313_v14, 5 }
 0x2f1   : > { %2522 = vst.msk [vmem:[#allocation4 + $0xe0] sm:$0xff] %vm11379_vm2, %v2488_v47  ;;  %v4104_v20 = vpop.permute.xlu0 %4103  ;;  %v5319_v59 = vshll.u32 %v5039_v53, 16  ;;  %v5738_v24 = vrot.slane %v5039_v53, 5  ;;  %v5741_v8 = vrot.slane %v5040_v52, 5  ;;  %v5329_v11 = vshll.u32 %v5040_v52, 16 }
 0x2f2   : > { %6027 = vrot.lane.b32.xlu1 %v10349_v12, %s7527_s8  ;;  %2592 = vst.msk [vmem:[#allocation4 + $0xe0] sm:$0xff] %vm11380_vm4, %v2558_v18  ;;  %v5325_v13 = vrot.slane %v5323_v6, 4  ;;  %v5316_v17 = vor.u32 %v5315_v2, %v5312_v45  ;;  %vm11383_vm2 = vcmask 982912  }
 0x2f3   : > { %5178 = vst.msk [vmem:[#allocation6 + $0x28] sm:$0xff] %vm11381_vm8, %v10358_v9  ;;  %6335 = vrot.lane.b32.xlu0 %v7192_v49, %s7529_s12  ;;  %v5321_v23 = vrot.slane %v5319_v59, 5  ;;  %v5740_v27 = vrot.slane %v5738_v24, 4  ;;  %v5739_v51 = vsel %vm7921_vm7, %v7177_v35, %v5738_v24  ;;  %v5331_v42 = vrot.slane %v5329_v11, 5  ;;  %vm11384_vm4 = vmmov %vm11383_vm2 }
 0x2f4   : > { %4138 = vst.msk [vmem:[#allocation4 + $0xd8] sm:$0xff] %vm11382_vm14, %v4104_v20  ;;  %v3823_v32 = vpop.permute.xlu1 %3822  ;;  %v4375_v41 = vpop.f32.mrb[20].mxu0  ;;  %v5317_v44 = vrot.slane %v5316_v17, 4  ;;  %vm11385_vm8 = vmmov %vm11382_vm14  ;;  %vm11386_vm14 = vcmask 195712  }
 0x2f5   : > { %3858 = vst.msk [vmem:[#allocation4 + $0xd0] sm:$0xff] %vm11378_vm15, %v3823_v32  ;;  %v4376_v56 = vadd.f32 %v10372_v15, %v4375_v41  ;;  %v4377_v58 = vpop.f32.mrb[21].mxu0  ;;  %v5326_v39 = vor.u32 %v5325_v13, %v5321_v23  ;;  %v3965_v61 = vpop.permute.xlu0 %3964  ;;  %v5742_v4 = vsel %vm7921_vm7, %v5740_v27, %v5741_v8  ;;  %vm11387_vm15 = vcmask 589312  }
 0x2f6   : > { %v4378_v46 = vpop.f32.mrb[22].mxu0  ;;  %6102 = vrot.lane.b32.xlu1 %v7192_v49, %s7532_s19  ;;  %3934 = vst.msk [vmem:[#allocation4 + $0xd0] sm:$0xff] %vm11383_vm2, %v3899_v63  ;;  %v10381_v16 = vcombine.low %v5739_v51, %v5742_v4  ;;  %v5322_v54 = vsel %vm7934_vm10, %v5317_v44, %v5321_v23  ;;  %vm11388_vm2 = vcmask 261312  }
 0x2f7   : > { %v4472_v5 = vmax.f32 %v4376_v56, 0.0  ;;  %v4379_v48 = vadd.f32 %v10372_v15, %v4378_v46  ;;  %v4380_v57 = vpop.f32.mrb[23].mxu0  ;;  %v5327_v30 = vrot.slane %v5326_v39, 4 }
 0x2f8   : > { %v3895_v3 = vpop.permute.xlu1 %3894  ;;  %6337 = vrot.lane.b32.xlu0 %v10381_v16, %s7529_s12 }
 0x2f9   : > { %v7281_v62 = vpack.c.bf16 %v4472_v5, %v4472_v5  ;;  %v4473_v22 = vmax.f32 %v4379_v48, 0.0  ;;  %3932 = vst.msk [vmem:[#allocation4 + $0xb0] sm:$0xff] %vm11384_vm4, %v3895_v3  ;;  %v5332_v28 = vsel %vm7934_vm10, %v5327_v30, %v5331_v42  ;;  %v2726_v21 = vpop.permute.xlu0 %2725  ;;  %vm11389_vm4 = vcmask 60416  }
 0x2fa   : > { %6171 = vrot.lane.b32.xlu1 %v10358_v9, %s7528_s9  ;;  %4002 = vst.msk [vmem:[#allocation4 + $0xb0] sm:$0xff] %vm3990_vm5, %v3965_v61  ;;  %v7161_v18 = vcombine.low %v5322_v54, %v5332_v28 }
 0x2fb   : > { %v4168_v19 = vld [vmem:[#allocation4 + $0xd8] sm:$0xff]  ;;  %v4676_v0 = vshrl.u32 %v7281_v62, 16  ;;  %v4679_v26 = vshll.u32 %v7281_v62, 16  ;;  %v7282_v7 = vpack.c.bf16 %v4473_v22, %v4473_v22 }
 0x2fc   : > { %7105 = vmatprep.mubr.msk.bf16.mxu1 %vm4252_vm3, %v4168_v19  ;;  %v4100_v33 = vpop.permute.xlu1 %4099  ;;  %5869 = vrot.lane.b32.xlu0 %v7192_v49, %s7525_s27 }
 0x2fd   : > { %v4678_v60 = vrot.slane %v4676_v0, 7  ;;  %v4684_v40 = vshrl.u32 %v7282_v7, 16  ;;  %v4687_v10 = vshll.u32 %v7282_v7, 16  ;;  %4136 = vst.msk [vmem:[#allocation4 + $0xb8] sm:$0xff] %vm11385_vm8, %v4100_v33  ;;  %v2252_v31 = vpop.permute.xlu0 %2251  ;;  %vm11390_vm8 = vcmask 326912  }
 0x2fe   : > { %6262 = vrot.lane.b32.xlu1 %v7161_v18, %s7534_s25  ;;  %2285 = vst.msk [vmem:[#allocation4 + $0xf0] sm:$0xff] %vm11386_vm14, %v2252_v31  ;;  %vm11391_vm14 = vcmask 392512  }
 0x2ff   : > { %v4681_v38 = vor.u32 %v4679_v26, %v4678_v60  ;;  %v4682_v63 = vrot.slane %v4678_v60, 4  ;;  %v4686_v37 = vrot.slane %v4684_v40, 7 }
 0x300   : > { %v2650_v55 = vpop.permute.xlu1 %2649  ;;  %5938 = vrot.lane.b32.xlu0 %v10358_v9, %s7530_s15 }
 0x301   : > { %v4947_v14 = vsel %vm7941_vm11, %v4681_v38, %v4946_v29  ;;  %v4689_v49 = vor.u32 %v4687_v10, %v4686_v37  ;;  %v4691_v53 = vrot.slane %v4686_v37, 4  ;;  %2684 = vst.msk [vmem:[#allocation4 + $0xe0] sm:$0xff] %vm2669_vm6, %v2650_v55  ;;  %v2322_v52 = vpop.permute.xlu0 %2321  ;;  %v4163_v6 = vld [vmem:[#allocation4 + $0xb0] sm:$0xff] }
 0x302   : > { %4948 = vst [vmem:[#allocation5 + $0x48] sm:$0xf] %v4947_v14  ;;  %5629 = vrot.lane.b32.xlu1 %v10349_v12, %s7526_s28  ;;  %2760 = vst.msk [vmem:[#allocation4 + $0xe0] sm:$0xff] %vm11387_vm15, %v2726_v21  ;;  %vm11392_vm15 = vcmask 64512  }
 0x303   : > { %2355 = vst.msk [vmem:[#allocation4 + $0xf0] sm:$0xff] %vm11388_vm2, %v2322_v52  ;;  %v4690_v47 = vsel %vm7947_vm12, %v4682_v63, %v4689_v49  ;;  %v4951_v9 = vsel %vm7954_vm13, %v4691_v53, %v4950_v50  ;;  %vm11393_vm2 = vcmask 458112  }
 0x304   : > { %4949 = vst.msk [vmem:[#allocation5 + $0x4c] sm:$0xf] %vm11389_vm4, %v4690_v47  ;;  %4952 = vst [vmem:[#allocation5 + $0x50] sm:$0x1] %v4951_v9  ;;  %v3969_v45 = vpop.permute.xlu1 %3968  ;;  %v4164_v2 = vld [vmem:[#allocation4 + $0xb8] sm:$0xff]  ;;  %6029 = vrot.lane.b32.xlu0 %v7161_v18, %s7527_s8  ;;  %vm11394_vm4 = vcmask 130112  }
 0x305   : > { %4004 = vst.msk [vmem:[#allocation4 + $0xd0] sm:$0xff] %vm3990_vm5, %v3969_v45  ;;  %7103 = vmatprep.mubr.msk.bf16.mxu0 %vm4252_vm3, %v4164_v2  ;;  %v2414_v12 = vpop.permute.xlu0 %2413 }
 0x306   : > { %5631 = vrot.lane.b32.xlu1 %v7161_v18, %s7526_s28  ;;  %4422 = vmatmul.mubr.bf16.gmra.mrb[44].mxu0 %v4163_v6  ;;  %2447 = vst.msk [vmem:[#allocation4 + $0xf0] sm:$0xff] %vm11390_vm8, %v2414_v12  ;;  %vm11395_vm8 = vcmask 851712   ;;  %v4953_v6 = vld [vmem:[#allocation5 + $0x54] sm:$0xf] }
 0x308   : > { %v2925_v20 = vpop.permute.xlu1 %2924  ;;  %6104 = vrot.lane.b32.xlu0 %v10381_v16, %s7532_s19 }
 0x309   : > { %2959 = vst.msk [vmem:[#allocation4 + $0xe0] sm:$0xff] %vm2944_vm9, %v2925_v20  ;;  %v10421_v59 = vld [vmem:[#allocation5 + $0x48] sm:$0xf]  ;;  %v2490_v35 = vpop.permute.xlu0 %2489 }
 0x30a   : > { %5871 = vrot.lane.b32.xlu1 %v10381_v16, %s7525_s27  ;;  %v5334_v24 = vshrl.u32 %v10421_v59, 16  ;;  %v5337_v8 = vshll.u32 %v10421_v59, 16  ;;  %2523 = vst.msk [vmem:[#allocation4 + $0xf0] sm:$0xff] %vm11391_vm14, %v2490_v35  ;;  %v7178_v33 = vrot.slane %v10421_v59, 9  ;;  %vm11396_vm14 = vcmask 917312  }
 0x30b   : > { %v5042_v13 = vld [vmem:[#allocation5 + $0x4c] sm:$0xf]  ;;  %v5043_v11 = vld [vmem:[#allocation5 + $0x50] sm:$0x1] }
 0x30c   : > { %v3422_v17 = vpop.permute.xlu1 %3421  ;;  %v7146_v23 = vcombine.low %v10421_v59, %v5042_v13  ;;  %v5347_v27 = vshrl.u32 %v5042_v13, 16  ;;  %v4167_v32 = vld [vmem:[#allocation4 + $0xd0] sm:$0xff]  ;;  %v5336_v41 = vrot.slane %v5334_v24, 4  ;;  %v5339_v56 = vrot.slane %v5337_v8, 5  ;;  %v4957_v59 = vld [vmem:[#allocation5 + $0x5c] sm:$0x1] }
 0x30d   : > { %3456 = vst.msk [vmem:[#allocation4 + $0xe0] sm:$0xff] %vm3441_vm1, %v3422_v17  ;;  %4438 = vmatmul.mubr.bf16.gmra.mrb[4].mxu1 %v4167_v32  ;;  %v5343_v58 = vshll.u32 %v5042_v13, 16  ;;  %v2560_v39 = vpop.permute.xlu0 %2559  ;;  %v5353_v4 = vshll.u32 %v5043_v11, 16  ;;  %v5745_v42 = vrot.slane %v5042_v13, 5  ;;  %v5748_v28 = vrot.slane %v5043_v11, 5 }
 0x30e   : > { %5940 = vrot.lane.b32.xlu1 %v7146_v23, %s7530_s15  ;;  %5179 = vst.msk [vmem:[#allocation6 + $0x30] sm:$0xff] %vm11392_vm15, %v7146_v23  ;;  %6173 = vrot.lane.b32.xlu0 %v7146_v23, %s7528_s9  ;;  %v5340_v61 = vor.u32 %v5339_v56, %v5336_v41  ;;  %v5349_v51 = vrot.slane %v5347_v27, 4  ;;  %vm11397_vm15 = vcmask 982912  }
 0x30f   : > { %2593 = vst.msk [vmem:[#allocation4 + $0xf0] sm:$0xff] %vm11393_vm2, %v2560_v39  ;;  %v5345_v46 = vrot.slane %v5343_v58, 5  ;;  %v5355_v22 = vrot.slane %v5353_v4, 5  ;;  %v5747_v7 = vrot.slane %v5745_v42, 4  ;;  %v5746_v52 = vsel %vm7921_vm7, %v7178_v33, %v5745_v42 }
 0x310   : > { %v3663_v16 = vpop.permute.xlu1 %3662  ;;  %v4383_v5 = vpop.f32.mrb[24].mxu0  ;;  %v5341_v44 = vrot.slane %v5340_v61, 4  ;;  %vm11398_vm2 = vcmask 60416  }
 0x311   : > { %3697 = vst.msk [vmem:[#allocation4 + $0xe0] sm:$0xff] %vm3682_vm0, %v3663_v16  ;;  %v4384_v48 = vadd.f32 %v10372_v15, %v4383_v5  ;;  %v4385_v57 = vpop.f32.mrb[25].mxu0  ;;  %v5350_v30 = vor.u32 %v5349_v51, %v5345_v46  ;;  %v4106_v3 = vpop.permute.xlu0 %4105  ;;  %v5749_v50 = vsel %vm7921_vm7, %v5747_v7, %v5748_v28 }
 0x312   : > { %v4386_v62 = vpop.f32.mrb[26].mxu0  ;;  %4139 = vst.msk [vmem:[#allocation4 + $0xe8] sm:$0xff] %vm11394_vm4, %v4106_v3  ;;  %v5346_v40 = vsel %vm7934_vm10, %v5341_v44, %v5345_v46  ;;  %v10455_v45 = vcombine.low %v5746_v52, %v5749_v50  ;;  %vm11399_vm4 = vcmask 589312  }
 0x313   : > { %v4474_v21 = vmax.f32 %v4384_v48, 0.0  ;;  %v4387_v19 = vadd.f32 %v10372_v15, %v4386_v62  ;;  %v4388_v0 = vpop.f32.mrb[27].mxu0  ;;  %v5351_v26 = vrot.slane %v5350_v30, 4 }
 0x314   : > { %v3733_v54 = vpop.permute.xlu1 %3732 }
 0x315   : > { %v7283_v18 = vpack.c.bf16 %v4474_v21, %v4474_v21  ;;  %v4475_v60 = vmax.f32 %v4387_v19, 0.0  ;;  %3767 = vst.msk [vmem:[#allocation4 + $0xe0] sm:$0xff] %vm11395_vm8, %v3733_v54  ;;  %v5356_v10 = vsel %vm7934_vm10, %v5351_v26, %v5355_v22  ;;  %v3971_v31 = vpop.permute.xlu0 %3970  ;;  %vm11400_vm8 = vcmask 130112  }
 0x316   : > { %v10444_v29 = vcombine.low %v5346_v40, %v5356_v10 }
 0x317   : > { %v4693_v38 = vshrl.u32 %v7283_v18, 16  ;;  %v4696_v63 = vshll.u32 %v7283_v18, 16  ;;  %v7284_v37 = vpack.c.bf16 %v4475_v60, %v4475_v60 }
 0x318   : > { %6031 = vrot.lane.b32.xlu1 %v10444_v29, %s7527_s8  ;;  %v3825_v55 = vpop.permute.xlu1 %3824  ;;  %6264 = vrot.lane.b32.xlu0 %v10444_v29, %s7534_s25 }
 0x319   : > { %v4695_v14 = vrot.slane %v4693_v38, 7  ;;  %v4701_v49 = vshrl.u32 %v7284_v37, 16  ;;  %v4704_v53 = vshll.u32 %v7284_v37, 16  ;;  %3859 = vst.msk [vmem:[#allocation4 + $0xe0] sm:$0xff] %vm11396_vm14, %v3825_v55  ;;  %v2927_v47 = vpop.permute.xlu0 %2926  ;;  %v4170_v9 = vld [vmem:[#allocation4 + $0xe8] sm:$0xff]  ;;  %vm11402_vm14 = vmmov %vm11400_vm8 }
 0x31a   : > { %7106 = vmatprep.mubr.msk.bf16.mxu1 %vm4252_vm3, %v4170_v9 }
 0x31b   : > { %v4698_v2 = vor.u32 %v4696_v63, %v4695_v14  ;;  %v4699_v12 = vrot.slane %v4695_v14, 4  ;;  %v4703_v20 = vrot.slane %v4701_v49, 7 }
 0x31c   : > { %6106 = vrot.lane.b32.xlu1 %v10455_v45, %s7532_s19  ;;  %v3901_v35 = vpop.permute.xlu1 %3900  ;;  %6339 = vrot.lane.b32.xlu0 %v10455_v45, %s7529_s12 }
 0x31d   : > { %v4954_v24 = vsel %vm7941_vm11, %v4698_v2, %v4953_v6  ;;  %v4706_v8 = vor.u32 %v4704_v53, %v4703_v20  ;;  %v4708_v13 = vrot.slane %v4703_v20, 4  ;;  %3935 = vst.msk [vmem:[#allocation4 + $0xe0] sm:$0xff] %vm11397_vm15, %v3901_v35  ;;  %v3665_v11 = vpop.permute.xlu0 %3664  ;;  %vm11405_vm15 = vcmask 195712  }
 0x31e   : > { %4955 = vst [vmem:[#allocation5 + $0x54] sm:$0xf] %v4954_v24  ;;  %4005 = vst.msk [vmem:[#allocation4 + $0xe0] sm:$0xff] %vm3990_vm5, %v3971_v31 }
 0x31f   : > { %v4707_v17 = vsel %vm7947_vm12, %v4699_v12, %v4706_v8  ;;  %v4958_v23 = vsel %vm7954_vm13, %v4708_v13, %v4957_v59 }
 0x320   : > { %4956 = vst.msk [vmem:[#allocation5 + $0x58] sm:$0xf] %vm11398_vm2, %v4707_v17  ;;  %4959 = vst [vmem:[#allocation5 + $0x5c] sm:$0x1] %v4958_v23  ;;  %v2652_v27 = vpop.permute.xlu1 %2651  ;;  %vm11406_vm2 = vcmask 982912  }
 0x321   : > { %2685 = vst.msk [vmem:[#allocation4 + $0xf0] sm:$0xff] %vm2669_vm6, %v2652_v27  ;;  %v3827_v32 = vpop.permute.xlu0 %3826 }
 0x324   : > { %v2728_v41 = vpop.permute.xlu1 %2727 }
 0x325   : > { %2761 = vst.msk [vmem:[#allocation4 + $0xf0] sm:$0xff] %vm11399_vm4, %v2728_v41  ;;  %v5044_v56 = vld [vmem:[#allocation5 + $0x54] sm:$0xf]  ;;  %v4169_v58 = vld [vmem:[#allocation4 + $0xe0] sm:$0xff]  ;;  %v4108_v39 = vpop.permute.xlu0 %4107  ;;  %vm11408_vm4 = vcmask 326912  }
 0x326   : > { %2960 = vst.msk [vmem:[#allocation4 + $0xf0] sm:$0xff] %vm2944_vm9, %v2927_v47  ;;  %v5358_v61 = vshrl.u32 %v5044_v56, 16  ;;  %v5361_v51 = vshll.u32 %v5044_v56, 16  ;;  %4446 = vmatmul.mubr.bf16.gmra.mrb[8].mxu1 %v4169_v58  ;;  %v7179_v42 = vrot.slane %v5044_v56, 9  ;;  %vm11401_vm9 = vcmask 64512  }
 0x327   : > { %4140 = vst.msk [vmem:[#allocation4 + $0xf8] sm:$0xff] %vm11400_vm8, %v4108_v39  ;;  %v5045_v4 = vld [vmem:[#allocation5 + $0x58] sm:$0xf]  ;;  %v5046_v46 = vld [vmem:[#allocation5 + $0x5c] sm:$0x1] }
 0x328   : > { %v3424_v16 = vpop.permute.xlu1 %3423  ;;  %v10475_v5 = vcombine.low %v5044_v56, %v5045_v4  ;;  %v5371_v48 = vshrl.u32 %v5045_v4, 16  ;;  %v5752_v57 = vrot.slane %v5045_v4, 5  ;;  %v5755_v44 = vrot.slane %v5046_v46, 5  ;;  %v4964_v39 = vld [vmem:[#allocation5 + $0x68] sm:$0x1] }
 0x329   : > { %3457 = vst.msk [vmem:[#allocation4 + $0xf0] sm:$0xff] %vm3441_vm1, %v3424_v16  ;;  %v5360_v30 = vrot.slane %v5358_v61, 4  ;;  %v5363_v3 = vrot.slane %v5361_v51, 5  ;;  %v5367_v62 = vshll.u32 %v5045_v4, 16  ;;  %v5622_v22 = vpop.permute.xlu0 %5621  ;;  %v5377_v26 = vshll.u32 %v5046_v46, 16 }
 0x32a   : > { %3698 = vst.msk [vmem:[#allocation4 + $0xf0] sm:$0xff] %vm3682_vm0, %v3665_v11  ;;  %6175 = vrot.lane.b32.xlu1 %v10475_v5, %s7528_s9  ;;  %v5754_v28 = vrot.slane %v5752_v57, 4  ;;  %v5373_v21 = vrot.slane %v5371_v48, 4  ;;  %v5753_v33 = vsel %vm7921_vm7, %v7179_v42, %v5752_v57  ;;  %vm11403_vm0 = vcmask 851712  }
 0x32b   : > { %5180 = vst.msk [vmem:[#allocation6 + $0x38] sm:$0xff] %vm11401_vm9, %v10475_v5  ;;  %v5364_v19 = vor.u32 %v5363_v3, %v5360_v30  ;;  %v5369_v0 = vrot.slane %v5367_v62, 5  ;;  %vm11404_vm1 = vcmask 917312   ;;  %v5379_v52 = vrot.slane %v5377_v26, 5 }
 0x32c   : > { %5669 = vst.msk [vmem:[#allocation6] sm:$0xff] %vm11402_vm14, %v5622_v22  ;;  %v3735_v7 = vpop.permute.xlu1 %3734  ;;  %v4391_v54 = vpop.f32.mrb[28].mxu0  ;;  %v5756_v18 = vsel %vm7921_vm7, %v5754_v28, %v5755_v44  ;;  %vm11411_vm9 = vcmask 60416   ;;  %vm11412_vm14 = vmmov %vm11405_vm15 }
 0x32d   : > { %3768 = vst.msk [vmem:[#allocation4 + $0xf0] sm:$0xff] %vm11403_vm0, %v3735_v7  ;;  %v4392_v60 = vadd.f32 %v10372_v15, %v4391_v54  ;;  %v4393_v40 = vpop.f32.mrb[29].mxu0  ;;  %v10490_v10 = vcombine.low %v5753_v33, %v5756_v18  ;;  %v5365_v31 = vrot.slane %v5364_v19, 4  ;;  %v5374_v38 = vor.u32 %v5373_v21, %v5369_v0  ;;  %v5862_v63 = vpop.permute.xlu0 %5861 }
 0x32e   : > { %v4172_v37 = vld [vmem:[#allocation4 + $0xf8] sm:$0xff]  ;;  %3860 = vst.msk [vmem:[#allocation4 + $0xf0] sm:$0xff] %vm11404_vm1, %v3827_v32  ;;  %v4394_v50 = vpop.f32.mrb[30].mxu0  ;;  %v4960_v32 = vld [vmem:[#allocation5 + $0x60] sm:$0xf]  ;;  %vm11413_vm0 = vcmask 458112  }
 0x32f   : > { %5909 = vst.msk [vmem:[#allocation6] sm:$0xff] %vm11405_vm15, %v5862_v63  ;;  %7107 = vmatprep.mubr.msk.bf16.mxu1 %vm4252_vm3, %v4172_v37  ;;  %v4476_v55 = vmax.f32 %v4392_v60, 0.0  ;;  %v4395_v14 = vadd.f32 %v10372_v15, %v4394_v50  ;;  %v4396_v49 = vpop.f32.mrb[31].mxu0  ;;  %6341 = vrot.lane.b32.xlu0 %v10490_v10, %s7529_s12  ;;  %v5375_v53 = vrot.slane %v5374_v38, 4  ;;  %v5370_v2 = vsel %vm7934_vm10, %v5365_v31, %v5369_v0  ;;  %vm11415_vm15 = vmmov %vm11408_vm4 }
 0x330   : > { %v3903_v47 = vpop.permute.xlu1 %3902  ;;  %vm11407_vm3 = vcmask 261312  }
 0x331   : > { %v7285_v9 = vpack.c.bf16 %v4476_v55, %v4476_v55  ;;  %v4477_v6 = vmax.f32 %v4395_v14, 0.0  ;;  %3936 = vst.msk [vmem:[#allocation4 + $0xf0] sm:$0xff] %vm11406_vm2, %v3903_v47  ;;  %v5380_v12 = vsel %vm7934_vm10, %v5375_v53, %v5379_v52  ;;  %v5931_v20 = vpop.permute.xlu0 %5930  ;;  %vm11414_vm1 = vmmov %vm11407_vm3  ;;  %vm11416_vm2 = vcmask 64512  }
 0x332   : > { %v7163_v59 = vcombine.low %v5370_v2, %v5380_v12  ;;  %5978 = vst.msk [vmem:[#allocation6] sm:$0xff] %vm11407_vm3, %v5931_v20  ;;  %vm11417_vm3 = vcmask 589312  }
 0x333   : > { %v4710_v35 = vshrl.u32 %v7285_v9, 16  ;;  %v4713_v24 = vshll.u32 %v7285_v9, 16  ;;  %v7286_v8 = vpack.c.bf16 %v4477_v6, %v4477_v6  ;;  %5873 = vrot.lane.b32.xlu0 %v10455_v45, %s7525_s27 }
 0x334   : > { %6266 = vrot.lane.b32.xlu1 %v7163_v59, %s7534_s25  ;;  %v3973_v13 = vpop.permute.xlu1 %3972 }
 0x335   : > { %v4712_v11 = vrot.slane %v4710_v35, 7  ;;  %v4718_v17 = vshrl.u32 %v7286_v8, 16  ;;  %v4721_v23 = vshll.u32 %v7286_v8, 16  ;;  %4006 = vst.msk [vmem:[#allocation4 + $0xf0] sm:$0xff] %vm3990_vm5, %v3973_v13  ;;  %v6022_v27 = vpop.permute.xlu0 %6021  ;;  %vm11409_vm5 = vmmov %vm11400_vm8  ;;  %vm11410_vm8 = vcmask 392512  }
 0x336   : > { %6069 = vst.msk [vmem:[#allocation6] sm:$0xff] %vm11408_vm4, %v6022_v27  ;;  %vm11418_vm4 = vmmov %vm11410_vm8 }
 0x337   : > { %v4715_v41 = vor.u32 %v4713_v24, %v4712_v11  ;;  %v4716_v56 = vrot.slane %v4712_v11, 4  ;;  %v4720_v58 = vrot.slane %v4718_v17, 7  ;;  %5942 = vrot.lane.b32.xlu0 %v10475_v5, %s7530_s15 }
 0x338   : > { %5633 = vrot.lane.b32.xlu1 %v10444_v29, %s7526_s28  ;;  %v5624_v45 = vpop.permute.xlu1 %5623 }
 0x339   : > { %v4961_v61 = vsel %vm7941_vm11, %v4715_v41, %v4960_v32  ;;  %v4723_v51 = vor.u32 %v4721_v23, %v4720_v58  ;;  %v4725_v4 = vrot.slane %v4720_v58, 4  ;;  %5670 = vst.msk [vmem:[#allocation6 + $0x8] sm:$0xff] %vm11409_vm5, %v5624_v45  ;;  %v6097_v46 = vpop.permute.xlu0 %6096  ;;  %vm6454_vm5 = vcmask 588800  }
 0x33a   : > { %4962 = vst [vmem:[#allocation5 + $0x60] sm:$0xf] %v4961_v61  ;;  %6144 = vst.msk [vmem:[#allocation6] sm:$0xff] %vm11410_vm8, %v6097_v46  ;;  %v4967_v61 = vld [vmem:[#allocation5 + $0x6c] sm:$0xf] }
 0x33b   : > { %v4724_v42 = vsel %vm7947_vm12, %v4716_v56, %v4723_v51  ;;  %v4965_v16 = vsel %vm7954_vm13, %v4725_v4, %v4964_v39  ;;  %6033 = vrot.lane.b32.xlu0 %v7163_v59, %s7527_s8  ;;  %vm11419_vm8 = vmmov %vm11413_vm0 }
 0x33c   : > { %4963 = vst.msk [vmem:[#allocation5 + $0x64] sm:$0xf] %vm11411_vm9, %v4724_v42  ;;  %4966 = vst [vmem:[#allocation5 + $0x68] sm:$0x1] %v4965_v16  ;;  %5635 = vrot.lane.b32.xlu1 %v7163_v59, %s7526_s28  ;;  %v5864_v29 = vpop.permute.xlu1 %5863  ;;  %v4171_v5 = vld [vmem:[#allocation4 + $0xf0] sm:$0xff] }
 0x33d   : > { %5910 = vst.msk [vmem:[#allocation6 + $0x8] sm:$0xff] %vm11412_vm14, %v5864_v29  ;;  %4454 = vmatmul.mubr.bf16.gmra.mrb[12].mxu1 %v4171_v5  ;;  %v6166_v48 = vpop.permute.xlu0 %6165  ;;  %v4971_v29 = vld [vmem:[#allocation5 + $0x74] sm:$0x1]  ;;  %vm11420_vm9 = vmmov %vm11417_vm3  ;;  %vm11421_vm14 = vcmask 60416  }
 0x33e   : > { %6213 = vst.msk [vmem:[#allocation6] sm:$0xff] %vm11413_vm0, %v6166_v48  ;;  %vm11422_vm0 = vcmask 130112  }
 0x33f   : > { %6108 = vrot.lane.b32.xlu0 %v10490_v10, %s7532_s19 }
 0x340   : > { %5875 = vrot.lane.b32.xlu1 %v10490_v10, %s7525_s27  ;;  %v5933_v57 = vpop.permute.xlu1 %5932 }
 0x341   : > { %5979 = vst.msk [vmem:[#allocation6 + $0x8] sm:$0xff] %vm11414_vm1, %v5933_v57  ;;  %v10531_v44 = vld [vmem:[#allocation5 + $0x60] sm:$0xf]  ;;  %v6257_v30 = vpop.permute.xlu0 %6256  ;;  %vm11423_vm1 = vcmask 195712  }
 0x342   : > { %v5382_v3 = vshrl.u32 %v10531_v44, 16  ;;  %v5385_v62 = vshll.u32 %v10531_v44, 16  ;;  %6304 = vst.msk [vmem:[#allocation6] sm:$0xff] %vm2669_vm6, %v6257_v30  ;;  %v7180_v11 = vrot.slane %v10531_v44, 9 }
 0x343   : > { %v5048_v22 = vld [vmem:[#allocation5 + $0x64] sm:$0xf]  ;;  %v5049_v0 = vld [vmem:[#allocation5 + $0x68] sm:$0x1] }
 0x344   : > { %v6024_v28 = vpop.permute.xlu1 %6023  ;;  %v7148_v21 = vcombine.low %v10531_v44, %v5048_v22  ;;  %v5395_v19 = vshrl.u32 %v5048_v22, 16  ;;  %v5384_v26 = vrot.slane %v5382_v3, 4  ;;  %v5387_v7 = vrot.slane %v5385_v62, 5 }
 0x345   : > { %6070 = vst.msk [vmem:[#allocation6 + $0x8] sm:$0xff] %vm11415_vm15, %v6024_v28  ;;  %v4399_v54 = vpop.f32.mrb[32].mxu0  ;;  %v5391_v33 = vshll.u32 %v5048_v22, 16  ;;  %v6332_v18 = vpop.permute.xlu0 %6331  ;;  %v5759_v60 = vrot.slane %v5048_v22, 5  ;;  %v5401_v50 = vshll.u32 %v5049_v0, 16  ;;  %v5762_v6 = vrot.slane %v5049_v0, 5 }
 0x346   : > { %6177 = vrot.lane.b32.xlu0 %v7148_v21, %s7528_s9  ;;  %5181 = vst.msk [vmem:[#allocation6 + $0x40] sm:$0xff] %vm11416_vm2, %v7148_v21  ;;  %5944 = vrot.lane.b32.xlu1 %v7148_v21, %s7530_s15  ;;  %v4400_v40 = vadd.f32 %v10372_v15, %v4399_v54  ;;  %v4401_v10 = vpop.f32.mrb[33].mxu0  ;;  %v5388_v31 = vor.u32 %v5387_v7, %v5384_v26  ;;  %v5397_v38 = vrot.slane %v5395_v19, 4  ;;  %vm11424_vm15 = vcmask 261312  }
 0x347   : > { %6379 = vst.msk [vmem:[#allocation6] sm:$0xff] %vm11417_vm3, %v6332_v18  ;;  %v4402_v63 = vpop.f32.mrb[34].mxu0  ;;  %v5393_v37 = vrot.slane %v5391_v33, 5  ;;  %v5761_v9 = vrot.slane %v5759_v60, 4  ;;  %v5403_v35 = vrot.slane %v5401_v50, 5  ;;  %v5760_v16 = vsel %vm7921_vm7, %v7180_v11, %v5759_v60  ;;  %vm11426_vm3 = vmmov %vm11422_vm0 }
 0x348   : > { %v4478_v55 = vmax.f32 %v4400_v40, 0.0  ;;  %v6099_v14 = vpop.permute.xlu1 %6098  ;;  %v4403_v49 = vadd.f32 %v10372_v15, %v4402_v63  ;;  %v4404_v53 = vpop.f32.mrb[35].mxu0  ;;  %v5389_v52 = vrot.slane %v5388_v31, 4  ;;  %vm11425_vm2 = vcmask 326912  }
 0x349   : > { %6145 = vst.msk [vmem:[#allocation6 + $0x8] sm:$0xff] %vm11418_vm4, %v6099_v14  ;;  %v5398_v47 = vor.u32 %v5397_v38, %v5393_v37  ;;  %v6334_v2 = vpop.permute.xlu0 %6333  ;;  %v5763_v27 = vsel %vm7921_vm7, %v5761_v9, %v5762_v6 }
 0x34a   : > { %v7287_v12 = vpack.c.bf16 %v4478_v55, %v4478_v55  ;;  %v4479_v20 = vmax.f32 %v4403_v49, 0.0  ;;  %v5394_v17 = vsel %vm7934_vm10, %v5389_v52, %v5393_v37  ;;  %v10563_v5 = vcombine.low %v5760_v16, %v5763_v27 }
 0x34b   : > { %v5399_v59 = vrot.slane %v5398_v47, 4 }
 0x34c   : > { %v4727_v24 = vshrl.u32 %v7287_v12, 16  ;;  %v7288_v8 = vpack.c.bf16 %v4479_v20, %v4479_v20  ;;  %v6168_v13 = vpop.permute.xlu1 %6167  ;;  %v4730_v58 = vshll.u32 %v7287_v12, 16 }
 0x34d   : > { %6214 = vst.msk [vmem:[#allocation6 + $0x8] sm:$0xff] %vm11419_vm8, %v6168_v13  ;;  %v5404_v23 = vsel %vm7934_vm10, %v5399_v59, %v5403_v35  ;;  %v5866_v32 = vpop.permute.xlu0 %5865  ;;  %vm11427_vm8 = vmmov %vm11423_vm1 }
 0x34e   : > { %v6395_v41 = vld [vmem:[#allocation6] sm:$0xff]  ;;  %v4729_v56 = vrot.slane %v4727_v24, 7  ;;  %v4735_v39 = vshrl.u32 %v7288_v8, 16  ;;  %v10553_v45 = vcombine.low %v5394_v17, %v5404_v23  ;;  %v4738_v46 = vshll.u32 %v7288_v8, 16 }
 0x34f   : > { %7366 = vmatprep.mubr.msk.bf16.mxu1 %vm6454_vm5, %v6395_v41 }
 0x350   : > { %v4732_v51 = vor.u32 %v4730_v58, %v4729_v56  ;;  %v4737_v4 = vrot.slane %v4735_v39, 7  ;;  %6268 = vrot.lane.b32.xlu0 %v10553_v45, %s7534_s25  ;;  %6035 = vrot.lane.b32.xlu1 %v10553_v45, %s7527_s8  ;;  %v6259_v42 = vpop.permute.xlu1 %6258  ;;  %v4733_v57 = vrot.slane %v4729_v56, 4 }
 0x351   : > { %6305 = vst.msk [vmem:[#allocation6 + $0x8] sm:$0xff] %vm2669_vm6, %v6259_v42  ;;  %v5935_v48 = vpop.permute.xlu0 %5934 }
 0x352   : > { %v4968_v44 = vsel %vm7941_vm11, %v4732_v51, %v4967_v61  ;;  %v4740_v30 = vor.u32 %v4738_v46, %v4737_v4  ;;  %v4742_v3 = vrot.slane %v4737_v4, 4  ;;  %6380 = vst.msk [vmem:[#allocation6 + $0x8] sm:$0xff] %vm11420_vm9, %v6334_v2  ;;  %vm11428_vm9 = vcmask 458112  }
 0x353   : > { %4969 = vst [vmem:[#allocation5 + $0x6c] sm:$0xf] %v4968_v44 }
 0x354   : > { %v4741_v62 = vsel %vm7947_vm12, %v4733_v57, %v4740_v30  ;;  %v4972_v22 = vsel %vm7954_vm13, %v4742_v3, %v4971_v29  ;;  %6343 = vrot.lane.b32.xlu0 %v10563_v5, %s7529_s12  ;;  %6110 = vrot.lane.b32.xlu1 %v10563_v5, %s7532_s19  ;;  %v5626_v28 = vpop.permute.xlu1 %5625 }
 0x355   : > { %4970 = vst.msk [vmem:[#allocation5 + $0x70] sm:$0xf] %vm11421_vm14, %v4741_v62  ;;  %4973 = vst [vmem:[#allocation5 + $0x74] sm:$0x1] %v4972_v22  ;;  %v6026_v21 = vpop.permute.xlu0 %6025  ;;  %vm11429_vm14 = vcmask 64512  }
 0x356   : > { %5671 = vst.msk [vmem:[#allocation6 + $0x10] sm:$0xff] %vm11422_vm0, %v5626_v28  ;;  %vm11430_vm0 = vmmov %vm11424_vm15 }
 0x357   : > { %5911 = vst.msk [vmem:[#allocation6 + $0x10] sm:$0xff] %vm11423_vm1, %v5866_v32  ;;  %vm11431_vm1 = vmmov %vm11425_vm2 }
 0x358   : > { %5980 = vst.msk [vmem:[#allocation6 + $0x10] sm:$0xff] %vm11424_vm15, %v5935_v48  ;;  %v5628_v19 = vpop.permute.xlu1 %5627  ;;  %vm11432_vm15 = vcmask 589312  }
 0x359   : > { %6071 = vst.msk [vmem:[#allocation6 + $0x10] sm:$0xff] %vm11425_vm2, %v6026_v21  ;;  %v6396_v0 = vld [vmem:[#allocation6 + $0x8] sm:$0xff]  ;;  %v6101_v26 = vpop.permute.xlu0 %6100  ;;  %vm11433_vm2 = vmmov %vm11418_vm4 }
 0x35a   : > { %5672 = vst.msk [vmem:[#allocation6 + $0x18] sm:$0xff] %vm11426_vm3, %v5628_v19  ;;  %7367 = vmatmul.mubr.msk.bf16.vlgmr.msra.gmra.mrb[16].mxu1 %vm6454_vm5, %v6396_v0  ;;  %v5050_v7 = vld [vmem:[#allocation5 + $0x6c] sm:$0xf]  ;;  %vm11434_vm3 = vmmov %vm11428_vm9 }
 0x35b   : > { %6146 = vst.msk [vmem:[#allocation6 + $0x10] sm:$0xff] %vm11418_vm4, %v6101_v26  ;;  %v5406_v54 = vshrl.u32 %v5050_v7, 16  ;;  %v5409_v33 = vshll.u32 %v5050_v7, 16  ;;  %v7181_v14 = vrot.slane %v5050_v7, 9  ;;  %vm11435_vm4 = vmmov %vm11432_vm15 }
 0x35c   : > { %v5868_v18 = vpop.permute.xlu1 %5867  ;;  %v5051_v60 = vld [vmem:[#allocation5 + $0x70] sm:$0xf]  ;;  %v5052_v40 = vld [vmem:[#allocation5 + $0x74] sm:$0x1] }
 0x35d   : > { %5912 = vst.msk [vmem:[#allocation6 + $0x18] sm:$0xff] %vm11427_vm8, %v5868_v18  ;;  %v7149_v10 = vcombine.low %v5050_v7, %v5051_v60  ;;  %v5419_v31 = vshrl.u32 %v5051_v60, 16  ;;  %v5766_v38 = vrot.slane %v5051_v60, 5  ;;  %v6170_v63 = vpop.permute.xlu0 %6169  ;;  %v5408_v37 = vrot.slane %v5406_v54, 4  ;;  %v4974_v18 = vld [vmem:[#allocation5 + $0x78] sm:$0xf] }
 0x35e   : > { %6215 = vst.msk [vmem:[#allocation6 + $0x10] sm:$0xff] %vm11428_vm9, %v6170_v63  ;;  %v5411_v50 = vrot.slane %v5409_v33, 5  ;;  %v5415_v55 = vshll.u32 %v5051_v60, 16  ;;  %v5769_v53 = vrot.slane %v5052_v40, 5  ;;  %v5425_v2 = vshll.u32 %v5052_v40, 16 }
 0x35f   : > { %6179 = vrot.lane.b32.xlu1 %v7149_v10, %s7528_s9  ;;  %5182 = vst.msk [vmem:[#allocation6 + $0x48] sm:$0xff] %vm11429_vm14, %v7149_v10  ;;  %v5768_v49 = vrot.slane %v5766_v38, 4  ;;  %v5421_v52 = vrot.slane %v5419_v31, 4  ;;  %v5767_v12 = vsel %vm7921_vm7, %v7181_v14, %v5766_v38  ;;  %vm11436_vm8 = vcmask 130112   ;;  %vm11438_vm14 = vmmov %vm11430_vm0  ;;  %v4978_v31 = vld [vmem:[#allocation5 + $0x80] sm:$0x1] }
 0x360   : > { %v5937_v47 = vpop.permute.xlu1 %5936  ;;  %v5412_v9 = vor.u32 %v5411_v50, %v5408_v37  ;;  %v5417_v6 = vrot.slane %v5415_v55, 5  ;;  %v5427_v17 = vrot.slane %v5425_v2, 5  ;;  %vm11437_vm9 = vcmask 195712  }
 0x361   : > { %5981 = vst.msk [vmem:[#allocation6 + $0x18] sm:$0xff] %vm11430_vm0, %v5937_v47  ;;  %v5770_v20 = vsel %vm7921_vm7, %v5768_v49, %v5769_v53  ;;  %v6261_v59 = vpop.permute.xlu0 %6260  ;;  %vm11439_vm0 = vmmov %vm11431_vm1 }
 0x362   : > { %v7197_v35 = vcombine.low %v5767_v12, %v5770_v20  ;;  %v5413_v24 = vrot.slane %v5412_v9, 4  ;;  %v5422_v8 = vor.u32 %v5421_v52, %v5417_v6  ;;  %6306 = vst.msk [vmem:[#allocation6 + $0x10] sm:$0xff] %vm2669_vm6, %v6261_v59 }
 0x364   : > { %v6028_v13 = vpop.permute.xlu1 %6027  ;;  %6345 = vrot.lane.b32.xlu0 %v7197_v35, %s7529_s12  ;;  %v5423_v11 = vrot.slane %v5422_v8, 4  ;;  %v5418_v27 = vsel %vm7934_vm10, %v5413_v24, %v5417_v6 }
 0x365   : > { %6072 = vst.msk [vmem:[#allocation6 + $0x18] sm:$0xff] %vm11431_vm1, %v6028_v13  ;;  %v6336_v23 = vpop.permute.xlu0 %6335  ;;  %vm11440_vm1 = vmmov %vm11436_vm8 }
 0x366   : > { %v5428_v32 = vsel %vm7934_vm10, %v5423_v11, %v5427_v17  ;;  %6381 = vst.msk [vmem:[#allocation6 + $0x10] sm:$0xff] %vm11432_vm15, %v6336_v23  ;;  %vm11441_vm15 = vmmov %vm11433_vm2 }
 0x367   : > { %v7165_v41 = vcombine.low %v5418_v27, %v5428_v32 }
 0x368   : > { %v6103_v56 = vpop.permute.xlu1 %6102  ;;  %5877 = vrot.lane.b32.xlu0 %v10563_v5, %s7525_s27 }
 0x369   : > { %6147 = vst.msk [vmem:[#allocation6 + $0x18] sm:$0xff] %vm11433_vm2, %v6103_v56  ;;  %6270 = vrot.lane.b32.xlu1 %v7165_v41, %s7534_s25  ;;  %vm11442_vm2 = vmmov %vm11437_vm9 }
 0x36a   : > { %v6338_v58 = vpop.permute.xlu0 %6337 }
 0x36c   : > { %v6172_v39 = vpop.permute.xlu1 %6171  ;;  %5946 = vrot.lane.b32.xlu0 %v7149_v10, %s7530_s15 }
 0x36d   : > { %6216 = vst.msk [vmem:[#allocation6 + $0x18] sm:$0xff] %vm11434_vm3, %v6172_v39  ;;  %5637 = vrot.lane.b32.xlu1 %v10553_v45, %s7526_s28  ;;  %v6397_v61 = vld [vmem:[#allocation6 + $0x10] sm:$0xff]  ;;  %vm11443_vm3 = vmmov %vm11438_vm14 }
 0x36e   : > { %v5870_v51 = vpop.permute.xlu0 %5869  ;;  %7370 = vmatprep.mubr.msk.bf16.mxu1 %vm6454_vm5, %v6397_v61 }
 0x370   : > { %v6263_v4 = vpop.permute.xlu1 %6262  ;;  %6037 = vrot.lane.b32.xlu0 %v7165_v41, %s7527_s8 }
 0x371   : > { %6307 = vst.msk [vmem:[#allocation6 + $0x18] sm:$0xff] %vm2669_vm6, %v6263_v4  ;;  %5639 = vrot.lane.b32.xlu1 %v7165_v41, %s7526_s28 }
 0x372   : > { %6382 = vst.msk [vmem:[#allocation6 + $0x18] sm:$0xff] %vm11435_vm4, %v6338_v58  ;;  %v5939_v46 = vpop.permute.xlu0 %5938  ;;  %vm11444_vm4 = vcmask 458112  }
 0x374   : > { %v4407_v42 = vpop.f32.mrb[36].mxu0  ;;  %v5630_v16 = vpop.permute.xlu1 %5629  ;;  %6112 = vrot.lane.b32.xlu0 %v7197_v35, %s7532_s19 }
 0x375   : > { %v4408_v45 = vadd.f32 %v10372_v15, %v4407_v42  ;;  %5673 = vst.msk [vmem:[#allocation6 + $0x20] sm:$0xff] %vm11436_vm8, %v5630_v16  ;;  %v4409_v29 = vpop.f32.mrb[37].mxu0  ;;  %5879 = vrot.lane.b32.xlu1 %v7197_v35, %s7525_s27  ;;  %vm11445_vm8 = vcmask 60416  }
 0x376   : > { %v4410_v5 = vpop.f32.mrb[38].mxu0  ;;  %5913 = vst.msk [vmem:[#allocation6 + $0x20] sm:$0xff] %vm11437_vm9, %v5870_v51  ;;  %v6030_v48 = vpop.permute.xlu0 %6029  ;;  %vm11446_vm9 = vmmov %vm11439_vm0 }
 0x377   : > { %v4480_v57 = vmax.f32 %v4408_v45, 0.0  ;;  %v4411_v44 = vadd.f32 %v10372_v15, %v4410_v5  ;;  %v4412_v30 = vpop.f32.mrb[39].mxu0  ;;  %5982 = vst.msk [vmem:[#allocation6 + $0x20] sm:$0xff] %vm11438_vm14, %v5939_v46  ;;  %vm11447_vm14 = vcmask 64512  }
 0x378   : > { %v5632_v3 = vpop.permute.xlu1 %5631  ;;  %6073 = vst.msk [vmem:[#allocation6 + $0x20] sm:$0xff] %vm11439_vm0, %v6030_v48  ;;  %vm11448_vm0 = vmmov %vm11441_vm15 }
 0x379   : > { %v7289_v62 = vpack.c.bf16 %v4480_v57, %v4480_v57  ;;  %v4481_v22 = vmax.f32 %v4411_v44, 0.0  ;;  %5674 = vst.msk [vmem:[#allocation6 + $0x28] sm:$0xff] %vm11440_vm1, %v5632_v3  ;;  %v6398_v28 = vld [vmem:[#allocation6 + $0x18] sm:$0xff]  ;;  %vm11449_vm1 = vcmask 589312  }
 0x37a   : > { %7371 = vmatmul.mubr.msk.bf16.gmra.mrb[20].mxu1 %vm6454_vm5, %v6398_v28  ;;  %v6105_v21 = vpop.permute.xlu0 %6104 }
 0x37b   : > { %v4744_v19 = vshrl.u32 %v7289_v62, 16  ;;  %v4747_v0 = vshll.u32 %v7289_v62, 16  ;;  %v7290_v26 = vpack.c.bf16 %v4481_v22, %v4481_v22  ;;  %6148 = vst.msk [vmem:[#allocation6 + $0x20] sm:$0xff] %vm11441_vm15, %v6105_v21  ;;  %vm11450_vm15 = vmmov %vm11444_vm4  ;;  %v10667_v62 = vld [vmem:[%s11146_s3] ss:$0 sm:$0xff] }
 0x37c   : > { %v5872_v15 = vpop.permute.xlu1 %5871 }
 0x37d   : > { %v4746_v7 = vrot.slane %v4744_v19, 7  ;;  %v4752_v54 = vshrl.u32 %v7290_v26, 16  ;;  %v4755_v33 = vshll.u32 %v7290_v26, 16  ;;  %5914 = vst.msk [vmem:[#allocation6 + $0x28] sm:$0xff] %vm11442_vm2, %v5872_v15  ;;  %vm11451_vm2 = vmmov %vm11449_vm1 }
 0x37f   : > { %v4749_v60 = vor.u32 %v4747_v0, %v4746_v7  ;;  %v4750_v40 = vrot.slane %v4746_v7, 4  ;;  %v4754_v10 = vrot.slane %v4752_v54, 7 }
 0x380   : > { %v5941_v38 = vpop.permute.xlu1 %5940  ;;  %v6174_v63 = vpop.permute.xlu0 %6173 }
 0x381   : > { %v4975_v37 = vsel %vm7941_vm11, %v4749_v60, %v4974_v18  ;;  %v4757_v50 = vor.u32 %v4755_v33, %v4754_v10  ;;  %v4759_v55 = vrot.slane %v4754_v10, 4  ;;  %5983 = vst.msk [vmem:[#allocation6 + $0x28] sm:$0xff] %vm11443_vm3, %v5941_v38  ;;  %vm11452_vm3 = vcmask 130112  }
 0x382   : > { %6217 = vst.msk [vmem:[#allocation6 + $0x20] sm:$0xff] %vm11444_vm4, %v6174_v63  ;;  %4976 = vst [vmem:[#allocation5 + $0x78] sm:$0xf] %v4975_v37  ;;  %v4981_v37 = vld [vmem:[#allocation5 + $0x84] sm:$0xf]  ;;  %vm11453_vm4 = vcmask 195712  }
 0x383   : > { %v4758_v14 = vsel %vm7947_vm12, %v4750_v40, %v4757_v50  ;;  %v4979_v49 = vsel %vm7954_vm13, %v4759_v55, %v4978_v31 }
 0x384   : > { %4977 = vst.msk [vmem:[#allocation5 + $0x7c] sm:$0xf] %vm11445_vm8, %v4758_v14  ;;  %4980 = vst [vmem:[#allocation5 + $0x80] sm:$0x1] %v4979_v49  ;;  %vm11454_vm8 = vcmask 261312  }
 0x389   : > { %v5053_v53 = vld [vmem:[#allocation5 + $0x78] sm:$0xf] }
 0x38a   : > { %v6032_v52 = vpop.permute.xlu1 %6031  ;;  %v6265_v47 = vpop.permute.xlu0 %6264  ;;  %v5430_v9 = vshrl.u32 %v5053_v53, 16  ;;  %v5433_v6 = vshll.u32 %v5053_v53, 16  ;;  %v7182_v16 = vrot.slane %v5053_v53, 9 }
 0x38b   : > { %6074 = vst.msk [vmem:[#allocation6 + $0x28] sm:$0xff] %vm11446_vm9, %v6032_v52  ;;  %v5054_v2 = vld [vmem:[#allocation5 + $0x7c] sm:$0xf]  ;;  %v5055_v59 = vld [vmem:[#allocation5 + $0x80] sm:$0x1] }
 0x38c   : > { %6308 = vst.msk [vmem:[#allocation6 + $0x20] sm:$0xff] %vm2669_vm6, %v6265_v47  ;;  %v7150_v12 = vcombine.low %v5053_v53, %v5054_v2  ;;  %v5443_v20 = vshrl.u32 %v5054_v2, 16  ;;  %v5432_v35 = vrot.slane %v5430_v9, 4  ;;  %v5435_v24 = vrot.slane %v5433_v6, 5  ;;  %v4985_v53 = vld [vmem:[#allocation5 + $0x8c] sm:$0x1] }
 0x38d   : > { %v5439_v8 = vshll.u32 %v5054_v2, 16  ;;  %v5449_v32 = vshll.u32 %v5055_v59, 16  ;;  %v5773_v41 = vrot.slane %v5054_v2, 5  ;;  %v5776_v4 = vrot.slane %v5055_v59, 5 }
 0x38e   : > { %v6107_v13 = vpop.permute.xlu1 %6106  ;;  %6181 = vrot.lane.b32.xlu0 %v7150_v12, %s7528_s9  ;;  %5183 = vst.msk [vmem:[#allocation6 + $0x50] sm:$0xff] %vm11447_vm14, %v7150_v12  ;;  %5948 = vrot.lane.b32.xlu1 %v7150_v12, %s7530_s15  ;;  %v6340_v11 = vpop.permute.xlu0 %6339  ;;  %v5436_v17 = vor.u32 %v5435_v24, %v5432_v35  ;;  %v5445_v23 = vrot.slane %v5443_v20, 4  ;;  %vm11455_vm14 = vmmov %vm11452_vm3 }
 0x38f   : > { %6149 = vst.msk [vmem:[#allocation6 + $0x28] sm:$0xff] %vm11448_vm0, %v6107_v13  ;;  %v5441_v27 = vrot.slane %v5439_v8, 5  ;;  %v5451_v61 = vrot.slane %v5449_v32, 5  ;;  %v5775_v51 = vrot.slane %v5773_v41, 4  ;;  %v5774_v48 = vsel %vm7921_vm7, %v7182_v16, %v5773_v41 }
 0x390   : > { %6383 = vst.msk [vmem:[#allocation6 + $0x20] sm:$0xff] %vm11449_vm1, %v6340_v11  ;;  %v5437_v56 = vrot.slane %v5436_v17, 4  ;;  %vm11456_vm0 = vcmask 60416   ;;  %vm11457_vm1 = vcmask 392512  }
 0x391   : > { %v5446_v58 = vor.u32 %v5445_v23, %v5441_v27  ;;  %v5777_v5 = vsel %vm7921_vm7, %v5775_v51, %v5776_v4 }
 0x392   : > { %v5442_v46 = vsel %vm7934_vm10, %v5437_v56, %v5441_v27  ;;  %v10657_v57 = vcombine.low %v5774_v48, %v5777_v5 }
 0x393   : > { %v5447_v39 = vrot.slane %v5446_v58, 4 }
 0x395   : > { %v5452_v42 = vsel %vm7934_vm10, %v5447_v39, %v5451_v61 }
 0x396   : > { %v10646_v45 = vcombine.low %v5442_v46, %v5452_v42 }
 0x397   : > { %v6399_v29 = vld [vmem:[#allocation6 + $0x20] sm:$0xff] }
 0x398   : > { %7374 = vmatprep.mubr.msk.bf16.mxu1 %vm6454_vm5, %v6399_v29  ;;  %6272 = vrot.lane.b32.xlu0 %v10646_v45, %s7534_s25 }
 0x399   : > { %6039 = vrot.lane.b32.xlu1 %v10646_v45, %s7527_s8 }
 0x39c   : > { %6347 = vrot.lane.b32.xlu0 %v10657_v57, %s7529_s12  ;;  %v6176_v44 = vpop.permute.xlu1 %6175 }
 0x39d   : > { %6114 = vrot.lane.b32.xlu1 %v10657_v57, %s7532_s19  ;;  %6218 = vst.msk [vmem:[#allocation6 + $0x28] sm:$0xff] %vm11450_vm15, %v6176_v44  ;;  %vm11458_vm15 = vmmov %vm11453_vm4 }
 0x3a1   : > { %v6342_v30 = vpop.permute.xlu0 %6341  ;;  %v4415_v3 = vpop.f32.mrb[40].mxu0 }
 0x3a2   : > { %v4416_v22 = vadd.f32 %v10667_v62, %v4415_v3  ;;  %v4417_v28 = vpop.f32.mrb[41].mxu0 }
 0x3a3   : > { %v4418_v21 = vpop.f32.mrb[42].mxu0 }
 0x3a4   : > { %v4482_v19 = vmax.f32 %v4416_v22, 0.0  ;;  %v4419_v0 = vadd.f32 %v10667_v62, %v4418_v21  ;;  %v4420_v26 = vpop.f32.mrb[43].mxu0  ;;  %v4995_v22 = vld [vmem:[#allocation5 + $0x9c] sm:$0xf] }
 0x3a5   : > { %v5874_v15 = vpop.permute.xlu0 %5873 }
 0x3a6   : > { %v6267_v7 = vpop.permute.xlu1 %6266  ;;  %v7291_v54 = vpack.c.bf16 %v4482_v19, %v4482_v19  ;;  %v4483_v33 = vmax.f32 %v4419_v0, 0.0 }
 0x3a7   : > { %6309 = vst.msk [vmem:[#allocation6 + $0x28] sm:$0xff] %vm2669_vm6, %v6267_v7 }
 0x3a8   : > { %6384 = vst.msk [vmem:[#allocation6 + $0x28] sm:$0xff] %vm11451_vm2, %v6342_v30  ;;  %v4761_v18 = vshrl.u32 %v7291_v54, 16  ;;  %v7292_v60 = vpack.c.bf16 %v4483_v33, %v4483_v33  ;;  %v4764_v38 = vshll.u32 %v7291_v54, 16  ;;  %vm11459_vm2 = vcmask 458112   ;;  %v4999_v33 = vld [vmem:[#allocation5 + $0xa4] sm:$0x1] }
 0x3a9   : > { %v5943_v40 = vpop.permute.xlu0 %5942 }
 0x3aa   : > { %v5634_v10 = vpop.permute.xlu1 %5633  ;;  %v4763_v31 = vrot.slane %v4761_v18, 7  ;;  %v4769_v63 = vshrl.u32 %v7292_v60, 16  ;;  %v4772_v14 = vshll.u32 %v7292_v60, 16 }
 0x3ab   : > { %5675 = vst.msk [vmem:[#allocation6 + $0x30] sm:$0xff] %vm11452_vm3, %v5634_v10  ;;  %vm11460_vm3 = vmmov %vm11454_vm8 }
 0x3ac   : > { %5915 = vst.msk [vmem:[#allocation6 + $0x30] sm:$0xff] %vm11453_vm4, %v5874_v15  ;;  %v4766_v50 = vor.u32 %v4764_v38, %v4763_v31  ;;  %v4771_v55 = vrot.slane %v4769_v63, 7  ;;  %v4767_v52 = vrot.slane %v4763_v31, 4  ;;  %vm11461_vm4 = vcmask 64512  }
 0x3ad   : > { %5984 = vst.msk [vmem:[#allocation6 + $0x30] sm:$0xff] %vm11454_vm8, %v5943_v40  ;;  %v6034_v49 = vpop.permute.xlu0 %6033  ;;  %vm11462_vm8 = vmmov %vm11456_vm0 }
 0x3ae   : > { %v4982_v47 = vsel %vm7941_vm11, %v4766_v50, %v4981_v37  ;;  %6075 = vst.msk [vmem:[#allocation6 + $0x30] sm:$0xff] %vm11446_vm9, %v6034_v49  ;;  %v5636_v9 = vpop.permute.xlu1 %5635  ;;  %v4774_v6 = vor.u32 %v4772_v14, %v4771_v55  ;;  %v4776_v2 = vrot.slane %v4771_v55, 4 }
 0x3af   : > { %4983 = vst [vmem:[#allocation5 + $0x84] sm:$0xf] %v4982_v47  ;;  %5676 = vst.msk [vmem:[#allocation6 + $0x38] sm:$0xff] %vm11455_vm14, %v5636_v9  ;;  %v6400_v12 = vld [vmem:[#allocation6 + $0x28] sm:$0xff]  ;;  %vm11463_vm14 = vcmask 589312  }
 0x3b0   : > { %v4775_v20 = vsel %vm7947_vm12, %v4767_v52, %v4774_v6  ;;  %v4986_v59 = vsel %vm7954_vm13, %v4776_v2, %v4985_v53  ;;  %7375 = vmatmul.mubr.msk.bf16.gmra.mrb[24].mxu1 %vm6454_vm5, %v6400_v12  ;;  %v4431_v35 = vpop.f32.mrb[0].mxu1 }
 0x3b1   : > { %4984 = vst.msk [vmem:[#allocation5 + $0x88] sm:$0xf] %vm11456_vm0, %v4775_v20  ;;  %4987 = vst [vmem:[#allocation5 + $0x8c] sm:$0x1] %v4986_v59  ;;  %v4432_v24 = vadd.f32 %v10667_v62, %v4431_v35  ;;  %v4433_v8 = vpop.f32.mrb[1].mxu1  ;;  %v6109_v13 = vpop.permute.xlu0 %6108 }
 0x3b2   : > { %6150 = vst.msk [vmem:[#allocation6 + $0x30] sm:$0xff] %vm11457_vm1, %v6109_v13  ;;  %v5876_v11 = vpop.permute.xlu1 %5875  ;;  %v4434_v17 = vpop.f32.mrb[2].mxu1  ;;  %vm11464_vm0 = vmmov %vm11457_vm1 }
 0x3b3   : > { %v4486_v23 = vmax.f32 %v4432_v24, 0.0  ;;  %5916 = vst.msk [vmem:[#allocation6 + $0x38] sm:$0xff] %vm11458_vm15, %v5876_v11  ;;  %v4435_v27 = vadd.f32 %v10667_v62, %v4434_v17  ;;  %v4436_v32 = vpop.f32.mrb[3].mxu1  ;;  %vm11465_vm1 = vmmov %vm11461_vm4 }
 0x3b4   : > { %vm11466_vm15 = vmmov %vm11459_vm2 }
 0x3b5   : > { %v7295_v41 = vpack.c.bf16 %v4486_v23, %v4486_v23  ;;  %v4487_v56 = vmax.f32 %v4435_v27, 0.0 }
 0x3b6   : > { %v5056_v58 = vld [vmem:[#allocation5 + $0x84] sm:$0xf] }
 0x3b7   : > { %v4795_v39 = vshrl.u32 %v7295_v41, 16  ;;  %v4798_v61 = vshll.u32 %v7295_v41, 16  ;;  %v7296_v51 = vpack.c.bf16 %v4487_v56, %v4487_v56  ;;  %v5454_v4 = vshrl.u32 %v5056_v58, 16 }
 0x3b8   : > { %v6178_v46 = vpop.permute.xlu0 %6177  ;;  %v5945_v42 = vpop.permute.xlu1 %5944  ;;  %v5057_v16 = vld [vmem:[#allocation5 + $0x88] sm:$0xf]  ;;  %v5457_v29 = vshll.u32 %v5056_v58, 16  ;;  %v5058_v3 = vld [vmem:[#allocation5 + $0x8c] sm:$0x1]  ;;  %v7183_v21 = vrot.slane %v5056_v58, 9 }
 0x3b9   : > { %v4797_v5 = vrot.slane %v4795_v39, 7  ;;  %v4803_v48 = vshrl.u32 %v7296_v51, 16  ;;  %v4806_v44 = vshll.u32 %v7296_v51, 16  ;;  %6219 = vst.msk [vmem:[#allocation6 + $0x30] sm:$0xff] %vm11459_vm2, %v6178_v46  ;;  %v7151_v30 = vcombine.low %v5056_v58, %v5057_v16  ;;  %vm11467_vm2 = vmmov %vm11463_vm14 }
 0x3ba   : > { %5985 = vst.msk [vmem:[#allocation6 + $0x38] sm:$0xff] %vm11460_vm3, %v5945_v42  ;;  %v5467_v28 = vshrl.u32 %v5057_v16, 16  ;;  %v5780_v19 = vrot.slane %v5057_v16, 5  ;;  %v5456_v0 = vrot.slane %v5454_v4, 4  ;;  %v5459_v54 = vrot.slane %v5457_v29, 5 }
 0x3bb   : > { %v4800_v26 = vor.u32 %v4798_v61, %v4797_v5  ;;  %v4801_v15 = vrot.slane %v4797_v5, 4  ;;  %v4805_v7 = vrot.slane %v4803_v48, 7  ;;  %6183 = vrot.lane.b32.xlu1 %v7151_v30, %s7528_s9  ;;  %5184 = vst.msk [vmem:[#allocation6 + $0x58] sm:$0xff] %vm11461_vm4, %v7151_v30  ;;  %v5783_v60 = vrot.slane %v5058_v3, 5 }
 0x3bc   : > { %v5782_v18 = vrot.slane %v5780_v19, 4  ;;  %v5463_v40 = vshll.u32 %v5057_v16, 16  ;;  %v5469_v10 = vrot.slane %v5467_v28, 4  ;;  %v5460_v37 = vor.u32 %v5459_v54, %v5456_v0 }
 0x3bd   : > { %v4996_v31 = vsel %vm7941_vm11, %v4800_v26, %v4995_v22  ;;  %v4808_v38 = vor.u32 %v4806_v44, %v4805_v7  ;;  %v4810_v63 = vrot.slane %v4805_v7, 4  ;;  %v5781_v50 = vsel %vm7921_vm7, %v7183_v21, %v5780_v19  ;;  %v4988_v7 = vld [vmem:[#allocation5 + $0x90] sm:$0xf] }
 0x3be   : > { %4997 = vst [vmem:[#allocation5 + $0x9c] sm:$0xf] %v4996_v31  ;;  %v5784_v55 = vsel %vm7921_vm7, %v5782_v18, %v5783_v60  ;;  %v5465_v14 = vrot.slane %v5463_v40, 5  ;;  %v5473_v49 = vshll.u32 %v5058_v3, 16  ;;  %v5461_v9 = vrot.slane %v5460_v37, 4 }
 0x3bf   : > { %v4809_v53 = vsel %vm7947_vm12, %v4801_v15, %v4808_v38  ;;  %v5000_v52 = vsel %vm7954_vm13, %v4810_v63, %v4999_v33  ;;  %v7199_v47 = vcombine.low %v5781_v50, %v5784_v55  ;;  %vm11468_vm3 = vcmask 130112   ;;  %v4992_v63 = vld [vmem:[#allocation5 + $0x98] sm:$0x1] }
 0x3c0   : > { %4998 = vst.msk [vmem:[#allocation5 + $0xa0] sm:$0xf] %vm11462_vm8, %v4809_v53  ;;  %5001 = vst [vmem:[#allocation5 + $0xa4] sm:$0x1] %v5000_v52  ;;  %v5470_v6 = vor.u32 %v5469_v10, %v5465_v14  ;;  %v5475_v59 = vrot.slane %v5473_v49, 5  ;;  %v5466_v35 = vsel %vm7934_vm10, %v5461_v9, %v5465_v14  ;;  %vm11469_vm4 = vcmask 195712  }
 0x3c1   : > { %6349 = vrot.lane.b32.xlu0 %v7199_v47, %s7529_s12  ;;  %vm11470_vm8 = vcmask 261312  }
 0x3c2   : > { %v6269_v2 = vpop.permute.xlu0 %6268  ;;  %v6036_v12 = vpop.permute.xlu1 %6035  ;;  %v5471_v20 = vrot.slane %v5470_v6, 4 }
 0x3c3   : > { %6310 = vst.msk [vmem:[#allocation6 + $0x30] sm:$0xff] %vm2669_vm6, %v6269_v2 }
 0x3c4   : > { %6076 = vst.msk [vmem:[#allocation6 + $0x38] sm:$0xff] %vm11446_vm9, %v6036_v12  ;;  %v5476_v24 = vsel %vm7934_vm10, %v5471_v20, %v5475_v59 }
 0x3c5   : > { %5881 = vrot.lane.b32.xlu0 %v10657_v57, %s7525_s27  ;;  %v7167_v8 = vcombine.low %v5466_v35, %v5476_v24  ;;  %v10717_v17 = vld [vmem:[#allocation5 + $0x9c] sm:$0xf] }
 0x3c6   : > { %v6344_v13 = vpop.permute.xlu0 %6343  ;;  %v6111_v11 = vpop.permute.xlu1 %6110 }
 0x3c7   : > { %6385 = vst.msk [vmem:[#allocation6 + $0x30] sm:$0xff] %vm11463_vm14, %v6344_v13  ;;  %6274 = vrot.lane.b32.xlu1 %v7167_v8, %s7534_s25  ;;  %v10719_v23 = vld [vmem:[#allocation5 + $0xa0] sm:$0xf]  ;;  %vm11471_vm14 = vmmov %vm11468_vm3 }
 0x3c8   : > { %6151 = vst.msk [vmem:[#allocation6 + $0x38] sm:$0xff] %vm11464_vm0, %v6111_v11  ;;  %v10723_v27 = vcombine.low %v10717_v17, %v10719_v23 }
 0x3c9   : > { %5950 = vrot.lane.b32.xlu0 %v7151_v30, %s7530_s15 }
 0x3ca   : > { %5186 = vst.msk [vmem:[#allocation6 + $0x68] sm:$0xff] %vm11465_vm1, %v10723_v27  ;;  %vm11472_vm1 = vmmov %vm11469_vm4 }
 0x3cb   : > { %5641 = vrot.lane.b32.xlu1 %v10646_v45, %s7526_s28 }
 0x3cd   : > { %6041 = vrot.lane.b32.xlu0 %v7167_v8, %s7527_s8 }
 0x3ce   : > { %v6401_v57 = vld [vmem:[#allocation6 + $0x30] sm:$0xff] }
 0x3cf   : > { %7378 = vmatprep.mubr.msk.bf16.mxu1 %vm6454_vm5, %v6401_v57  ;;  %5643 = vrot.lane.b32.xlu1 %v7167_v8, %s7526_s28  ;;  %v5002_v8 = vld [vmem:[#allocation5 + $0xa8] sm:$0xf] }
 0x3d1   : > { %v6180_v32 = vpop.permute.xlu1 %6179  ;;  %6116 = vrot.lane.b32.xlu0 %v7199_v47, %s7532_s19 }
 0x3d2   : > { %6220 = vst.msk [vmem:[#allocation6 + $0x38] sm:$0xff] %vm11466_vm15, %v6180_v32  ;;  %vm11473_vm15 = vcmask 60416   ;;  %v5006_v32 = vld [vmem:[#allocation5 + $0xb0] sm:$0x1] }
 0x3d3   : > { %5883 = vrot.lane.b32.xlu1 %v7199_v47, %s7525_s27 }
 0x3d6   : > { %v6346_v41 = vpop.permute.xlu0 %6345 }
 0x3d9   : > { %v4423_v56 = vpop.f32.mrb[44].mxu0 }
 0x3da   : > { %v4424_v58 = vadd.f32 %v10667_v62, %v4423_v56  ;;  %v4425_v39 = vpop.f32.mrb[45].mxu0  ;;  %v5878_v45 = vpop.permute.xlu0 %5877 }
 0x3db   : > { %v6271_v61 = vpop.permute.xlu1 %6270  ;;  %v4426_v51 = vpop.f32.mrb[46].mxu0 }
 0x3dc   : > { %v4484_v4 = vmax.f32 %v4424_v58, 0.0  ;;  %6311 = vst.msk [vmem:[#allocation6 + $0x38] sm:$0xff] %vm2669_vm6, %v6271_v61  ;;  %v4427_v46 = vadd.f32 %v10667_v62, %v4426_v51  ;;  %v4428_v42 = vpop.f32.mrb[47].mxu0 }
 0x3dd   : > { %6386 = vst.msk [vmem:[#allocation6 + $0x38] sm:$0xff] %vm11467_vm2, %v6346_v41  ;;  %vm11474_vm2 = vmmov %vm11473_vm15 }
 0x3de   : > { %v7293_v16 = vpack.c.bf16 %v4484_v4, %v4484_v4  ;;  %v4485_v29 = vmax.f32 %v4427_v46, 0.0  ;;  %v5947_v5 = vpop.permute.xlu0 %5946 }
 0x3df   : > { %v5638_v48 = vpop.permute.xlu1 %5637 }
 0x3e0   : > { %v4778_v44 = vshrl.u32 %v7293_v16, 16  ;;  %v7294_v30 = vpack.c.bf16 %v4485_v29, %v4485_v29  ;;  %5677 = vst.msk [vmem:[#allocation6 + $0x40] sm:$0xff] %vm11468_vm3, %v5638_v48  ;;  %v4439_v3 = vpop.f32.mrb[4].mxu1  ;;  %v4781_v19 = vshll.u32 %v7293_v16, 16  ;;  %vm11475_vm3 = vcmask 64512  }
 0x3e1   : > { %5917 = vst.msk [vmem:[#allocation6 + $0x40] sm:$0xff] %vm11469_vm4, %v5878_v45  ;;  %v4440_v22 = vadd.f32 %v10667_v62, %v4439_v3  ;;  %v4441_v28 = vpop.f32.mrb[5].mxu1  ;;  %vm11476_vm4 = vmmov %vm11475_vm3 }
 0x3e2   : > { %v4780_v21 = vrot.slane %v4778_v44, 7  ;;  %v4786_v0 = vshrl.u32 %v7294_v30, 16  ;;  %5986 = vst.msk [vmem:[#allocation6 + $0x40] sm:$0xff] %vm11470_vm8, %v5947_v5  ;;  %v6038_v26 = vpop.permute.xlu0 %6037  ;;  %v4442_v15 = vpop.f32.mrb[6].mxu1  ;;  %v4789_v31 = vshll.u32 %v7294_v30, 16  ;;  %v5515_v28 = vshrl.u32 %v10719_v23, 16 }
 0x3e3   : > { %v4488_v54 = vmax.f32 %v4440_v22, 0.0  ;;  %6077 = vst.msk [vmem:[#allocation6 + $0x40] sm:$0xff] %vm11446_vm9, %v6038_v26  ;;  %v5640_v33 = vpop.permute.xlu1 %5639  ;;  %v4443_v18 = vadd.f32 %v10667_v62, %v4442_v15  ;;  %v4444_v60 = vpop.f32.mrb[7].mxu1  ;;  %v5511_v22 = vshll.u32 %v10719_v23, 16  ;;  %v5502_v26 = vshrl.u32 %v10717_v17, 16 }
 0x3e4   : > { %v4783_v40 = vor.u32 %v4781_v19, %v4780_v21  ;;  %v4788_v10 = vrot.slane %v4786_v0, 7  ;;  %5678 = vst.msk [vmem:[#allocation6 + $0x48] sm:$0xff] %vm11471_vm14, %v5640_v33  ;;  %v6402_v38 = vld [vmem:[#allocation6 + $0x38] sm:$0xff]  ;;  %v4784_v55 = vrot.slane %v4780_v21, 4  ;;  %v5505_v15 = vshll.u32 %v10717_v17, 16  ;;  %vm11479_vm14 = vmmov %vm11474_vm2 }
 0x3e5   : > { %v7297_v37 = vpack.c.bf16 %v4488_v54, %v4488_v54  ;;  %v4489_v50 = vmax.f32 %v4443_v18, 0.0  ;;  %7379 = vmatmul.mubr.msk.bf16.gmra.mrb[28].mxu1 %vm6454_vm5, %v6402_v38  ;;  %v5794_v33 = vrot.slane %v10719_v23, 5  ;;  %v10777_v18 = vrot.slane %v5511_v22, 5  ;;  %v5009_v22 = vld [vmem:[#allocation5 + $0xb4] sm:$0xf] }
 0x3e6   : > { %v4989_v14 = vsel %vm7941_vm11, %v4783_v40, %v4988_v7  ;;  %v4791_v49 = vor.u32 %v4789_v31, %v4788_v10  ;;  %v4793_v53 = vrot.slane %v4788_v10, 4  ;;  %v6113_v52 = vpop.permute.xlu0 %6112  ;;  %v5517_v60 = vrot.slane %v5515_v28, 4 }
 0x3e7   : > { %4990 = vst [vmem:[#allocation5 + $0x90] sm:$0xf] %v4989_v14  ;;  %v4812_v47 = vshrl.u32 %v7297_v37, 16  ;;  %v4815_v9 = vshll.u32 %v7297_v37, 16  ;;  %v7298_v6 = vpack.c.bf16 %v4489_v50, %v4489_v50  ;;  %6152 = vst.msk [vmem:[#allocation6 + $0x40] sm:$0xff] %vm11464_vm0, %v6113_v52  ;;  %v5880_v2 = vpop.permute.xlu1 %5879  ;;  %v5504_v14 = vrot.slane %v5502_v26, 4 }
 0x3e8   : > { %v4792_v12 = vsel %vm7947_vm12, %v4784_v55, %v4791_v49  ;;  %v4993_v20 = vsel %vm7954_vm13, %v4793_v53, %v4992_v63  ;;  %5918 = vst.msk [vmem:[#allocation6 + $0x48] sm:$0xff] %vm11472_vm1, %v5880_v2  ;;  %v5064_v37 = vld [vmem:[#allocation5 + $0xa4] sm:$0x1]  ;;  %v5507_v49 = vrot.slane %v5505_v15, 5  ;;  %vm11477_vm8 = vcmask 458112  }
 0x3e9   : > { %4991 = vst.msk [vmem:[#allocation5 + $0x94] sm:$0xf] %vm11473_vm15, %v4792_v12  ;;  %4994 = vst [vmem:[#allocation5 + $0x98] sm:$0x1] %v4993_v20  ;;  %v4814_v59 = vrot.slane %v4812_v47, 7  ;;  %v4820_v35 = vshrl.u32 %v7298_v6, 16 }
 0x3ea   : > { %v4823_v24 = vshll.u32 %v7298_v6, 16  ;;  %v5796_v12 = vrot.slane %v5794_v33, 4  ;;  %v5797_v20 = vrot.slane %v5064_v37, 5  ;;  %vm11478_vm9 = vcmask 261312   ;;  %v5013_v15 = vld [vmem:[#allocation5 + $0xbc] sm:$0x1] }
 0x3eb   : > { %v4817_v13 = vor.u32 %v4815_v9, %v4814_v59  ;;  %v4818_v11 = vrot.slane %v4814_v59, 4  ;;  %v4822_v57 = vrot.slane %v4820_v35, 7  ;;  %v5518_v59 = vor.u32 %v5517_v60, %v10777_v18 }
 0x3ec   : > { %vm11480_vm0 = vcmask 326912   ;;  %vm11481_vm1 = vcmask 589312   ;;  %vm11482_vm15 = vcmask 392512  }
 0x3ed   : > { %v5003_v41 = vsel %vm7941_vm11, %v4817_v13, %v5002_v8  ;;  %v4825_v56 = vor.u32 %v4823_v24, %v4822_v57  ;;  %v4827_v58 = vrot.slane %v4822_v57, 4  ;;  %v7185_v57 = vrot.slane %v10717_v17, 9 }
 0x3ee   : > { %5004 = vst [vmem:[#allocation5 + $0xa8] sm:$0xf] %v5003_v41  ;;  %v10759_v39 = vld [vmem:[#allocation5 + $0x90] sm:$0xf] }
 0x3ef   : > { %v4826_v45 = vsel %vm7947_vm12, %v4818_v11, %v4825_v56  ;;  %v5007_v61 = vsel %vm7954_vm13, %v4827_v58, %v5006_v32  ;;  %v5478_v51 = vshrl.u32 %v10759_v39, 16  ;;  %v5481_v4 = vshll.u32 %v10759_v39, 16 }
 0x3f0   : > { %5005 = vst.msk [vmem:[#allocation5 + $0xac] sm:$0xf] %vm11474_vm2, %v4826_v45  ;;  %5008 = vst [vmem:[#allocation5 + $0xb0] sm:$0x1] %v5007_v61  ;;  %v5060_v46 = vld [vmem:[#allocation5 + $0x94] sm:$0xf]  ;;  %v5508_v32 = vor.u32 %v5507_v49, %v5504_v14  ;;  %v5798_v61 = vsel %vm7921_vm7, %v5796_v12, %v5797_v20  ;;  %v5795_v17 = vsel %vm7921_vm7, %v7185_v57, %v5794_v33 }
 0x3f1   : > { %v7152_v42 = vcombine.low %v10759_v39, %v5060_v46  ;;  %v5491_v16 = vshrl.u32 %v5060_v46, 16  ;;  %v5061_v29 = vld [vmem:[#allocation5 + $0x98] sm:$0x1]  ;;  %v5480_v5 = vrot.slane %v5478_v51, 4  ;;  %v5483_v48 = vrot.slane %v5481_v4, 5  ;;  %vm11483_vm2 = vmmov %vm11475_vm3 }
 0x3f2   : > { %v5487_v44 = vshll.u32 %v5060_v46, 16  ;;  %v5497_v19 = vshll.u32 %v5061_v29, 16  ;;  %v5787_v0 = vrot.slane %v5060_v46, 5  ;;  %v5790_v9 = vrot.slane %v5061_v29, 5 }
 0x3f3   : > { %6185 = vrot.lane.b32.xlu0 %v7152_v42, %s7528_s9  ;;  %5185 = vst.msk [vmem:[#allocation6 + $0x60] sm:$0xff] %vm11475_vm3, %v7152_v42  ;;  %5952 = vrot.lane.b32.xlu1 %v7152_v42, %s7530_s15  ;;  %v5484_v30 = vor.u32 %v5483_v48, %v5480_v5  ;;  %v5493_v3 = vrot.slane %v5491_v16, 4  ;;  %v7184_v8 = vrot.slane %v10759_v39, 9  ;;  %v5521_v45 = vshll.u32 %v5064_v37, 16  ;;  %vm11484_vm3 = vmmov %vm11479_vm14 }
 0x3f4   : > { %v5489_v21 = vrot.slane %v5487_v44, 5  ;;  %v5499_v38 = vrot.slane %v5497_v19, 5  ;;  %v5789_v63 = vrot.slane %v5787_v0, 4  ;;  %v5519_v29 = vrot.slane %v5518_v59, 4 }
 0x3f5   : > { %v5485_v7 = vrot.slane %v5484_v30, 4  ;;  %v10779_v40 = vld [vmem:[#allocation5 + $0xa8] sm:$0xf]  ;;  %v5788_v58 = vsel %vm7921_vm7, %v7184_v8, %v5787_v0  ;;  %v5509_v5 = vrot.slane %v5508_v32, 4  ;;  %v10816_v28 = vcombine.low %v5795_v17, %v5798_v61 }
 0x3f6   : > { %v5494_v54 = vor.u32 %v5493_v3, %v5489_v21  ;;  %v5791_v13 = vsel %vm7921_vm7, %v5789_v63, %v5790_v9  ;;  %v5523_v3 = vrot.slane %v5521_v45, 5  ;;  %v5529_v33 = vshll.u32 %v10779_v40, 16 }
 0x3f7   : > { %v10781_v10 = vld [vmem:[#allocation5 + $0xac] sm:$0xf]  ;;  %v5490_v23 = vsel %vm7934_vm10, %v5485_v7, %v5489_v21  ;;  %v7200_v39 = vcombine.low %v5788_v58, %v5791_v13  ;;  %v5514_v7 = vsel %vm7934_vm10, %v5509_v5, %v10777_v18 }
 0x3f8   : > { %v5495_v31 = vrot.slane %v5494_v54, 4  ;;  %v10785_v50 = vcombine.low %v10779_v40, %v10781_v10  ;;  %v5524_v26 = vsel %vm7934_vm10, %v5519_v29, %v5523_v3  ;;  %v5526_v54 = vshrl.u32 %v10779_v40, 16 }
 0x3f9   : > { %v4447_v55 = vpop.f32.mrb[8].mxu1  ;;  %v5539_v60 = vshrl.u32 %v10781_v10, 16  ;;  %v5535_v37 = vshll.u32 %v10781_v10, 16  ;;  %v5801_v45 = vrot.slane %v10781_v10, 5 }
 0x3fa   : > { %v5500_v53 = vsel %vm7934_vm10, %v5495_v31, %v5499_v38  ;;  %v4448_v52 = vadd.f32 %v10667_v62, %v4447_v55  ;;  %v4449_v47 = vpop.f32.mrb[9].mxu1  ;;  %5187 = vst.msk [vmem:[#allocation6 + $0x70] sm:$0xff] %vm11476_vm4, %v10785_v50  ;;  %v7169_v55 = vcombine.low %v5514_v7, %v5524_v26  ;;  %vm11488_vm4 = vmmov %vm11484_vm3 }
 0x3fb   : > { %v10794_v6 = vcombine.low %v5490_v23, %v5500_v53  ;;  %v4450_v2 = vpop.f32.mrb[10].mxu1  ;;  %v5528_v53 = vrot.slane %v5526_v54, 4  ;;  %v5537_v47 = vrot.slane %v5535_v37, 5  ;;  %v5541_v9 = vrot.slane %v5539_v60, 4  ;;  %v5016_v60 = vld [vmem:[#allocation5 + $0xc0] sm:$0xf] }
 0x3fc   : > { %v4490_v35 = vmax.f32 %v4448_v52, 0.0  ;;  %v4451_v24 = vadd.f32 %v10667_v62, %v4450_v2  ;;  %v4452_v11 = vpop.f32.mrb[11].mxu1  ;;  %v5531_v52 = vrot.slane %v5529_v33, 5  ;;  %v5067_v2 = vld [vmem:[#allocation5 + $0xb0] sm:$0x1] }
 0x3fd   : > { %6276 = vrot.lane.b32.xlu0 %v10794_v6, %s7534_s25  ;;  %6043 = vrot.lane.b32.xlu1 %v10794_v6, %s7527_s8 }
 0x3fe   : > { %v7299_v41 = vpack.c.bf16 %v4490_v35, %v4490_v35  ;;  %v4491_v56 = vmax.f32 %v4451_v24, 0.0  ;;  %v5532_v59 = vor.u32 %v5531_v52, %v5528_v53  ;;  %v5542_v35 = vor.u32 %v5541_v9, %v5537_v47 }
 0x3ff   : > { %v5545_v24 = vshll.u32 %v5067_v2, 16 }
 0x400   : > { %v4829_v51 = vshrl.u32 %v7299_v41, 16  ;;  %v4832_v4 = vshll.u32 %v7299_v41, 16  ;;  %v6182_v46 = vpop.permute.xlu0 %6181  ;;  %v5949_v42 = vpop.permute.xlu1 %5948  ;;  %v7300_v16 = vpack.c.bf16 %v4491_v56, %v4491_v56  ;;  %v5533_v41 = vrot.slane %v5532_v59, 4 }
 0x401   : > { %6221 = vst.msk [vmem:[#allocation6 + $0x40] sm:$0xff] %vm11477_vm8, %v6182_v46  ;;  %6351 = vrot.lane.b32.xlu0 %v7200_v39, %s7529_s12  ;;  %6118 = vrot.lane.b32.xlu1 %v7200_v39, %s7532_s19  ;;  %v5543_v56 = vrot.slane %v5542_v35, 4  ;;  %v5547_v58 = vrot.slane %v5545_v24, 5 }
 0x402   : > { %5987 = vst.msk [vmem:[#allocation6 + $0x48] sm:$0xff] %vm11478_vm9, %v5949_v42  ;;  %v4831_v48 = vrot.slane %v4829_v51, 7  ;;  %v4837_v44 = vshrl.u32 %v7300_v16, 16  ;;  %v4840_v30 = vshll.u32 %v7300_v16, 16  ;;  %v5538_v5 = vsel %vm7934_vm10, %v5533_v41, %v5537_v47  ;;  %vm11490_vm9 = vmmov %vm11481_vm1 }
 0x404   : > { %v4834_v21 = vor.u32 %v4832_v4, %v4831_v48  ;;  %v4835_v19 = vrot.slane %v4831_v48, 4  ;;  %v4839_v0 = vrot.slane %v4837_v44, 7  ;;  %v5548_v48 = vsel %vm7934_vm10, %v5543_v56, %v5547_v58 }
 0x405   : > { %6353 = vrot.lane.b32.xlu0 %v10816_v28, %s7529_s12  ;;  %6187 = vrot.lane.b32.xlu1 %v10723_v27, %s7528_s9  ;;  %v5803_v44 = vrot.slane %v5801_v45, 4 }
 0x406   : > { %v5010_v31 = vsel %vm7941_vm11, %v4834_v21, %v5009_v22  ;;  %v4842_v38 = vor.u32 %v4840_v30, %v4839_v0  ;;  %v4844_v63 = vrot.slane %v4839_v0, 4  ;;  %v5804_v30 = vrot.slane %v5067_v2, 5 }
 0x407   : > { %5011 = vst [vmem:[#allocation5 + $0xb4] sm:$0xf] %v5010_v31  ;;  %v7170_v31 = vcombine.low %v5538_v5, %v5548_v48  ;;  %v10933_v5 = vld [vmem:[#allocation5 + $0xcc] sm:$0xf] }
 0x408   : > { %v4843_v14 = vsel %vm7947_vm12, %v4835_v19, %v4842_v38  ;;  %v5014_v18 = vsel %vm7954_vm13, %v4844_v63, %v5013_v15  ;;  %v5805_v63 = vsel %vm7921_vm7, %v5803_v44, %v5804_v30 }
 0x409   : > { %5012 = vst.msk [vmem:[#allocation5 + $0xb8] sm:$0xf] %vm11479_vm14, %v4843_v14  ;;  %5015 = vst [vmem:[#allocation5 + $0xbc] sm:$0x1] %v5014_v18  ;;  %5885 = vrot.lane.b32.xlu0 %v7200_v39, %s7525_s27  ;;  %6278 = vrot.lane.b32.xlu1 %v7169_v55, %s7534_s25  ;;  %vm11491_vm14 = vcmask 130112  }
 0x40a   : > { %v6273_v49 = vpop.permute.xlu0 %6272 }
 0x40b   : > { %v6040_v23 = vpop.permute.xlu1 %6039  ;;  %6312 = vst.msk [vmem:[#allocation6 + $0x40] sm:$0xff] %vm2669_vm6, %v6273_v49 }
 0x40c   : > { %6078 = vst.msk [vmem:[#allocation6 + $0x48] sm:$0xff] %vm11480_vm0, %v6040_v23  ;;  %v5020_v23 = vld [vmem:[#allocation5 + $0xc8] sm:$0x1]  ;;  %vm11492_vm0 = vcmask 195712  }
 0x40d   : > { %5954 = vrot.lane.b32.xlu0 %v10723_v27, %s7530_s15  ;;  %5645 = vrot.lane.b32.xlu1 %v10794_v6, %s7526_s28 }
 0x40e   : > { %v6348_v12 = vpop.permute.xlu0 %6347  ;;  %v10848_v13 = vld [vmem:[#allocation5 + $0xb4] sm:$0xf] }
 0x40f   : > { %v6115_v20 = vpop.permute.xlu1 %6114  ;;  %6387 = vst.msk [vmem:[#allocation6 + $0x40] sm:$0xff] %vm11481_vm1, %v6348_v12  ;;  %v5550_v4 = vshrl.u32 %v10848_v13, 16  ;;  %v5553_v46 = vshll.u32 %v10848_v13, 16  ;;  %v7187_v37 = vrot.slane %v10848_v13, 9  ;;  %vm11493_vm1 = vcmask 261312  }
 0x410   : > { %6153 = vst.msk [vmem:[#allocation6 + $0x48] sm:$0xff] %vm11482_vm15, %v6115_v20  ;;  %v4455_v8 = vpop.f32.mrb[12].mxu1  ;;  %v10850_v11 = vld [vmem:[#allocation5 + $0xb8] sm:$0xf]  ;;  %v5070_v0 = vld [vmem:[#allocation5 + $0xbc] sm:$0x1] }
 0x411   : > { %6045 = vrot.lane.b32.xlu0 %v7169_v55, %s7527_s8  ;;  %5647 = vrot.lane.b32.xlu1 %v7169_v55, %s7526_s28  ;;  %v4456_v27 = vadd.f32 %v10667_v62, %v4455_v8  ;;  %v4457_v6 = vpop.f32.mrb[13].mxu1  ;;  %v10857_v57 = vcombine.low %v10848_v13, %v10850_v11  ;;  %v5559_v42 = vshll.u32 %v10850_v11, 16  ;;  %v5563_v16 = vshrl.u32 %v10850_v11, 16 }
 0x412   : > { %v4458_v32 = vpop.f32.mrb[14].mxu1  ;;  %v5808_v19 = vrot.slane %v10850_v11, 5  ;;  %v5555_v26 = vrot.slane %v5553_v46, 5  ;;  %v5811_v49 = vrot.slane %v5070_v0, 5  ;;  %v5569_v9 = vshll.u32 %v5070_v0, 16 }
 0x413   : > { %v4492_v39 = vmax.f32 %v4456_v27, 0.0  ;;  %v4459_v61 = vadd.f32 %v10667_v62, %v4458_v32  ;;  %v4460_v51 = vpop.f32.mrb[15].mxu1  ;;  %5188 = vst.msk [vmem:[#allocation6 + $0x78] sm:$0xff] %vm11483_vm2, %v10857_v57  ;;  %v7186_v62 = vrot.slane %v10779_v40, 9  ;;  %v5561_v40 = vrot.slane %v5559_v42, 5  ;;  %vm11495_vm2 = vmmov %vm11491_vm14 }
 0x414   : > { %v5565_v15 = vrot.slane %v5563_v16, 4  ;;  %v5810_v53 = vrot.slane %v5808_v19, 4  ;;  %v5809_v24 = vsel %vm7921_vm7, %v7187_v37, %v5808_v19  ;;  %v5571_v11 = vrot.slane %v5569_v9, 5 }
 0x415   : > { %v7301_v29 = vpack.c.bf16 %v4492_v39, %v4492_v39  ;;  %v4493_v17 = vmax.f32 %v4459_v61, 0.0  ;;  %6120 = vrot.lane.b32.xlu0 %v10816_v28, %s7532_s19  ;;  %5887 = vrot.lane.b32.xlu1 %v10816_v28, %s7525_s27  ;;  %v5552_v28 = vrot.slane %v5550_v4, 4  ;;  %v5802_v38 = vsel %vm7921_vm7, %v7186_v62, %v5801_v45  ;;  %v10922_v61 = vld [vmem:[%s11148_s5] ss:$0 sm:$0xff] }
 0x416   : > { %v6403_v10 = vld [vmem:[#allocation6 + $0x40] sm:$0xff]  ;;  %v5566_v47 = vor.u32 %v5565_v15, %v5561_v40  ;;  %v7202_v35 = vcombine.low %v5802_v38, %v5805_v63  ;;  %v5812_v34 = vsel %vm7921_vm7, %v5810_v53, %v5811_v49  ;;  %v6233_v15 = vshll.u32 %v10933_v5, 16 }
 0x417   : > { %v4846_v3 = vshrl.u32 %v7301_v29, 16  ;;  %v4849_v22 = vshll.u32 %v7301_v29, 16  ;;  %v7302_v21 = vpack.c.bf16 %v4493_v17, %v4493_v17  ;;  %7382 = vmatprep.mubr.msk.bf16.mxu1 %vm6454_vm5, %v6403_v10  ;;  %v5556_v52 = vor.u32 %v5555_v26, %v5552_v28 }
 0x418   : > { %v5567_v13 = vrot.slane %v5566_v47, 4  ;;  %v7203_v36 = vcombine.low %v5809_v24, %v5812_v34  ;;  %vm11494_vm15 = vcmask 326912  }
 0x419   : > { %v4848_v7 = vrot.slane %v4846_v3, 7  ;;  %v4854_v54 = vshrl.u32 %v7302_v21, 16  ;;  %v4857_v33 = vshll.u32 %v7302_v21, 16  ;;  %6189 = vrot.lane.b32.xlu0 %v10785_v50, %s7528_s9  ;;  %5956 = vrot.lane.b32.xlu1 %v10785_v50, %s7530_s15  ;;  %v5557_v8 = vrot.slane %v5556_v52, 4  ;;  %v10937_v3 = vld [vmem:[#allocation5 + $0xd0] sm:$0xf] }
 0x41a   : > { %v5572_v27 = vsel %vm7934_vm10, %v5567_v13, %v5571_v11  ;;  %v6235_v52 = vrot.slane %v6233_v15, 5 }
 0x41b   : > { %v4851_v55 = vor.u32 %v4849_v22, %v4848_v7  ;;  %v4852_v14 = vrot.slane %v4848_v7, 4  ;;  %v4856_v18 = vrot.slane %v4854_v54, 7  ;;  %v5562_v43 = vsel %vm7934_vm10, %v5557_v8, %v5561_v40 }
 0x41c   : > { %v7171_v32 = vcombine.low %v5562_v43, %v5572_v27  ;;  %v6230_v40 = vshrl.u32 %v10933_v5, 16 }
 0x41d   : > { %v5017_v50 = vsel %vm7941_vm11, %v4851_v55, %v5016_v60  ;;  %v4859_v2 = vor.u32 %v4857_v33, %v4856_v18  ;;  %v4861_v12 = vrot.slane %v4856_v18, 4  ;;  %6280 = vrot.lane.b32.xlu0 %v7170_v31, %s7534_s25  ;;  %6047 = vrot.lane.b32.xlu1 %v7170_v31, %s7527_s8  ;;  %vm11485_vm11 = vmmov %vm11477_vm8  ;;  %v6243_v33 = vshrl.u32 %v10937_v3, 16 }
 0x41e   : > { %5018 = vst [vmem:[#allocation5 + $0xc0] sm:$0xf] %v5017_v50  ;;  %v6239_v60 = vshll.u32 %v10937_v3, 16  ;;  %v6232_v53 = vrot.slane %v6230_v40, 4  ;;  %vm11489_vm8 = vmmov %vm11484_vm3 }
 0x41f   : > { %v4860_v20 = vsel %vm7947_vm12, %v4852_v14, %v4859_v2  ;;  %v5021_v59 = vsel %vm7954_vm13, %v4861_v12, %v5020_v23  ;;  %vm11486_vm12 = vmmov %vm11484_vm3  ;;  %v6245_v9 = vrot.slane %v6243_v33, 4 }
 0x420   : > { %5019 = vst.msk [vmem:[#allocation5 + $0xc4] sm:$0xf] %vm11484_vm3, %v4860_v20  ;;  %5022 = vst [vmem:[#allocation5 + $0xc8] sm:$0x1] %v5021_v59  ;;  %v6241_v47 = vrot.slane %v6239_v60, 5  ;;  %v6236_v13 = vor.u32 %v6235_v52, %v6232_v53 }
 0x421   : > { %6355 = vrot.lane.b32.xlu0 %v7202_v35, %s7529_s12  ;;  %6122 = vrot.lane.b32.xlu1 %v7202_v35, %s7532_s19  ;;  %vm11487_vm13 = vmmov %vm11484_vm3  ;;  %v5076_v20 = vld [vmem:[#allocation5 + $0xd4] sm:$0x1]  ;;  %vm11496_vm3 = vcmask 392512  }
 0x422   : > { %v6246_v11 = vor.u32 %v6245_v9, %v6241_v47 }
 0x425   : > { %6357 = vrot.lane.b32.xlu0 %v7203_v36, %s7529_s12  ;;  %6191 = vrot.lane.b32.xlu1 %v10857_v57, %s7528_s9  ;;  %v10909_v6 = vld [vmem:[#allocation5 + $0xc0] sm:$0xf] }
 0x426   : > { %v5995_v56 = vshrl.u32 %v10909_v6, 16  ;;  %v5998_v58 = vshll.u32 %v10909_v6, 16  ;;  %v7206_v12 = vrot.slane %v10909_v6, 9 }
 0x427   : > { %v10911_v41 = vld [vmem:[#allocation5 + $0xc4] sm:$0xf]  ;;  %v10924_v51 = vld [vmem:[#allocation5 + $0xc8] sm:$0x1] }
 0x428   : > { %v6008_v45 = vshrl.u32 %v10911_v41, 16  ;;  %v6004_v39 = vshll.u32 %v10911_v41, 16  ;;  %v5997_v4 = vrot.slane %v5995_v56, 4  ;;  %v6000_v46 = vrot.slane %v5998_v58, 5 }
 0x429   : > { %5889 = vrot.lane.b32.xlu0 %v7202_v35, %s7525_s27  ;;  %6282 = vrot.lane.b32.xlu1 %v7171_v32, %s7534_s25  ;;  %v6014_v30 = vshll.u32 %v10924_v51, 16  ;;  %v6088_v37 = vrot.slane %v10911_v41, 5  ;;  %v7204_v50 = vcombine.low %v10909_v6, %v10911_v41  ;;  %v6091_v34 = vrot.slane %v10924_v51, 5 }
 0x42a   : > { %v10926_v42 = vrot.slane %v6004_v39, 5  ;;  %v6010_v16 = vrot.slane %v6008_v45, 4  ;;  %v6001_v19 = vor.u32 %v6000_v46, %v5997_v4  ;;  %v6237_v56 = vrot.slane %v6236_v13, 4 }
 0x42b   : > { %v6016_v49 = vrot.slane %v6014_v30, 5  ;;  %v6090_v24 = vrot.slane %v6088_v37, 4  ;;  %v6089_v6 = vsel %vm7921_vm7, %v7206_v12, %v6088_v37  ;;  %v6247_v58 = vrot.slane %v6246_v11, 4 }
 0x42c   : > { %v6011_v0 = vor.u32 %v6010_v16, %v10926_v42  ;;  %v6002_v14 = vrot.slane %v6001_v19, 4  ;;  %v6323_v39 = vrot.slane %v10937_v3, 5  ;;  %v7208_v46 = vcombine.low %v10933_v5, %v10937_v3 }
 0x42d   : > { %5958 = vrot.lane.b32.xlu0 %v10857_v57, %s7530_s15  ;;  %5649 = vrot.lane.b32.xlu1 %v7170_v31, %s7526_s28  ;;  %v7368_v29 = vpop.f32.mrb[16].mxu1  ;;  %v6184_v17 = vpop.permute.xlu1 %6183  ;;  %v6242_v16 = vsel %vm7934_vm10, %v6237_v56, %v6241_v47 }
 0x42e   : > { %v6550_v62 = vadd.f32 %v7368_v29, %v10922_v61  ;;  %v6541_v10 = vpop.f32.mrb[17].mxu1  ;;  %6222 = vst.msk [vmem:[#allocation6 + $0x48] sm:$0xff] %vm11485_vm11, %v6184_v17  ;;  %v6012_v18 = vrot.slane %v6011_v0, 4  ;;  %v6007_v59 = vsel %vm7934_vm10, %v6002_v14, %v10926_v42  ;;  %vm11497_vm11 = vmmov %vm11492_vm0 }
 0x42f   : > { %v6542_v48 = vadd.f32 %v10922_v61, %v6541_v10  ;;  %v7369_v44 = vpop.f32.mrb[18].mxu1  ;;  %v6325_v10 = vrot.slane %v6323_v39, 4 }
 0x430   : > { %v6670_v57 = vmax.f32 %v6550_v62, 0.0  ;;  %v6553_v22 = vadd.f32 %v7369_v44, %v10922_v61  ;;  %v6544_v21 = vpop.f32.mrb[19].mxu1  ;;  %v6017_v35 = vsel %vm7934_vm10, %v6012_v18, %v6016_v49  ;;  %v7210_v62 = vrot.slane %v10933_v5, 9 }
 0x431   : > { %v6668_v28 = vmax.f32 %v6542_v48, 0.0  ;;  %6049 = vrot.lane.b32.xlu0 %v7171_v32, %s7527_s8  ;;  %v6545_v26 = vadd.f32 %v10922_v61, %v6544_v21  ;;  %5651 = vrot.lane.b32.xlu1 %v7171_v32, %s7526_s28  ;;  %v7205_v43 = vcombine.low %v6007_v59, %v6017_v35  ;;  %v6092_v32 = vsel %vm7921_vm7, %v6090_v24, %v6091_v34 }
 0x432   : > { %v7305_v7 = vpack.c.bf16 %v6670_v57, %v6670_v57  ;;  %v6671_v54 = vmax.f32 %v6553_v22, 0.0  ;;  %v7207_v51 = vcombine.low %v6089_v6, %v6092_v32  ;;  %v6326_v48 = vrot.slane %v5076_v20, 5 }
 0x433   : > { %v7303_v31 = vpack.c.bf16 %v6668_v28, %v6668_v28  ;;  %v6669_v38 = vmax.f32 %v6545_v26, 0.0  ;;  %v6350_v63 = vpop.permute.xlu0 %6349  ;;  %v6324_v25 = vsel %vm7921_vm7, %v7210_v62, %v6323_v39 }
 0x434   : > { %6830 = vst.msk [vmem:[%s10945_s13 + $0x8] sm:$0xf] %vm11486_vm12, %v7305_v7  ;;  %v7306_v55 = vpack.c.bf16 %v6671_v54, %v6671_v54  ;;  %v6327_v57 = vsel %vm7921_vm7, %v6325_v10, %v6326_v48  ;;  %vm11498_vm7 = vmmov %vm11488_vm4 }
 0x435   : > { %6828 = vst.msk [vmem:[%s10945_s13] sm:$0xf] %vm11487_vm13, %v7303_v31  ;;  %v7304_v23 = vpack.c.bf16 %v6669_v38, %v6669_v38  ;;  %6124 = vrot.lane.b32.xlu0 %v7203_v36, %s7532_s19  ;;  %5891 = vrot.lane.b32.xlu1 %v7203_v36, %s7525_s27  ;;  %v6249_v36 = vshll.u32 %v5076_v20, 16  ;;  %v7211_v5 = vcombine.low %v6324_v25, %v6327_v57  ;;  %vm11500_vm12 = vmmov %vm11488_vm4 }
 0x436   : > { %6831 = vst.msk [vmem:[%s10945_s13 + $0xc] sm:$0xf] %vm11488_vm4, %v7306_v55  ;;  %vm11501_vm13 = vmmov %vm11488_vm4 }
 0x437   : > { %6829 = vst.msk [vmem:[%s10945_s13 + $0x4] sm:$0xf] %vm11489_vm8, %v7304_v23  ;;  %v5882_v2 = vpop.permute.xlu0 %5881  ;;  %v6251_v45 = vrot.slane %v6249_v36, 5  ;;  %vm11503_vm8 = vmmov %vm11493_vm1 }
 0x439   : > { %6193 = vrot.lane.b32.xlu0 %v7204_v50, %s7528_s9  ;;  %5960 = vrot.lane.b32.xlu1 %v7204_v50, %s7530_s15  ;;  %v6275_v8 = vpop.permute.xlu1 %6274  ;;  %v6252_v29 = vsel %vm7934_vm10, %v6247_v58, %v6251_v45  ;;  %vm11499_vm10 = vmmov %vm11488_vm4  ;;  %vm11502_vm4 = vcmask 458112  }
 0x43a   : > { %6313 = vst.msk [vmem:[#allocation6 + $0x48] sm:$0xff] %vm2669_vm6, %v6275_v8  ;;  %v7209_v30 = vcombine.low %v6242_v16, %v6252_v29 }
 0x43b   : > { %6388 = vst.msk [vmem:[#allocation6 + $0x48] sm:$0xff] %vm11490_vm9, %v6350_v63  ;;  %v5951_v27 = vpop.permute.xlu0 %5950  ;;  %vm11504_vm9 = vmmov %vm11494_vm15 }
 0x43d   : > { %6284 = vrot.lane.b32.xlu0 %v7205_v43, %s7534_s25  ;;  %6051 = vrot.lane.b32.xlu1 %v7205_v43, %s7527_s8  ;;  %v5642_v41 = vpop.permute.xlu1 %5641 }
 0x43e   : > { %5679 = vst.msk [vmem:[#allocation6 + $0x50] sm:$0xff] %vm11491_vm14, %v5642_v41  ;;  %vm11505_vm14 = vcmask 589312  }
 0x43f   : > { %5919 = vst.msk [vmem:[#allocation6 + $0x50] sm:$0xff] %vm11492_vm0, %v5882_v2  ;;  %v6042_v4 = vpop.permute.xlu0 %6041  ;;  %vm11506_vm0 = vmmov %vm11496_vm3 }
 0x440   : > { %5988 = vst.msk [vmem:[#allocation6 + $0x50] sm:$0xff] %vm11493_vm1, %v5951_v27  ;;  %vm11507_vm1 = vmmov %vm11502_vm4 }
 0x441   : > { %6359 = vrot.lane.b32.xlu0 %v7207_v51, %s7529_s12  ;;  %6126 = vrot.lane.b32.xlu1 %v7207_v51, %s7532_s19  ;;  %6079 = vst.msk [vmem:[#allocation6 + $0x50] sm:$0xff] %vm11494_vm15, %v6042_v4  ;;  %v5644_v42 = vpop.permute.xlu1 %5643  ;;  %vm11508_vm15 = vmmov %vm11505_vm14 }
 0x442   : > { %5680 = vst.msk [vmem:[#allocation6 + $0x58] sm:$0xff] %vm11495_vm2, %v5644_v42  ;;  %v6404_v17 = vld [vmem:[#allocation6 + $0x48] sm:$0xff] }
 0x443   : > { %7383 = vmatmul.mubr.msk.bf16.gmra.mrb[32].mxu1 %vm6454_vm5, %v6404_v17  ;;  %v6117_v44 = vpop.permute.xlu0 %6116 }
 0x444   : > { %6154 = vst.msk [vmem:[#allocation6 + $0x50] sm:$0xff] %vm11496_vm3, %v6117_v44  ;;  %vm11509_vm3 = vmmov %vm11497_vm11 }
 0x445   : > { %6195 = vrot.lane.b32.xlu1 %v7208_v46, %s7528_s9  ;;  %v5884_v3 = vpop.permute.xlu1 %5883 }
 0x446   : > { %5920 = vst.msk [vmem:[#allocation6 + $0x58] sm:$0xff] %vm11497_vm11, %v5884_v3  ;;  %vm11510_vm11 = vmmov %vm11503_vm8 }
 0x449   : > { %6286 = vrot.lane.b32.xlu1 %v7209_v30, %s7534_s25 }
 0x44d   : > { %6361 = vrot.lane.b32.xlu1 %v7211_v5, %s7529_s12  ;;  %v7372_v22 = vpop.f32.mrb[20].mxu1 }
 0x44e   : > { %v6566_v21 = vadd.f32 %v7372_v22, %v10922_v61  ;;  %v6557_v19 = vpop.f32.mrb[21].mxu1 }
 0x44f   : > { %v6558_v0 = vadd.f32 %v10922_v61, %v6557_v19  ;;  %v7373_v28 = vpop.f32.mrb[22].mxu1 }
 0x450   : > { %v6674_v26 = vmax.f32 %v6566_v21, 0.0  ;;  %v6569_v1 = vadd.f32 %v7373_v28, %v10922_v61  ;;  %v6560_v40 = vpop.f32.mrb[23].mxu1 }
 0x451   : > { %v6672_v15 = vmax.f32 %v6558_v0, 0.0  ;;  %v6561_v7 = vadd.f32 %v10922_v61, %v6560_v40 }
 0x452   : > { %v7309_v54 = vpack.c.bf16 %v6674_v26, %v6674_v26  ;;  %v6675_v33 = vmax.f32 %v6569_v1, 0.0 }
 0x453   : > { %v7307_v60 = vpack.c.bf16 %v6672_v15, %v6672_v15  ;;  %v6673_v31 = vmax.f32 %v6561_v7, 0.0 }
 0x454   : > { %6834 = vst.msk [vmem:[%s10945_s13 + $0x18] sm:$0xf] %vm11498_vm7, %v7309_v54  ;;  %v7310_v38 = vpack.c.bf16 %v6675_v33, %v6675_v33  ;;  %vm11511_vm7 = vmmov %vm11504_vm9 }
 0x455   : > { %6832 = vst.msk [vmem:[%s10945_s13 + $0x10] sm:$0xf] %vm11499_vm10, %v7307_v60  ;;  %v7308_v63 = vpack.c.bf16 %v6673_v31, %v6673_v31  ;;  %vm11512_vm10 = vmmov %vm11495_vm2 }
 0x456   : > { %6835 = vst.msk [vmem:[%s10945_s13 + $0x1c] sm:$0xf] %vm11500_vm12, %v7310_v38  ;;  %vm11513_vm12 = vmmov %vm11506_vm0 }
 0x457   : > { %6833 = vst.msk [vmem:[%s10945_s13 + $0x14] sm:$0xf] %vm11501_vm13, %v7308_v63  ;;  %vm11514_vm13 = vmmov %vm11509_vm3 }
 0x465   : > { %v6186_v37 = vpop.permute.xlu0 %6185  ;;  %v5953_v55 = vpop.permute.xlu1 %5952 }
 0x466   : > { %6223 = vst.msk [vmem:[#allocation6 + $0x50] sm:$0xff] %vm11502_vm4, %v6186_v37  ;;  %vm11515_vm4 = vcmask 60416  }
 0x467   : > { %5989 = vst.msk [vmem:[#allocation6 + $0x58] sm:$0xff] %vm11503_vm8, %v5953_v55  ;;  %vm11516_vm8 = vmmov %vm11515_vm4 }
 0x46f   : > { %v6277_v14 = vpop.permute.xlu0 %6276  ;;  %v6044_v18 = vpop.permute.xlu1 %6043 }
 0x470   : > { %6314 = vst.msk [vmem:[#allocation6 + $0x50] sm:$0xff] %vm2669_vm6, %v6277_v14 }
 0x471   : > { %6080 = vst.msk [vmem:[#allocation6 + $0x58] sm:$0xff] %vm11504_vm9, %v6044_v18  ;;  %vm11517_vm9 = vmmov %vm11515_vm4 }
 0x473   : > { %v6352_v49 = vpop.permute.xlu0 %6351  ;;  %v6119_v23 = vpop.permute.xlu1 %6118 }
 0x474   : > { %6389 = vst.msk [vmem:[#allocation6 + $0x50] sm:$0xff] %vm11505_vm14, %v6352_v49  ;;  %vm11518_vm14 = vmmov %vm11507_vm1 }
 0x475   : > { %6155 = vst.msk [vmem:[#allocation6 + $0x58] sm:$0xff] %vm11506_vm0, %v6119_v23  ;;  %vm11519_vm0 = vmmov %vm11515_vm4 }
 0x477   : > { %v6354_v53 = vpop.permute.xlu0 %6353  ;;  %v6188_v52 = vpop.permute.xlu1 %6187 }
 0x478   : > { %6224 = vst.msk [vmem:[#allocation6 + $0x58] sm:$0xff] %vm11507_vm1, %v6188_v52  ;;  %vm11520_vm1 = vmmov %vm11510_vm11 }
 0x47b   : > { %v5886_v47 = vpop.permute.xlu0 %5885  ;;  %v6279_v9 = vpop.permute.xlu1 %6278  ;;  %v6405_v50 = vld [vmem:[#allocation6 + $0x50] sm:$0xff] }
 0x47c   : > { %6315 = vst.msk [vmem:[#allocation6 + $0x58] sm:$0xff] %vm2669_vm6, %v6279_v9  ;;  %7386 = vmatprep.mubr.msk.bf16.mxu1 %vm6454_vm5, %v6405_v50 }
 0x47d   : > { %6390 = vst.msk [vmem:[#allocation6 + $0x58] sm:$0xff] %vm11508_vm15, %v6354_v53  ;;  %vm11521_vm15 = vmmov %vm11511_vm7 }
 0x47f   : > { %v5955_v2 = vpop.permute.xlu0 %5954  ;;  %v5646_v12 = vpop.permute.xlu1 %5645 }
 0x480   : > { %5681 = vst.msk [vmem:[#allocation6 + $0x60] sm:$0xff] %vm11495_vm2, %v5646_v12  ;;  %vm11522_vm2 = vcmask 589312  }
 0x481   : > { %5921 = vst.msk [vmem:[#allocation6 + $0x60] sm:$0xff] %vm11509_vm3, %v5886_v47  ;;  %vm11523_vm3 = vmmov %vm11513_vm12 }
 0x482   : > { %5990 = vst.msk [vmem:[#allocation6 + $0x60] sm:$0xff] %vm11510_vm11, %v5955_v2  ;;  %vm11524_vm11 = vmmov %vm11518_vm14 }
 0x483   : > { %v7376_v20 = vpop.f32.mrb[24].mxu1  ;;  %v6046_v59 = vpop.permute.xlu0 %6045 }
 0x484   : > { %v6582_v35 = vadd.f32 %v7376_v20, %v10922_v61  ;;  %v6573_v24 = vpop.f32.mrb[25].mxu1  ;;  %6081 = vst.msk [vmem:[#allocation6 + $0x60] sm:$0xff] %vm11511_vm7, %v6046_v59  ;;  %v5648_v34 = vpop.permute.xlu1 %5647  ;;  %v6406_v8 = vld [vmem:[#allocation6 + $0x58] sm:$0xff]  ;;  %vm11525_vm7 = vmmov %vm11522_vm2 }
 0x485   : > { %v6574_v13 = vadd.f32 %v10922_v61, %v6573_v24  ;;  %v7377_v11 = vpop.f32.mrb[26].mxu1  ;;  %5682 = vst.msk [vmem:[#allocation6 + $0x68] sm:$0xff] %vm11512_vm10, %v5648_v34  ;;  %7387 = vmatmul.mubr.msk.bf16.gmra.mrb[36].mxu1 %vm6454_vm5, %v6406_v8 }
 0x486   : > { %v6678_v36 = vmax.f32 %v6582_v35, 0.0  ;;  %v6585_v43 = vadd.f32 %v7377_v11, %v10922_v61  ;;  %v6576_v27 = vpop.f32.mrb[27].mxu1 }
 0x487   : > { %v6676_v6 = vmax.f32 %v6574_v13, 0.0  ;;  %v6577_v32 = vadd.f32 %v10922_v61, %v6576_v27  ;;  %v6121_v41 = vpop.permute.xlu0 %6120 }
 0x488   : > { %v7313_v56 = vpack.c.bf16 %v6678_v36, %v6678_v36  ;;  %v6679_v58 = vmax.f32 %v6585_v43, 0.0  ;;  %6156 = vst.msk [vmem:[#allocation6 + $0x60] sm:$0xff] %vm11513_vm12, %v6121_v41  ;;  %v5888_v45 = vpop.permute.xlu1 %5887  ;;  %vm11526_vm12 = vmmov %vm11514_vm13 }
 0x489   : > { %v7311_v39 = vpack.c.bf16 %v6676_v6, %v6676_v6  ;;  %v6677_v51 = vmax.f32 %v6577_v32, 0.0  ;;  %5922 = vst.msk [vmem:[#allocation6 + $0x68] sm:$0xff] %vm11514_vm13, %v5888_v45  ;;  %vm11527_vm13 = vmmov %vm11520_vm1 }
 0x48a   : > { %6838 = vst.msk [vmem:[%s10945_s13 + $0x28] sm:$0xf] %vm11515_vm4, %v7313_v56  ;;  %v7314_v4 = vpack.c.bf16 %v6679_v58, %v6679_v58  ;;  %vm11528_vm4 = vmmov %vm11521_vm15 }
 0x48b   : > { %6836 = vst.msk [vmem:[%s10945_s13 + $0x20] sm:$0xf] %vm11516_vm8, %v7311_v39  ;;  %v7312_v46 = vpack.c.bf16 %v6677_v51, %v6677_v51  ;;  %v6190_v42 = vpop.permute.xlu0 %6189  ;;  %vm11529_vm8 = vmmov %vm11512_vm10 }
 0x48c   : > { %6839 = vst.msk [vmem:[%s10945_s13 + $0x2c] sm:$0xf] %vm11517_vm9, %v7314_v4  ;;  %v5957_v16 = vpop.permute.xlu1 %5956  ;;  %vm11530_vm9 = vmmov %vm11523_vm3 }
 0x48d   : > { %6225 = vst.msk [vmem:[#allocation6 + $0x60] sm:$0xff] %vm11518_vm14, %v6190_v42  ;;  %vm11531_vm14 = vmmov %vm11526_vm12 }
 0x48e   : > { %6837 = vst.msk [vmem:[%s10945_s13 + $0x24] sm:$0xf] %vm11519_vm0, %v7312_v46  ;;  %vm11532_vm0 = vmmov %vm11524_vm11 }
 0x48f   : > { %5991 = vst.msk [vmem:[#allocation6 + $0x68] sm:$0xff] %vm11520_vm1, %v5957_v16  ;;  %v6281_v29 = vpop.permute.xlu0 %6280 }
 0x490   : > { %6316 = vst.msk [vmem:[#allocation6 + $0x60] sm:$0xff] %vm2669_vm6, %v6281_v29  ;;  %v6048_v17 = vpop.permute.xlu1 %6047 }
 0x491   : > { %6082 = vst.msk [vmem:[#allocation6 + $0x68] sm:$0xff] %vm11521_vm15, %v6048_v17  ;;  %vm11533_vm15 = vmmov %vm11528_vm4 }
 0x493   : > { %v6356_v62 = vpop.permute.xlu0 %6355 }
 0x494   : > { %6391 = vst.msk [vmem:[#allocation6 + $0x60] sm:$0xff] %vm11522_vm2, %v6356_v62  ;;  %v6123_v10 = vpop.permute.xlu1 %6122 }
 0x495   : > { %6157 = vst.msk [vmem:[#allocation6 + $0x68] sm:$0xff] %vm11523_vm3, %v6123_v10 }
 0x497   : > { %v6358_v48 = vpop.permute.xlu0 %6357 }
 0x498   : > { %v6192_v44 = vpop.permute.xlu1 %6191 }
 0x499   : > { %6226 = vst.msk [vmem:[#allocation6 + $0x68] sm:$0xff] %vm11524_vm11, %v6192_v44  ;;  %vm11534_vm11 = vmmov %vm11532_vm0 }
 0x49b   : > { %v5890_v30 = vpop.permute.xlu0 %5889  ;;  %v6407_v3 = vld [vmem:[#allocation6 + $0x60] sm:$0xff] }
 0x49c   : > { %v6283_v25 = vpop.permute.xlu1 %6282  ;;  %7390 = vmatprep.mubr.msk.bf16.mxu1 %vm6454_vm5, %v6407_v3 }
 0x49d   : > { %6317 = vst.msk [vmem:[#allocation6 + $0x68] sm:$0xff] %vm2669_vm6, %v6283_v25 }
 0x49e   : > { %6392 = vst.msk [vmem:[#allocation6 + $0x68] sm:$0xff] %vm11525_vm7, %v6358_v48  ;;  %vm11535_vm7 = vcmask 60416  }
 0x49f   : > { %v5959_v57 = vpop.permute.xlu0 %5958 }
 0x4a0   : > { %v5650_v5 = vpop.permute.xlu1 %5649 }
 0x4a1   : > { %5683 = vst.msk [vmem:[#allocation6 + $0x70] sm:$0xff] %vm11512_vm10, %v5650_v5  ;;  %vm11536_vm10 = vmmov %vm11535_vm7 }
 0x4a2   : > { %5923 = vst.msk [vmem:[#allocation6 + $0x70] sm:$0xff] %vm11526_vm12, %v5890_v30  ;;  %vm11537_vm12 = vmmov %vm11535_vm7 }
 0x4a3   : > { %5992 = vst.msk [vmem:[#allocation6 + $0x70] sm:$0xff] %vm11527_vm13, %v5959_v57  ;;  %v6050_v22 = vpop.permute.xlu0 %6049  ;;  %vm11538_vm13 = vmmov %vm11522_vm2 }
 0x4a4   : > { %6083 = vst.msk [vmem:[#allocation6 + $0x70] sm:$0xff] %vm11528_vm4, %v6050_v22  ;;  %v5652_v21 = vpop.permute.xlu1 %5651  ;;  %vm11539_vm4 = vmmov %vm11535_vm7 }
 0x4a5   : > { %5684 = vst.msk [vmem:[#allocation6 + $0x78] sm:$0xff] %vm11529_vm8, %v5652_v21  ;;  %v6408_v19 = vld [vmem:[#allocation6 + $0x68] sm:$0xff]  ;;  %vm11542_vm8 = vmmov %vm11539_vm4 }
 0x4a6   : > { %7391 = vmatmul.mubr.msk.bf16.gmra.mrb[40].mxu1 %vm6454_vm5, %v6408_v19 }
 0x4a7   : > { %v6125_v0 = vpop.permute.xlu0 %6124 }
 0x4a8   : > { %6158 = vst.msk [vmem:[#allocation6 + $0x70] sm:$0xff] %vm11530_vm9, %v6125_v0  ;;  %v5892_v28 = vpop.permute.xlu1 %5891  ;;  %vm11543_vm9 = vmmov %vm11539_vm4 }
 0x4a9   : > { %5924 = vst.msk [vmem:[#allocation6 + $0x78] sm:$0xff] %vm11531_vm14, %v5892_v28  ;;  %vm11544_vm14 = vmmov %vm11539_vm4 }
 0x4ab   : > { %v6194_v26 = vpop.permute.xlu0 %6193 }
 0x4ac   : > { %6227 = vst.msk [vmem:[#allocation6 + $0x70] sm:$0xff] %vm11532_vm0, %v6194_v26  ;;  %v5961_v1 = vpop.permute.xlu1 %5960  ;;  %vm11545_vm0 = vmmov %vm11539_vm4 }
 0x4ad   : > { %5993 = vst.msk [vmem:[#allocation6 + $0x78] sm:$0xff] %vm11520_vm1, %v5961_v1  ;;  %vm11546_vm1 = vmmov %vm11545_vm0 }
 0x4af   : > { %v6285_v40 = vpop.permute.xlu0 %6284 }
 0x4b0   : > { %6318 = vst.msk [vmem:[#allocation6 + $0x70] sm:$0xff] %vm2669_vm6, %v6285_v40  ;;  %v6052_v15 = vpop.permute.xlu1 %6051 }
 0x4b1   : > { %6084 = vst.msk [vmem:[#allocation6 + $0x78] sm:$0xff] %vm11533_vm15, %v6052_v15  ;;  %vm11547_vm15 = vmmov %vm11545_vm0 }
 0x4b3   : > { %v6360_v7 = vpop.permute.xlu0 %6359 }
 0x4b4   : > { %6393 = vst.msk [vmem:[#allocation6 + $0x70] sm:$0xff] %vm11522_vm2, %v6360_v7  ;;  %v6127_v54 = vpop.permute.xlu1 %6126  ;;  %vm11548_vm2 = vmmov %vm11545_vm0 }
 0x4b5   : > { %6159 = vst.msk [vmem:[#allocation6 + $0x78] sm:$0xff] %vm11523_vm3, %v6127_v54  ;;  %vm11549_vm3 = vmmov %vm11545_vm0 }
 0x4b8   : > { %v6196_v33 = vpop.permute.xlu1 %6195  ;;  %v7380_v60 = vpop.f32.mrb[28].mxu1 }
 0x4b9   : > { %6228 = vst.msk [vmem:[#allocation6 + $0x78] sm:$0xff] %vm11534_vm11, %v6196_v33  ;;  %v6598_v31 = vadd.f32 %v7380_v60, %v10922_v61  ;;  %v6589_v38 = vpop.f32.mrb[29].mxu1  ;;  %vm11550_vm11 = vmmov %vm11545_vm0 }
 0x4ba   : > { %v6590_v63 = vadd.f32 %v10922_v61, %v6589_v38  ;;  %v7381_v37 = vpop.f32.mrb[30].mxu1 }
 0x4bb   : > { %v6682_v55 = vmax.f32 %v6598_v31, 0.0  ;;  %v6601_v14 = vadd.f32 %v7381_v37, %v10922_v61  ;;  %v6592_v18 = vpop.f32.mrb[31].mxu1  ;;  %v6409_v49 = vld [vmem:[#allocation6 + $0x70] sm:$0xff] }
 0x4bc   : > { %v6680_v23 = vmax.f32 %v6590_v63, 0.0  ;;  %v6287_v53 = vpop.permute.xlu1 %6286  ;;  %v6593_v52 = vadd.f32 %v10922_v61, %v6592_v18  ;;  %7394 = vmatprep.mubr.msk.bf16.mxu1 %vm6454_vm5, %v6409_v49 }
 0x4bd   : > { %v7317_v47 = vpack.c.bf16 %v6682_v55, %v6682_v55  ;;  %v6683_v9 = vmax.f32 %v6601_v14, 0.0  ;;  %6319 = vst.msk [vmem:[#allocation6 + $0x78] sm:$0xff] %vm2669_vm6, %v6287_v53  ;;  %vm11540_vm6 = vmmov %vm11539_vm4 }
 0x4be   : > { %v7315_v50 = vpack.c.bf16 %v6680_v23, %v6680_v23  ;;  %v6681_v2 = vmax.f32 %v6593_v52, 0.0 }
 0x4bf   : > { %6842 = vst.msk [vmem:[%s10945_s13 + $0x38] sm:$0xf] %vm11535_vm7, %v7317_v47  ;;  %v7318_v12 = vpack.c.bf16 %v6683_v9, %v6683_v9  ;;  %vm11551_vm7 = vmmov %vm11545_vm0 }
 0x4c0   : > { %6840 = vst.msk [vmem:[%s10945_s13 + $0x30] sm:$0xf] %vm11536_vm10, %v7315_v50  ;;  %v7316_v20 = vpack.c.bf16 %v6681_v2, %v6681_v2  ;;  %v6362_v59 = vpop.permute.xlu1 %6361  ;;  %vm11552_vm10 = vmmov %vm11545_vm0 }
 0x4c1   : > { %6843 = vst.msk [vmem:[%s10945_s13 + $0x3c] sm:$0xf] %vm11537_vm12, %v7318_v12  ;;  %vm11553_vm12 = vmmov %vm11545_vm0 }
 0x4c2   : > { %6394 = vst.msk [vmem:[#allocation6 + $0x78] sm:$0xff] %vm11538_vm13, %v6362_v59  ;;  %vm11554_vm13 = vmmov %vm11545_vm0 }
 0x4c3   : > { %6841 = vst.msk [vmem:[%s10945_s13 + $0x34] sm:$0xf] %vm11539_vm4, %v7316_v20 }
 0x4c9   : > { %v6410_v35 = vld [vmem:[#allocation6 + $0x78] sm:$0xff] }
 0x4ca   : > { %7395 = vmatmul.mubr.msk.bf16.gmra.mrb[44].mxu1 %vm6454_vm5, %v6410_v35  ;;  %vm11541_vm5 = vmmov %vm11539_vm4 }
 0x4cb   : > { %vm11555_vm4 = vmmov %vm11545_vm0 }
 0x516   : > { %v7384_v24 = vpop.f32.mrb[32].mxu1 }
 0x517   : > { %v6614_v34 = vadd.f32 %v7384_v24, %v10922_v61  ;;  %v6605_v8 = vpop.f32.mrb[33].mxu1 }
 0x518   : > { %v6606_v13 = vadd.f32 %v10922_v61, %v6605_v8  ;;  %v7385_v11 = vpop.f32.mrb[34].mxu1 }
 0x519   : > { %v6686_v36 = vmax.f32 %v6614_v34, 0.0  ;;  %v6617_v43 = vadd.f32 %v7385_v11, %v10922_v61  ;;  %v6608_v27 = vpop.f32.mrb[35].mxu1 }
 0x51a   : > { %v6684_v6 = vmax.f32 %v6606_v13, 0.0  ;;  %v6609_v32 = vadd.f32 %v10922_v61, %v6608_v27 }
 0x51b   : > { %v7321_v41 = vpack.c.bf16 %v6686_v36, %v6686_v36  ;;  %v6687_v56 = vmax.f32 %v6617_v43, 0.0 }
 0x51c   : > { %v7319_v58 = vpack.c.bf16 %v6684_v6, %v6684_v6  ;;  %v6685_v45 = vmax.f32 %v6609_v32, 0.0 }
 0x51d   : > { %6846 = vst.msk [vmem:[%s10945_s13 + $0x48] sm:$0xf] %vm11540_vm6, %v7321_v41  ;;  %v7322_v39 = vpack.c.bf16 %v6687_v56, %v6687_v56 }
 0x51e   : > { %6844 = vst.msk [vmem:[%s10945_s13 + $0x40] sm:$0xf] %vm11541_vm5, %v7319_v58  ;;  %v7320_v51 = vpack.c.bf16 %v6685_v45, %v6685_v45 }
 0x51f   : > { %6847 = vst.msk [vmem:[%s10945_s13 + $0x4c] sm:$0xf] %vm11542_vm8, %v7322_v39 }
 0x520   : > { %6845 = vst.msk [vmem:[%s10945_s13 + $0x44] sm:$0xf] %vm11543_vm9, %v7320_v51 }
 0x558   : > { %v7388_v4 = vpop.f32.mrb[36].mxu1 }
 0x559   : > { %v6630_v46 = vadd.f32 %v7388_v4, %v10922_v61  ;;  %v6621_v42 = vpop.f32.mrb[37].mxu1 }
 0x55a   : > { %v6622_v16 = vadd.f32 %v10922_v61, %v6621_v42  ;;  %v7389_v29 = vpop.f32.mrb[38].mxu1 }
 0x55b   : > { %v6690_v17 = vmax.f32 %v6630_v46, 0.0  ;;  %v6633_v62 = vadd.f32 %v7389_v29, %v10922_v61  ;;  %v6624_v10 = vpop.f32.mrb[39].mxu1 }
 0x55c   : > { %v6688_v48 = vmax.f32 %v6622_v16, 0.0  ;;  %v6625_v44 = vadd.f32 %v10922_v61, %v6624_v10 }
 0x55d   : > { %v7325_v30 = vpack.c.bf16 %v6690_v17, %v6690_v17  ;;  %v6691_v3 = vmax.f32 %v6633_v62, 0.0 }
 0x55e   : > { %v7323_v25 = vpack.c.bf16 %v6688_v48, %v6688_v48  ;;  %v6689_v57 = vmax.f32 %v6625_v44, 0.0 }
 0x55f   : > { %6850 = vst.msk [vmem:[%s10945_s13 + $0x58] sm:$0xf] %vm11544_vm14, %v7325_v30  ;;  %v7326_v5 = vpack.c.bf16 %v6691_v3, %v6691_v3 }
 0x560   : > { %6848 = vst.msk [vmem:[%s10945_s13 + $0x50] sm:$0xf] %vm11545_vm0, %v7323_v25  ;;  %v7324_v22 = vpack.c.bf16 %v6689_v57, %v6689_v57 }
 0x561   : > { %6851 = vst.msk [vmem:[%s10945_s13 + $0x5c] sm:$0xf] %vm11546_vm1, %v7326_v5 }
 0x562   : > { %6849 = vst.msk [vmem:[%s10945_s13 + $0x54] sm:$0xf] %vm11547_vm15, %v7324_v22 }
 0x579   : > { %v7392_v21 = vpop.f32.mrb[40].mxu1 }
 0x57a   : > { %v6646_v19 = vadd.f32 %v7392_v21, %v10922_v61  ;;  %v6637_v0 = vpop.f32.mrb[41].mxu1 }
 0x57b   : > { %v6638_v28 = vadd.f32 %v10922_v61, %v6637_v0  ;;  %v7393_v26 = vpop.f32.mrb[42].mxu1 }
 0x57c   : > { %v6694_v1 = vmax.f32 %v6646_v19, 0.0  ;;  %v6649_v40 = vadd.f32 %v7393_v26, %v10922_v61  ;;  %v6640_v15 = vpop.f32.mrb[43].mxu1 }
 0x57d   : > { %v6692_v7 = vmax.f32 %v6638_v28, 0.0  ;;  %v6641_v54 = vadd.f32 %v10922_v61, %v6640_v15 }
 0x57e   : > { %v7329_v33 = vpack.c.bf16 %v6694_v1, %v6694_v1  ;;  %v6695_v60 = vmax.f32 %v6649_v40, 0.0 }
 0x57f   : > { %v7327_v31 = vpack.c.bf16 %v6692_v7, %v6692_v7  ;;  %v6693_v38 = vmax.f32 %v6641_v54, 0.0 }
 0x580   : > { %6854 = vst.msk [vmem:[%s10945_s13 + $0x68] sm:$0xf] %vm11548_vm2, %v7329_v33  ;;  %v7330_v63 = vpack.c.bf16 %v6695_v60, %v6695_v60 }
 0x581   : > { %6852 = vst.msk [vmem:[%s10945_s13 + $0x60] sm:$0xf] %vm11549_vm3, %v7327_v31  ;;  %v7328_v37 = vpack.c.bf16 %v6693_v38, %v6693_v38 }
 0x582   : > { %6855 = vst.msk [vmem:[%s10945_s13 + $0x6c] sm:$0xf] %vm11550_vm11, %v7330_v63 }
 0x583   : > { %6853 = vst.msk [vmem:[%s10945_s13 + $0x64] sm:$0xf] %vm11551_vm7, %v7328_v37 }
 0x59d   : > { %v7396_v55 = vpop.f32.mrb[44].mxu1 }
 0x59e   : > { %v6662_v14 = vadd.f32 %v7396_v55, %v10922_v61  ;;  %v6653_v18 = vpop.f32.mrb[45].mxu1 }
 0x59f   : > { %v6654_v49 = vadd.f32 %v10922_v61, %v6653_v18  ;;  %v7397_v23 = vpop.f32.mrb[46].mxu1 }
 0x5a0   : > { %v6698_v53 = vmax.f32 %v6662_v14, 0.0  ;;  %v6665_v52 = vadd.f32 %v7397_v23, %v10922_v61  ;;  %v6656_v47 = vpop.f32.mrb[47].mxu1 }
 0x5a1   : > { %v6696_v9 = vmax.f32 %v6654_v49, 0.0  ;;  %v6657_v50 = vadd.f32 %v10922_v61, %v6656_v47 }
 0x5a2   : > { %v7333_v2 = vpack.c.bf16 %v6698_v53, %v6698_v53  ;;  %v6699_v12 = vmax.f32 %v6665_v52, 0.0 }
 0x5a3   : > { %v7331_v20 = vpack.c.bf16 %v6696_v9, %v6696_v9  ;;  %v6697_v59 = vmax.f32 %v6657_v50, 0.0 }
 0x5a4   : > { %6858 = vst.msk [vmem:[%s10945_s13 + $0x78] sm:$0xf] %vm11552_vm10, %v7333_v2  ;;  %v7334_v35 = vpack.c.bf16 %v6699_v12, %v6699_v12 }
 0x5a5   : > { %6856 = vst.msk [vmem:[%s10945_s13 + $0x70] sm:$0xf] %vm11553_vm12, %v7331_v20  ;;  %v7332_v24 = vpack.c.bf16 %v6697_v59, %v6697_v59 }
 0x5a6   : > { %6859 = vst.msk [vmem:[%s10945_s13 + $0x7c] sm:$0xf] %vm11554_vm13, %v7334_v35 }
 0x5a7   : > { %6857 = vst.msk [vmem:[%s10945_s13 + $0x74] sm:$0xf] %vm11555_vm4, %v7332_v24 }
 0x5a8 PF: > { %s16_s21 = sadd.s32 1, %s7522_s21  }
 0x5a9   : > { %p13_p4 = scmp.ge.s32.totalorder %s16_s21, 4  }
 0x5ab   :  { %15 = sbr.rel (!%p13_p4) target bundleno = 1 (0x1), region = 80 }

</bundles_post_ra>
